<compile_context>
chip_gen: v6e
topology: v6e:2x2x1
jax: 0.10.0
libtpu: 0.0.40
codegen_flags: <defaults>
</compile_context>

<pallas_src>
import functools

import numpy as np

import jax
import jax.numpy as jnp
from jax.experimental import pallas as pl
from jax.experimental.pallas import tpu as pltpu


IMG = 28                       # input spatial size implied by fc1 in_features = 7*7*16
F32 = jnp.float32
BF16 = jnp.bfloat16


# ---------------------------------------------------------------------------
# Fused kernel
# ---------------------------------------------------------------------------
def _shift_rows(a, shift, use_roll):
    """Shift rows by +1 (row y-1 placed at y) or -1 (row y+1 placed at y)."""
    if use_roll:
        return pltpu.roll(a, shift=shift, axis=0)      # XLU rotate; wrap rows are masked/dropped
    # Fallback: slice + concat (zero fill) — known-good lowering.
    R = a.shape[0]
    z = jnp.zeros((1, a.shape[1]), a.dtype)
    if shift == 1:
        return jnp.concatenate([z, a[:R - 1, :]], axis=0)
    return jnp.concatenate([a[1:, :], z], axis=0)


def net_kernel(x_ref,
               m1_ref, m2_ref, m3_ref, m4_ref, m5_ref,
               cb_ref, em_ref,
               ce1_ref, co1_ref, ce2_ref, co2_ref,
               r1_ref, r2_ref,
               sy_ref, wfc_ref, fb_ref,
               o_ref, *, use_roll):

    def conv3x3_relu(a, m_ref, bias, edge):
        # a:     (R, W*Cin) f32, rows = b*H + y, lane = x*Cin + c
        # m_ref: (3, W*Cin, W*Cout) bf16 block-banded tap matrices (ky = 0, 1, 2)
        # bias:  (1, W*Cout) f32 (bias tiled over x)
        # edge:  (R, 2) f32 row masks (col0: not-first-row, col1: not-last-row)
        a_up = (_shift_rows(a, 1, use_roll) * edge[:, 0:1]).astype(BF16)    # row y-1
        a_dn = (_shift_rows(a, -1, use_roll) * edge[:, 1:2]).astype(BF16)   # row y+1
        out = jnp.dot(a_up, m_ref[0], preferred_element_type=F32)
        out = out + jnp.dot(a.astype(BF16), m_ref[1], preferred_element_type=F32)
        out = out + jnp.dot(a_dn, m_ref[2], preferred_element_type=F32)
        return jnp.maximum(out + bias, 0.0)

    def maxpool2x2(a, ce_ref, co_ref, r_ref):
        # a: (R, W*C) f32 -> (R//2, (W//2)*C) f32
        ab = a.astype(BF16)
        cm = jnp.maximum(jnp.dot(ab, ce_ref[...], preferred_element_type=F32),
                         jnp.dot(ab, co_ref[...], preferred_element_type=F32))   # col-pair max
        rm = jnp.maximum(cm, _shift_rows(cm, -1, use_roll))     # row-pair max (valid @ even rows)
        return jnp.dot(r_ref[...], rm.astype(BF16), preferred_element_type=F32)  # keep even rows

    R1 = x_ref.shape[0]          # tb*28
    R2 = R1 // 2                 # tb*14
    R3 = R1 // 4                 # tb*7

    e1 = em_ref[:, 0:2]
    e2 = em_ref[0:R2, 2:4]
    e3 = em_ref[0:R3, 4:6]

    a = x_ref[...]                                           # (tb*28, 28) f32
    a = conv3x3_relu(a, m1_ref, cb_ref[0:1, 0:140], e1)      # (tb*28, 28*5)
    a = conv3x3_relu(a, m2_ref, cb_ref[1:2, 0:140], e1)      # (tb*28, 28*5)
    a = maxpool2x2(a, ce1_ref, co1_ref, r1_ref)              # (tb*14, 14*5)
    a = conv3x3_relu(a, m3_ref, cb_ref[2:3, 0:112], e2)      # (tb*14, 14*8)
    a = conv3x3_relu(a, m4_ref, cb_ref[3:4, 0:112], e2)      # (tb*14, 14*8)
    a = maxpool2x2(a, ce2_ref, co2_ref, r2_ref)              # (tb*7, 7*8)
    a = conv3x3_relu(a, m5_ref, cb_ref[4:5, 0:112], e3)      # (tb*7, 7*16)

    # Flatten: regroup rows (b*7 + y) into lanes (y*112 + x*16 + c); the PyTorch
    # NCHW flatten order is folded into the reordered fc1 weight (host side).
    a_b = a.astype(BF16)
    pieces = [jnp.dot(sy_ref[y], a_b, preferred_element_type=F32) for y in range(7)]
    flat = jnp.concatenate(pieces, axis=1)                   # (tb, 784) f32

    w1 = wfc_ref[0:784, :]
    w2 = wfc_ref[784:912, :]
    h = jnp.dot(flat.astype(BF16), w1, preferred_element_type=F32) + fb_ref[0:1, :]
    h = jnp.maximum(h, 0.0)
    # TODO(synk): Dropout(p=0.2) is inference-mode identity here (PyTorch eval()).
    out = jnp.dot(h.astype(BF16), w2, preferred_element_type=F32) + fb_ref[1:2, :]
    o_ref[...] = out                                         # lane-dense (tb, 128) store


# ---------------------------------------------------------------------------
# Constant preparation (runs ONCE per parameter set, outside the jitted path)
# ---------------------------------------------------------------------------
def _conv_tap_mats(w, W):
    """w: (Cout, Cin, 3, 3) -> (3, W*Cin, W*Cout) bf16 block-banded tap matrices."""
    w = jnp.asarray(w, jnp.float32)
    mats = []
    for ky in range(3):
        m = jnp.zeros((W * w.shape[1], W * w.shape[0]), jnp.float32)
        for kx in range(3):
            shift = jnp.eye(W, W, k=1 - kx, dtype=jnp.float32)   # x-tap + x zero-pad
            m = m + jnp.kron(shift, w[:, :, ky, kx].T)
        mats.append(m)
    return jnp.stack(mats, axis=0).astype(BF16)


def _bias_pack(params):
    rows = []
    for name, W in (("c1_b", 28), ("c2_b", 28), ("c3_b", 14), ("c4_b", 14), ("c5_b", 7)):
        r = np.tile(np.asarray(params[name], np.float32), W)
        rows.append(np.pad(r, (0, 140 - r.shape[0])))
    return jnp.asarray(np.stack(rows, axis=0))                # (5, 140) f32


def _edge_pack(tb):
    em = np.zeros((tb * 28, 6), np.float32)
    for j, H in enumerate((28, 14, 7)):
        r = np.arange(tb * H)
        em[:tb * H, 2 * j] = (r % H != 0)                      # keep shifted-down (y-1) row
        em[:tb * H, 2 * j + 1] = (r % H != H - 1)              # keep shifted-up (y+1) row
    return jnp.asarray(em)


def _col_selects(W, C):
    Wo = W // 2
    se = np.zeros((W * C, Wo * C), np.float32)
    so = np.zeros((W * C, Wo * C), np.float32)
    for x in range(Wo):
        for c in range(C):
            se[(2 * x) * C + c, x * C + c] = 1.0
            so[(2 * x + 1) * C + c, x * C + c] = 1.0
    return jnp.asarray(se, BF16), jnp.asarray(so, BF16)


def _row_select(tb, H):
    Ho = H // 2
    s = np.zeros((Ho, H), np.float32)
    s[np.arange(Ho), 2 * np.arange(Ho)] = 1.0
    return jnp.asarray(np.kron(np.eye(tb, dtype=np.float32), s), BF16)   # (tb*Ho, tb*H)


def _flatten_select(tb):
    s = np.zeros((7, tb, tb * 7), np.float32)
    for y in range(7):
        s[y, np.arange(tb), np.arange(tb) * 7 + y] = 1.0
    return jnp.asarray(s, BF16)


def _fc_pack(params):
    # fc1 input index in PyTorch is c*49 + y*7 + x; our lane index is y*112 + x*16 + c.
    w1 = jnp.asarray(params["fc1_w"], jnp.float32)                        # (100, 784)
    w1r = w1.reshape(100, 16, 7, 7).transpose(2, 3, 1, 0).reshape(784, 100)
    w1r = jnp.pad(w1r, ((0, 0), (0, 28)))                                 # (784, 128)
    w2r = jnp.pad(jnp.asarray(params["fc2_w"], jnp.float32).T, ((0, 28), (0, 92)))  # (128, 128)
    wfc = jnp.concatenate([w1r, w2r], axis=0).astype(BF16)                # (912, 128)
    fb1 = jnp.pad(jnp.asarray(params["fc1_b"], jnp.float32), (0, 28))
    fb2 = jnp.pad(jnp.asarray(params["fc2_b"], jnp.float32), (0, 92))
    fb = jnp.stack([fb1, fb2], axis=0)                                    # (2, 128) f32
    return wfc, fb


def prepare_net_constants(params, tb):
    ce1, co1 = _col_selects(28, 5)
    ce2, co2 = _col_selects(14, 8)
    wfc, fb = _fc_pack(params)
    return dict(
        m1=_conv_tap_mats(params["c1_w"], 28),
        m2=_conv_tap_mats(params["c2_w"], 28),
        m3=_conv_tap_mats(params["c3_w"], 14),
        m4=_conv_tap_mats(params["c4_w"], 14),
        m5=_conv_tap_mats(params["c5_w"], 7),
        cb=_bias_pack(params),
        em=_edge_pack(tb),
        ce1=ce1, co1=co1, ce2=ce2, co2=co2,
        r1=_row_select(tb, 28), r2=_row_select(tb, 14),
        sy=_flatten_select(tb),
        wfc=wfc, fb=fb,
    )


# ---------------------------------------------------------------------------
# Forward
# ---------------------------------------------------------------------------
_CONST_ORDER = ("m1", "m2", "m3", "m4", "m5", "cb", "em",
                "ce1", "co1", "ce2", "co2", "r1", "r2", "sy", "wfc", "fb")


def _net_forward(x_nchw, consts, *, tb, use_roll):
    B = x_nchw.shape[0]
    Bp = ((B + tb - 1) // tb) * tb
    x = x_nchw.astype(jnp.float32).reshape(B, IMG, IMG)
    if Bp != B:
        x = jnp.pad(x, ((0, Bp - B), (0, 0), (0, 0)))
    x2d = x.reshape(Bp * IMG, IMG)                           # rows = b*28 + y

    ops = (x2d,) + tuple(consts[k] for k in _CONST_ORDER)

    def const_spec(arr):
        nd = arr.ndim
        return pl.BlockSpec(arr.shape, lambda i, _nd=nd: (0,) * _nd)

    in_specs = [pl.BlockSpec((tb * IMG, IMG), lambda i: (i, 0))]
    in_specs += [const_spec(a) for a in ops[1:]]

    out = pl.pallas_call(
        functools.partial(net_kernel, use_roll=use_roll),
        out_shape=jax.ShapeDtypeStruct((Bp, 128), jnp.float32),
        grid=(Bp // tb,),
        in_specs=in_specs,
        out_specs=pl.BlockSpec((tb, 128), lambda i: (i, 0)),
        compiler_params=pltpu.CompilerParams(dimension_semantics=("parallel",)),
    )(*ops)

    return out[:B, :36]                                      # drop batch/lane padding -> (B, 36)


_net_forward_jit = jax.jit(_net_forward, static_argnames=("tb", "use_roll"))


def pick_batch_tile(B):
    Bp = ((B + 7) // 8) * 8
    if Bp % 16 == 0 and Bp // 16 >= 2:
        return 16
    return 8


def make_net(params, tb=8, use_roll=True):
    consts = prepare_net_constants(params, tb)               # hoisted: built once

    def fwd(x):
        return _net_forward_jit(x, consts, tb=tb, use_roll=use_roll)

    return fwd


# ---------------------------------------------------------------------------
# Pure-JAX reference (for validation) and parameter init (PyTorch layouts)
# ---------------------------------------------------------------------------
def net_reference(x, params):
    def conv(a, w, b):
        out = jax.lax.conv_general_dilated(a, jnp.asarray(w, jnp.float32), (1, 1), "SAME",
                                           dimension_numbers=("NCHW", "OIHW", "NCHW"))
        return jax.nn.relu(out + jnp.asarray(b, jnp.float32).reshape(1, -1, 1, 1))

    def pool(a):
        return jax.lax.reduce_window(a, -jnp.inf, jax.lax.max,
                                     (1, 1, 2, 2), (1, 1, 2, 2), "VALID")

    a = conv(x, params["c1_w"], params["c1_b"])
    a = conv(a, params["c2_w"], params["c2_b"])
    a = pool(a)
    a = conv(a, params["c3_w"], params["c3_b"])
    a = conv(a, params["c4_w"], params["c4_b"])
    a = pool(a)
    a = conv(a, params["c5_w"], params["c5_b"])
    flat = a.reshape(a.shape[0], -1)
    h = jax.nn.relu(flat @ params["fc1_w"].T + params["fc1_b"])
    return h @ params["fc2_w"].T + params["fc2_b"]


def init_params(key):
    def normal(k, shape, scale=0.2):
        return scale * jax.random.normal(k, shape, dtype=jnp.float32)

    ks = jax.random.split(key, 14)
    return {
        "c1_w": normal(ks[0], (5, 1, 3, 3)),   "c1_b": normal(ks[1], (5,)),
        "c2_w": normal(ks[2], (5, 5, 3, 3)),   "c2_b": normal(ks[3], (5,)),
        "c3_w": normal(ks[4], (8, 5, 3, 3)),   "c3_b": normal(ks[5], (8,)),
        "c4_w": normal(ks[6], (8, 8, 3, 3)),   "c4_b": normal(ks[7], (8,)),
        "c5_w": normal(ks[8], (16, 8, 3, 3)),  "c5_b": normal(ks[9], (16,)),
        "fc1_w": normal(ks[10], (100, 7 * 7 * 16)), "fc1_b": normal(ks[11], (100,)),
        "fc2_w": normal(ks[12], (36, 100)),         "fc2_b": normal(ks[13], (36,)),
    }


def _run_and_check(params, x, tb, use_roll):
    net = make_net(params, tb=tb, use_roll=use_roll)
    y = jax.block_until_ready(net(x))
    y_ref = net_reference(x.astype(jnp.float32), params)
    err = float(jnp.max(jnp.abs(y - y_ref)))
    scale = float(jnp.max(jnp.abs(y_ref)))
    ok = np.isfinite(err) and err <= 0.05 * (1.0 + scale)    # loose: bf16 MXU operands
    return y, ok


if __name__ == "__main__":
    key = jax.random.PRNGKey(0)
    k_x, k_p = jax.random.split(key)

    B = 16
    x = jax.random.normal(k_x, (B, 1, IMG, IMG), dtype=jnp.float32)
    params = init_params(k_p)
    tb = pick_batch_tile(B)

    y, ok = None, False
    try:
        y, ok = _run_and_check(params, x, tb, use_roll=True)
    except Exception:
        ok = False
    if not ok:
        # Fallback: concat-based row shifts (known-good lowering on all TPU gens).
        y, ok = _run_and_check(params, x, tb, use_roll=False)

    assert ok and y.shape == (B, 36) and y.dtype == jnp.float32
    print("KERNEL_OK")
</pallas_src>

<mosaic_0001>
module attributes {stable_mosaic.version = 11 : i64} {
  func.func @net_kernel(%arg0: i32, %arg1: memref<224x28xf32, #tpu.memory_space<vmem>>, %arg2: memref<3x28x140xbf16, #tpu.memory_space<vmem>>, %arg3: memref<3x140x140xbf16, #tpu.memory_space<vmem>>, %arg4: memref<3x70x112xbf16, #tpu.memory_space<vmem>>, %arg5: memref<3x112x112xbf16, #tpu.memory_space<vmem>>, %arg6: memref<3x56x112xbf16, #tpu.memory_space<vmem>>, %arg7: memref<5x140xf32, #tpu.memory_space<vmem>>, %arg8: memref<224x6xf32, #tpu.memory_space<vmem>>, %arg9: memref<140x70xbf16, #tpu.memory_space<vmem>>, %arg10: memref<140x70xbf16, #tpu.memory_space<vmem>>, %arg11: memref<112x56xbf16, #tpu.memory_space<vmem>>, %arg12: memref<112x56xbf16, #tpu.memory_space<vmem>>, %arg13: memref<112x224xbf16, #tpu.memory_space<vmem>>, %arg14: memref<56x112xbf16, #tpu.memory_space<vmem>>, %arg15: memref<7x8x56xbf16, #tpu.memory_space<vmem>>, %arg16: memref<912x128xbf16, #tpu.memory_space<vmem>>, %arg17: memref<2x128xf32, #tpu.memory_space<vmem>>, %arg18: memref<8x128xf32, #tpu.memory_space<vmem>>) attributes {dimension_semantics = [#tpu.dimension_semantics<parallel>], iteration_bounds = array<i64: 2>, scalar_prefetch = 0 : i64, scratch_operands = 0 : i64, tpu.core_type = #tpu.core_type<tc>, window_params = [{transform_indices = @transform_0, window_bounds = array<i64: 224, 28>}, {pipeline_mode = #tpu.pipeline_mode<synchronous>, transform_indices = @transform_1, window_bounds = array<i64: 3, 28, 140>}, {pipeline_mode = #tpu.pipeline_mode<synchronous>, transform_indices = @transform_2, window_bounds = array<i64: 3, 140, 140>}, {pipeline_mode = #tpu.pipeline_mode<synchronous>, transform_indices = @transform_3, window_bounds = array<i64: 3, 70, 112>}, {pipeline_mode = #tpu.pipeline_mode<synchronous>, transform_indices = @transform_4, window_bounds = array<i64: 3, 112, 112>}, {pipeline_mode = #tpu.pipeline_mode<synchronous>, transform_indices = @transform_5, window_bounds = array<i64: 3, 56, 112>}, {pipeline_mode = #tpu.pipeline_mode<synchronous>, transform_indices = @transform_6, window_bounds = array<i64: 5, 140>}, {pipeline_mode = #tpu.pipeline_mode<synchronous>, transform_indices = @transform_7, window_bounds = array<i64: 224, 6>}, {pipeline_mode = #tpu.pipeline_mode<synchronous>, transform_indices = @transform_8, window_bounds = array<i64: 140, 70>}, {pipeline_mode = #tpu.pipeline_mode<synchronous>, transform_indices = @transform_9, window_bounds = array<i64: 140, 70>}, {pipeline_mode = #tpu.pipeline_mode<synchronous>, transform_indices = @transform_10, window_bounds = array<i64: 112, 56>}, {pipeline_mode = #tpu.pipeline_mode<synchronous>, transform_indices = @transform_11, window_bounds = array<i64: 112, 56>}, {pipeline_mode = #tpu.pipeline_mode<synchronous>, transform_indices = @transform_12, window_bounds = array<i64: 112, 224>}, {pipeline_mode = #tpu.pipeline_mode<synchronous>, transform_indices = @transform_13, window_bounds = array<i64: 56, 112>}, {pipeline_mode = #tpu.pipeline_mode<synchronous>, transform_indices = @transform_14, window_bounds = array<i64: 7, 8, 56>}, {pipeline_mode = #tpu.pipeline_mode<synchronous>, transform_indices = @transform_15, window_bounds = array<i64: 912, 128>}, {pipeline_mode = #tpu.pipeline_mode<synchronous>, transform_indices = @transform_16, window_bounds = array<i64: 2, 128>}, {transform_indices = @transform_17, window_bounds = array<i64: 8, 128>}]} {
    %c0 = arith.constant 0 : index
    %c0_0 = arith.constant 0 : index
    %0 = vector.load %arg8[%c0, %c0_0] : memref<224x6xf32, #tpu.memory_space<vmem>>, vector<224x2xf32>
    %c0_1 = arith.constant 0 : index
    %c2 = arith.constant 2 : index
    %1 = vector.load %arg8[%c0_1, %c2] : memref<224x6xf32, #tpu.memory_space<vmem>>, vector<112x2xf32>
    %c0_2 = arith.constant 0 : index
    %c4 = arith.constant 4 : index
    %2 = vector.load %arg8[%c0_2, %c4] : memref<224x6xf32, #tpu.memory_space<vmem>>, vector<56x2xf32>
    %c0_3 = arith.constant 0 : index
    %c0_4 = arith.constant 0 : index
    %3 = vector.load %arg1[%c0_3, %c0_4] : memref<224x28xf32, #tpu.memory_space<vmem>>, vector<224x28xf32>
    %c0_5 = arith.constant 0 : index
    %c0_6 = arith.constant 0 : index
    %4 = vector.load %arg7[%c0_5, %c0_6] : memref<5x140xf32, #tpu.memory_space<vmem>>, vector<1x140xf32>
    %cst = arith.constant 0.000000e+00 : f32
    %5 = vector.broadcast %cst : f32 to vector<1x28xf32>
    %6 = vector.extract_strided_slice %3 {offsets = [0, 0], sizes = [223, 28], strides = [1, 1]} : vector<224x28xf32> to vector<223x28xf32>
    %7 = tpu.concatenate %5, %6 in 0 : vector<1x28xf32>, vector<223x28xf32> -> vector<224x28xf32>
    %8 = vector.extract_strided_slice %0 {offsets = [0, 0], sizes = [224, 1], strides = [1, 1]} : vector<224x2xf32> to vector<224x1xf32>
    %9 = vector.broadcast %8 : vector<224x1xf32> to vector<224x28xf32>
    %10 = arith.mulf %7, %9 : vector<224x28xf32>
    %11 = arith.truncf %10 : vector<224x28xf32> to vector<224x28xbf16>
    %cst_7 = arith.constant 0.000000e+00 : f32
    %12 = vector.broadcast %cst_7 : f32 to vector<1x28xf32>
    %13 = vector.extract_strided_slice %3 {offsets = [1, 0], sizes = [223, 28], strides = [1, 1]} : vector<224x28xf32> to vector<223x28xf32>
    %14 = tpu.concatenate %13, %12 in 0 : vector<223x28xf32>, vector<1x28xf32> -> vector<224x28xf32>
    %15 = vector.extract_strided_slice %0 {offsets = [0, 1], sizes = [224, 1], strides = [1, 1]} : vector<224x2xf32> to vector<224x1xf32>
    %16 = vector.broadcast %15 : vector<224x1xf32> to vector<224x28xf32>
    %17 = arith.mulf %14, %16 : vector<224x28xf32>
    %18 = arith.truncf %17 : vector<224x28xf32> to vector<224x28xbf16>
    %c0_8 = arith.constant 0 : index
    %c0_9 = arith.constant 0 : index
    %c0_10 = arith.constant 0 : index
    %19 = vector.load %arg2[%c0_8, %c0_9, %c0_10] : memref<3x28x140xbf16, #tpu.memory_space<vmem>>, vector<1x28x140xbf16>
    %20 = vector.shape_cast %19 : vector<1x28x140xbf16> to vector<28x140xbf16>
    %cst_11 = arith.constant dense<0.000000e+00> : vector<224x140xf32>
    %21 = tpu.matmul %11, %20, %cst_11 {dimension_numbers = #tpu.dot_dimension_numbers<[1], [0], [0], [1], [0, 0, 1, 1], [], []>} : vector<224x28xbf16>, vector<28x140xbf16>, vector<224x140xf32> -> vector<224x140xf32>
    %22 = arith.truncf %3 : vector<224x28xf32> to vector<224x28xbf16>
    %c1 = arith.constant 1 : index
    %c0_12 = arith.constant 0 : index
    %c0_13 = arith.constant 0 : index
    %23 = vector.load %arg2[%c1, %c0_12, %c0_13] : memref<3x28x140xbf16, #tpu.memory_space<vmem>>, vector<1x28x140xbf16>
    %24 = vector.shape_cast %23 : vector<1x28x140xbf16> to vector<28x140xbf16>
    %cst_14 = arith.constant dense<0.000000e+00> : vector<224x140xf32>
    %25 = tpu.matmul %22, %24, %cst_14 {dimension_numbers = #tpu.dot_dimension_numbers<[1], [0], [0], [1], [0, 0, 1, 1], [], []>} : vector<224x28xbf16>, vector<28x140xbf16>, vector<224x140xf32> -> vector<224x140xf32>
    %26 = arith.addf %21, %25 : vector<224x140xf32>
    %c2_15 = arith.constant 2 : index
    %c0_16 = arith.constant 0 : index
    %c0_17 = arith.constant 0 : index
    %27 = vector.load %arg2[%c2_15, %c0_16, %c0_17] : memref<3x28x140xbf16, #tpu.memory_space<vmem>>, vector<1x28x140xbf16>
    %28 = vector.shape_cast %27 : vector<1x28x140xbf16> to vector<28x140xbf16>
    %cst_18 = arith.constant dense<0.000000e+00> : vector<224x140xf32>
    %29 = tpu.matmul %18, %28, %cst_18 {dimension_numbers = #tpu.dot_dimension_numbers<[1], [0], [0], [1], [0, 0, 1, 1], [], []>} : vector<224x28xbf16>, vector<28x140xbf16>, vector<224x140xf32> -> vector<224x140xf32>
    %30 = arith.addf %26, %29 : vector<224x140xf32>
    %31 = vector.broadcast %4 : vector<1x140xf32> to vector<224x140xf32>
    %32 = arith.addf %30, %31 : vector<224x140xf32>
    %cst_19 = arith.constant 0.000000e+00 : f32
    %33 = vector.broadcast %cst_19 : f32 to vector<224x140xf32>
    %34 = arith.maximumf %32, %33 : vector<224x140xf32>
    %c1_20 = arith.constant 1 : index
    %c0_21 = arith.constant 0 : index
    %35 = vector.load %arg7[%c1_20, %c0_21] : memref<5x140xf32, #tpu.memory_space<vmem>>, vector<1x140xf32>
    %cst_22 = arith.constant 0.000000e+00 : f32
    %36 = vector.broadcast %cst_22 : f32 to vector<1x140xf32>
    %37 = vector.extract_strided_slice %34 {offsets = [0, 0], sizes = [223, 140], strides = [1, 1]} : vector<224x140xf32> to vector<223x140xf32>
    %38 = tpu.concatenate %36, %37 in 0 : vector<1x140xf32>, vector<223x140xf32> -> vector<224x140xf32>
    %39 = vector.extract_strided_slice %0 {offsets = [0, 0], sizes = [224, 1], strides = [1, 1]} : vector<224x2xf32> to vector<224x1xf32>
    %40 = vector.broadcast %39 : vector<224x1xf32> to vector<224x140xf32>
    %41 = arith.mulf %38, %40 : vector<224x140xf32>
    %42 = arith.truncf %41 : vector<224x140xf32> to vector<224x140xbf16>
    %cst_23 = arith.constant 0.000000e+00 : f32
    %43 = vector.broadcast %cst_23 : f32 to vector<1x140xf32>
    %44 = vector.extract_strided_slice %34 {offsets = [1, 0], sizes = [223, 140], strides = [1, 1]} : vector<224x140xf32> to vector<223x140xf32>
    %45 = tpu.concatenate %44, %43 in 0 : vector<223x140xf32>, vector<1x140xf32> -> vector<224x140xf32>
    %46 = vector.extract_strided_slice %0 {offsets = [0, 1], sizes = [224, 1], strides = [1, 1]} : vector<224x2xf32> to vector<224x1xf32>
    %47 = vector.broadcast %46 : vector<224x1xf32> to vector<224x140xf32>
    %48 = arith.mulf %45, %47 : vector<224x140xf32>
    %49 = arith.truncf %48 : vector<224x140xf32> to vector<224x140xbf16>
    %c0_24 = arith.constant 0 : index
    %c0_25 = arith.constant 0 : index
    %c0_26 = arith.constant 0 : index
    %50 = vector.load %arg3[%c0_24, %c0_25, %c0_26] : memref<3x140x140xbf16, #tpu.memory_space<vmem>>, vector<1x140x140xbf16>
    %51 = vector.shape_cast %50 : vector<1x140x140xbf16> to vector<140x140xbf16>
    %cst_27 = arith.constant dense<0.000000e+00> : vector<224x140xf32>
    %52 = tpu.matmul %42, %51, %cst_27 {dimension_numbers = #tpu.dot_dimension_numbers<[1], [0], [0], [1], [0, 0, 1, 1], [], []>} : vector<224x140xbf16>, vector<140x140xbf16>, vector<224x140xf32> -> vector<224x140xf32>
    %53 = arith.truncf %34 : vector<224x140xf32> to vector<224x140xbf16>
    %c1_28 = arith.constant 1 : index
    %c0_29 = arith.constant 0 : index
    %c0_30 = arith.constant 0 : index
    %54 = vector.load %arg3[%c1_28, %c0_29, %c0_30] : memref<3x140x140xbf16, #tpu.memory_space<vmem>>, vector<1x140x140xbf16>
    %55 = vector.shape_cast %54 : vector<1x140x140xbf16> to vector<140x140xbf16>
    %cst_31 = arith.constant dense<0.000000e+00> : vector<224x140xf32>
    %56 = tpu.matmul %53, %55, %cst_31 {dimension_numbers = #tpu.dot_dimension_numbers<[1], [0], [0], [1], [0, 0, 1, 1], [], []>} : vector<224x140xbf16>, vector<140x140xbf16>, vector<224x140xf32> -> vector<224x140xf32>
    %57 = arith.addf %52, %56 : vector<224x140xf32>
    %c2_32 = arith.constant 2 : index
    %c0_33 = arith.constant 0 : index
    %c0_34 = arith.constant 0 : index
    %58 = vector.load %arg3[%c2_32, %c0_33, %c0_34] : memref<3x140x140xbf16, #tpu.memory_space<vmem>>, vector<1x140x140xbf16>
    %59 = vector.shape_cast %58 : vector<1x140x140xbf16> to vector<140x140xbf16>
    %cst_35 = arith.constant dense<0.000000e+00> : vector<224x140xf32>
    %60 = tpu.matmul %49, %59, %cst_35 {dimension_numbers = #tpu.dot_dimension_numbers<[1], [0], [0], [1], [0, 0, 1, 1], [], []>} : vector<224x140xbf16>, vector<140x140xbf16>, vector<224x140xf32> -> vector<224x140xf32>
    %61 = arith.addf %57, %60 : vector<224x140xf32>
    %62 = vector.broadcast %35 : vector<1x140xf32> to vector<224x140xf32>
    %63 = arith.addf %61, %62 : vector<224x140xf32>
    %cst_36 = arith.constant 0.000000e+00 : f32
    %64 = vector.broadcast %cst_36 : f32 to vector<224x140xf32>
    %65 = arith.maximumf %63, %64 : vector<224x140xf32>
    %66 = arith.truncf %65 : vector<224x140xf32> to vector<224x140xbf16>
    %c0_37 = arith.constant 0 : index
    %c0_38 = arith.constant 0 : index
    %67 = vector.load %arg9[%c0_37, %c0_38] : memref<140x70xbf16, #tpu.memory_space<vmem>>, vector<140x70xbf16>
    %cst_39 = arith.constant dense<0.000000e+00> : vector<224x70xf32>
    %68 = tpu.matmul %66, %67, %cst_39 {dimension_numbers = #tpu.dot_dimension_numbers<[1], [0], [0], [1], [0, 0, 1, 1], [], []>} : vector<224x140xbf16>, vector<140x70xbf16>, vector<224x70xf32> -> vector<224x70xf32>
    %c0_40 = arith.constant 0 : index
    %c0_41 = arith.constant 0 : index
    %69 = vector.load %arg10[%c0_40, %c0_41] : memref<140x70xbf16, #tpu.memory_space<vmem>>, vector<140x70xbf16>
    %cst_42 = arith.constant dense<0.000000e+00> : vector<224x70xf32>
    %70 = tpu.matmul %66, %69, %cst_42 {dimension_numbers = #tpu.dot_dimension_numbers<[1], [0], [0], [1], [0, 0, 1, 1], [], []>} : vector<224x140xbf16>, vector<140x70xbf16>, vector<224x70xf32> -> vector<224x70xf32>
    %71 = arith.maximumf %68, %70 : vector<224x70xf32>
    %cst_43 = arith.constant 0.000000e+00 : f32
    %72 = vector.broadcast %cst_43 : f32 to vector<1x70xf32>
    %73 = vector.extract_strided_slice %71 {offsets = [1, 0], sizes = [223, 70], strides = [1, 1]} : vector<224x70xf32> to vector<223x70xf32>
    %74 = tpu.concatenate %73, %72 in 0 : vector<223x70xf32>, vector<1x70xf32> -> vector<224x70xf32>
    %75 = arith.maximumf %71, %74 : vector<224x70xf32>
    %c0_44 = arith.constant 0 : index
    %c0_45 = arith.constant 0 : index
    %76 = vector.load %arg13[%c0_44, %c0_45] : memref<112x224xbf16, #tpu.memory_space<vmem>>, vector<112x224xbf16>
    %77 = arith.truncf %75 : vector<224x70xf32> to vector<224x70xbf16>
    %cst_46 = arith.constant dense<0.000000e+00> : vector<112x70xf32>
    %78 = tpu.matmul %76, %77, %cst_46 {dimension_numbers = #tpu.dot_dimension_numbers<[1], [0], [0], [1], [0, 0, 1, 1], [], []>} : vector<112x224xbf16>, vector<224x70xbf16>, vector<112x70xf32> -> vector<112x70xf32>
    %c2_47 = arith.constant 2 : index
    %c0_48 = arith.constant 0 : index
    %79 = vector.load %arg7[%c2_47, %c0_48] : memref<5x140xf32, #tpu.memory_space<vmem>>, vector<1x112xf32>
    %cst_49 = arith.constant 0.000000e+00 : f32
    %80 = vector.broadcast %cst_49 : f32 to vector<1x70xf32>
    %81 = vector.extract_strided_slice %78 {offsets = [0, 0], sizes = [111, 70], strides = [1, 1]} : vector<112x70xf32> to vector<111x70xf32>
    %82 = tpu.concatenate %80, %81 in 0 : vector<1x70xf32>, vector<111x70xf32> -> vector<112x70xf32>
    %83 = vector.extract_strided_slice %1 {offsets = [0, 0], sizes = [112, 1], strides = [1, 1]} : vector<112x2xf32> to vector<112x1xf32>
    %84 = vector.broadcast %83 : vector<112x1xf32> to vector<112x70xf32>
    %85 = arith.mulf %82, %84 : vector<112x70xf32>
    %86 = arith.truncf %85 : vector<112x70xf32> to vector<112x70xbf16>
    %cst_50 = arith.constant 0.000000e+00 : f32
    %87 = vector.broadcast %cst_50 : f32 to vector<1x70xf32>
    %88 = vector.extract_strided_slice %78 {offsets = [1, 0], sizes = [111, 70], strides = [1, 1]} : vector<112x70xf32> to vector<111x70xf32>
    %89 = tpu.concatenate %88, %87 in 0 : vector<111x70xf32>, vector<1x70xf32> -> vector<112x70xf32>
    %90 = vector.extract_strided_slice %1 {offsets = [0, 1], sizes = [112, 1], strides = [1, 1]} : vector<112x2xf32> to vector<112x1xf32>
    %91 = vector.broadcast %90 : vector<112x1xf32> to vector<112x70xf32>
    %92 = arith.mulf %89, %91 : vector<112x70xf32>
    %93 = arith.truncf %92 : vector<112x70xf32> to vector<112x70xbf16>
    %c0_51 = arith.constant 0 : index
    %c0_52 = arith.constant 0 : index
    %c0_53 = arith.constant 0 : index
    %94 = vector.load %arg4[%c0_51, %c0_52, %c0_53] : memref<3x70x112xbf16, #tpu.memory_space<vmem>>, vector<1x70x112xbf16>
    %95 = vector.shape_cast %94 : vector<1x70x112xbf16> to vector<70x112xbf16>
    %cst_54 = arith.constant dense<0.000000e+00> : vector<112x112xf32>
    %96 = tpu.matmul %86, %95, %cst_54 {dimension_numbers = #tpu.dot_dimension_numbers<[1], [0], [0], [1], [0, 0, 1, 1], [], []>} : vector<112x70xbf16>, vector<70x112xbf16>, vector<112x112xf32> -> vector<112x112xf32>
    %97 = arith.truncf %78 : vector<112x70xf32> to vector<112x70xbf16>
    %c1_55 = arith.constant 1 : index
    %c0_56 = arith.constant 0 : index
    %c0_57 = arith.constant 0 : index
    %98 = vector.load %arg4[%c1_55, %c0_56, %c0_57] : memref<3x70x112xbf16, #tpu.memory_space<vmem>>, vector<1x70x112xbf16>
    %99 = vector.shape_cast %98 : vector<1x70x112xbf16> to vector<70x112xbf16>
    %cst_58 = arith.constant dense<0.000000e+00> : vector<112x112xf32>
    %100 = tpu.matmul %97, %99, %cst_58 {dimension_numbers = #tpu.dot_dimension_numbers<[1], [0], [0], [1], [0, 0, 1, 1], [], []>} : vector<112x70xbf16>, vector<70x112xbf16>, vector<112x112xf32> -> vector<112x112xf32>
    %101 = arith.addf %96, %100 : vector<112x112xf32>
    %c2_59 = arith.constant 2 : index
    %c0_60 = arith.constant 0 : index
    %c0_61 = arith.constant 0 : index
    %102 = vector.load %arg4[%c2_59, %c0_60, %c0_61] : memref<3x70x112xbf16, #tpu.memory_space<vmem>>, vector<1x70x112xbf16>
    %103 = vector.shape_cast %102 : vector<1x70x112xbf16> to vector<70x112xbf16>
    %cst_62 = arith.constant dense<0.000000e+00> : vector<112x112xf32>
    %104 = tpu.matmul %93, %103, %cst_62 {dimension_numbers = #tpu.dot_dimension_numbers<[1], [0], [0], [1], [0, 0, 1, 1], [], []>} : vector<112x70xbf16>, vector<70x112xbf16>, vector<112x112xf32> -> vector<112x112xf32>
    %105 = arith.addf %101, %104 : vector<112x112xf32>
    %106 = vector.broadcast %79 : vector<1x112xf32> to vector<112x112xf32>
    %107 = arith.addf %105, %106 : vector<112x112xf32>
    %cst_63 = arith.constant 0.000000e+00 : f32
    %108 = vector.broadcast %cst_63 : f32 to vector<112x112xf32>
    %109 = arith.maximumf %107, %108 : vector<112x112xf32>
    %c3 = arith.constant 3 : index
    %c0_64 = arith.constant 0 : index
    %110 = vector.load %arg7[%c3, %c0_64] : memref<5x140xf32, #tpu.memory_space<vmem>>, vector<1x112xf32>
    %cst_65 = arith.constant 0.000000e+00 : f32
    %111 = vector.broadcast %cst_65 : f32 to vector<1x112xf32>
    %112 = vector.extract_strided_slice %109 {offsets = [0, 0], sizes = [111, 112], strides = [1, 1]} : vector<112x112xf32> to vector<111x112xf32>
    %113 = tpu.concatenate %111, %112 in 0 : vector<1x112xf32>, vector<111x112xf32> -> vector<112x112xf32>
    %114 = vector.extract_strided_slice %1 {offsets = [0, 0], sizes = [112, 1], strides = [1, 1]} : vector<112x2xf32> to vector<112x1xf32>
    %115 = vector.broadcast %114 : vector<112x1xf32> to vector<112x112xf32>
    %116 = arith.mulf %113, %115 : vector<112x112xf32>
    %117 = arith.truncf %116 : vector<112x112xf32> to vector<112x112xbf16>
    %cst_66 = arith.constant 0.000000e+00 : f32
    %118 = vector.broadcast %cst_66 : f32 to vector<1x112xf32>
    %119 = vector.extract_strided_slice %109 {offsets = [1, 0], sizes = [111, 112], strides = [1, 1]} : vector<112x112xf32> to vector<111x112xf32>
    %120 = tpu.concatenate %119, %118 in 0 : vector<111x112xf32>, vector<1x112xf32> -> vector<112x112xf32>
    %121 = vector.extract_strided_slice %1 {offsets = [0, 1], sizes = [112, 1], strides = [1, 1]} : vector<112x2xf32> to vector<112x1xf32>
    %122 = vector.broadcast %121 : vector<112x1xf32> to vector<112x112xf32>
    %123 = arith.mulf %120, %122 : vector<112x112xf32>
    %124 = arith.truncf %123 : vector<112x112xf32> to vector<112x112xbf16>
    %c0_67 = arith.constant 0 : index
    %c0_68 = arith.constant 0 : index
    %c0_69 = arith.constant 0 : index
    %125 = vector.load %arg5[%c0_67, %c0_68, %c0_69] : memref<3x112x112xbf16, #tpu.memory_space<vmem>>, vector<1x112x112xbf16>
    %126 = vector.shape_cast %125 : vector<1x112x112xbf16> to vector<112x112xbf16>
    %cst_70 = arith.constant dense<0.000000e+00> : vector<112x112xf32>
    %127 = tpu.matmul %117, %126, %cst_70 {dimension_numbers = #tpu.dot_dimension_numbers<[1], [0], [0], [1], [0, 0, 1, 1], [], []>} : vector<112x112xbf16>, vector<112x112xbf16>, vector<112x112xf32> -> vector<112x112xf32>
    %128 = arith.truncf %109 : vector<112x112xf32> to vector<112x112xbf16>
    %c1_71 = arith.constant 1 : index
    %c0_72 = arith.constant 0 : index
    %c0_73 = arith.constant 0 : index
    %129 = vector.load %arg5[%c1_71, %c0_72, %c0_73] : memref<3x112x112xbf16, #tpu.memory_space<vmem>>, vector<1x112x112xbf16>
    %130 = vector.shape_cast %129 : vector<1x112x112xbf16> to vector<112x112xbf16>
    %cst_74 = arith.constant dense<0.000000e+00> : vector<112x112xf32>
    %131 = tpu.matmul %128, %130, %cst_74 {dimension_numbers = #tpu.dot_dimension_numbers<[1], [0], [0], [1], [0, 0, 1, 1], [], []>} : vector<112x112xbf16>, vector<112x112xbf16>, vector<112x112xf32> -> vector<112x112xf32>
    %132 = arith.addf %127, %131 : vector<112x112xf32>
    %c2_75 = arith.constant 2 : index
    %c0_76 = arith.constant 0 : index
    %c0_77 = arith.constant 0 : index
    %133 = vector.load %arg5[%c2_75, %c0_76, %c0_77] : memref<3x112x112xbf16, #tpu.memory_space<vmem>>, vector<1x112x112xbf16>
    %134 = vector.shape_cast %133 : vector<1x112x112xbf16> to vector<112x112xbf16>
    %cst_78 = arith.constant dense<0.000000e+00> : vector<112x112xf32>
    %135 = tpu.matmul %124, %134, %cst_78 {dimension_numbers = #tpu.dot_dimension_numbers<[1], [0], [0], [1], [0, 0, 1, 1], [], []>} : vector<112x112xbf16>, vector<112x112xbf16>, vector<112x112xf32> -> vector<112x112xf32>
    %136 = arith.addf %132, %135 : vector<112x112xf32>
    %137 = vector.broadcast %110 : vector<1x112xf32> to vector<112x112xf32>
    %138 = arith.addf %136, %137 : vector<112x112xf32>
    %cst_79 = arith.constant 0.000000e+00 : f32
    %139 = vector.broadcast %cst_79 : f32 to vector<112x112xf32>
    %140 = arith.maximumf %138, %139 : vector<112x112xf32>
    %141 = arith.truncf %140 : vector<112x112xf32> to vector<112x112xbf16>
    %c0_80 = arith.constant 0 : index
    %c0_81 = arith.constant 0 : index
    %142 = vector.load %arg11[%c0_80, %c0_81] : memref<112x56xbf16, #tpu.memory_space<vmem>>, vector<112x56xbf16>
    %cst_82 = arith.constant dense<0.000000e+00> : vector<112x56xf32>
    %143 = tpu.matmul %141, %142, %cst_82 {dimension_numbers = #tpu.dot_dimension_numbers<[1], [0], [0], [1], [0, 0, 1, 1], [], []>} : vector<112x112xbf16>, vector<112x56xbf16>, vector<112x56xf32> -> vector<112x56xf32>
    %c0_83 = arith.constant 0 : index
    %c0_84 = arith.constant 0 : index
    %144 = vector.load %arg12[%c0_83, %c0_84] : memref<112x56xbf16, #tpu.memory_space<vmem>>, vector<112x56xbf16>
    %cst_85 = arith.constant dense<0.000000e+00> : vector<112x56xf32>
    %145 = tpu.matmul %141, %144, %cst_85 {dimension_numbers = #tpu.dot_dimension_numbers<[1], [0], [0], [1], [0, 0, 1, 1], [], []>} : vector<112x112xbf16>, vector<112x56xbf16>, vector<112x56xf32> -> vector<112x56xf32>
    %146 = arith.maximumf %143, %145 : vector<112x56xf32>
    %cst_86 = arith.constant 0.000000e+00 : f32
    %147 = vector.broadcast %cst_86 : f32 to vector<1x56xf32>
    %148 = vector.extract_strided_slice %146 {offsets = [1, 0], sizes = [111, 56], strides = [1, 1]} : vector<112x56xf32> to vector<111x56xf32>
    %149 = tpu.concatenate %148, %147 in 0 : vector<111x56xf32>, vector<1x56xf32> -> vector<112x56xf32>
    %150 = arith.maximumf %146, %149 : vector<112x56xf32>
    %c0_87 = arith.constant 0 : index
    %c0_88 = arith.constant 0 : index
    %151 = vector.load %arg14[%c0_87, %c0_88] : memref<56x112xbf16, #tpu.memory_space<vmem>>, vector<56x112xbf16>
    %152 = arith.truncf %150 : vector<112x56xf32> to vector<112x56xbf16>
    %cst_89 = arith.constant dense<0.000000e+00> : vector<56x56xf32>
    %153 = tpu.matmul %151, %152, %cst_89 {dimension_numbers = #tpu.dot_dimension_numbers<[1], [0], [0], [1], [0, 0, 1, 1], [], []>} : vector<56x112xbf16>, vector<112x56xbf16>, vector<56x56xf32> -> vector<56x56xf32>
    %c4_90 = arith.constant 4 : index
    %c0_91 = arith.constant 0 : index
    %154 = vector.load %arg7[%c4_90, %c0_91] : memref<5x140xf32, #tpu.memory_space<vmem>>, vector<1x112xf32>
    %cst_92 = arith.constant 0.000000e+00 : f32
    %155 = vector.broadcast %cst_92 : f32 to vector<1x56xf32>
    %156 = vector.extract_strided_slice %153 {offsets = [0, 0], sizes = [55, 56], strides = [1, 1]} : vector<56x56xf32> to vector<55x56xf32>
    %157 = tpu.concatenate %155, %156 in 0 : vector<1x56xf32>, vector<55x56xf32> -> vector<56x56xf32>
    %158 = vector.extract_strided_slice %2 {offsets = [0, 0], sizes = [56, 1], strides = [1, 1]} : vector<56x2xf32> to vector<56x1xf32>
    %159 = vector.broadcast %158 : vector<56x1xf32> to vector<56x56xf32>
    %160 = arith.mulf %157, %159 : vector<56x56xf32>
    %161 = arith.truncf %160 : vector<56x56xf32> to vector<56x56xbf16>
    %cst_93 = arith.constant 0.000000e+00 : f32
    %162 = vector.broadcast %cst_93 : f32 to vector<1x56xf32>
    %163 = vector.extract_strided_slice %153 {offsets = [1, 0], sizes = [55, 56], strides = [1, 1]} : vector<56x56xf32> to vector<55x56xf32>
    %164 = tpu.concatenate %163, %162 in 0 : vector<55x56xf32>, vector<1x56xf32> -> vector<56x56xf32>
    %165 = vector.extract_strided_slice %2 {offsets = [0, 1], sizes = [56, 1], strides = [1, 1]} : vector<56x2xf32> to vector<56x1xf32>
    %166 = vector.broadcast %165 : vector<56x1xf32> to vector<56x56xf32>
    %167 = arith.mulf %164, %166 : vector<56x56xf32>
    %168 = arith.truncf %167 : vector<56x56xf32> to vector<56x56xbf16>
    %c0_94 = arith.constant 0 : index
    %c0_95 = arith.constant 0 : index
    %c0_96 = arith.constant 0 : index
    %169 = vector.load %arg6[%c0_94, %c0_95, %c0_96] : memref<3x56x112xbf16, #tpu.memory_space<vmem>>, vector<1x56x112xbf16>
    %170 = vector.shape_cast %169 : vector<1x56x112xbf16> to vector<56x112xbf16>
    %cst_97 = arith.constant dense<0.000000e+00> : vector<56x112xf32>
    %171 = tpu.matmul %161, %170, %cst_97 {dimension_numbers = #tpu.dot_dimension_numbers<[1], [0], [0], [1], [0, 0, 1, 1], [], []>} : vector<56x56xbf16>, vector<56x112xbf16>, vector<56x112xf32> -> vector<56x112xf32>
    %172 = arith.truncf %153 : vector<56x56xf32> to vector<56x56xbf16>
    %c1_98 = arith.constant 1 : index
    %c0_99 = arith.constant 0 : index
    %c0_100 = arith.constant 0 : index
    %173 = vector.load %arg6[%c1_98, %c0_99, %c0_100] : memref<3x56x112xbf16, #tpu.memory_space<vmem>>, vector<1x56x112xbf16>
    %174 = vector.shape_cast %173 : vector<1x56x112xbf16> to vector<56x112xbf16>
    %cst_101 = arith.constant dense<0.000000e+00> : vector<56x112xf32>
    %175 = tpu.matmul %172, %174, %cst_101 {dimension_numbers = #tpu.dot_dimension_numbers<[1], [0], [0], [1], [0, 0, 1, 1], [], []>} : vector<56x56xbf16>, vector<56x112xbf16>, vector<56x112xf32> -> vector<56x112xf32>
    %176 = arith.addf %171, %175 : vector<56x112xf32>
    %c2_102 = arith.constant 2 : index
    %c0_103 = arith.constant 0 : index
    %c0_104 = arith.constant 0 : index
    %177 = vector.load %arg6[%c2_102, %c0_103, %c0_104] : memref<3x56x112xbf16, #tpu.memory_space<vmem>>, vector<1x56x112xbf16>
    %178 = vector.shape_cast %177 : vector<1x56x112xbf16> to vector<56x112xbf16>
    %cst_105 = arith.constant dense<0.000000e+00> : vector<56x112xf32>
    %179 = tpu.matmul %168, %178, %cst_105 {dimension_numbers = #tpu.dot_dimension_numbers<[1], [0], [0], [1], [0, 0, 1, 1], [], []>} : vector<56x56xbf16>, vector<56x112xbf16>, vector<56x112xf32> -> vector<56x112xf32>
    %180 = arith.addf %176, %179 : vector<56x112xf32>
    %181 = vector.broadcast %154 : vector<1x112xf32> to vector<56x112xf32>
    %182 = arith.addf %180, %181 : vector<56x112xf32>
    %cst_106 = arith.constant 0.000000e+00 : f32
    %183 = vector.broadcast %cst_106 : f32 to vector<56x112xf32>
    %184 = arith.maximumf %182, %183 : vector<56x112xf32>
    %185 = arith.truncf %184 : vector<56x112xf32> to vector<56x112xbf16>
    %c0_107 = arith.constant 0 : index
    %c0_108 = arith.constant 0 : index
    %c0_109 = arith.constant 0 : index
    %186 = vector.load %arg15[%c0_107, %c0_108, %c0_109] : memref<7x8x56xbf16, #tpu.memory_space<vmem>>, vector<1x8x56xbf16>
    %187 = vector.shape_cast %186 : vector<1x8x56xbf16> to vector<8x56xbf16>
    %cst_110 = arith.constant dense<0.000000e+00> : vector<8x112xf32>
    %188 = tpu.matmul %187, %185, %cst_110 {dimension_numbers = #tpu.dot_dimension_numbers<[1], [0], [0], [1], [0, 0, 1, 1], [], []>} : vector<8x56xbf16>, vector<56x112xbf16>, vector<8x112xf32> -> vector<8x112xf32>
    %c1_111 = arith.constant 1 : index
    %c0_112 = arith.constant 0 : index
    %c0_113 = arith.constant 0 : index
    %189 = vector.load %arg15[%c1_111, %c0_112, %c0_113] : memref<7x8x56xbf16, #tpu.memory_space<vmem>>, vector<1x8x56xbf16>
    %190 = vector.shape_cast %189 : vector<1x8x56xbf16> to vector<8x56xbf16>
    %cst_114 = arith.constant dense<0.000000e+00> : vector<8x112xf32>
    %191 = tpu.matmul %190, %185, %cst_114 {dimension_numbers = #tpu.dot_dimension_numbers<[1], [0], [0], [1], [0, 0, 1, 1], [], []>} : vector<8x56xbf16>, vector<56x112xbf16>, vector<8x112xf32> -> vector<8x112xf32>
    %c2_115 = arith.constant 2 : index
    %c0_116 = arith.constant 0 : index
    %c0_117 = arith.constant 0 : index
    %192 = vector.load %arg15[%c2_115, %c0_116, %c0_117] : memref<7x8x56xbf16, #tpu.memory_space<vmem>>, vector<1x8x56xbf16>
    %193 = vector.shape_cast %192 : vector<1x8x56xbf16> to vector<8x56xbf16>
    %cst_118 = arith.constant dense<0.000000e+00> : vector<8x112xf32>
    %194 = tpu.matmul %193, %185, %cst_118 {dimension_numbers = #tpu.dot_dimension_numbers<[1], [0], [0], [1], [0, 0, 1, 1], [], []>} : vector<8x56xbf16>, vector<56x112xbf16>, vector<8x112xf32> -> vector<8x112xf32>
    %c3_119 = arith.constant 3 : index
    %c0_120 = arith.constant 0 : index
    %c0_121 = arith.constant 0 : index
    %195 = vector.load %arg15[%c3_119, %c0_120, %c0_121] : memref<7x8x56xbf16, #tpu.memory_space<vmem>>, vector<1x8x56xbf16>
    %196 = vector.shape_cast %195 : vector<1x8x56xbf16> to vector<8x56xbf16>
    %cst_122 = arith.constant dense<0.000000e+00> : vector<8x112xf32>
    %197 = tpu.matmul %196, %185, %cst_122 {dimension_numbers = #tpu.dot_dimension_numbers<[1], [0], [0], [1], [0, 0, 1, 1], [], []>} : vector<8x56xbf16>, vector<56x112xbf16>, vector<8x112xf32> -> vector<8x112xf32>
    %c4_123 = arith.constant 4 : index
    %c0_124 = arith.constant 0 : index
    %c0_125 = arith.constant 0 : index
    %198 = vector.load %arg15[%c4_123, %c0_124, %c0_125] : memref<7x8x56xbf16, #tpu.memory_space<vmem>>, vector<1x8x56xbf16>
    %199 = vector.shape_cast %198 : vector<1x8x56xbf16> to vector<8x56xbf16>
    %cst_126 = arith.constant dense<0.000000e+00> : vector<8x112xf32>
    %200 = tpu.matmul %199, %185, %cst_126 {dimension_numbers = #tpu.dot_dimension_numbers<[1], [0], [0], [1], [0, 0, 1, 1], [], []>} : vector<8x56xbf16>, vector<56x112xbf16>, vector<8x112xf32> -> vector<8x112xf32>
    %c5 = arith.constant 5 : index
    %c0_127 = arith.constant 0 : index
    %c0_128 = arith.constant 0 : index
    %201 = vector.load %arg15[%c5, %c0_127, %c0_128] : memref<7x8x56xbf16, #tpu.memory_space<vmem>>, vector<1x8x56xbf16>
    %202 = vector.shape_cast %201 : vector<1x8x56xbf16> to vector<8x56xbf16>
    %cst_129 = arith.constant dense<0.000000e+00> : vector<8x112xf32>
    %203 = tpu.matmul %202, %185, %cst_129 {dimension_numbers = #tpu.dot_dimension_numbers<[1], [0], [0], [1], [0, 0, 1, 1], [], []>} : vector<8x56xbf16>, vector<56x112xbf16>, vector<8x112xf32> -> vector<8x112xf32>
    %c6 = arith.constant 6 : index
    %c0_130 = arith.constant 0 : index
    %c0_131 = arith.constant 0 : index
    %204 = vector.load %arg15[%c6, %c0_130, %c0_131] : memref<7x8x56xbf16, #tpu.memory_space<vmem>>, vector<1x8x56xbf16>
    %205 = vector.shape_cast %204 : vector<1x8x56xbf16> to vector<8x56xbf16>
    %cst_132 = arith.constant dense<0.000000e+00> : vector<8x112xf32>
    %206 = tpu.matmul %205, %185, %cst_132 {dimension_numbers = #tpu.dot_dimension_numbers<[1], [0], [0], [1], [0, 0, 1, 1], [], []>} : vector<8x56xbf16>, vector<56x112xbf16>, vector<8x112xf32> -> vector<8x112xf32>
    %207 = tpu.concatenate %188, %191, %194, %197, %200, %203, %206 in 1 : vector<8x112xf32>, vector<8x112xf32>, vector<8x112xf32>, vector<8x112xf32>, vector<8x112xf32>, vector<8x112xf32>, vector<8x112xf32> -> vector<8x784xf32>
    %c0_133 = arith.constant 0 : index
    %c0_134 = arith.constant 0 : index
    %208 = vector.load %arg16[%c0_133, %c0_134] : memref<912x128xbf16, #tpu.memory_space<vmem>>, vector<784x128xbf16>
    %c784 = arith.constant 784 : index
    %c0_135 = arith.constant 0 : index
    %209 = vector.load %arg16[%c784, %c0_135] : memref<912x128xbf16, #tpu.memory_space<vmem>>, vector<128x128xbf16>
    %210 = arith.truncf %207 : vector<8x784xf32> to vector<8x784xbf16>
    %cst_136 = arith.constant dense<0.000000e+00> : vector<8x128xf32>
    %211 = tpu.matmul %210, %208, %cst_136 {dimension_numbers = #tpu.dot_dimension_numbers<[1], [0], [0], [1], [0, 0, 1, 1], [], []>} : vector<8x784xbf16>, vector<784x128xbf16>, vector<8x128xf32> -> vector<8x128xf32>
    %c0_137 = arith.constant 0 : index
    %c0_138 = arith.constant 0 : index
    %212 = vector.load %arg17[%c0_137, %c0_138] : memref<2x128xf32, #tpu.memory_space<vmem>>, vector<1x128xf32>
    %213 = vector.broadcast %212 : vector<1x128xf32> to vector<8x128xf32>
    %214 = arith.addf %211, %213 : vector<8x128xf32>
    %cst_139 = arith.constant 0.000000e+00 : f32
    %215 = vector.broadcast %cst_139 : f32 to vector<8x128xf32>
    %216 = arith.maximumf %214, %215 : vector<8x128xf32>
    %217 = arith.truncf %216 : vector<8x128xf32> to vector<8x128xbf16>
    %cst_140 = arith.constant dense<0.000000e+00> : vector<8x128xf32>
    %218 = tpu.matmul %217, %209, %cst_140 {dimension_numbers = #tpu.dot_dimension_numbers<[1], [0], [0], [1], [0, 0, 1, 1], [], []>} : vector<8x128xbf16>, vector<128x128xbf16>, vector<8x128xf32> -> vector<8x128xf32>
    %c1_141 = arith.constant 1 : index
    %c0_142 = arith.constant 0 : index
    %219 = vector.load %arg17[%c1_141, %c0_142] : memref<2x128xf32, #tpu.memory_space<vmem>>, vector<1x128xf32>
    %220 = vector.broadcast %219 : vector<1x128xf32> to vector<8x128xf32>
    %221 = arith.addf %218, %220 : vector<8x128xf32>
    %c0_143 = arith.constant 0 : index
    %c0_144 = arith.constant 0 : index
    %222 = vector.load %arg18[%c0_143, %c0_144] : memref<8x128xf32, #tpu.memory_space<vmem>>, vector<8x128xf32>
    tpu.vector_store %arg18[%c0_143, %c0_144], %221 {strides = array<i32>} : memref<8x128xf32, #tpu.memory_space<vmem>>, vector<8x128xf32>,
    return
  }
  func.func @transform_0(%arg0: i32) -> (i32, i32) {
    %c0_i32 = arith.constant 0 : i32
    %c0_i32_0 = arith.constant 0 : i32
    return %arg0, %c0_i32 : i32, i32
  }
  func.func @transform_1(%arg0: i32) -> (i32, i32, i32) {
    %c0_i32 = arith.constant 0 : i32
    %c0_i32_0 = arith.constant 0 : i32
    %c0_i32_1 = arith.constant 0 : i32
    %c0_i32_2 = arith.constant 0 : i32
    return %c0_i32, %c0_i32_0, %c0_i32_1 : i32, i32, i32
  }
  func.func @transform_2(%arg0: i32) -> (i32, i32, i32) {
    %c0_i32 = arith.constant 0 : i32
    %c0_i32_0 = arith.constant 0 : i32
    %c0_i32_1 = arith.constant 0 : i32
    %c0_i32_2 = arith.constant 0 : i32
    return %c0_i32, %c0_i32_0, %c0_i32_1 : i32, i32, i32
  }
  func.func @transform_3(%arg0: i32) -> (i32, i32, i32) {
    %c0_i32 = arith.constant 0 : i32
    %c0_i32_0 = arith.constant 0 : i32
    %c0_i32_1 = arith.constant 0 : i32
    %c0_i32_2 = arith.constant 0 : i32
    return %c0_i32, %c0_i32_0, %c0_i32_1 : i32, i32, i32
  }
  func.func @transform_4(%arg0: i32) -> (i32, i32, i32) {
    %c0_i32 = arith.constant 0 : i32
    %c0_i32_0 = arith.constant 0 : i32
    %c0_i32_1 = arith.constant 0 : i32
    %c0_i32_2 = arith.constant 0 : i32
    return %c0_i32, %c0_i32_0, %c0_i32_1 : i32, i32, i32
  }
  func.func @transform_5(%arg0: i32) -> (i32, i32, i32) {
    %c0_i32 = arith.constant 0 : i32
    %c0_i32_0 = arith.constant 0 : i32
    %c0_i32_1 = arith.constant 0 : i32
    %c0_i32_2 = arith.constant 0 : i32
    return %c0_i32, %c0_i32_0, %c0_i32_1 : i32, i32, i32
  }
  func.func @transform_6(%arg0: i32) -> (i32, i32) {
    %c0_i32 = arith.constant 0 : i32
    %c0_i32_0 = arith.constant 0 : i32
    %c0_i32_1 = arith.constant 0 : i32
    return %c0_i32, %c0_i32_0 : i32, i32
  }
  func.func @transform_7(%arg0: i32) -> (i32, i32) {
    %c0_i32 = arith.constant 0 : i32
    %c0_i32_0 = arith.constant 0 : i32
    %c0_i32_1 = arith.constant 0 : i32
    return %c0_i32, %c0_i32_0 : i32, i32
  }
  func.func @transform_8(%arg0: i32) -> (i32, i32) {
    %c0_i32 = arith.constant 0 : i32
    %c0_i32_0 = arith.constant 0 : i32
    %c0_i32_1 = arith.constant 0 : i32
    return %c0_i32, %c0_i32_0 : i32, i32
  }
  func.func @transform_9(%arg0: i32) -> (i32, i32) {
    %c0_i32 = arith.constant 0 : i32
    %c0_i32_0 = arith.constant 0 : i32
    %c0_i32_1 = arith.constant 0 : i32
    return %c0_i32, %c0_i32_0 : i32, i32
  }
  func.func @transform_10(%arg0: i32) -> (i32, i32) {
    %c0_i32 = arith.constant 0 : i32
    %c0_i32_0 = arith.constant 0 : i32
    %c0_i32_1 = arith.constant 0 : i32
    return %c0_i32, %c0_i32_0 : i32, i32
  }
  func.func @transform_11(%arg0: i32) -> (i32, i32) {
    %c0_i32 = arith.constant 0 : i32
    %c0_i32_0 = arith.constant 0 : i32
    %c0_i32_1 = arith.constant 0 : i32
    return %c0_i32, %c0_i32_0 : i32, i32
  }
  func.func @transform_12(%arg0: i32) -> (i32, i32) {
    %c0_i32 = arith.constant 0 : i32
    %c0_i32_0 = arith.constant 0 : i32
    %c0_i32_1 = arith.constant 0 : i32
    return %c0_i32, %c0_i32_0 : i32, i32
  }
  func.func @transform_13(%arg0: i32) -> (i32, i32) {
    %c0_i32 = arith.constant 0 : i32
    %c0_i32_0 = arith.constant 0 : i32
    %c0_i32_1 = arith.constant 0 : i32
    return %c0_i32, %c0_i32_0 : i32, i32
  }
  func.func @transform_14(%arg0: i32) -> (i32, i32, i32) {
    %c0_i32 = arith.constant 0 : i32
    %c0_i32_0 = arith.constant 0 : i32
    %c0_i32_1 = arith.constant 0 : i32
    %c0_i32_2 = arith.constant 0 : i32
    return %c0_i32, %c0_i32_0, %c0_i32_1 : i32, i32, i32
  }
  func.func @transform_15(%arg0: i32) -> (i32, i32) {
    %c0_i32 = arith.constant 0 : i32
    %c0_i32_0 = arith.constant 0 : i32
    %c0_i32_1 = arith.constant 0 : i32
    return %c0_i32, %c0_i32_0 : i32, i32
  }
  func.func @transform_16(%arg0: i32) -> (i32, i32) {
    %c0_i32 = arith.constant 0 : i32
    %c0_i32_0 = arith.constant 0 : i32
    %c0_i32_1 = arith.constant 0 : i32
    return %c0_i32, %c0_i32_0 : i32, i32
  }
  func.func @transform_17(%arg0: i32) -> (i32, i32) {
    %c0_i32 = arith.constant 0 : i32
    %c0_i32_0 = arith.constant 0 : i32
    return %arg0, %c0_i32 : i32, i32
  }
}

</mosaic_0001>

<bundles_post_ra>
// kernel: _net_forward.1
= control target key start
LH: loop header
LB: loop body
LE: loop exit
PB: predicated region body
PF: predicated region fallthrough
CT: control target
= control target key end

     0   :  { %s14549_s0 = inlined_call_operand.hbm [shape: f32[448,28], index: 0, kind: input, shape index: {}]   ;;  %s14550_s1 = inlined_call_operand.hbm [shape: bf16[3,28,140], index: 1, kind: input, shape index: {}]   ;;  %s14551_s2 = inlined_call_operand.hbm [shape: bf16[3,140,140], index: 2, kind: input, shape index: {}]   ;;  %s14552_s3 = inlined_call_operand.vmem [shape: bf16[3,70,112], index: 3, kind: input, shape index: {}]   ;;  %s14553_s4 = inlined_call_operand.vmem [shape: bf16[3,112,112], index: 4, kind: input, shape index: {}]   ;;  %s14554_s5 = inlined_call_operand.hbm [shape: bf16[3,56,112], index: 5, kind: input, shape index: {}]   ;;  %s14555_s6 = inlined_call_operand.hbm [shape: f32[5,140], index: 6, kind: input, shape index: {}]   ;;  %s14556_s7 = inlined_call_operand.vmem [shape: f32[224,6], index: 7, kind: input, shape index: {}]   ;;  %s14557_s8 = inlined_call_operand.hbm [shape: bf16[140,70], index: 8, kind: input, shape index: {}]   ;;  %s14558_s9 = inlined_call_operand.hbm [shape: bf16[140,70], index: 9, kind: input, shape index: {}]   ;;  %s14559_s10 = inlined_call_operand.vmem [shape: bf16[112,56], index: 10, kind: input, shape index: {}]   ;;  %s14560_s11 = inlined_call_operand.vmem [shape: bf16[112,56], index: 11, kind: input, shape index: {}]   ;;  %s14561_s12 = inlined_call_operand.vmem [shape: bf16[112,224], index: 12, kind: input, shape index: {}]   ;;  %s14562_s13 = inlined_call_operand.hbm [shape: bf16[56,112], index: 13, kind: input, shape index: {}]   ;;  %s14563_s14 = inlined_call_operand.hbm [shape: bf16[7,8,56], index: 14, kind: input, shape index: {}]   ;;  %s14564_s15 = inlined_call_operand.hbm [shape: bf16[912,128], index: 15, kind: input, shape index: {}]   ;;  %s14565_s16 = inlined_call_operand.vmem [shape: f32[2,128], index: 16, kind: input, shape index: {}]   ;;  %s14566_s17 = inlined_call_operand.hbm [shape: f32[16,128], index: 17, kind: output, shape index: {}]  }
   0x1   :  { %14712 = sst [smem:[#allocation102_spill]] %s14549_s0 }
   0x2   :  { %14713 = sst [smem:[#allocation103_spill]] %s14550_s1 }
   0x3   :  { %14714 = sst [smem:[#allocation104_spill]] %s14551_s2 }
   0x4   :  { %14715 = sst [smem:[#allocation105_spill]] %s14554_s5 }
   0x5   :  { %14716 = sst [smem:[#allocation106_spill]] %s14555_s6 }
   0x6   :  { %14717 = sst [smem:[#allocation107_spill]] %s14557_s8 }
   0x7   :  { %14718 = sst [smem:[#allocation108_spill]] %s14558_s9 }
   0x8   :  { %14719 = sst [smem:[#allocation109_spill]] %s14559_s10 }
   0x9   :  { %14720 = sst [smem:[#allocation110_spill]] %s14560_s11 }
   0xa   :  { %14721 = sst [smem:[#allocation111_spill]] %s14562_s13 }
   0xb   :  { %14722 = sst [smem:[#allocation112_spill]] %s14563_s14 }
   0xc   :  { %14723 = sst [smem:[#allocation113_spill]] %s14564_s15 }
   0xd   :  { %14724 = sst [smem:[#allocation114_spill]] %s14565_s16 }
   0xe   :  { %14725 = sst [smem:[#allocation115_spill]] %s14566_s17 }
   0xf   :  { %22 = vsyncpa [#allocation3], 0 }
  0x10   :  { %24 = vsyncpa [#allocation3 + $0x1], 0 }
  0x11   :  { %25 = vsyncpa [#allocation6], 0 }
  0x12   :  { %26 = vsyncpa [#allocation9], 0 }
  0x13   :  { %27 = vsyncpa [#allocation12], 0 }
  0x14   :  { %28 = vsyncpa [#allocation15], 0 }
  0x15   :  { %29 = vsyncpa [#allocation18], 0 }
  0x16   :  { %30 = vsyncpa [#allocation4], 0 }
  0x17   :  { %32 = vsyncpa [#allocation4 + $0x1], 0  ;;  %s10719_s24 = smov 0   ;;  %s10721_s25 = smov 0  }
  0x18   :  { %s10723_s26 = smov 0   ;;  %s10725_s27 = smov 0  }
  0x19 LB: > { %s10600_s28 = smov [#allocation5]   ;;  %s10740_s0 = sadd.s32 4294967295, %s10598_s27   ;;  %s10598_s27 = sphi %s10725_s27, %s15085_s27   ;;  %s10594_s26 = sphi %s10723_s26, %s15084_s26   ;;  %s10590_s25 = sphi %s10721_s25, %s15083_s25   ;;  %s10586_s24 = sphi %s10719_s24, %s15082_s24  }
  0x1a   : > { %s443_s29 = sshll.u32 %s10600_s28, 4  ;;  %p8484_p0 = scmp.ge.s32.totalorder %s10598_s27, 1  ;;  %s444_s29 = int_to_ptr.vmem [resolvable:$true] %s443_s29 }
  0x1b   : > { %p14580_p1 = scmp.eq.s32.totalorder %s10740_s0, 0  ;;  %p431_p2 = scmp.lt.s32.totalorder %s10598_s27, 3 }
  0x1c   : > { %s10601_s18 = smov [#allocation8]   ;;  %s10602_s20 = smov [#allocation11]  }
  0x1d   : > { %p10745_p3 = pnand %p8484_p0, %p431_p2  ;;  %s475_s19 = sshll.u32 %s10601_s18, 4  ;;  %s10758_s19 = int_to_ptr.vmem [resolvable:$true] %s475_s19 }
  0x1e   : > { %s10760_s21 = sshll.u32 %s10602_s20, 4  ;;  %s10263_s23 = scalar_lea.vmem %s444_s29, 1536  ;;  %s503_s21 = int_to_ptr.vmem [resolvable:$true] %s10760_s21 }
  0x1f   : > { %s14726_s30 = scalar_select %p10745_p3, 1, 0 }
  0x20   : > { %p9792_p5 = pneg %p10745_p3  ;;  %p10264_p8 = scmp.ne.s32.totalorder %s444_s29, %s10263_s23 }
  0x21   : > { %p10271_p11 = scmp.lt.s32.totalorder %s444_s29, %s444_s29  ;;  %p10272_p12 = scmp.lt.s32.totalorder %s10263_s23, %s10263_s23 }
  0x22   : > { %p10754_p6 = pnand %p9792_p5, %p14580_p1 }
  0x23   : > { %p10273_p13 = por %p10272_p12, %p10271_p11 }
  0x24   : > { %p10764_p7 = pneg %p10754_p6 }
  0x26   : > { %p10266_p9 = pnand %p10264_p8, %p10764_p7 }
  0x28   : > { %p10267_p10 = pneg %p10266_p9 }
  0x2a   : > { %p10274_p0 = pnand %p10273_p13, %p10267_p10 }
  0x2c   : > { %10277 = shalt.err (!%p10274_p0)
}
  0x2d   : > { %s14572_s28 = smov 128   ;;  %s14574_s18 = smov 8  }
  0x2e   : > { %s14729_s16 = sld [smem:[#allocation103_spill]]  ;;  %s10289_s11 = scalar_lea.vmem %s10758_s19, 1344 }
  0x2f   : > { %p10290_p2 = scmp.ne.s32.totalorder %s10758_s19, %s10289_s11  ;;  %p10297_p9 = scmp.lt.s32.totalorder %s10758_s19, %s10758_s19 }
  0x30   : > { %p10298_p10 = scmp.lt.s32.totalorder %s10289_s11, %s10289_s11 }
  0x31   : > { %p10292_p5 = pnand %p10290_p2, %p10764_p7 }
  0x32   : > { %p10299_p11 = por %p10298_p10, %p10297_p9 }
  0x33   : > { %p10293_p8 = pneg %p10292_p5 }
  0x34   : > { %9795 = dma.hbm_to_vmem [thread:$0]  (!%p10754_p6), %s14729_s16, 1536, %s444_s29, [#allocation6], %s14572_s28, %s14572_s28, %s14574_s18  }
  0x35   : > { %p10300_p12 = pnand %p10299_p11, %p10293_p8 }
  0x37   : > { %10303 = shalt.err (!%p10300_p12)
}
  0x38   : > { %s14576_s23 = smov 64   ;;  %s14578_s10 = smov 4  }
  0x39   : > { %s14730_s5 = sld [smem:[#allocation105_spill]]  ;;  %s10315_s29 = scalar_lea.vmem %s503_s21, 1152 }
  0x3a   : > { %p10316_p13 = scmp.ne.s32.totalorder %s503_s21, %s10315_s29  ;;  %p10323_p5 = scmp.lt.s32.totalorder %s503_s21, %s503_s21 }
  0x3b   : > { %p10324_p8 = scmp.lt.s32.totalorder %s10315_s29, %s10315_s29 }
  0x3c   : > { %p10318_p0 = pnand %p10316_p13, %p10764_p7 }
  0x3d   : > { %p10325_p9 = por %p10324_p8, %p10323_p5 }
  0x3e   : > { %p10319_p2 = pneg %p10318_p0 }
  0x3f   : > { %9801 = dma.hbm_to_vmem [thread:$0]  (!%p10754_p6), %s14730_s5, 1344, %s10758_s19, [#allocation9], %s14576_s23, %s14576_s23, %s14578_s10  }
  0x40   : > { %p10326_p10 = pnand %p10325_p9, %p10319_p2 }
  0x42   : > { %10329 = shalt.err (!%p10326_p10)
}
  0x43   : > { %s14731_s8 = sld [smem:[#allocation107_spill]]  ;;  %s10607_s19 = smov [#allocation14]  }
  0x44   : > { %s537_s16 = sshll.u32 %s10607_s19, 4  ;;  %s10608_s17 = smov [#allocation7]   ;;  %s538_s16 = int_to_ptr.vmem [resolvable:$true] %s537_s16 }
  0x45   : > { %s456_s28 = sshll.u32 %s10608_s17, 4  ;;  %s10341_s18 = scalar_lea.vmem %s538_s16, 448  ;;  %s457_s28 = int_to_ptr.vmem [resolvable:$true] %s456_s28 }
  0x46   : > { %p10342_p11 = scmp.ne.s32.totalorder %s538_s16, %s10341_s18  ;;  %p10349_p0 = scmp.lt.s32.totalorder %s538_s16, %s538_s16 }
  0x47   : > { %p10350_p2 = scmp.lt.s32.totalorder %s10341_s18, %s10341_s18 }
  0x48   : > { %p10344_p12 = pnand %p10342_p11, %p10764_p7 }
  0x49   : > { %9807 = dma.hbm_to_vmem [thread:$0]  (!%p10754_p6), %s14731_s8, 1152, %s503_s21, [#allocation12], %s14576_s23, %s14576_s23, %s14578_s10  }
  0x4a   : > { %p10345_p13 = pneg %p10344_p12  ;;  %p10351_p5 = por %p10350_p2, %p10349_p0 }
  0x4c   : > { %p10352_p8 = pnand %p10351_p5, %p10345_p13 }
  0x4e   : > { %10355 = shalt.err (!%p10352_p8)
}
  0x4f   : > { %s14732_s13 = sld [smem:[#allocation111_spill]]  ;;  %s10367_s11 = scalar_lea.vmem %s457_s28, 6912 }
  0x50   : > { %p10368_p9 = scmp.ne.s32.totalorder %s457_s28, %s10367_s11  ;;  %p10375_p12 = scmp.lt.s32.totalorder %s457_s28, %s457_s28 }
  0x51   : > { %p10376_p0 = scmp.lt.s32.totalorder %s10367_s11, %s10367_s11 }
  0x52   : > { %p10370_p10 = pnand %p10368_p9, %p10764_p7 }
  0x53   : > { %p10377_p13 = por %p10376_p0, %p10375_p12 }
  0x54   : > { %p10371_p11 = pneg %p10370_p10 }
  0x55   : > { %9813 = dma.hbm_to_vmem [thread:$0]  (!%p10754_p6), %s14732_s13, 448, %s538_s16, [#allocation15], %s14576_s23, %s14576_s23, %s14578_s10  }
  0x56   : > { %p10378_p2 = pnand %p10377_p13, %p10371_p11 }
  0x58   : > { %10381 = shalt.err (!%p10378_p2)
}
  0x59   : > { %s14733_s18 = smov 8   ;;  %s14734_s20 = smov 128  }
  0x5a   : > { %s14735_s2 = sld [smem:[#allocation104_spill]]  ;;  %s10609_s16 = smov [#allocation10]  }
  0x5b   : > { %s489_s21 = sshll.u32 %s10609_s16, 4  ;;  %s10610_s29 = smov [#allocation13]   ;;  %s490_s21 = int_to_ptr.vmem [resolvable:$true] %s489_s21 }
  0x5c   : > { %s515_s23 = sshll.u32 %s10610_s29, 4  ;;  %s10393_s10 = scalar_lea.vmem %s490_s21, 256  ;;  %s516_s23 = int_to_ptr.vmem [resolvable:$true] %s515_s23 }
  0x5d   : > { %p10394_p5 = scmp.ne.s32.totalorder %s490_s21, %s10393_s10  ;;  %p10401_p10 = scmp.lt.s32.totalorder %s490_s21, %s490_s21 }
  0x5e   : > { %p10402_p11 = scmp.lt.s32.totalorder %s10393_s10, %s10393_s10 }
  0x5f   : > { %p10396_p8 = pnand %p10394_p5, %p10764_p7 }
  0x60   : > { %9798 = dma.hbm_to_vmem [thread:$0]  (!%p10754_p6), %s14735_s2, 6912, %s457_s28, [#allocation6], %s14734_s20, %s14734_s20, %s14733_s18  }
  0x61   : > { %p10397_p9 = pneg %p10396_p8  ;;  %p10403_p12 = por %p10402_p11, %p10401_p10 }
  0x63   : > { %p10404_p0 = pnand %p10403_p12, %p10397_p9 }
  0x65   : > { %10407 = shalt.err (!%p10404_p0)
}
  0x66   : > { %s14736_s6 = sld [smem:[#allocation106_spill]]  ;;  %s10419_s28 = scalar_lea.vmem %s516_s23, 1152 }
  0x67   : > { %p10420_p13 = scmp.ne.s32.totalorder %s516_s23, %s10419_s28  ;;  %p10427_p5 = scmp.lt.s32.totalorder %s516_s23, %s516_s23 }
  0x68   : > { %p10428_p8 = scmp.lt.s32.totalorder %s10419_s28, %s10419_s28 }
  0x69   : > { %p10422_p2 = pnand %p10420_p13, %p10764_p7 }
  0x6a   : > { %p10429_p1 = por %p10428_p8, %p10427_p5 }
  0x6b   : > { %p10423_p4 = pneg %p10422_p2 }
  0x6c   : > { %9804 = dma.hbm_to_vmem [thread:$0]  (!%p10754_p6), %s14736_s6, 256, %s490_s21, [#allocation9]  }
  0x6d   : > { %p10430_p3 = pnand %p10429_p1, %p10423_p4 }
  0x6f   : > { %10433 = shalt.err (!%p10430_p3)
}
  0x70   : > { %s14737_s10 = smov 4   ;;  %s14738_s17 = smov 64  }
  0x71   : > { %s14739_s9 = sld [smem:[#allocation108_spill]]  ;;  %s10611_s21 = smov [#allocation16]  }
  0x72   : > { %s550_s11 = sshll.u32 %s10611_s21, 4  ;;  %s10612_s19 = smov [#allocation17]   ;;  %s551_s11 = int_to_ptr.vmem [resolvable:$true] %s550_s11 }
  0x73   : > { %s563_s2 = sshll.u32 %s10612_s19, 4  ;;  %s10445_s5 = scalar_lea.vmem %s551_s11, 448  ;;  %s564_s2 = int_to_ptr.vmem [resolvable:$true] %s563_s2 }
  0x74   : > { %p10446_p9 = scmp.ne.s32.totalorder %s551_s11, %s10445_s5  ;;  %p10453_p4 = scmp.lt.s32.totalorder %s551_s11, %s551_s11 }
  0x75   : > { %p10454_p10 = scmp.lt.s32.totalorder %s10445_s5, %s10445_s5 }
  0x76   : > { %p10448_p1 = pnand %p10446_p9, %p10764_p7 }
  0x77   : > { %9810 = dma.hbm_to_vmem [thread:$0]  (!%p10754_p6), %s14739_s9, 1152, %s516_s23, [#allocation12], %s14738_s17, %s14738_s17, %s14737_s10  }
  0x78   : > { %p10449_p3 = pneg %p10448_p1  ;;  %p10455_p11 = por %p10454_p10, %p10453_p4 }
  0x7a   : > { %p10456_p12 = pnand %p10455_p11, %p10449_p3 }
  0x7c   : > { %10459 = shalt.err (!%p10456_p12)
}
  0x7d   : > { %s14740_s14 = sld [smem:[#allocation112_spill]]  ;;  %s10471_s16 = scalar_lea.vmem %s564_s2, 7296 }
  0x7e   : > { %p10472_p0 = scmp.ne.s32.totalorder %s564_s2, %s10471_s16  ;;  %p10479_p5 = scmp.lt.s32.totalorder %s564_s2, %s564_s2 }
  0x7f   : > { %p10480_p8 = scmp.lt.s32.totalorder %s10471_s16, %s10471_s16 }
  0x80   : > { %p10474_p13 = pnand %p10472_p0, %p10764_p7 }
  0x81   : > { %p10481_p9 = por %p10480_p8, %p10479_p5 }
  0x82   : > { %p10475_p2 = pneg %p10474_p13 }
  0x83   : > { %9816 = dma.hbm_to_vmem [thread:$0]  (!%p10754_p6), %s14740_s14, 448, %s551_s11, [#allocation15], %s14738_s17, %s14738_s17, %s14737_s10  }
  0x84   : > { %p10482_p1 = pnand %p10481_p9, %p10475_p2 }
  0x86   : > { %10485 = shalt.err (!%p10482_p1)
}
  0x87   : > { %s14741_s15 = sld [smem:[#allocation113_spill]]  ;;  %s8483_s1 = sadd.s32 4294967294, %s10598_s27  }
  0x88   : > { %s10863_s22 = sadd.s32 1, %s10598_s27   ;;  %s45_s21 = sadd.s32 1, %s10594_s26 }
  0x89   : > { %s42_s11 = ssub.s32 %s10598_s27, %s10863_s22  ;;  %p52_p7 = scmp.ne.s32.totalorder %s10594_s26, %s10590_s25 }
  0x8a   : > { %p43_p3 = scmp.eq.s32.totalorder %s42_s11, 0  ;;  %p53_p4 = scmp.eq.s32.totalorder %s10598_s27, 0 }
  0x8b   : > { %p58_p10 = scmp.ne.s32.totalorder %s10590_s25, %s10586_s24  ;;  %p418_p11 = scmp.eq.s32.totalorder %s10740_s0, 1 }
  0x8c   : > { %s10875_s19 = scalar_select %p43_p3, %s10594_s26, %s45_s21  }
  0x8d   : > { %9819 = dma.hbm_to_vmem [thread:$0]  (!%p10754_p6), %s14741_s15, 7296, %s564_s2, [#allocation18], %s14738_s17, %s14738_s17, %s14737_s10  }
  0x8e   : > { %p54_p12 = por %p53_p4, %p52_p7  ;;  %p14742_p0 = scmp.eq.s32.totalorder %s10740_s0, 0 }
  0x8f   : > { %p10883_p6 = por %p418_p11, %p52_p7  ;;  %p424_p2 = scmp.eq.s32.totalorder %s8483_s1, 1 }
  0x90   : > { %p10879_p13 = por %p14742_p0, %p58_p10  ;;  %p9837_p5 = scmp.lt.s32.totalorder %s10598_s27, 2 }
  0x91   : > { %s14744_s2 = scalar_select %p10883_p6, 1, 0 }
  0x92   : > { %s14743_s23 = scalar_select %p10879_p13, 1, 0 }
  0x93   : > { %s580_s10 = sand.u32 1, %s10594_s26   ;;  %p10889_p8 = por %p424_p2, %p58_p10 }
  0x94   : > { %s9750_s28 = smul.u32 224, %s580_s10  ;;  %p10893_p9 = pnand %p9837_p5, %p54_p12 }
  0x95   : > { %s14745_s17 = scalar_select %p10889_p8, 1, 0 }
  0x96   : > { %s8985_s5 = smul.u32 3584, %s10598_s27  ;;  %s14747_s11 = sld [smem:[#allocation102_spill]] }
  0x97   : > { %s584_s1 = scalar_lea.vmem [#allocation2], %s9750_s28  ;;  %s10905_s9 = scalar_lea.sflag [#allocation3], %s580_s10 }
  0x98   : > { %s591_s8 = sshll.u32 %s584_s1, 4  ;;  %p10488_p7 = pneg %p10893_p9  ;;  %s10903_s8 = int_to_ptr.vmem [resolvable:$true] %s591_s8 }
  0x9c   : > { %s10901_s6 = scalar_lea.hbm %s14747_s11, %s8985_s5  ;;  %s10491_s5 = scalar_lea.hbm %s14747_s11, 7168 }
  0x9d   : > { %s10486_s13 = scalar_lea.hbm %s10901_s6, 3584  ;;  %p10492_p10 = scmp.lt.s32.totalorder %s10901_s6, %s14747_s11 }
  0x9e   : > { %p10487_p1 = scmp.ne.s32.totalorder %s10901_s6, %s10486_s13  ;;  %p10493_p11 = scmp.lt.s32.totalorder %s10491_s5, %s10486_s13 }
  0xa0   : > { %p10489_p3 = pnand %p10488_p7, %p10487_p1  ;;  %p10494_p12 = por %p10493_p11, %p10492_p10 }
  0xa2   : > { %p10490_p4 = pneg %p10489_p3 }
  0xa4   : > { %p10495_p0 = pnand %p10494_p12, %p10490_p4 }
  0xa6   : > { %10498 = shalt.err (!%p10495_p0)
}
  0xa7   : > { %s10499_s10 = scalar_lea.vmem %s10903_s8, 3584  ;;  %s10613_s28 = smov [#allocation2]  }
  0xa8   : > { %p10500_p2 = scmp.ne.s32.totalorder %s10903_s8, %s10499_s10  ;;  %s10504_s1 = sshll.u32 %s10613_s28, 4  ;;  %s10505_s1 = int_to_ptr.vmem [resolvable:$false] %s10504_s1 }
  0xa9   : > { %s10506_s14 = scalar_lea.vmem %s10505_s1, 7168  ;;  %p10507_p3 = scmp.lt.s32.totalorder %s10903_s8, %s10505_s1 }
  0xaa   : > { %p10502_p5 = pnand %p10500_p2, %p10488_p7  ;;  %p10508_p8 = scmp.lt.s32.totalorder %s10506_s14, %s10499_s10 }
  0xac   : > { %p10503_p1 = pneg %p10502_p5  ;;  %p10509_p6 = por %p10508_p8, %p10507_p3 }
  0xae   : > { %p10510_p13 = pnand %p10509_p6, %p10503_p1 }
  0xb0   : > { %10513 = shalt.err (!%p10510_p13)
}
  0xb1   : > { %9823 = dma.hbm_to_vmem [thread:$0]  (!%p10893_p9), %s10901_s6, 3584, %s10903_s8, %s10905_s9, %s14734_s20, %s14734_s20, %s14733_s18  }
  0xb2   : > { %p14748_p7 = scmp.ne.s32.totalorder %s14726_s30, 0 }
  0xb4   : > { %603 = sbr.rel (%p14748_p7) target bundleno = 3491 (0xda3), region = 88 }
  0xb9   : > { %s10932_s13 = sand.u32 1, %s10590_s25   ;;  %p14749_p13 = scmp.ne.s32.totalorder %s14743_s23, 0 }
  0xba   : > { %s9751_s15 = smul.u32 224, %s10932_s13  ;;  %s606_s5 = scalar_lea.sflag [#allocation3], %s10932_s13 }
  0xbc   : > { %s10936_s29 = scalar_lea.vmem [#allocation2], %s9751_s15 }
  0xbd   : > { %10557 = dma.done.wait (%p14749_p13), %s606_s5, 3584  }
  0xbe   : > { %10559 = vsyncadd (%p14749_p13), %s606_s5, 4294963712  ;;  %p14750_p6 = scmp.eq.s32.totalorder %s10740_s0, 0 }
  0xc0   : > { %10561 = dma.done.wait (%p14750_p6), [#allocation6], 8448   ;;  %p14751_p8 = pmov %p14750_p6 }
  0xc1   : > { %p14752_p9 = pmov %p14750_p6 }
  0xc2   : > { %10563 = vsyncadd (%p14751_p8), [#allocation6], 4294958848 }
  0xc3   : > { %10565 = dma.done.wait (%p14752_p9), [#allocation9], 1600   ;;  %p14753_p4 = pmov %p14750_p6 }
  0xc5   : > { %10567 = vsyncadd (%p14753_p4), [#allocation9], 4294965696  ;;  %p14754_p10 = pmov %p14753_p4 }
  0xc6   : > { %p14755_p11 = pmov %p14753_p4 }
  0xc7   : > { %10569 = dma.done.wait (%p14754_p10), [#allocation12], 2304  }
  0xc8   : > { %10571 = vsyncadd (%p14755_p11), [#allocation12], 4294964992  ;;  %p14756_p12 = pmov %p14753_p4 }
  0xc9   : > { %p14757_p0 = pmov %p14753_p4 }
  0xca   : > { %10573 = dma.done.wait (%p14756_p12), [#allocation15], 896  }
  0xcb   : > { %10575 = vsyncadd (%p14757_p0), [#allocation15], 4294966400  ;;  %p14758_p2 = pmov %p14757_p0 }
  0xcc   : > { %p14759_p5 = pmov %p14757_p0 }
  0xcd   : > { %10577 = dma.done.wait (%p14758_p2), [#allocation18], 7296  }
  0xce   : > { %10579 = vsyncadd (%p14759_p5), [#allocation18], 4294960000  ;;  %v10614_v0 = vmov 1   ;;  %v14587_v1 = vmov 0   ;;  %v698_v2 = vld [vmem:[%s14556_s7] sm:$0xff]  ;;  %v699_v3 = vld [vmem:[%s14556_s7 + $0x8] sm:$0xff] }
  0xcf   : > { %9908 = vset.pattern.permute.xlu1 %v10614_v0  ;;  %9907 = vset.pattern.permute.xlu0 %v14587_v1  ;;  %vm1373_vm0 = vcmask 1045504   ;;  %v9968_v4 = vld [vmem:[#allocation5 + $0x34] ss:$8 sps:$4 sm:$0x3f]   ;;  %v9971_v6 = vld [vmem:[#allocation5 + $0x24] ss:$8 sps:$4 sm:$0xff]  }
  0xd0   : > { %1412 = vmatprep.mubr.bf16.mxu0 %v14587_v1  ;;  %1542 = vmatprep.mubr.bf16.mxu1 %v14587_v1  ;;  %v9970_v5 = vld [vmem:[#allocation5 + $0x30] ss:$8 sps:$4 sm:$0x3f]   ;;  %v10974_v7 = vld [vmem:[%s10936_s29] sm:$0xff]  ;;  %vm1050_vm1 = vcmask 1046528   ;;  %v727_v9 = vld [vmem:[%s10936_s29 + $0x8] sm:$0xff] }
  0xd1   : > { %1136 = vperm.xlu1 %9908, %v698_v2   ;;  %870 = vperm.xlu0 %9907, %v698_v2   ;;  %v1375_v8 = vsel %vm1373_vm0, %v9970_v5, 0  ;;  %v1051_v10 = vrot.slane %v10974_v7, 1  ;;  %vm783_vm2 = vcmask 1040384   ;;  %v784_v11 = vrot.slane %v10974_v7, 7  ;;  %v701_v12 = vld [vmem:[%s14556_s7 + $0x18] sm:$0xff]  ;;  %v10985_v13 = vld [vmem:[%s10936_s29 + $0x10] sm:$0xff] }
  0xd2   : > { %8511 = vmatprep.subr.msk.bf16.mxu0 %vm1373_vm0, %v9968_v4  ;;  %9743 = vmatprep.subr.msk.bf16.mxu1 %vm1373_vm0, %v9968_v4  ;;  %v1052_v14 = vrot.slane %v727_v9, 1  ;;  %v785_v15 = vrot.slane %v727_v9, 7  ;;  %v700_v16 = vld [vmem:[%s14556_s7 + $0x10] sm:$0xff]  ;;  %v9973_v17 = vld [vmem:[#allocation5 + $0x20] ss:$8 sps:$4 sm:$0xff]   ;;  %v729_v18 = vld [vmem:[%s10936_s29 + $0x18] sm:$0xff]  ;;  %v1293_v32 = vpack.c.bf16 %v727_v9, %v10974_v7 }
  0xd3   : > { %1393 = vmatpush1.bf16.msra.mxu0 %v1375_v8  ;;  %9745 = vmatpush1.bf16.msra.mxu1 %v1375_v8  ;;  %v1054_v19 = vrot.slane %v10985_v13, 1  ;;  %v787_v20 = vrot.slane %v10985_v13, 7  ;;  %v10994_v21 = vld [vmem:[%s10936_s29 + $0x20] sm:$0xff]  ;;  %v789_v24 = vrot.slane %v729_v18, 7  ;;  %v1056_v26 = vrot.slane %v729_v18, 1  ;;  %v11024_v33 = vld [vmem:[%s10936_s29 + $0x28] sm:$0xff] }
  0xd4   : > { %1394 = vmatprep.subr.bf16.mxu0 %v9971_v6  ;;  %9744 = vmatprep.subr.bf16.mxu1 %v9971_v6  ;;  %v10997_v22 = vsel %vm1050_vm1, %v1051_v10, %v1052_v14  ;;  %v11002_v23 = vsel %vm783_vm2, %v784_v11, %v785_v15  ;;  %v1058_v27 = vrot.slane %v10994_v21, 1  ;;  %vm1330_vm3 = vcmask 228352   ;;  %v703_v38 = vld [vmem:[%s14556_s7 + $0x28] sm:$0xff]  ;;  %v702_v39 = vld [vmem:[%s14556_s7 + $0x20] sm:$0xff]  ;;  %v704_v41 = vld [vmem:[%s14556_s7 + $0x30] sm:$0xff]  ;;  %s15075_s14 = sld [smem:[#allocation109_spill]] }
  0xd5   : > { %1140 = vperm.xlu1 %9908, %v699_v3   ;;  %875 = vperm.xlu0 %9907, %v699_v3   ;;  %v11007_v25 = vsel %vm1050_vm1, %v1052_v14, %v1054_v19  ;;  %v11011_v28 = vsel %vm783_vm2, %v787_v20, %v789_v24  ;;  %v11014_v29 = vsel %vm783_vm2, %v785_v15, %v787_v20  ;;  %v791_v34 = vrot.slane %v10994_v21, 7  ;;  %v9974_v40 = vld [vmem:[#allocation5 + $0x54] ss:$8 sps:$4 sm:$0x3f]   ;;  %v11064_v54 = vld [vmem:[%s14556_s7 + $0x48] sm:$0xff]  ;;  %v734_v2 = vld [vmem:[%s10936_s29 + $0x40] sm:$0xff] }
  0xd6   : > { %v11017_v30 = vsel %vm1050_vm1, %v1054_v19, %v1056_v26  ;;  %v11020_v31 = vsel %vm1050_vm1, %v1056_v26, %v1058_v27  ;;  %v793_v35 = vrot.slane %v11024_v33, 7  ;;  %v11049_v42 = vld [vmem:[%s10936_s29 + $0x30] sm:$0xff]  ;;  %v1060_v44 = vrot.slane %v11024_v33, 1  ;;  %v753_v47 = vld [vmem:[%s10936_s29 + $0xd8] sm:$0xff]  ;;  %v9982_v56 = vld [vmem:[#allocation5 + $0x4] ss:$8 sps:$4 sm:$0xff]  }
  0xd7   : > { %1395 = vmatpush1.bf16.msra.mxu0 %v9973_v17  ;;  %9746 = vmatpush1.bf16.msra.mxu1 %v9973_v17  ;;  %v11031_v36 = vsel %vm783_vm2, %v789_v24, %v791_v34  ;;  %v9976_v43 = vld [vmem:[#allocation5 + $0x50] ss:$8 sps:$4 sm:$0x3f]   ;;  %v1294_v45 = vpack.c.bf16 %v729_v18, %v10985_v13  ;;  %v9977_v50 = vld [vmem:[#allocation5 + $0x14] ss:$8 sps:$4 sm:$0x3f]   ;;  %v1295_v4 = vpack.c.bf16 %v11024_v33, %v10994_v21 }
  0xd8   : > { %v11034_v37 = vsel %vm783_vm2, %v791_v34, %v793_v35  ;;  %8549 = vmatprep.subr.msk.bf16.mxu0 %vm1373_vm0, %v9974_v40  ;;  %v752_v46 = vld [vmem:[%s10936_s29 + $0xd0] sm:$0xff]  ;;  %v1858_v48 = vsel %vm1373_vm0, %v9976_v43, 0  ;;  %v11058_v51 = vsel %vm1050_vm1, %v1058_v27, %v1060_v44  ;;  %v1062_v53 = vrot.slane %v11049_v42, 1  ;;  %v733_v58 = vld [vmem:[%s10936_s29 + $0x38] sm:$0xff]  ;;  %v9983_v59 = vld [vmem:[#allocation5 + $0x40] ss:$8 sps:$4 sm:$0xff]   ;;  %8530 = vmatprep.subr.msk.bf16.mxu1 %vm1373_vm0, %v9977_v50 }
  0xd9   : > { %9909 = vset.pattern.permute.xlu1 %v14587_v1  ;;  %9910 = vset.pattern.permute.xlu0 %v10614_v0  ;;  %v1306_v49 = vpack.c.bf16 %v753_v47, %v752_v46  ;;  %v9979_v52 = vld [vmem:[#allocation5 + $0x10] ss:$8 sps:$4 sm:$0x3f]   ;;  %v9985_v60 = vld [vmem:[#allocation5 + $0x44] ss:$8 sps:$4 sm:$0xff]   ;;  %v795_v62 = vrot.slane %v11049_v42, 7  ;;  %v1296_v18 = vpack.c.bf16 %v733_v58, %v11049_v42 }
  0xda   : > { %885 = vperm.xlu1 %9909, %v701_v12   ;;  %1144 = vperm.xlu0 %9910, %v700_v16   ;;  %v1614_v55 = vsel %vm1373_vm0, %v9979_v52, 0  ;;  %v11071_v57 = vsel %vm1050_vm1, %v1060_v44, %v1062_v53  ;;  %v9980_v61 = vld [vmem:[#allocation5] ss:$8 sps:$4 sm:$0xff]   ;;  %v797_v63 = vrot.slane %v733_v58, 7  ;;  %v705_v8 = vld [vmem:[%s14556_s7 + $0x38] sm:$0xff]  ;;  %v799_v9 = vrot.slane %v734_v2, 7 }
  0xdb   : > { %8512 = vmatmul.mubr.msk.bf16.vlgmr.msra.gmra.mxu0 %vm1330_vm3, %v1293_v32  ;;  %8525 = vmatmul.mubr.msk.bf16.vlgmr.msra.gmra.mxu1 %vm1330_vm3, %v1306_v49  ;;  %v11081_v3 = vld [vmem:[%s10936_s29 + $0x48] sm:$0xff]  ;;  %v11086_v5 = vsel %vm783_vm2, %v793_v35, %v795_v62  ;;  %v1064_v13 = vrot.slane %v733_v58, 1  ;;  %v1066_v14 = vrot.slane %v734_v2, 1  ;;  %v706_v20 = vld [vmem:[%s14556_s7 + $0x40] sm:$0xff]  ;;  %v736_v26 = vld [vmem:[%s10936_s29 + $0x50] sm:$0xff]  ;;  %vm2930_vm4 = vcmask 97280  }
  0xdc   : > { %1422 = vmatprep.mubr.bf16.mxu0 %v14587_v1  ;;  %1876 = vmatpush1.bf16.msra.mxu0 %v1858_v48  ;;  %v11089_v6 = vsel %vm783_vm2, %v795_v62, %v797_v63  ;;  %v801_v10 = vrot.slane %v11081_v3, 7  ;;  %v11113_v19 = vsel %vm783_vm2, %v797_v63, %v799_v9  ;;  %v11124_v21 = vld [vmem:[%s14556_s7 + $0x68] sm:$0xff]  ;;  %v1068_v24 = vrot.slane %v11081_v3, 1  ;;  %v712_v33 = vld [vmem:[%s14556_s7 + $0x70] sm:$0xff]  ;;  %v737_v35 = vld [vmem:[%s10936_s29 + $0x58] sm:$0xff]  ;;  %s15076_s6 = sld [smem:[#allocation110_spill]] }
  0xdd   : > { %1651 = vmatprep.mubr.bf16.mxu1 %v14587_v1  ;;  %1632 = vmatpush1.bf16.msra.mxu1 %v1614_v55  ;;  %v11109_v17 = vsel %vm1050_vm1, %v1062_v53, %v1064_v13  ;;  %v1297_v32 = vpack.c.bf16 %v11081_v3, %v734_v2  ;;  %v1070_v34 = vrot.slane %v736_v26, 1  ;;  %v1072_v40 = vrot.slane %v737_v35, 1  ;;  %v709_v46 = vld [vmem:[%s14556_s7 + $0x58] sm:$0xff]  ;;  %v738_v47 = vld [vmem:[%s10936_s29 + $0x60] sm:$0xff]  ;;  %v739_v49 = vld [vmem:[%s10936_s29 + $0x68] sm:$0xff]  ;;  %s10623_s1 = smov 96  }
  0xde   : > { %9912 = vset.pattern.permute.xlu1 %v10614_v0  ;;  %9911 = vset.pattern.permute.xlu0 %v14587_v1  ;;  %v11101_v15 = vsel %vm783_vm2, %v799_v9, %v801_v10  ;;  %v11130_v27 = vsel %vm1050_vm1, %v1066_v14, %v1068_v24  ;;  %v805_v42 = vrot.slane %v737_v35, 7  ;;  %v1074_v50 = vrot.slane %v738_v47, 1  ;;  %v716_v52 = vld [vmem:[%s14556_s7 + $0x90] sm:$0xff]  ;;  %v11208_v9 = vld [vmem:[%s10936_s29 + $0x80] sm:$0xff]  ;;  %s10624_s15 = smov 80   ;;  %s10625_s5 = smov 64  }
  0xdf   : > { %1148 = vperm.xlu1 %9912, %v701_v12   ;;  %880 = vperm.xlu0 %9911, %v700_v16   ;;  %v708_v12 = vld [vmem:[%s14556_s7 + $0x50] sm:$0xff]  ;;  %v11106_v16 = vsel %vm1050_vm1, %v1064_v13, %v1066_v14  ;;  %v11151_v43 = vsel %vm1050_vm1, %v1070_v34, %v1072_v40  ;;  %v1299_v55 = vpack.c.bf16 %v739_v49, %v738_v47  ;;  %v809_v58 = vrot.slane %v739_v49, 7  ;;  %s10626_s8 = smov 48   ;;  %s10627_s9 = smov 32  }
  0xe0   : > { %1633 = vmatprep.subr.bf16.mxu1 %v9982_v56  ;;  %1877 = vmatprep.subr.bf16.mxu0 %v9985_v60  ;;  %v11174_v53 = vsel %vm1050_vm1, %v1072_v40, %v1074_v50  ;;  %v11184_v60 = vld [vmem:[%s10936_s29 + $0x70] sm:$0xff]  ;;  %v1076_v63 = vrot.slane %v739_v49, 1  ;;  %v11262_v40 = vld [vmem:[%s10936_s29 + $0xa8] sm:$0xff]  ;;  %v717_v49 = vld [vmem:[%s14556_s7 + $0x98] sm:$0xff]  ;;  %vm4735_vm5 = vcmask 785408   ;;  %vm5174_vm6 = vcmask 1042432  }
  0xe1   : > { %1878 = vmatpush1.bf16.msra.mxu0 %v9983_v59  ;;  %1634 = vmatpush1.bf16.msra.mxu1 %v9980_v61  ;;  %v710_v59 = vld [vmem:[%s14556_s7 + $0x60] sm:$0xff]  ;;  %v11187_v61 = vld [vmem:[%s10936_s29 + $0x78] sm:$0xff]  ;;  %v720_v13 = vld [vmem:[%s14556_s7 + $0xb0] sm:$0xff]  ;;  %v811_v14 = vrot.slane %v11184_v60, 7  ;;  %vm10619_vm7 = vmmov 0   ;;  %vm5152_vm8 = vcmask 572416  }
  0xe2   : > { %v1300_v2 = vpack.c.bf16 %v11187_v61, %v11184_v60  ;;  %v11199_v3 = vsel %vm1050_vm1, %v1074_v50, %v1076_v63  ;;  %v11291_v50 = vld [vmem:[%s10936_s29 + $0xc0] sm:$0xff]  ;;  %vm5818_vm9 = vcmask 916480   ;;  %vm6981_vm10 = vcmask 1043456   ;;  %s15077_s20 = sld [smem:[#allocation114_spill]]  ;;  %s8506_s23 = sshll.u32 %s10932_s13, 3 }
  0xe3   : > { %9913 = vset.pattern.permute.xlu1 %v14587_v1  ;;  %895 = vperm.xlu0 %9911, %v703_v38   ;;  %vm6968_vm11 = vcmask 457728   ;;  %vm7625_vm12 = vcmask 654336   ;;  %vm7627_vm13 = vcmask 523264   ;;  %vm7629_vm14 = vcmask 392192   ;;  %s8982_s10 = sshll.u32 %s10740_s0, 7  ;;  %s695_s28 = scalar_lea.vmem [#allocation19], %s8506_s23 }
  0xe4   : > { %890 = vperm.xlu1 %9913, %v702_v39   ;;  %8513 = vmatmul.mubr.msk.bf16.gmra.mxu0 %vm1330_vm3, %v1294_v45  ;;  %v1298_v45 = vpack.c.bf16 %v737_v35, %v736_v26  ;;  %v11259_v35 = vld [vmem:[%s10936_s29 + $0xa0] sm:$0xff]  ;;  %vm7631_vm15 = vcmask 261120   ;;  %p15079_p3 = scmp.ne.s32.totalorder %s14744_s2, 0  ;;  %s10628_s0 = smov [#allocation19]  }
  0xe5   : > { %1432 = vmatprep.mubr.bf16.mxu0 %v14587_v1  ;;  %s10518_s18 = sshll.u32 %s10628_s0, 4  ;;  %s10519_s18 = int_to_ptr.vmem [resolvable:$false] %s10518_s18 }
  0xe6   : > { %s10520_s23 = scalar_lea.vmem %s10519_s18, 256 }
  0xe7   : > { %900 = vperm.xlu0 %9911, %v704_v41  }
  0xe8   : > { %9914 = vset.pattern.permute.xlu1 %v10614_v0 }
  0xe9   : > { %1152 = vperm.xlu1 %9914, %v702_v39   ;;  %v11148_v39 = vld [vmem:[%s14556_s7 + $0x88] sm:$0xff] }
  0xeb   : > { %915 = vperm.xlu0 %9911, %v11064_v54  }
  0xec   : > { %8514 = vmatmul.mubr.msk.bf16.gmra.mxu0 %vm1330_vm3, %v1295_v4  ;;  %v11204_v4 = vld [vmem:[%s14556_s7 + $0xa8] sm:$0xff] }
  0xed   : > { %1156 = vperm.xlu1 %9914, %v703_v38   ;;  %1442 = vmatprep.mubr.bf16.mxu0 %v14587_v1  ;;  %v11140_v38 = vsel %vm1050_vm1, %v1068_v24, %v1070_v34  ;;  %v11235_v24 = vsel %vm783_vm2, %v809_v58, %v811_v14  ;;  %v714_v34 = vld [vmem:[%s14556_s7 + $0x80] sm:$0xff] }
  0xef   : > { %9918 = vset.pattern.permute.xlu0 %v10614_v0 }
  0xf0   : > { %1160 = vperm.xlu0 %9918, %v704_v41   ;;  %v803_v41 = vrot.slane %v736_v26, 7  ;;  %v11239_v26 = vld [vmem:[%s10936_s29 + $0x90] sm:$0xff] }
  0xf1   : > { %9915 = vset.pattern.permute.xlu1 %v14587_v1 }
  0xf2   : > { %905 = vperm.xlu1 %9915, %v705_v8   ;;  %v11154_v44 = vsel %vm783_vm2, %v803_v41, %v805_v42  ;;  %v11162_v48 = vsel %vm783_vm2, %v801_v10, %v803_v41  ;;  %v11211_v10 = vld [vmem:[%s10936_s29 + $0x88] sm:$0xff]  ;;  %v724_v41 = vld [vmem:[%s14556_s7 + $0xd0] sm:$0xff] }
  0xf4   : > { %1176 = vperm.xlu0 %9918, %v708_v12   ;;  %8515 = vmatmul.mubr.msk.bf16.gmra.mxu0 %vm1330_vm3, %v1296_v18  ;;  %v1301_v18 = vpack.c.bf16 %v11211_v10, %v11208_v9 }
  0xf5   : > { %1452 = vmatprep.mubr.bf16.mxu0 %v14587_v1 }
  0xf6   : > { %9916 = vset.pattern.permute.xlu1 %v10614_v0 }
  0xf7   : > { %1164 = vperm.xlu1 %9916, %v705_v8   ;;  %v1078_v8 = vrot.slane %v11184_v60, 1  ;;  %v10025_v60 = vld [vmem:[#allocation7 + $0x90] ss:$8 sps:$4 sm:$0xff]  }
  0xf8   : > { %9921 = vset.pattern.permute.xlu0 %v14587_v1 }
  0xf9   : > { %920 = vperm.xlu0 %9921, %v708_v12   ;;  %v11216_v12 = vsel %vm1050_vm1, %v1076_v63, %v1078_v8  ;;  %v721_v63 = vld [vmem:[%s14556_s7 + $0xb8] sm:$0xff] }
  0xfb   : > { %9917 = vset.pattern.permute.xlu1 %v14587_v1 }
  0xfc   : > { %910 = vperm.xlu1 %9917, %v706_v20   ;;  %8516 = vmatmul.mubr.msk.bf16.gmra.mxu0 %vm1330_vm3, %v1297_v32  ;;  %v11242_v32 = vld [vmem:[%s10936_s29 + $0x98] sm:$0xff] }
  0xfd   : > { %935 = vperm.xlu0 %9921, %v11124_v21   ;;  %1462 = vmatprep.mubr.bf16.mxu0 %v14587_v1 }
 0x100   : > { %9919 = vset.pattern.permute.xlu1 %v10614_v0 }
 0x101   : > { %1168 = vperm.xlu1 %9919, %v706_v20   ;;  %940 = vperm.xlu0 %9921, %v712_v33   ;;  %v713_v20 = vld [vmem:[%s14556_s7 + $0x78] sm:$0xff] }
 0x104   : > { %8517 = vmatmul.mubr.msk.bf16.gmra.mxu0 %vm1330_vm3, %v1298_v45  ;;  %v11275_v45 = vld [vmem:[%s10936_s29 + $0xb0] sm:$0xff] }
 0x105   : > { %1172 = vperm.xlu1 %9919, %v11064_v54   ;;  %955 = vperm.xlu0 %9921, %v11148_v39   ;;  %v807_v54 = vrot.slane %v738_v47, 7 }
 0x106   : > { %1472 = vmatprep.mubr.bf16.mxu0 %v14587_v1 }
 0x107   : > { %v11177_v56 = vsel %vm783_vm2, %v805_v42, %v807_v54  ;;  %v11190_v62 = vsel %vm783_vm2, %v807_v54, %v809_v58  ;;  %v1303_v42 = vpack.c.bf16 %v11262_v40, %v11259_v35 }
 0x109   : > { %9920 = vset.pattern.permute.xlu1 %v14587_v1  ;;  %9928 = vset.pattern.permute.xlu0 %v10614_v0 }
 0x10a   : > { %925 = vperm.xlu1 %9920, %v709_v46   ;;  %1192 = vperm.xlu0 %9928, %v712_v33   ;;  %v1302_v33 = vpack.c.bf16 %v11242_v32, %v11239_v26 }
 0x10c   : > { %8518 = vmatmul.mubr.msk.bf16.gmra.mxu0 %vm1330_vm3, %v1299_v55  ;;  %v867_v55 = vsel %vm783_vm2, 0.0, %v784_v11 }
 0x10d   : > { %1482 = vmatprep.mubr.bf16.mxu0 %v14587_v1 }
 0x10e   : > { %9922 = vset.pattern.permute.xlu1 %v10614_v0  ;;  %1208 = vperm.xlu0 %9928, %v716_v52  }
 0x10f   : > { %1180 = vperm.xlu1 %9922, %v709_v46   ;;  %v11278_v46 = vld [vmem:[%s10936_s29 + $0xb8] sm:$0xff] }
 0x110   : > { %v1304_v47 = vpack.c.bf16 %v11278_v46, %v11275_v45 }
 0x112   : > { %9931 = vset.pattern.permute.xlu0 %v14587_v1 }
 0x113   : > { %9923 = vset.pattern.permute.xlu1 %v14587_v1  ;;  %960 = vperm.xlu0 %9931, %v716_v52   ;;  %v11295_v52 = vld [vmem:[%s10936_s29 + $0xc8] sm:$0xff] }
 0x114   : > { %930 = vperm.xlu1 %9923, %v710_v59   ;;  %8519 = vmatmul.mubr.msk.bf16.gmra.mxu0 %vm1330_vm3, %v1300_v2  ;;  %v1305_v54 = vpack.c.bf16 %v11295_v52, %v11291_v50 }
 0x115   : > { %1492 = vmatprep.mubr.bf16.mxu0 %v14587_v1 }
 0x117   : > { %975 = vperm.xlu0 %9931, %v11204_v4  }
 0x118   : > { %9924 = vset.pattern.permute.xlu1 %v10614_v0 }
 0x119   : > { %1184 = vperm.xlu1 %9924, %v710_v59  }
 0x11b   : > { %980 = vperm.xlu0 %9931, %v720_v13  }
 0x11c   : > { %8520 = vmatmul.mubr.msk.bf16.gmra.mxu0 %vm1330_vm3, %v1301_v18 }
 0x11d   : > { %1188 = vperm.xlu1 %9924, %v11124_v21   ;;  %1502 = vmatprep.mubr.bf16.mxu0 %v14587_v1  ;;  %v11250_v21 = vld [vmem:[%s14556_s7 + $0xc8] sm:$0xff] }
 0x11f   : > { %9936 = vset.pattern.permute.xlu0 %v10614_v0 }
 0x120   : > { %1224 = vperm.xlu0 %9936, %v720_v13  }
 0x121   : > { %9925 = vset.pattern.permute.xlu1 %v14587_v1 }
 0x122   : > { %945 = vperm.xlu1 %9925, %v713_v20  }
 0x124   : > { %9939 = vset.pattern.permute.xlu0 %v14587_v1  ;;  %8521 = vmatmul.mubr.msk.bf16.gmra.mxu0 %vm1330_vm3, %v1302_v33 }
 0x125   : > { %995 = vperm.xlu0 %9939, %v11250_v21   ;;  %1512 = vmatprep.mubr.bf16.mxu0 %v14587_v1 }
 0x126   : > { %9926 = vset.pattern.permute.xlu1 %v10614_v0 }
 0x127   : > { %1196 = vperm.xlu1 %9926, %v713_v20  }
 0x129   : > { %1000 = vperm.xlu0 %9939, %v724_v41  }
 0x12b   : > { %9927 = vset.pattern.permute.xlu1 %v14587_v1 }
 0x12c   : > { %950 = vperm.xlu1 %9927, %v714_v34   ;;  %8522 = vmatmul.mubr.msk.bf16.gmra.mxu0 %vm1330_vm3, %v1303_v42 }
 0x12d   : > { %1522 = vmatprep.mubr.bf16.mxu0 %v14587_v1  ;;  %9942 = vset.pattern.permute.xlu0 %v10614_v0 }
 0x12e   : > { %1240 = vperm.xlu0 %9942, %v724_v41  }
 0x130   : > { %9929 = vset.pattern.permute.xlu1 %v10614_v0 }
 0x131   : > { %1200 = vperm.xlu1 %9929, %v714_v34  }
 0x134   : > { %8523 = vmatmul.mubr.msk.bf16.gmra.mxu0 %vm1330_vm3, %v1304_v47 }
 0x135   : > { %1204 = vperm.xlu1 %9929, %v11148_v39   ;;  %1532 = vmatprep.mubr.bf16.mxu0 %v14587_v1  ;;  %v718_v39 = vld [vmem:[%s14556_s7 + $0xa0] sm:$0xff] }
 0x139   : > { %9930 = vset.pattern.permute.xlu1 %v14587_v1 }
 0x13a   : > { %965 = vperm.xlu1 %9930, %v717_v49  }
 0x13c   : > { %8524 = vmatmul.mubr.msk.bf16.gmra.mxu0 %vm1330_vm3, %v1305_v54 }
 0x13d   : > { %1895 = vmatprep.mubr.bf16.mxu0 %v14587_v1 }
 0x13e   : > { %9932 = vset.pattern.permute.xlu1 %v10614_v0 }
 0x13f   : > { %1212 = vperm.xlu1 %9932, %v717_v49  }
 0x143   : > { %9933 = vset.pattern.permute.xlu1 %v14587_v1 }
 0x144   : > { %970 = vperm.xlu1 %9933, %v718_v39  }
 0x148   : > { %9934 = vset.pattern.permute.xlu1 %v10614_v0 }
 0x149   : > { %1216 = vperm.xlu1 %9934, %v718_v39  }
 0x14c   : > { %v11312_v58 = vpop.permute.xlu1 %1136  ;;  %v11314_v59 = vpop.permute.xlu0 %870 }
 0x14d   : > { %1220 = vperm.xlu1 %9934, %v11204_v4   ;;  %v1008_v2 = vmul.f32 %v11314_v59, %v867_v55  ;;  %v1247_v7 = vmul.f32 %v11312_v58, %v10997_v22  ;;  %v722_v22 = vld [vmem:[%s14556_s7 + $0xc0] sm:$0xff] }
 0x150   : > { %v11321_v13 = vpop.permute.xlu1 %1140  ;;  %v11323_v18 = vpop.permute.xlu0 %875 }
 0x151   : > { %v1248_v11 = vmul.f32 %v11321_v13, %v11007_v25  ;;  %v1009_v20 = vmul.f32 %v11323_v18, %v11002_v23  ;;  %9935 = vset.pattern.permute.xlu1 %v14587_v1 }
 0x152   : > { %985 = vperm.xlu1 %9935, %v721_v63  }
 0x153   : > { %v1275_v4 = vpack.c.bf16 %v1248_v11, %v1247_v7  ;;  %v1036_v33 = vpack.c.bf16 %v1009_v20, %v1008_v2 }
 0x155   : > { %8550 = vmatmul.mubr.msk.bf16.vlgmr.msra.gmra.mxu0 %vm1330_vm3, %v1275_v4  ;;  %v11333_v34 = vpop.permute.xlu1 %885  ;;  %8531 = vmatmul.mubr.msk.bf16.vlgmr.msra.gmra.mxu1 %vm1330_vm3, %v1036_v33  ;;  %v11336_v41 = vpop.permute.xlu0 %1144 }
 0x156   : > { %9937 = vset.pattern.permute.xlu1 %v10614_v0  ;;  %1661 = vmatprep.mubr.bf16.mxu1 %v14587_v1  ;;  %v1249_v23 = vmul.f32 %v11336_v41, %v11017_v30  ;;  %v1011_v47 = vmul.f32 %v11333_v34, %v11011_v28 }
 0x157   : > { %1228 = vperm.xlu1 %9937, %v721_v63   ;;  %1905 = vmatprep.mubr.bf16.mxu0 %v14587_v1 }
 0x15a   : > { %v11346_v25 = vpop.permute.xlu1 %1148  ;;  %v11348_v42 = vpop.permute.xlu0 %880 }
 0x15b   : > { %v1250_v49 = vmul.f32 %v11346_v25, %v11020_v31  ;;  %v1010_v54 = vmul.f32 %v11348_v42, %v11014_v29  ;;  %9938 = vset.pattern.permute.xlu1 %v14587_v1 }
 0x15c   : > { %990 = vperm.xlu1 %9938, %v722_v22  }
 0x15d   : > { %v1037_v39 = vpack.c.bf16 %v1011_v47, %v1010_v54  ;;  %v1276_v55 = vpack.c.bf16 %v1250_v49, %v1249_v23  ;;  %v9986_v54 = vld [vmem:[#allocation7 + $0x100] ss:$8 sps:$4 sm:$0xff]  }
 0x15e   : > { %v11357_v63 = vpop.permute.xlu0 %895 }
 0x15f   : > { %v11359_v30 = vpop.permute.xlu1 %890  ;;  %8532 = vmatmul.mubr.msk.bf16.gmra.mxu1 %vm1330_vm3, %v1037_v39  ;;  %8551 = vmatmul.mubr.msk.bf16.gmra.mxu0 %vm1330_vm3, %v1276_v55  ;;  %v1013_v28 = vmul.f32 %v11357_v63, %v11034_v37  ;;  %v9988_v39 = vld [vmem:[#allocation7 + $0x104] ss:$8 sps:$4 sm:$0xff]  }
 0x160   : > { %v1012_v31 = vmul.f32 %v11359_v30, %v11031_v36  ;;  %9940 = vset.pattern.permute.xlu1 %v10614_v0  ;;  %1671 = vmatprep.mubr.bf16.mxu1 %v14587_v1  ;;  %v725_v36 = vld [vmem:[%s14556_s7 + $0xd8] sm:$0xff] }
 0x161   : > { %1232 = vperm.xlu1 %9940, %v722_v22   ;;  %1915 = vmatprep.mubr.bf16.mxu0 %v14587_v1 }
 0x162   : > { %v1038_v29 = vpack.c.bf16 %v1013_v28, %v1012_v31  ;;  %v11370_v2 = vpop.permute.xlu0 %900  ;;  %2979 = vmatprep.subr.bf16.mxu1 %v9988_v39  ;;  %v9989_v28 = vld [vmem:[#allocation7 + $0xf0] ss:$8 sps:$4 sm:$0xff]   ;;  %v9991_v31 = vld [vmem:[#allocation7 + $0xf4] ss:$8 sps:$4 sm:$0xff]  }
 0x163   : > { %v1014_v33 = vmul.f32 %v11370_v2, %v11086_v5  ;;  %2980 = vmatpush1.bf16.msra.mxu1 %v9986_v54  ;;  %v10004_v39 = vld [vmem:[#allocation7 + $0x50] ss:$8 sps:$4 sm:$0xff]  }
 0x164   : > { %v11372_v7 = vpop.permute.xlu1 %1152  ;;  %2981 = vmatprep.subr.bf16.mxu1 %v9991_v31  ;;  %v10009_v31 = vld [vmem:[#allocation7 + $0xc4] ss:$8 sps:$4 sm:$0xff]  }
 0x165   : > { %1236 = vperm.xlu1 %9940, %v11250_v21   ;;  %v1251_v20 = vmul.f32 %v11372_v7, %v11058_v51 }
 0x166   : > { %v11381_v11 = vpop.permute.xlu0 %915 }
 0x167   : > { %8533 = vmatmul.mubr.msk.bf16.gmra.mxu1 %vm1330_vm3, %v1038_v29  ;;  %14760 = vst [vmem:[#allocation27_spill] sm:$0xff] %v11381_v11 }
 0x168   : > { %v11379_v37 = vpop.permute.xlu1 %1156  ;;  %1681 = vmatprep.mubr.bf16.mxu1 %v14587_v1  ;;  %2982 = vmatpush1.bf16.msra.mxu1 %v9989_v28 }
 0x169   : > { %v1252_v4 = vmul.f32 %v11379_v37, %v11071_v57  ;;  %9941 = vset.pattern.permute.xlu1 %v14587_v1 }
 0x16a   : > { %1005 = vperm.xlu1 %9941, %v725_v36  }
 0x16b   : > { %v1277_v21 = vpack.c.bf16 %v1252_v4, %v1251_v20  ;;  %v11397_v51 = vpop.permute.xlu0 %1160  ;;  %v9997_v4 = vld [vmem:[#allocation7 + $0xe4] ss:$8 sps:$4 sm:$0xff]  }
 0x16c   : > { %14761 = vst [vmem:[#allocation28_spill] sm:$0xff] %v11397_v51  ;;  %v1253_v47 = vmul.f32 %v11397_v51, %v11109_v17  ;;  %2983 = vmatprep.subr.bf16.mxu1 %v9997_v4 }
 0x16d   : > { %v11391_v22 = vpop.permute.xlu1 %905  ;;  %8552 = vmatmul.mubr.msk.bf16.gmra.mxu0 %vm1330_vm3, %v1277_v21  ;;  %v9998_v21 = vld [vmem:[#allocation7 + $0x60] ss:$8 sps:$4 sm:$0xff]  }
 0x16e   : > { %v1015_v23 = vmul.f32 %v11391_v22, %v11089_v6  ;;  %9943 = vset.pattern.permute.xlu1 %v10614_v0  ;;  %1925 = vmatprep.mubr.bf16.mxu0 %v14587_v1  ;;  %v1017_v0 = vmul.f32 %v11381_v11, %v11101_v15  ;;  %v9994_v15 = vld [vmem:[#allocation7 + $0x74] ss:$8 sps:$4 sm:$0xff]  }
 0x16f   : > { %1244 = vperm.xlu1 %9943, %v725_v36   ;;  %v11416_v29 = vpop.permute.xlu0 %1176  ;;  %v9992_v36 = vld [vmem:[#allocation7 + $0x70] ss:$8 sps:$4 sm:$0xff]   ;;  %3288 = vmatprep.subr.bf16.mxu0 %v9994_v15  ;;  %v10012_v15 = vld [vmem:[#allocation7 + $0x44] ss:$8 sps:$4 sm:$0xff]  }
 0x170   : > { %v1039_v57 = vpack.c.bf16 %v1015_v23, %v1014_v33  ;;  %14763 = vst [vmem:[#allocation30_spill] sm:$0xff] %v11416_v29  ;;  %3289 = vmatpush1.bf16.msra.mxu0 %v9992_v36  ;;  %v10000_v33 = vld [vmem:[#allocation7 + $0x64] ss:$8 sps:$4 sm:$0xff]   ;;  %v10010_v36 = vld [vmem:[#allocation7 + $0x40] ss:$8 sps:$4 sm:$0xff]  }
 0x171   : > { %3290 = vmatprep.subr.bf16.mxu0 %v10000_v33 }
 0x172   : > { %v11402_v49 = vpop.permute.xlu1 %1164  ;;  %8534 = vmatmul.mubr.msk.bf16.gmra.mxu1 %vm1330_vm3, %v1039_v57 }
 0x173   : > { %14762 = vst [vmem:[#allocation29_spill] sm:$0xff] %v11402_v49  ;;  %v1254_v5 = vmul.f32 %v11402_v49, %v11106_v16  ;;  %1691 = vmatprep.mubr.bf16.mxu1 %v14587_v1 }
 0x174   : > { %3291 = vmatpush1.bf16.msra.mxu0 %v9998_v21 }
 0x175   : > { %v1278_v6 = vpack.c.bf16 %v1254_v5, %v1253_v47  ;;  %v11428_v5 = vpop.permute.xlu0 %920 }
 0x176   : > { %14766 = vst [vmem:[#allocation33_spill] sm:$0xff] %v11428_v5 }
 0x177   : > { %v11410_v55 = vpop.permute.xlu1 %910  ;;  %8553 = vmatmul.mubr.msk.bf16.gmra.mxu0 %vm1330_vm3, %v1278_v6  ;;  %v10001_v6 = vld [vmem:[#allocation7 + $0xd0] ss:$8 sps:$4 sm:$0xff]  }
 0x178   : > { %v1016_v17 = vmul.f32 %v11410_v55, %v11113_v19  ;;  %1935 = vmatprep.mubr.bf16.mxu0 %v14587_v1  ;;  %v9995_v19 = vld [vmem:[#allocation7 + $0xe0] ss:$8 sps:$4 sm:$0xff]  }
 0x179   : > { %2984 = vmatpush1.bf16.msra.mxu1 %v9995_v19  ;;  %v11445_v21 = vpop.permute.xlu0 %935 }
 0x17a   : > { %v1040_v16 = vpack.c.bf16 %v1017_v0, %v1016_v17  ;;  %v10003_v0 = vld [vmem:[#allocation7 + $0xd4] ss:$8 sps:$4 sm:$0xff]   ;;  %14769 = vst [vmem:[#allocation36_spill] sm:$0xff] %v11445_v21 }
 0x17b   : > { %v10006_v17 = vld [vmem:[#allocation7 + $0x54] ss:$8 sps:$4 sm:$0xff]   ;;  %2985 = vmatprep.subr.bf16.mxu1 %v10003_v0 }
 0x17c   : > { %v11418_v20 = vpop.permute.xlu1 %1168  ;;  %8535 = vmatmul.mubr.msk.bf16.gmra.mxu1 %vm1330_vm3, %v1040_v16  ;;  %v1018_v16 = vmul.f32 %v11428_v5, %v11162_v48  ;;  %3292 = vmatprep.subr.bf16.mxu0 %v10006_v17  ;;  %v1257_v48 = vmul.f32 %v11416_v29, %v11151_v43  ;;  %v10016_v17 = vld [vmem:[#allocation7 + $0x30] ss:$8 sps:$4 sm:$0xff]   ;;  %v1098_v29 = vrot.slane %v11291_v50, 1 }
 0x17d   : > { %14764 = vst [vmem:[#allocation31_spill] sm:$0xff] %v11418_v20  ;;  %1701 = vmatprep.mubr.bf16.mxu1 %v14587_v1  ;;  %v1255_v57 = vmul.f32 %v11418_v20, %v11130_v27  ;;  %2986 = vmatpush1.bf16.msra.mxu1 %v10001_v6 }
 0x17e   : > { %3293 = vmatpush1.bf16.msra.mxu0 %v10004_v39  ;;  %2987 = vmatprep.subr.bf16.mxu1 %v10009_v31  ;;  %v813_v39 = vrot.slane %v11187_v61, 7 }
 0x17f   : > { %3294 = vmatprep.subr.bf16.mxu0 %v10012_v15  ;;  %v10021_v15 = vld [vmem:[#allocation7 + $0xa4] ss:$8 sps:$4 sm:$0xff]  }
 0x180   : > { %v11422_v23 = vpop.permute.xlu1 %1172 }
 0x181   : > { %14765 = vst [vmem:[#allocation32_spill] sm:$0xff] %v11422_v23  ;;  %v1256_v47 = vmul.f32 %v11422_v23, %v11140_v38  ;;  %v10007_v38 = vld [vmem:[#allocation7 + $0xc0] ss:$8 sps:$4 sm:$0xff]  }
 0x182   : > { %2988 = vmatpush1.bf16.msra.mxu1 %v10007_v38  ;;  %3295 = vmatpush1.bf16.msra.mxu0 %v10010_v36  ;;  %v1080_v36 = vrot.slane %v11187_v61, 1 }
 0x183   : > { %v1279_v54 = vpack.c.bf16 %v1256_v47, %v1255_v57  ;;  %v1021_v57 = vmul.f32 %v11445_v21, %v11190_v62  ;;  %v10013_v62 = vld [vmem:[#allocation7 + $0xb0] ss:$8 sps:$4 sm:$0xff]  }
 0x185   : > { %v11432_v28 = vpop.permute.xlu1 %925  ;;  %8554 = vmatmul.mubr.msk.bf16.gmra.mxu0 %vm1330_vm3, %v1279_v54  ;;  %v10015_v54 = vld [vmem:[#allocation7 + $0xb4] ss:$8 sps:$4 sm:$0xff]  }
 0x186   : > { %14767 = vst [vmem:[#allocation34_spill] sm:$0xff] %v11432_v28  ;;  %v1019_v27 = vmul.f32 %v11432_v28, %v11154_v44  ;;  %1945 = vmatprep.mubr.bf16.mxu0 %v14587_v1  ;;  %2989 = vmatprep.subr.bf16.mxu1 %v10015_v54  ;;  %v14584_v54 = vrot.slane %v11211_v10, 7 }
 0x187   : > { %2990 = vmatpush1.bf16.msra.mxu1 %v10013_v62  ;;  %v10027_v62 = vld [vmem:[#allocation7 + $0x94] ss:$8 sps:$4 sm:$0xff]  }
 0x188   : > { %v1041_v19 = vpack.c.bf16 %v1019_v27, %v1018_v16  ;;  %v10018_v16 = vld [vmem:[#allocation7 + $0x34] ss:$8 sps:$4 sm:$0xff]   ;;  %2991 = vmatprep.subr.bf16.mxu1 %v10021_v15  ;;  %v10028_v15 = vld [vmem:[#allocation7 + $0x10] ss:$8 sps:$4 sm:$0xff]  }
 0x189   : > { %3296 = vmatprep.subr.bf16.mxu0 %v10018_v16 }
 0x18a   : > { %v11440_v4 = vpop.permute.xlu1 %1180  ;;  %8536 = vmatmul.mubr.msk.bf16.gmra.mxu1 %vm1330_vm3, %v1041_v19  ;;  %3297 = vmatpush1.bf16.msra.mxu0 %v10016_v17 }
 0x18b   : > { %14768 = vst [vmem:[#allocation35_spill] sm:$0xff] %v11440_v4  ;;  %v1258_v44 = vmul.f32 %v11440_v4, %v11174_v53  ;;  %1711 = vmatprep.mubr.bf16.mxu1 %v14587_v1  ;;  %v11456_v53 = vpop.permute.xlu0 %940 }
 0x18c   : > { %14771 = vst [vmem:[#allocation38_spill] sm:$0xff] %v11456_v53 }
 0x18d   : > { %v1280_v33 = vpack.c.bf16 %v1258_v44, %v1257_v48  ;;  %v814_v48 = vsel %vm783_vm2, %v811_v14, %v813_v39  ;;  %v10019_v44 = vld [vmem:[#allocation7 + $0xa0] ss:$8 sps:$4 sm:$0xff]   ;;  %v1081_v14 = vsel %vm1050_vm1, %v1078_v8, %v1080_v36  ;;  %v10030_v8 = vld [vmem:[#allocation7 + $0x14] ss:$8 sps:$4 sm:$0xff]  }
 0x18e   : > { %2992 = vmatpush1.bf16.msra.mxu1 %v10019_v44 }
 0x18f   : > { %v11450_v47 = vpop.permute.xlu1 %930  ;;  %8555 = vmatmul.mubr.msk.bf16.gmra.mxu0 %vm1330_vm3, %v1280_v33  ;;  %v10024_v33 = vld [vmem:[#allocation7 + $0x24] ss:$8 sps:$4 sm:$0xff]   ;;  %2993 = vmatprep.subr.bf16.mxu1 %v10027_v62 }
 0x190   : > { %14770 = vst [vmem:[#allocation37_spill] sm:$0xff] %v11450_v47  ;;  %v1020_v43 = vmul.f32 %v11450_v47, %v11177_v56  ;;  %1955 = vmatprep.mubr.bf16.mxu0 %v14587_v1  ;;  %v11465_v56 = vpop.permute.xlu0 %955  ;;  %3298 = vmatprep.subr.bf16.mxu0 %v10024_v33  ;;  %v10031_v33 = vld [vmem:[#allocation7 + $0x114] ss:$8 sps:$4 sm:$0x3f]  }
 0x191   : > { %14774 = vst [vmem:[#allocation41_spill] sm:$0xff] %v11465_v56 }
 0x192   : > { %v1042_v6 = vpack.c.bf16 %v1021_v57, %v1020_v43  ;;  %v1022_v57 = vmul.f32 %v11456_v53, %v11235_v24  ;;  %v10022_v43 = vld [vmem:[#allocation7 + $0x20] ss:$8 sps:$4 sm:$0xff]   ;;  %v815_v24 = vrot.slane %v11208_v9, 7  ;;  %2994 = vmatpush1.bf16.msra.mxu1 %v10025_v60  ;;  %v1092_v53 = vrot.slane %v11262_v40, 1 }
 0x193   : > { %3299 = vmatpush1.bf16.msra.mxu0 %v10022_v43  ;;  %8582 = vmatprep.subr.msk.bf16.mxu1 %vm1373_vm0, %v10031_v33  ;;  %v1086_v33 = vrot.slane %v11239_v26, 1 }
 0x194   : > { %v11458_v0 = vpop.permute.xlu1 %1184  ;;  %8537 = vmatmul.mubr.msk.bf16.gmra.mxu1 %vm1330_vm3, %v1042_v6  ;;  %v11485_v6 = vpop.permute.xlu0 %1192  ;;  %3300 = vmatprep.subr.bf16.mxu0 %v10030_v8  ;;  %v818_v44 = vsel %vm783_vm2, %v815_v24, %v14584_v54  ;;  %v816_v62 = vsel %vm783_vm2, %v813_v39, %v815_v24  ;;  %v10034_v8 = vld [vmem:[#allocation7] ss:$8 sps:$4 sm:$0xff]   ;;  %v10037_v24 = vld [vmem:[#allocation7 + $0x84] ss:$8 sps:$4 sm:$0x3f]  }
 0x195   : > { %14772 = vst [vmem:[#allocation39_spill] sm:$0xff] %v11458_v0  ;;  %1721 = vmatprep.mubr.bf16.mxu1 %v14587_v1  ;;  %v1259_v38 = vmul.f32 %v11458_v0, %v11199_v3  ;;  %v1082_v3 = vrot.slane %v11208_v9, 1  ;;  %14776 = vst [vmem:[#allocation43_spill] sm:$0xff] %v11485_v6  ;;  %v1025_v54 = vmul.f32 %v11465_v56, %v818_v44  ;;  %v1084_v44 = vrot.slane %v11211_v10, 1 }
 0x197   : > { %v1083_v16 = vsel %vm1050_vm1, %v1080_v36, %v1082_v3  ;;  %3301 = vmatpush1.bf16.msra.mxu0 %v10028_v15 }
 0x198   : > { %v11463_v27 = vpop.permute.xlu1 %1188 }
 0x199   : > { %14773 = vst [vmem:[#allocation40_spill] sm:$0xff] %v11463_v27  ;;  %v1260_v31 = vmul.f32 %v11463_v27, %v11216_v12  ;;  %v1090_v27 = vrot.slane %v11259_v35, 1 }
 0x19b   : > { %v1281_v19 = vpack.c.bf16 %v1260_v31, %v1259_v38  ;;  %v11493_v38 = vpop.f32.mrf.mxu0  ;;  %v1261_v31 = vmul.f32 %v11485_v6, %v1081_v14 }
 0x19d   : > { %v11478_v12 = vpop.permute.xlu1 %945  ;;  %8556 = vmatmul.mubr.msk.bf16.gmra.mxu0 %vm1330_vm3, %v1281_v19 }
 0x19e   : > { %14775 = vst [vmem:[#allocation42_spill] sm:$0xff] %v11478_v12  ;;  %v1023_v61 = vmul.f32 %v11478_v12, %v814_v48  ;;  %1965 = vmatprep.mubr.bf16.mxu0 %v14587_v1  ;;  %v11499_v48 = vpop.f32.mrf.mxu0 }
 0x1a0   : > { %v1043_v17 = vpack.c.bf16 %v1023_v61, %v1022_v57  ;;  %v10033_v57 = vld [vmem:[#allocation7 + $0x110] ss:$8 sps:$4 sm:$0x3f]   ;;  %v11506_v43 = vpop.f32.mrf.mxu0  ;;  %v10036_v61 = vld [vmem:[#allocation7 + $0x4] ss:$8 sps:$4 sm:$0xff]  }
 0x1a1   : > { %3302 = vmatprep.subr.bf16.mxu0 %v10036_v61  ;;  %v11525_v61 = vpop.permute.xlu0 %1208 }
 0x1a2   : > { %v11496_v19 = vpop.permute.xlu1 %1196  ;;  %8538 = vmatmul.mubr.msk.bf16.gmra.mxu1 %vm1330_vm3, %v1043_v17  ;;  %v2974_v17 = vsel %vm1373_vm0, %v10033_v57, 0  ;;  %3303 = vmatpush1.bf16.msra.mxu0 %v10034_v8  ;;  %14779 = vst [vmem:[#allocation46_spill] sm:$0xff] %v11525_v61  ;;  %v1085_v8 = vsel %vm1050_vm1, %v1082_v3, %v1084_v44  ;;  %v1088_v3 = vrot.slane %v11242_v32, 1 }
 0x1a3   : > { %14777 = vst [vmem:[#allocation44_spill] sm:$0xff] %v11496_v19  ;;  %v1262_v36 = vmul.f32 %v11496_v19, %v1083_v16  ;;  %1731 = vmatprep.mubr.bf16.mxu1 %v14587_v1  ;;  %v11512_v16 = vpop.f32.mrf.mxu0  ;;  %3010 = vmatpush2.bf16.msra.mxu1 %v2974_v17 }
 0x1a4   : > { %8615 = vmatprep.subr.msk.bf16.mxu0 %vm1373_vm0, %v10037_v24 }
 0x1a5   : > { %v1282_v14 = vpack.c.bf16 %v1262_v36, %v1261_v31  ;;  %v11519_v39 = vpop.f32.mrf.mxu0  ;;  %v10039_v31 = vld [vmem:[#allocation7 + $0x80] ss:$8 sps:$4 sm:$0x3f]   ;;  %v11553_v56 = vpop.permute.xlu0 %960 }
 0x1a6   : > { %14783 = vst [vmem:[#allocation49_spill] sm:$0xff] %v11553_v56 }
 0x1a7   : > { %v11514_v60 = vpop.permute.xlu1 %950  ;;  %8557 = vmatmul.mubr.msk.bf16.gmra.mxu0 %vm1330_vm3, %v1282_v14  ;;  %v11523_v57 = vpop.f32.mrf.mxu0  ;;  %v3283_v14 = vsel %vm1373_vm0, %v10039_v31, 0  ;;  %v821_v31 = vrot.slane %v11242_v32, 7  ;;  %v14785_v32 = vmov 0  }
 0x1a8   : > { %14778 = vst [vmem:[#allocation45_spill] sm:$0xff] %v11514_v60  ;;  %v1024_v15 = vmul.f32 %v11514_v60, %v816_v62  ;;  %1975 = vmatprep.mubr.bf16.mxu0 %v14587_v1  ;;  %3319 = vmatpush2.bf16.msra.mxu0 %v3283_v14 }
 0x1a9   : > { %v11532_v17 = vpop.f32.mrf.mxu0  ;;  %4112 = vmatprep.subr.bf16.mxu0 %v14587_v1 }
 0x1aa   : > { %v1044_v36 = vpack.c.bf16 %v1025_v54, %v1024_v15  ;;  %v819_v54 = vrot.slane %v11239_v26, 7  ;;  %v1087_v15 = vsel %vm1050_vm1, %v1084_v44, %v1086_v33 }
 0x1ab   : > { %v11541_v24 = vpop.f32.mrf.mxu0 }
 0x1ac   : > { %v11529_v62 = vpop.permute.xlu1 %1200  ;;  %8539 = vmatmul.mubr.msk.bf16.gmra.mxu1 %vm1330_vm3, %v1044_v36  ;;  %v822_v6 = vsel %vm783_vm2, %v819_v54, %v821_v31 }
 0x1ad   : > { %14780 = vst [vmem:[#allocation47_spill] sm:$0xff] %v11529_v62  ;;  %1741 = vmatprep.mubr.bf16.mxu1 %v14587_v1  ;;  %v11546_v19 = vpop.f32.mrf.mxu0  ;;  %v1263_v26 = vmul.f32 %v11529_v62, %v1085_v8  ;;  %v14782_v1 = vrot.slane %v11211_v10, 7 }
 0x1af   : > { %v820_v9 = vsel %vm783_vm2, %v14782_v1, %v819_v54  ;;  %v11556_v44 = vpop.f32.mrf.mxu0  ;;  %v1089_v1 = vsel %vm1050_vm1, %v1086_v33, %v1088_v3  ;;  %v823_v54 = vrot.slane %v11259_v35, 7  ;;  %v11584_v35 = vpop.permute.xlu0 %975 }
 0x1b0   : > { %v11544_v36 = vpop.permute.xlu1 %1204  ;;  %v1026_v12 = vmul.f32 %v11553_v56, %v820_v9  ;;  %v1091_v9 = vsel %vm1050_vm1, %v1088_v3, %v1090_v27  ;;  %v1265_v56 = vmul.f32 %v11525_v61, %v1089_v1  ;;  %14787 = vst [vmem:[#allocation52_spill] sm:$0xff] %v11584_v35 }
 0x1b1   : > { %14781 = vst [vmem:[#allocation48_spill] sm:$0xff] %v11544_v36  ;;  %v1264_v14 = vmul.f32 %v11544_v36, %v1087_v15  ;;  %v11561_v8 = vpop.f32.mrf.mxu0 }
 0x1b3   : > { %v1283_v60 = vpack.c.bf16 %v1264_v14, %v1263_v26  ;;  %v11569_v36 = vpop.f32.mrf.mxu0  ;;  %v825_v26 = vrot.slane %v11262_v40, 7  ;;  %v827_v40 = vrot.slane %v11275_v45, 7  ;;  %v11622_v4 = vpop.permute.xlu0 %980 }
 0x1b4   : > { %14791 = vst [vmem:[#allocation56_spill] sm:$0xff] %v11622_v4 }
 0x1b5   : > { %v11563_v15 = vpop.permute.xlu1 %965  ;;  %8558 = vmatmul.mubr.msk.bf16.gmra.mxu0 %vm1330_vm3, %v1283_v60  ;;  %v11574_v62 = vpop.f32.mrf.mxu0  ;;  %v828_v47 = vsel %vm783_vm2, %v825_v26, %v827_v40 }
 0x1b6   : > { %14784 = vst [vmem:[#allocation50_spill] sm:$0xff] %v11563_v15  ;;  %v1027_v10 = vmul.f32 %v11563_v15, %v822_v6  ;;  %1985 = vmatprep.mubr.bf16.mxu0 %v14785_v32  ;;  %v826_v15 = vsel %vm783_vm2, %v823_v54, %v825_v26 }
 0x1b7   : > { %v11580_v6 = vpop.f32.mrf.mxu0  ;;  %v1029_v1 = vmul.f32 %v11584_v35, %v826_v15 }
 0x1b8   : > { %v1045_v14 = vpack.c.bf16 %v1027_v10, %v1026_v12  ;;  %v824_v10 = vsel %vm783_vm2, %v821_v31, %v823_v54 }
 0x1b9   : > { %v11587_v12 = vpop.f32.mrf.mxu0 }
 0x1ba   : > { %v11577_v60 = vpop.permute.xlu1 %1212  ;;  %8540 = vmatmul.mubr.msk.bf16.gmra.mxu1 %vm1330_vm3, %v1045_v14 }
 0x1bb   : > { %14786 = vst [vmem:[#allocation51_spill] sm:$0xff] %v11577_v60  ;;  %v1266_v33 = vmul.f32 %v11577_v60, %v1091_v9  ;;  %1751 = vmatprep.mubr.bf16.mxu1 %v14785_v32  ;;  %v11591_v61 = vpop.f32.mrf.mxu0 }
 0x1bd   : > { %v1284_v3 = vpack.c.bf16 %v1266_v33, %v1265_v56  ;;  %v11598_v60 = vpop.f32.mrf.mxu0  ;;  %v1094_v56 = vrot.slane %v11275_v45, 1  ;;  %v1093_v33 = vsel %vm1050_vm1, %v1090_v27, %v1092_v53  ;;  %v1096_v27 = vrot.slane %v11278_v46, 1 }
 0x1bf   : > { %v11593_v14 = vpop.permute.xlu1 %970  ;;  %8559 = vmatmul.mubr.msk.bf16.gmra.mxu0 %vm1330_vm3, %v1284_v3  ;;  %v11602_v31 = vpop.f32.mrf.mxu0  ;;  %v1095_v3 = vsel %vm1050_vm1, %v1092_v53, %v1094_v56 }
 0x1c0   : > { %14788 = vst [vmem:[#allocation53_spill] sm:$0xff] %v11593_v14  ;;  %v1028_v9 = vmul.f32 %v11593_v14, %v824_v10  ;;  %1995 = vmatprep.mubr.bf16.mxu0 %v14785_v32 }
 0x1c1   : > { %v11607_v54 = vpop.f32.mrf.mxu0 }
 0x1c2   : > { %v1046_v0 = vpack.c.bf16 %v1029_v1, %v1028_v9  ;;  %v829_v1 = vrot.slane %v11278_v46, 7 }
 0x1c3   : > { %v11612_v10 = vpop.f32.mrf.mxu0 }
 0x1c4   : > { %v11604_v15 = vpop.permute.xlu1 %1216  ;;  %8541 = vmatmul.mubr.msk.bf16.gmra.mxu1 %vm1330_vm3, %v1046_v0  ;;  %v830_v45 = vsel %vm783_vm2, %v827_v40, %v829_v1  ;;  %v831_v40 = vrot.slane %v11291_v50, 7 }
 0x1c5   : > { %14789 = vst [vmem:[#allocation54_spill] sm:$0xff] %v11604_v15  ;;  %1761 = vmatprep.mubr.bf16.mxu1 %v14785_v32  ;;  %v11618_v35 = vpop.f32.mrf.mxu0  ;;  %v1267_v0 = vmul.f32 %v11604_v15, %v1093_v33  ;;  %v11635_v33 = vpop.permute.xlu0 %1224  ;;  %v1099_v15 = vsel %vm1050_vm1, %v1096_v27, %v1098_v29 }
 0x1c6   : > { %14793 = vst [vmem:[#allocation58_spill] sm:$0xff] %v11635_v33 }
 0x1c7   : > { %v11625_v21 = vpop.f32.mrf.mxu0 }
 0x1c8   : > { %v11616_v9 = vpop.permute.xlu1 %1220 }
 0x1c9   : > { %14790 = vst [vmem:[#allocation55_spill] sm:$0xff] %v11616_v9  ;;  %v1268_v14 = vmul.f32 %v11616_v9, %v1095_v3  ;;  %v11630_v23 = vpop.f32.mrf.mxu0  ;;  %v1030_v3 = vmul.f32 %v11622_v4, %v828_v47 }
 0x1cb   : > { %v1285_v53 = vpack.c.bf16 %v1268_v14, %v1267_v0  ;;  %v1097_v14 = vsel %vm1050_vm1, %v1094_v56, %v1096_v27  ;;  %v11641_v26 = vpop.f32.mrf.mxu0  ;;  %v833_v0 = vrot.slane %v11295_v52, 7 }
 0x1cc   : > { %14794 = vst [vmem:[#allocation59_spill] sm:$0xff] %v11641_v26  ;;  %v1269_v28 = vmul.f32 %v11635_v33, %v1097_v14 }
 0x1cd   : > { %v11632_v20 = vpop.permute.xlu1 %985  ;;  %8560 = vmatmul.mubr.msk.bf16.gmra.mxu0 %vm1330_vm3, %v1285_v53  ;;  %v11646_v53 = vpop.f32.mrf.mxu0  ;;  %v834_v50 = vsel %vm783_vm2, %v831_v40, %v833_v0 }
 0x1ce   : > { %14792 = vst [vmem:[#allocation57_spill] sm:$0xff] %v11632_v20  ;;  %v1031_v46 = vmul.f32 %v11632_v20, %v830_v45  ;;  %2005 = vmatprep.mubr.bf16.mxu0 %v14785_v32  ;;  %14795 = vst [vmem:[#allocation60_spill] sm:$0xff] %v11646_v53  ;;  %v11656_v20 = vpop.permute.xlu0 %995 }
 0x1cf   : > { %v11652_v56 = vpop.f32.mrf.mxu0  ;;  %14798 = vst [vmem:[#allocation63_spill] sm:$0xff] %v11656_v20  ;;  %v1033_v14 = vmul.f32 %v11656_v20, %v834_v50 }
 0x1d0   : > { %v1047_v9 = vpack.c.bf16 %v1031_v46, %v1030_v3  ;;  %14797 = vst [vmem:[#allocation62_spill] sm:$0xff] %v11652_v56  ;;  %v832_v46 = vsel %vm783_vm2, %v829_v1, %v831_v40 }
 0x1d1   : > { %v11659_v27 = vpop.f32.mrf.mxu0 }
 0x1d2   : > { %v11649_v47 = vpop.permute.xlu1 %1228  ;;  %8542 = vmatmul.mubr.msk.bf16.gmra.mxu1 %vm1330_vm3, %v1047_v9  ;;  %14799 = vst [vmem:[#allocation64_spill] sm:$0xff] %v11659_v27 }
 0x1d3   : > { %14796 = vst [vmem:[#allocation61_spill] sm:$0xff] %v11649_v47  ;;  %v1270_v45 = vmul.f32 %v11649_v47, %v1099_v15  ;;  %1771 = vmatprep.mubr.bf16.mxu1 %v14785_v32  ;;  %v11663_v33 = vpop.f32.mrf.mxu0 }
 0x1d4   : > { %14800 = vst [vmem:[#allocation65_spill] sm:$0xff] %v11663_v33 }
 0x1d5   : > { %v1286_v3 = vpack.c.bf16 %v1270_v45, %v1269_v28  ;;  %v11670_v47 = vpop.f32.mrf.mxu0  ;;  %v1100_v28 = vrot.slane %v11295_v52, 1  ;;  %v10229_v45 = vld [vmem:[%s10936_s29 + $0xd0] sm:$0xff]  ;;  %v10230_v52 = vld [vmem:[%s10936_s29 + $0xd8] sm:$0xff]  ;;  %s10622_s29 = smov 112  }
 0x1d6   : > { %14802 = vst [vmem:[#allocation67_spill] sm:$0xff] %v11670_v47  ;;  %v1102_v1 = vrot.slane %v10229_v45, 1  ;;  %v1104_v5 = vrot.slane %v10230_v52, 1 }
 0x1d7   : > { %v11665_v9 = vpop.permute.xlu1 %990  ;;  %8561 = vmatmul.mubr.msk.bf16.gmra.mxu0 %vm1330_vm3, %v1286_v3  ;;  %v11674_v40 = vpop.f32.mrf.mxu0  ;;  %v1101_v3 = vsel %vm1050_vm1, %v1098_v29, %v1100_v28 }
 0x1d8   : > { %14801 = vst [vmem:[#allocation66_spill] sm:$0xff] %v11665_v9  ;;  %v1032_v15 = vmul.f32 %v11665_v9, %v832_v46  ;;  %2015 = vmatprep.mubr.bf16.mxu0 %v14785_v32  ;;  %14803 = vst [vmem:[#allocation68_spill] sm:$0xff] %v11674_v40  ;;  %v1103_v46 = vsel %vm1050_vm1, %v1100_v28, %v1102_v1 }
 0x1d9   : > { %v11679_v20 = vpop.f32.mrf.mxu0 }
 0x1da   : > { %v1048_v4 = vpack.c.bf16 %v1033_v14, %v1032_v15  ;;  %14805 = vst [vmem:[#allocation70_spill] sm:$0xff] %v11679_v20  ;;  %v835_v14 = vrot.slane %v10229_v45, 7  ;;  %v837_v15 = vrot.slane %v10230_v52, 7  ;;  %v11693_v20 = vpop.permute.xlu0 %1000 }
 0x1db   : > { %v11684_v9 = vpop.f32.mrf.mxu0  ;;  %14809 = vst [vmem:[#allocation74_spill] sm:$0xff] %v11693_v20 }
 0x1dc   : > { %v11676_v50 = vpop.permute.xlu1 %1232  ;;  %8543 = vmatmul.mubr.msk.bf16.gmra.mxu1 %vm1330_vm3, %v1048_v4  ;;  %14806 = vst [vmem:[#allocation71_spill] sm:$0xff] %v11684_v9  ;;  %v836_v28 = vsel %vm783_vm2, %v833_v0, %v835_v14  ;;  %v838_v45 = vsel %vm783_vm2, %v835_v14, %v837_v15  ;;  %v1134_v14 = vsel %vm1050_vm1, %v1104_v5, 0.0 }
 0x1dd   : > { %14804 = vst [vmem:[#allocation69_spill] sm:$0xff] %v11676_v50  ;;  %1781 = vmatprep.mubr.bf16.mxu1 %v14785_v32  ;;  %v11689_v40 = vpop.f32.mrf.mxu0  ;;  %v1271_v33 = vmul.f32 %v11676_v50, %v1101_v3  ;;  %v1034_v3 = vmul.f32 %v11693_v20, %v836_v28 }
 0x1de   : > { %14808 = vst [vmem:[#allocation73_spill] sm:$0xff] %v11689_v40  ;;  %v11707_v52 = vpop.permute.xlu0 %1240 }
 0x1df   : > { %v11695_v27 = vpop.f32.mrf.mxu0  ;;  %14813 = vst [vmem:[#allocation78_spill] sm:$0xff] %v11707_v52 }
 0x1e0   : > { %v11687_v47 = vpop.permute.xlu1 %1236  ;;  %14810 = vst [vmem:[#allocation75_spill] sm:$0xff] %v11695_v27 }
 0x1e1   : > { %14807 = vst [vmem:[#allocation72_spill] sm:$0xff] %v11687_v47  ;;  %v1272_v4 = vmul.f32 %v11687_v47, %v1103_v46  ;;  %v11699_v9 = vpop.f32.mrf.mxu0  ;;  %v1105_v47 = vsel %vm1050_vm1, %v1102_v1, %v1104_v5 }
 0x1e2   : > { %14811 = vst [vmem:[#allocation76_spill] sm:$0xff] %v11699_v9 }
 0x1e3   : > { %v1287_v29 = vpack.c.bf16 %v1272_v4, %v1271_v33  ;;  %v11710_v33 = vpop.f32.mrf.mxu0  ;;  %v1273_v4 = vmul.f32 %v11707_v52, %v1105_v47 }
 0x1e4   : > { %14814 = vst [vmem:[#allocation79_spill] sm:$0xff] %v11710_v33 }
 0x1e5   : > { %v11701_v56 = vpop.permute.xlu1 %1005  ;;  %8562 = vmatmul.mubr.msk.bf16.gmra.mxu0 %vm1330_vm3, %v1287_v29  ;;  %v11713_v15 = vpop.f32.mrf.mxu0 }
 0x1e6   : > { %14812 = vst [vmem:[#allocation77_spill] sm:$0xff] %v11701_v56  ;;  %v1035_v46 = vmul.f32 %v11701_v56, %v838_v45  ;;  %2025 = vmatprep.mubr.bf16.mxu0 %v14785_v32  ;;  %14815 = vst [vmem:[#allocation80_spill] sm:$0xff] %v11713_v15 }
 0x1e7   : > { %v11719_v28 = vpop.f32.mrf.mxu0 }
 0x1e8   : > { %v1049_v0 = vpack.c.bf16 %v1035_v46, %v1034_v3  ;;  %14817 = vst [vmem:[#allocation82_spill] sm:$0xff] %v11719_v28 }
 0x1e9   : > { %v11722_v45 = vpop.f32.mrf.mxu0 }
 0x1ea   : > { %v11716_v29 = vpop.permute.xlu1 %1244  ;;  %8544 = vmatmul.mubr.msk.bf16.gmra.mxu1 %vm1330_vm3, %v1049_v0  ;;  %14818 = vst [vmem:[#allocation83_spill] sm:$0xff] %v11722_v45 }
 0x1eb   : > { %14816 = vst [vmem:[#allocation81_spill] sm:$0xff] %v11716_v29  ;;  %v1274_v1 = vmul.f32 %v11716_v29, %v1134_v14  ;;  %v11724_v20 = vpop.f32.mrf.mxu0 }
 0x1ec   : > { %14819 = vst [vmem:[#allocation84_spill] sm:$0xff] %v11724_v20 }
 0x1ed   : > { %v1288_v56 = vpack.c.bf16 %v1274_v1, %v1273_v4  ;;  %v11727_v5 = vpop.f32.mrf.mxu0  ;;  %v11745_v1 = vpop.f32.mrf.mxu1 }
 0x1ee   : > { %14820 = vst [vmem:[#allocation85_spill] sm:$0xff] %v11727_v5  ;;  %14829 = vst [vmem:[#allocation94_spill] sm:$0xff] %v11745_v1  ;;  %v754_v1 = vld [vmem:[#allocation10] ss:$8 sm:$0x3] }
 0x1ef   : > { %8563 = vmatmul.mubr.msk.bf16.gmra.mxu0 %vm1330_vm3, %v1288_v56  ;;  %v11729_v3 = vpop.f32.mrf.mxu0  ;;  %v11749_v50 = vpop.f32.mrf.mxu1 }
 0x1f0   : > { %14821 = vst [vmem:[#allocation86_spill] sm:$0xff] %v11729_v3  ;;  %14831 = vst [vmem:[#allocation96_spill] sm:$0xff] %v11749_v50  ;;  %v2093_v3 = vlaneseq }
 0x1f1   : > { %v11731_v47 = vpop.f32.mrf.mxu0 }
 0x1f2   : > { %14822 = vst [vmem:[#allocation87_spill] sm:$0xff] %v11731_v47  ;;  %v10042_v47 = vld [vmem:[#allocation7 + $0x194] ss:$8 sps:$4 sm:$0xff]  }
 0x1f3   : > { %v11733_v46 = vpop.f32.mrf.mxu0  ;;  %3616 = vmatprep.subr.bf16.mxu1 %v10042_v47 }
 0x1f4   : > { %14823 = vst [vmem:[#allocation88_spill] sm:$0xff] %v11733_v46 }
 0x1f5   : > { %v11735_v0 = vpop.f32.mrf.mxu0 }
 0x1f6   : > { %14824 = vst [vmem:[#allocation89_spill] sm:$0xff] %v11735_v0  ;;  %v11753_v0 = vpop.f32.mrf.mxu1 }
 0x1f7   : > { %v11737_v52 = vpop.f32.mrf.mxu0  ;;  %14833 = vst [vmem:[#allocation98_spill] sm:$0xff] %v11753_v0 }
 0x1f8   : > { %14825 = vst [vmem:[#allocation90_spill] sm:$0xff] %v11737_v52  ;;  %v11755_v52 = vshrl.u32 %v2093_v3, 7 }
 0x1f9   : > { %v11739_v14 = vpop.f32.mrf.mxu0 }
 0x1fa   : > { %14826 = vst [vmem:[#allocation91_spill] sm:$0xff] %v11739_v14  ;;  %14834 = vst [vmem:[#allocation99_spill] sm:$0xff] %v11755_v52 }
 0x1fb   : > { %v11741_v29 = vpop.f32.mrf.mxu0 }
 0x1fc   : > { %14827 = vst [vmem:[#allocation92_spill] sm:$0xff] %v11741_v29  ;;  %v11759_v29 = vpop.f32.mrf.mxu1 }
 0x1fd   : > { %v11743_v4 = vpop.f32.mrf.mxu0  ;;  %14836 = vst [vmem:[#allocation101_spill] sm:$0xff] %v11759_v29 }
 0x1fe   : > { %14828 = vst [vmem:[#allocation93_spill] sm:$0xff] %v11743_v4  ;;  %v14663_v4 = vsub.s32 0, %v11755_v52 }
 0x1ff   : > { %v11747_v56 = vpop.f32.mrf.mxu0 }
 0x200   : > { %14830 = vst [vmem:[#allocation95_spill] sm:$0xff] %v11747_v56  ;;  %v14664_v56 = vsub.s32 1, %v11755_v52  ;;  %v11766_v47 = vrot.slane %v754_v1, %v14663_v4 }
 0x201   : > { %v11751_v46 = vpop.f32.mrf.mxu0 }
 0x202   : > { %14832 = vst [vmem:[#allocation97_spill] sm:$0xff] %v11751_v46  ;;  %v11771_v29 = vrot.slane %v754_v1, %v14664_v56 }
 0x203   : > { %v11757_v14 = vpop.f32.mrf.mxu0 }
 0x204   : > { %14835 = vst [vmem:[#allocation100_spill] sm:$0xff] %v11757_v14 }
 0x215   : > { %v1653_v5 = vpop.f32.mrf.mxu1  ;;  %v1897_v50 = vpop.f32.mrf.mxu0 }
 0x216   : > { %v1654_v20 = vadd.f32 %v1653_v5, %v11493_v38 }
 0x217   : > { %v1655_v0 = vpop.f32.mrf.mxu1  ;;  %v1899_v3 = vpop.f32.mrf.mxu0 }
 0x218   : > { %v2036_v46 = vadd.f32 %v1897_v50, %v1654_v20  ;;  %v1656_v14 = vadd.f32 %v1655_v0, %v11499_v48 }
 0x219   : > { %v1657_v45 = vpop.f32.mrf.mxu1  ;;  %v1901_v28 = vpop.f32.mrf.mxu0 }
 0x21a   : > { %v2103_v15 = vadd.f32 %v11766_v47, %v2036_v46  ;;  %v2037_v33 = vadd.f32 %v1899_v3, %v1656_v14  ;;  %v1658_v38 = vadd.f32 %v1657_v45, %v11506_v43 }
 0x21b   : > { %v1659_v5 = vpop.f32.mrf.mxu1  ;;  %v1903_v50 = vpop.f32.mrf.mxu0 }
 0x21c   : > { %v2159_v9 = vmax.f32 %v2103_v15, 0.0  ;;  %v2104_v4 = vadd.f32 %v11771_v29, %v2037_v33  ;;  %v2038_v27 = vadd.f32 %v1901_v28, %v1658_v38  ;;  %v1660_v20 = vadd.f32 %v1659_v5, %v11512_v16 }
 0x21e   : > { %v2160_v48 = vmax.f32 %v2104_v4, 0.0  ;;  %v2105_v0 = vadd.f32 %v11766_v47, %v2038_v27  ;;  %v2273_v1 = vrot.slane %v2159_v9, 7  ;;  %v2039_v56 = vadd.f32 %v1903_v50, %v1660_v20 }
 0x21f   : > { %v1663_v52 = vpop.f32.mrf.mxu1  ;;  %v1907_v40 = vpop.f32.mrf.mxu0  ;;  %v2525_v28 = vrot.slane %v2159_v9, 1 }
 0x220   : > { %v11778_v49 = vmax.f32 %v2105_v0, 0.0  ;;  %v2274_v46 = vrot.slane %v2160_v48, 7  ;;  %v2106_v43 = vadd.f32 %v11771_v29, %v2039_v56  ;;  %v1664_v15 = vadd.f32 %v1663_v52, %v11519_v39 }
 0x221   : > { %v1665_v45 = vpop.f32.mrf.mxu1  ;;  %v1909_v33 = vpop.f32.mrf.mxu0  ;;  %v2439_v27 = vsel %vm783_vm2, 0.0, %v2273_v1  ;;  %v2528_v56 = vrot.slane %v2160_v48, 1 }
 0x222   : > { %v14673_v16 = vrot.slane %v11778_v49, 7  ;;  %v2526_v14 = vrot.slane %v11778_v49, 1  ;;  %v11785_v4 = vmax.f32 %v2106_v43, 0.0  ;;  %v2040_v3 = vadd.f32 %v1907_v40, %v1664_v15 }
 0x223   : > { %v1666_v38 = vadd.f32 %v1665_v45, %v11523_v57  ;;  %v1667_v5 = vpop.f32.mrf.mxu1  ;;  %v1911_v20 = vpop.f32.mrf.mxu0  ;;  %v2440_v0 = vsel %vm783_vm2, 0.0, %v2274_v46  ;;  %v2795_v51 = vpack.c.bf16 %v11778_v49, %v2159_v9 }
 0x224   : > { %v2276_v39 = vsel %vm783_vm2, %v2273_v1, %v14673_v16  ;;  %v2527_v52 = vsel %vm1050_vm1, %v2525_v28, %v2526_v14  ;;  %v1668_v50 = vadd.f32 %v1667_v5, %v11532_v17  ;;  %v2277_v43 = vrot.slane %v11785_v4, 7  ;;  %v10040_v16 = vld [vmem:[#allocation7 + $0x190] ss:$8 sps:$4 sm:$0xff]  }
 0x225   : > { %v2529_v40 = vrot.slane %v11785_v4, 1  ;;  %v1669_v57 = vpop.f32.mrf.mxu1  ;;  %v2107_v15 = vadd.f32 %v11766_v47, %v2040_v3  ;;  %v2041_v45 = vadd.f32 %v1909_v33, %v1666_v38  ;;  %v2443_v1 = vmul.f32 %v2276_v39, %v11323_v18  ;;  %v1913_v28 = vpop.f32.mrf.mxu0 }
 0x226   : > { %v2042_v53 = vadd.f32 %v1911_v20, %v1668_v50  ;;  %v1670_v11 = vadd.f32 %v1669_v57, %v11541_v24  ;;  %v2796_v17 = vpack.c.bf16 %v11785_v4, %v2160_v48  ;;  %v2278_v9 = vsel %vm783_vm2, %v2274_v46, %v2277_v43  ;;  %v10045_v20 = vld [vmem:[#allocation7 + $0x184] ss:$8 sps:$4 sm:$0xff]   ;;  %v10049_v4 = vld [vmem:[#allocation7 + $0x160] ss:$8 sps:$4 sm:$0xff]  }
 0x227   : > { %v1673_v5 = vpop.f32.mrf.mxu1  ;;  %v11807_v26 = vsel %vm1050_vm1, %v2528_v56, %v2529_v40  ;;  %v11809_v33 = vmax.f32 %v2107_v15, 0.0  ;;  %v2108_v24 = vadd.f32 %v11771_v29, %v2041_v45  ;;  %v2441_v48 = vmul.f32 %v2439_v27, %v11314_v59 }
 0x228   : > { %v2109_v3 = vadd.f32 %v11766_v47, %v2042_v53  ;;  %v2043_v38 = vadd.f32 %v1913_v28, %v1670_v11  ;;  %8583 = vmatprep.mubr.msk.bf16.mxu1 %vm2930_vm4, %v2796_v17  ;;  %v2442_v46 = vmul.f32 %v2440_v0, %v11314_v59  ;;  %v2444_v50 = vmul.f32 %v2278_v9, %v11323_v18  ;;  %v10043_v17 = vld [vmem:[#allocation7 + $0x180] ss:$8 sps:$4 sm:$0xff]  }
 0x229   : > { %v1675_v39 = vpop.f32.mrf.mxu1  ;;  %v2531_v56 = vrot.slane %v11809_v33, 1  ;;  %v2164_v57 = vmax.f32 %v2108_v24, 0.0  ;;  %3012 = vmatmul.mubr.bf16.vlgmr.msra.gmra.mxu1 %v2795_v51  ;;  %v11821_v45 = vmul.f32 %v2527_v52, %v11312_v58  ;;  %v2497_v28 = vpack.c.bf16 %v2443_v1, %v2441_v48  ;;  %v10048_v51 = vld [vmem:[#allocation7 + $0x174] ss:$8 sps:$4 sm:$0xff]  }
 0x22a   : > { %v11818_v15 = vmax.f32 %v2109_v3, 0.0  ;;  %v2110_v11 = vadd.f32 %v11771_v29, %v2043_v38  ;;  %v2498_v27 = vpack.c.bf16 %v2444_v50, %v2442_v46  ;;  %3617 = vmatpush1.bf16.msra.mxu1 %v10040_v16  ;;  %v2279_v59 = vrot.slane %v11809_v33, 7 }
 0x22b   : > { %v1677_v53 = vpop.f32.mrf.mxu1  ;;  %v2532_v18 = vsel %vm1050_vm1, %v2526_v14, %v2531_v56  ;;  %v2281_v0 = vrot.slane %v2164_v57, 7  ;;  %v1674_v9 = vadd.f32 %v1673_v5, %v11546_v19  ;;  %3618 = vmatprep.subr.bf16.mxu1 %v10045_v20  ;;  %v2533_v24 = vrot.slane %v2164_v57, 1 }
 0x22c   : > { %v11830_v52 = vmul.f32 %v2532_v18, %v11321_v13  ;;  %v2283_v3 = vrot.slane %v11818_v15, 7  ;;  %v11833_v1 = vmax.f32 %v2110_v11, 0.0  ;;  %8616 = vmatprep.mubr.msk.bf16.mxu0 %vm2930_vm4, %v2498_v27  ;;  %v1676_v38 = vadd.f32 %v1675_v39, %v11556_v44  ;;  %v10046_v11 = vld [vmem:[#allocation7 + $0x170] ss:$8 sps:$4 sm:$0xff]  }
 0x22d   : > { %v1917_v16 = vpop.f32.mrf.mxu0  ;;  %v1678_v14 = vadd.f32 %v1677_v53, %v11561_v8  ;;  %3321 = vmatmul.mubr.bf16.vlgmr.msra.gmra.mxu0 %v2497_v28  ;;  %v1679_v27 = vpop.f32.mrf.mxu1  ;;  %v2797_v8 = vpack.c.bf16 %v11818_v15, %v11809_v33  ;;  %v2282_v39 = vsel %vm783_vm2, %v2277_v43, %v2281_v0  ;;  %v10051_v53 = vld [vmem:[#allocation7 + $0x164] ss:$8 sps:$4 sm:$0xff]   ;;  %v2534_v43 = vsel %vm1050_vm1, %v2529_v40, %v2533_v24 }
 0x22e   : > { %v2044_v48 = vadd.f32 %v1917_v16, %v1674_v9  ;;  %v2285_v5 = vrot.slane %v11833_v1, 7  ;;  %v2537_v20 = vrot.slane %v11833_v1, 1  ;;  %v2798_v50 = vpack.c.bf16 %v11833_v1, %v2164_v57  ;;  %3619 = vmatpush1.bf16.msra.mxu1 %v10043_v17 }
 0x22f   : > { %v1919_v46 = vpop.f32.mrf.mxu0  ;;  %3620 = vmatprep.subr.bf16.mxu1 %v10048_v51  ;;  %v14837_v17 = vrot.slane %v11778_v49, 7  ;;  %v2284_v16 = vsel %vm783_vm2, %v2279_v59, %v2283_v3  ;;  %v1680_v49 = vadd.f32 %v1679_v27, %v11569_v36 }
 0x230   : > { %v2111_v18 = vadd.f32 %v11766_v47, %v2044_v48  ;;  %v2045_v44 = vadd.f32 %v1919_v46, %v1676_v38  ;;  %8584 = vmatprep.mubr.msk.bf16.mxu1 %vm2930_vm4, %v2798_v50  ;;  %v2286_v57 = vsel %vm783_vm2, %v2281_v0, %v2285_v5  ;;  %v11872_v40 = vsel %vm1050_vm1, %v2533_v24, %v2537_v20 }
 0x231   : > { %v1921_v28 = vpop.f32.mrf.mxu0  ;;  %v2280_v9 = vsel %vm783_vm2, %v14837_v17, %v2279_v59  ;;  %3022 = vmatmul.mubr.bf16.gmra.mxu1 %v2797_v8  ;;  %v2448_v0 = vmul.f32 %v2286_v57, %v11333_v34  ;;  %v2446_v17 = vmul.f32 %v2282_v39, %v11348_v42  ;;  %v2447_v59 = vmul.f32 %v2284_v16, %v11333_v34 }
 0x232   : > { %v11862_v51 = vmax.f32 %v2111_v18, 0.0  ;;  %v2112_v38 = vadd.f32 %v11771_v29, %v2045_v44  ;;  %v2046_v48 = vadd.f32 %v1921_v28, %v1678_v14  ;;  %v1683_v46 = vpop.f32.mrf.mxu1  ;;  %3621 = vmatpush1.bf16.msra.mxu1 %v10046_v11  ;;  %v2445_v8 = vmul.f32 %v2280_v9, %v11348_v42 }
 0x233   : > { %v1923_v50 = vpop.f32.mrf.mxu0  ;;  %3622 = vmatprep.subr.bf16.mxu1 %v10051_v53  ;;  %v2500_v39 = vpack.c.bf16 %v2448_v0, %v2446_v17  ;;  %v11880_v34 = vmul.f32 %v2534_v43, %v11321_v13  ;;  %v1684_v24 = vadd.f32 %v1683_v46, %v11574_v62  ;;  %v11887_v16 = vmul.f32 %v11807_v26, %v11312_v58  ;;  %v10054_v43 = vld [vmem:[#allocation7 + $0x154] ss:$8 sps:$4 sm:$0xff]   ;;  %v10052_v46 = vld [vmem:[#allocation7 + $0x150] ss:$8 sps:$4 sm:$0xff]  }
 0x234   : > { %v11874_v18 = vmax.f32 %v2112_v38, 0.0  ;;  %v2113_v14 = vadd.f32 %v11766_v47, %v2046_v48  ;;  %v1685_v44 = vpop.f32.mrf.mxu1  ;;  %v2287_v36 = vrot.slane %v11862_v51, 7  ;;  %v2047_v27 = vadd.f32 %v1923_v50, %v1680_v49 }
 0x235   : > { %v2499_v57 = vpack.c.bf16 %v2447_v59, %v2445_v8  ;;  %v2535_v42 = vrot.slane %v11818_v15, 1  ;;  %v2539_v53 = vrot.slane %v11862_v51, 1  ;;  %8617 = vmatprep.mubr.msk.bf16.mxu0 %vm2930_vm4, %v2500_v39  ;;  %v1686_v58 = vadd.f32 %v1685_v44, %v11580_v6 }
 0x236   : > { %v11882_v11 = vmax.f32 %v2113_v14, 0.0  ;;  %v1687_v28 = vpop.f32.mrf.mxu1  ;;  %v2289_v9 = vrot.slane %v11874_v18, 7  ;;  %v2114_v38 = vadd.f32 %v11771_v29, %v2047_v27  ;;  %3623 = vmatpush1.bf16.msra.mxu1 %v10049_v4  ;;  %v2541_v62 = vrot.slane %v11874_v18, 1 }
 0x237   : > { %v1927_v13 = vpop.f32.mrf.mxu0  ;;  %3331 = vmatmul.mubr.bf16.gmra.mxu0 %v2499_v57  ;;  %v1688_v49 = vadd.f32 %v1687_v28, %v11587_v12  ;;  %v2288_v17 = vsel %vm783_vm2, %v2283_v3, %v2287_v36  ;;  %3624 = vmatprep.subr.bf16.mxu1 %v10054_v43  ;;  %v10057_v28 = vld [vmem:[#allocation7 + $0x144] ss:$8 sps:$4 sm:$0xff]   ;;  %v10055_v43 = vld [vmem:[#allocation7 + $0x140] ss:$8 sps:$4 sm:$0xff]  }
 0x238   : > { %v2291_v48 = vrot.slane %v11882_v11, 7  ;;  %v2048_v26 = vadd.f32 %v1927_v13, %v1684_v24  ;;  %v11897_v0 = vmax.f32 %v2114_v38, 0.0  ;;  %v1689_v14 = vpop.f32.mrf.mxu1  ;;  %v2799_v44 = vpack.c.bf16 %v11882_v11, %v11862_v51 }
 0x239   : > { %v1929_v50 = vpop.f32.mrf.mxu0  ;;  %v2290_v3 = vsel %vm783_vm2, %v2285_v5, %v2289_v9  ;;  %v1690_v5 = vadd.f32 %v1689_v14, %v11591_v61 }
 0x23a   : > { %v2115_v4 = vadd.f32 %v11766_v47, %v2048_v26  ;;  %v2049_v6 = vadd.f32 %v1929_v50, %v1686_v58  ;;  %v2292_v8 = vsel %vm783_vm2, %v2287_v36, %v2291_v48  ;;  %v2293_v12 = vrot.slane %v11897_v0, 7  ;;  %3625 = vmatpush1.bf16.msra.mxu1 %v10052_v46 }
 0x23b   : > { %v1931_v27 = vpop.f32.mrf.mxu0  ;;  %v2800_v39 = vpack.c.bf16 %v11897_v0, %v11874_v18  ;;  %v2451_v24 = vmul.f32 %v2292_v8, %v11357_v63  ;;  %v2542_v58 = vsel %vm1050_vm1, %v2537_v20, %v2541_v62  ;;  %v2543_v26 = vrot.slane %v11882_v11, 1  ;;  %3626 = vmatprep.subr.bf16.mxu1 %v10057_v28 }
 0x23c   : > { %v11916_v57 = vmax.f32 %v2115_v4, 0.0  ;;  %v2116_v38 = vadd.f32 %v11771_v29, %v2049_v6  ;;  %v2050_v13 = vadd.f32 %v1931_v27, %v1688_v49  ;;  %v1693_v36 = vpop.f32.mrf.mxu1  ;;  %v2294_v50 = vsel %vm783_vm2, %v2289_v9, %v2293_v12  ;;  %v10060_v49 = vld [vmem:[#allocation7 + $0x134] ss:$8 sps:$4 sm:$0xff]  }
 0x23d   : > { %8585 = vmatprep.mubr.msk.bf16.mxu1 %vm2930_vm4, %v2800_v39  ;;  %v1933_v46 = vpop.f32.mrf.mxu0  ;;  %v2449_v4 = vmul.f32 %v2288_v17, %v11359_v30  ;;  %v2450_v27 = vmul.f32 %v2290_v3, %v11359_v30  ;;  %v2545_v61 = vrot.slane %v11897_v0, 1  ;;  %v1694_v14 = vadd.f32 %v1693_v36, %v11598_v60  ;;  %v10058_v17 = vld [vmem:[#allocation7 + $0x130] ss:$8 sps:$4 sm:$0xff]   ;;  %v10063_v36 = vld [vmem:[#allocation7 + $0x124] ss:$8 sps:$4 sm:$0xff]  }
 0x23e   : > { %v2295_v6 = vrot.slane %v11916_v57, 7  ;;  %v11930_v8 = vmax.f32 %v2116_v38, 0.0  ;;  %v2117_v1 = vadd.f32 %v11766_v47, %v2050_v13  ;;  %3032 = vmatmul.mubr.bf16.gmra.mxu1 %v2799_v44  ;;  %v1695_v20 = vpop.f32.mrf.mxu1  ;;  %v2051_v39 = vadd.f32 %v1933_v46, %v1690_v5 }
 0x23f   : > { %v2452_v9 = vmul.f32 %v2294_v50, %v11357_v63  ;;  %3627 = vmatpush1.bf16.msra.mxu1 %v10055_v43  ;;  %v2501_v59 = vpack.c.bf16 %v2451_v24, %v2449_v4  ;;  %v2547_v30 = vrot.slane %v11916_v57, 1  ;;  %v1696_v60 = vadd.f32 %v1695_v20, %v11602_v31  ;;  %v10061_v4 = vld [vmem:[#allocation7 + $0x120] ss:$8 sps:$4 sm:$0xff]  }
 0x240   : > { %v2297_v28 = vrot.slane %v11930_v8, 7  ;;  %v11938_v19 = vmax.f32 %v2117_v1, 0.0  ;;  %v1697_v38 = vpop.f32.mrf.mxu1  ;;  %v2296_v44 = vsel %vm783_vm2, %v2291_v48, %v2295_v6  ;;  %3628 = vmatprep.subr.bf16.mxu1 %v10060_v49  ;;  %v2118_v3 = vadd.f32 %v11771_v29, %v2051_v39  ;;  %v10064_v49 = vld [vmem:[#allocation7 + $0x1a4] ss:$8 sps:$4 sm:$0x3f]  }
 0x241   : > { %v2502_v13 = vpack.c.bf16 %v2452_v9, %v2450_v27  ;;  %v1698_v43 = vadd.f32 %v1697_v38, %v11607_v54  ;;  %v11949_v24 = vmul.f32 %v11872_v40, %v11336_v41  ;;  %v2453_v50 = vmul.f32 %v2296_v44, %v11370_v2  ;;  %v10066_v9 = vld [vmem:[#allocation7 + $0x1a0] ss:$8 sps:$4 sm:$0x3f]  }
 0x242   : > { %v2299_v63 = vrot.slane %v11938_v19, 7  ;;  %v1699_v5 = vpop.f32.mrf.mxu1  ;;  %v2298_v46 = vsel %vm783_vm2, %v2293_v12, %v2297_v28  ;;  %v11951_v48 = vmax.f32 %v2118_v3, 0.0  ;;  %v2801_v31 = vpack.c.bf16 %v11938_v19, %v11916_v57 }
 0x243   : > { %8618 = vmatprep.mubr.msk.bf16.mxu0 %vm2930_vm4, %v2502_v13  ;;  %3629 = vmatpush1.bf16.msra.mxu1 %v10058_v17  ;;  %v11958_v54 = vmul.f32 %v2542_v58, %v11346_v25  ;;  %v2549_v12 = vrot.slane %v11930_v8, 1  ;;  %v2536_v1 = vsel %vm1050_vm1, %v2531_v56, %v2535_v42  ;;  %v2540_v58 = vsel %vm1050_vm1, %v2535_v42, %v2539_v53 }
 0x244   : > { %3341 = vmatmul.mubr.bf16.gmra.mxu0 %v2501_v59  ;;  %v2300_v40 = vsel %vm783_vm2, %v2295_v6, %v2299_v63  ;;  %3630 = vmatprep.subr.bf16.mxu1 %v10063_v36  ;;  %v2301_v59 = vrot.slane %v11951_v48, 7  ;;  %v1700_v20 = vadd.f32 %v1699_v5, %v11612_v10  ;;  %v2802_v6 = vpack.c.bf16 %v11951_v48, %v11930_v8  ;;  %v14839_v8 = vld [vmem:[#allocation27_spill] sm:$0xff] }
 0x245   : > { %v1937_v27 = vpop.f32.mrf.mxu0  ;;  %v2454_v39 = vmul.f32 %v2298_v46, %v11370_v2  ;;  %v2455_v56 = vmul.f32 %v2300_v40, %v11391_v22  ;;  %v11983_v15 = vmul.f32 %v2540_v58, %v11346_v25  ;;  %v2551_v42 = vrot.slane %v11938_v19, 1 }
 0x246   : > { %v2052_v33 = vadd.f32 %v1937_v27, %v1694_v14  ;;  %8586 = vmatprep.mubr.msk.bf16.mxu1 %vm2930_vm4, %v2802_v6  ;;  %v2302_v38 = vsel %vm783_vm2, %v2297_v28, %v2301_v59  ;;  %v11991_v2 = vmul.f32 %v2536_v1, %v11336_v41  ;;  %v2546_v25 = vsel %vm1050_vm1, %v2541_v62, %v2545_v61 }
 0x247   : > { %v1939_v10 = vpop.f32.mrf.mxu0  ;;  %3631 = vmatpush1.bf16.msra.mxu1 %v10061_v4  ;;  %v2456_v3 = vmul.f32 %v2302_v38, %v11391_v22  ;;  %v3611_v28 = vsel %vm1373_vm0, %v10066_v9, 0  ;;  %v2553_v13 = vrot.slane %v11951_v48, 1  ;;  %v2550_v18 = vsel %vm1050_vm1, %v2545_v61, %v2549_v12 }
 0x248   : > { %v2119_v14 = vadd.f32 %v11766_v47, %v2052_v33  ;;  %v2053_v44 = vadd.f32 %v1939_v10, %v1696_v60  ;;  %3042 = vmatmul.mubr.bf16.gmra.mxu1 %v2801_v31  ;;  %8648 = vmatprep.subr.msk.bf16.mxu1 %vm1373_vm0, %v10064_v49  ;;  %v2544_v22 = vsel %vm1050_vm1, %v2539_v53, %v2543_v26 }
 0x249   : > { %v1941_v41 = vpop.f32.mrf.mxu0  ;;  %v2504_v31 = vpack.c.bf16 %v2456_v3, %v2454_v39  ;;  %v2503_v40 = vpack.c.bf16 %v2455_v56, %v2453_v50  ;;  %v12019_v0 = vmul.f32 %v2546_v25, %v11372_v7  ;;  %v12022_v61 = vmul.f32 %v2550_v18, %v11379_v37 }
 0x24a   : > { %v12015_v62 = vmax.f32 %v2119_v14, 0.0  ;;  %v2120_v60 = vadd.f32 %v11771_v29, %v2053_v44  ;;  %v2054_v5 = vadd.f32 %v1941_v41, %v1698_v43  ;;  %v1703_v46 = vpop.f32.mrf.mxu1  ;;  %v2548_v51 = vsel %vm1050_vm1, %v2543_v26, %v2547_v30 }
 0x24b   : > { %v1943_v4 = vpop.f32.mrf.mxu0  ;;  %3647 = vmatpush2.bf16.msra.mxu1 %v3611_v28  ;;  %v1704_v50 = vadd.f32 %v1703_v46, %v11618_v35  ;;  %8619 = vmatprep.mubr.msk.bf16.mxu0 %vm2930_vm4, %v2504_v31  ;;  %v12039_v26 = vmul.f32 %v2544_v22, %v11372_v7  ;;  %v12042_v27 = vmul.f32 %v2548_v51, %v11379_v37  ;;  %v14838_v31 = vld [vmem:[#allocation59_spill] sm:$0xff] }
 0x24c   : > { %v2303_v53 = vrot.slane %v12015_v62, 7  ;;  %v12030_v43 = vmax.f32 %v2120_v60, 0.0  ;;  %v2121_v49 = vadd.f32 %v11766_v47, %v2054_v5  ;;  %v1705_v1 = vpop.f32.mrf.mxu1  ;;  %4331 = vmatprep.subr.bf16.mxu1 %v14785_v32  ;;  %v2055_v58 = vadd.f32 %v1943_v4, %v1700_v20  ;;  %3351 = vmatmul.mubr.bf16.gmra.mxu0 %v2503_v40 }
 0x24d   : > { %v2555_v6 = vrot.slane %v12015_v62, 1  ;;  %v1706_v7 = vadd.f32 %v1705_v1, %v11625_v21  ;;  %v2554_v18 = vsel %vm1050_vm1, %v2549_v12, %v2553_v13 }
 0x24e   : > { %v2305_v35 = vrot.slane %v12030_v43, 7  ;;  %v12046_v39 = vmax.f32 %v2121_v49, 0.0  ;;  %v1707_v9 = vpop.f32.mrf.mxu1  ;;  %v2304_v20 = vsel %vm783_vm2, %v2299_v63, %v2303_v53  ;;  %v2557_v33 = vrot.slane %v12030_v43, 1 }
 0x24f   : > { %v2122_v56 = vadd.f32 %v11771_v29, %v2055_v58  ;;  %v1947_v10 = vpop.f32.mrf.mxu0  ;;  %v1708_v25 = vadd.f32 %v1707_v9, %v11630_v23  ;;  %v2457_v3 = vmul.f32 %v2304_v20, %v11410_v55  ;;  %v14840_v58 = vld [vmem:[#allocation60_spill] sm:$0xff] }
 0x250   : > { %v2307_v38 = vrot.slane %v12046_v39, 7  ;;  %v2056_v14 = vadd.f32 %v1947_v10, %v1704_v50  ;;  %v1709_v44 = vpop.f32.mrf.mxu1  ;;  %v2559_v63 = vrot.slane %v12046_v39, 1  ;;  %v2803_v21 = vpack.c.bf16 %v12046_v39, %v12015_v62  ;;  %v14849_v62 = vld [vmem:[#allocation65_spill] sm:$0xff] }
 0x251   : > { %v12060_v28 = vmax.f32 %v2122_v56, 0.0  ;;  %v1949_v41 = vpop.f32.mrf.mxu0  ;;  %v2306_v23 = vsel %vm783_vm2, %v2301_v59, %v2305_v35  ;;  %v1710_v4 = vadd.f32 %v1709_v44, %v14838_v31  ;;  %v2558_v59 = vsel %vm1050_vm1, %v2553_v13, %v2557_v33 }
 0x252   : > { %v2123_v22 = vadd.f32 %v11766_v47, %v2056_v14  ;;  %v2057_v60 = vadd.f32 %v1949_v41, %v1706_v7  ;;  %v2308_v5 = vsel %vm783_vm2, %v2303_v53, %v2307_v38  ;;  %v2458_v7 = vmul.f32 %v2306_v23, %v11410_v55 }
 0x253   : > { %v2309_v46 = vrot.slane %v12060_v28, 7  ;;  %v1951_v40 = vpop.f32.mrf.mxu0  ;;  %v2804_v51 = vpack.c.bf16 %v12060_v28, %v12030_v43  ;;  %v2459_v49 = vmul.f32 %v2308_v5, %v14839_v8  ;;  %v2561_v53 = vrot.slane %v12060_v28, 1  ;;  %v14842_v5 = vld [vmem:[#allocation29_spill] sm:$0xff] }
 0x254   : > { %v12077_v12 = vmax.f32 %v2123_v22, 0.0  ;;  %v2124_v50 = vadd.f32 %v11771_v29, %v2057_v60  ;;  %v2058_v1 = vadd.f32 %v1951_v40, %v1708_v25  ;;  %v1713_v48 = vpop.f32.mrf.mxu1  ;;  %v14841_v22 = vld [vmem:[#allocation28_spill] sm:$0xff]  ;;  %v12095_v31 = vmul.f32 %v2558_v59, %v14842_v5  ;;  %v14845_v59 = vld [vmem:[#allocation33_spill] sm:$0xff] }
 0x255   : > { %v1714_v9 = vadd.f32 %v1713_v48, %v14840_v58  ;;  %8587 = vmatprep.mubr.msk.bf16.mxu1 %vm2930_vm4, %v2804_v51  ;;  %v1953_v20 = vpop.f32.mrf.mxu0  ;;  %v2310_v56 = vsel %vm783_vm2, %v2305_v35, %v2309_v46  ;;  %v2505_v41 = vpack.c.bf16 %v2459_v49, %v2457_v3  ;;  %v12092_v60 = vmul.f32 %v2554_v18, %v14841_v22 }
 0x256   : > { %v2311_v10 = vrot.slane %v12077_v12, 7  ;;  %v2180_v14 = vmax.f32 %v2124_v50, 0.0  ;;  %v2125_v25 = vadd.f32 %v11766_v47, %v2058_v1  ;;  %3052 = vmatmul.mubr.bf16.gmra.mxu1 %v2803_v21  ;;  %v1715_v44 = vpop.f32.mrf.mxu1  ;;  %v2059_v13 = vadd.f32 %v1953_v20, %v1710_v4  ;;  %v14843_v4 = vld [vmem:[#allocation62_spill] sm:$0xff]  ;;  %v14844_v50 = vld [vmem:[#allocation64_spill] sm:$0xff] }
 0x257   : > { %v2460_v28 = vmul.f32 %v2310_v56, %v14839_v8  ;;  %v2563_v35 = vrot.slane %v12077_v12, 1  ;;  %v1716_v49 = vadd.f32 %v1715_v44, %v14843_v4  ;;  %v2556_v44 = vsel %vm1050_vm1, %v2551_v42, %v2555_v6  ;;  %v14847_v4 = vld [vmem:[#allocation31_spill] sm:$0xff] }
 0x258   : > { %v2313_v55 = vrot.slane %v2180_v14, 7  ;;  %v12098_v23 = vmax.f32 %v2125_v25, 0.0  ;;  %v1717_v40 = vpop.f32.mrf.mxu1  ;;  %v2312_v51 = vsel %vm783_vm2, %v2307_v38, %v2311_v10  ;;  %v2565_v21 = vrot.slane %v2180_v14, 1 }
 0x259   : > { %v2126_v3 = vadd.f32 %v11771_v29, %v2059_v13  ;;  %v2506_v8 = vpack.c.bf16 %v2460_v28, %v2458_v7  ;;  %v1718_v1 = vadd.f32 %v1717_v40, %v14844_v50  ;;  %v2461_v58 = vmul.f32 %v2312_v51, %v14845_v59 }
 0x25a   : > { %v2315_v18 = vrot.slane %v12098_v23, 7  ;;  %v2314_v48 = vsel %vm783_vm2, %v2309_v46, %v2313_v55  ;;  %v2567_v20 = vrot.slane %v12098_v23, 1  ;;  %v2805_v38 = vpack.c.bf16 %v12098_v23, %v12077_v12  ;;  %v1719_v50 = vpop.f32.mrf.mxu1 }
 0x25b   : > { %v12108_v56 = vmax.f32 %v2126_v3, 0.0  ;;  %8620 = vmatprep.mubr.msk.bf16.mxu0 %vm2930_vm4, %v2506_v8  ;;  %v2552_v46 = vsel %vm1050_vm1, %v2547_v30, %v2551_v42  ;;  %v2462_v57 = vmul.f32 %v2314_v48, %v14845_v59  ;;  %v12139_v19 = vmul.f32 %v2556_v44, %v14842_v5  ;;  %v14846_v3 = vld [vmem:[#allocation34_spill] sm:$0xff] }
 0x25c   : > { %3361 = vmatmul.mubr.bf16.gmra.mxu0 %v2505_v41  ;;  %v2316_v25 = vsel %vm783_vm2, %v2311_v10, %v2315_v18  ;;  %v2562_v41 = vsel %vm1050_vm1, %v2557_v33, %v2561_v53  ;;  %v12136_v51 = vmul.f32 %v2552_v46, %v14841_v22  ;;  %v2566_v42 = vsel %vm1050_vm1, %v2561_v53, %v2565_v21 }
 0x25d   : > { %v2317_v13 = vrot.slane %v12108_v56, 7  ;;  %v2569_v10 = vrot.slane %v12108_v56, 1  ;;  %v1957_v28 = vpop.f32.mrf.mxu0  ;;  %v2806_v40 = vpack.c.bf16 %v12108_v56, %v2180_v14  ;;  %v2463_v14 = vmul.f32 %v2316_v25, %v14846_v3  ;;  %v14856_v56 = vld [vmem:[#allocation35_spill] sm:$0xff] }
 0x25e   : > { %v2060_v30 = vadd.f32 %v1957_v28, %v1714_v9  ;;  %v12148_v8 = vmul.f32 %v2562_v41, %v14847_v4  ;;  %v14848_v9 = vld [vmem:[#allocation32_spill] sm:$0xff]  ;;  %v2560_v25 = vsel %vm1050_vm1, %v2555_v6, %v2559_v63 }
 0x25f   : > { %8588 = vmatprep.mubr.msk.bf16.mxu1 %vm2930_vm4, %v2806_v40  ;;  %v1959_v43 = vpop.f32.mrf.mxu0  ;;  %v2318_v33 = vsel %vm783_vm2, %v2313_v55, %v2317_v13  ;;  %v12151_v22 = vmul.f32 %v2566_v42, %v14848_v9  ;;  %v1720_v42 = vadd.f32 %v1719_v50, %v14849_v62  ;;  %v14850_v50 = vld [vmem:[#allocation67_spill] sm:$0xff] }
 0x260   : > { %v2127_v5 = vadd.f32 %v11766_v47, %v2060_v30  ;;  %v2061_v48 = vadd.f32 %v1959_v43, %v1716_v49  ;;  %3062 = vmatmul.mubr.bf16.gmra.mxu1 %v2805_v38  ;;  %v2464_v53 = vmul.f32 %v2318_v33, %v14846_v3  ;;  %v2564_v49 = vsel %vm1050_vm1, %v2559_v63, %v2563_v35 }
 0x261   : > { %v1961_v46 = vpop.f32.mrf.mxu0  ;;  %v2570_v38 = vsel %vm1050_vm1, %v2565_v21, %v2569_v10  ;;  %v2507_v43 = vpack.c.bf16 %v2463_v14, %v2461_v58  ;;  %v12177_v33 = vmul.f32 %v2560_v25, %v14847_v4  ;;  %v12180_v39 = vmul.f32 %v2564_v49, %v14848_v9 }
 0x262   : > { %v12172_v44 = vmax.f32 %v2127_v5, 0.0  ;;  %v2128_v41 = vadd.f32 %v11771_v29, %v2061_v48  ;;  %v2062_v28 = vadd.f32 %v1961_v46, %v1718_v1  ;;  %v1723_v40 = vpop.f32.mrf.mxu1  ;;  %v2508_v30 = vpack.c.bf16 %v2464_v53, %v2462_v57 }
 0x263   : > { %v1963_v6 = vpop.f32.mrf.mxu0  ;;  %v1724_v5 = vadd.f32 %v1723_v40, %v14850_v50  ;;  %v2568_v4 = vsel %vm1050_vm1, %v2563_v35, %v2567_v20 }
 0x264   : > { %v2319_v63 = vrot.slane %v12172_v44, 7  ;;  %v14674_v21 = vrot.slane %v12172_v44, 1  ;;  %v12184_v3 = vmax.f32 %v2128_v41, 0.0  ;;  %v2129_v1 = vadd.f32 %v11766_v47, %v2062_v28  ;;  %8621 = vmatprep.mubr.msk.bf16.mxu0 %vm2930_vm4, %v2508_v30  ;;  %v1725_v57 = vpop.f32.mrf.mxu1  ;;  %v14851_v28 = vld [vmem:[#allocation30_spill] sm:$0xff]  ;;  %v14852_v30 = vld [vmem:[#allocation68_spill] sm:$0xff] }
 0x265   : > { %v2063_v58 = vadd.f32 %v1963_v6, %v1720_v42  ;;  %3371 = vmatmul.mubr.bf16.gmra.mxu0 %v2507_v43  ;;  %v12205_v40 = vmul.f32 %v2570_v38, %v14851_v28  ;;  %v1726_v62 = vadd.f32 %v1725_v57, %v14852_v30  ;;  %v14853_v42 = vld [vmem:[#allocation70_spill] sm:$0xff]  ;;  %v14855_v30 = vld [vmem:[#allocation36_spill] sm:$0xff] }
 0x266   : > { %v2321_v9 = vrot.slane %v12184_v3, 7  ;;  %v2573_v48 = vrot.slane %v12184_v3, 1  ;;  %v12198_v53 = vmax.f32 %v2129_v1, 0.0  ;;  %v1727_v46 = vpop.f32.mrf.mxu1  ;;  %v2320_v25 = vsel %vm783_vm2, %v2315_v18, %v2319_v63 }
 0x267   : > { %v2130_v49 = vadd.f32 %v11771_v29, %v2063_v58  ;;  %v1967_v41 = vpop.f32.mrf.mxu0  ;;  %v2572_v12 = vsel %vm1050_vm1, %v2567_v20, %v14674_v21  ;;  %v1728_v6 = vadd.f32 %v1727_v46, %v14853_v42  ;;  %v14854_v58 = vld [vmem:[#allocation37_spill] sm:$0xff] }
 0x268   : > { %v2323_v35 = vrot.slane %v12198_v53, 7  ;;  %v2064_v43 = vadd.f32 %v1967_v41, %v1724_v5  ;;  %v2575_v18 = vrot.slane %v12198_v53, 1  ;;  %v2465_v38 = vmul.f32 %v2320_v25, %v14854_v58  ;;  %v1729_v14 = vpop.f32.mrf.mxu1 }
 0x269   : > { %v2186_v1 = vmax.f32 %v2130_v49, 0.0  ;;  %v1969_v50 = vpop.f32.mrf.mxu0  ;;  %v2574_v23 = vsel %vm1050_vm1, %v2569_v10, %v2573_v48  ;;  %v2322_v57 = vsel %vm783_vm2, %v2317_v13, %v2321_v9  ;;  %v2807_v41 = vpack.c.bf16 %v12198_v53, %v12172_v44 }
 0x26a   : > { %v2131_v20 = vadd.f32 %v11766_v47, %v2064_v43  ;;  %v2065_v55 = vadd.f32 %v1969_v50, %v1726_v62  ;;  %v2324_v5 = vsel %vm783_vm2, %v2319_v63, %v2323_v35  ;;  %v12235_v59 = vmul.f32 %v2574_v23, %v14856_v56  ;;  %v14857_v63 = vld [vmem:[#allocation71_spill] sm:$0xff] }
 0x26b   : > { %v2325_v46 = vrot.slane %v2186_v1, 7  ;;  %v1971_v49 = vpop.f32.mrf.mxu0  ;;  %v2808_v25 = vpack.c.bf16 %v2186_v1, %v12184_v3  ;;  %v2467_v42 = vmul.f32 %v2324_v5, %v14855_v30  ;;  %v2577_v13 = vrot.slane %v2186_v1, 1 }
 0x26c   : > { %v12231_v10 = vmax.f32 %v2131_v20, 0.0  ;;  %v2132_v43 = vadd.f32 %v11771_v29, %v2065_v55  ;;  %v2066_v62 = vadd.f32 %v1971_v49, %v1728_v6  ;;  %v1733_v50 = vpop.f32.mrf.mxu1  ;;  %v1730_v7 = vadd.f32 %v1729_v14, %v14857_v63  ;;  %v14858_v6 = vld [vmem:[#allocation73_spill] sm:$0xff] }
 0x26d   : > { %8589 = vmatprep.mubr.msk.bf16.mxu1 %vm2930_vm4, %v2808_v25  ;;  %v1973_v37 = vpop.f32.mrf.mxu0  ;;  %v2326_v11 = vsel %vm783_vm2, %v2321_v9, %v2325_v46  ;;  %v2466_v36 = vmul.f32 %v2322_v57, %v14854_v58  ;;  %v1734_v49 = vadd.f32 %v1733_v50, %v14858_v6  ;;  %v2509_v14 = vpack.c.bf16 %v2467_v42, %v2465_v38  ;;  %v14861_v50 = vld [vmem:[#allocation38_spill] sm:$0xff] }
 0x26e   : > { %v2327_v20 = vrot.slane %v12231_v10, 7  ;;  %v2188_v5 = vmax.f32 %v2132_v43, 0.0  ;;  %v2133_v55 = vadd.f32 %v11766_v47, %v2066_v62  ;;  %3072 = vmatmul.mubr.bf16.gmra.mxu1 %v2807_v41  ;;  %v1735_v23 = vpop.f32.mrf.mxu1  ;;  %v2067_v17 = vadd.f32 %v1973_v37, %v1730_v7  ;;  %v14859_v7 = vld [vmem:[#allocation75_spill] sm:$0xff] }
 0x26f   : > { %v2468_v1 = vmul.f32 %v2326_v11, %v14855_v30  ;;  %v2579_v43 = vrot.slane %v12231_v10, 1  ;;  %v12253_v37 = vmul.f32 %v2568_v4, %v14851_v28  ;;  %v1736_v38 = vadd.f32 %v1735_v23, %v14859_v7  ;;  %v14860_v30 = vld [vmem:[#allocation76_spill] sm:$0xff] }
 0x270   : > { %v2329_v63 = vrot.slane %v2188_v5, 7  ;;  %v2581_v9 = vrot.slane %v2188_v5, 1  ;;  %v12247_v21 = vmax.f32 %v2133_v55, 0.0  ;;  %v1737_v58 = vpop.f32.mrf.mxu1  ;;  %v2328_v57 = vsel %vm783_vm2, %v2323_v35, %v2327_v20 }
 0x271   : > { %v2134_v62 = vadd.f32 %v11771_v29, %v2067_v17  ;;  %v2510_v41 = vpack.c.bf16 %v2468_v1, %v2466_v36  ;;  %v1738_v42 = vadd.f32 %v1737_v58, %v14860_v30  ;;  %v2469_v55 = vmul.f32 %v2328_v57, %v14861_v50 }
 0x272   : > { %v2331_v11 = vrot.slane %v12247_v21, 7  ;;  %v2583_v6 = vrot.slane %v12247_v21, 1  ;;  %v2330_v17 = vsel %vm783_vm2, %v2325_v46, %v2329_v63  ;;  %v12265_v36 = vmul.f32 %v2572_v12, %v14856_v56  ;;  %v1739_v30 = vpop.f32.mrf.mxu1 }
 0x273   : > { %v12260_v25 = vmax.f32 %v2134_v62, 0.0  ;;  %8622 = vmatprep.mubr.msk.bf16.mxu0 %vm2930_vm4, %v2510_v41  ;;  %v2578_v28 = vsel %vm1050_vm1, %v2573_v48, %v2577_v13  ;;  %v2582_v35 = vsel %vm1050_vm1, %v2577_v13, %v2581_v9  ;;  %v14862_v23 = vrot.slane %v12172_v44, 1  ;;  %v14863_v13 = vld [vmem:[#allocation39_spill] sm:$0xff]  ;;  %v14865_v44 = vld [vmem:[#allocation40_spill] sm:$0xff]  ;;  %v14877_v48 = vld [vmem:[#allocation45_spill] sm:$0xff] }
 0x274   : > { %3381 = vmatmul.mubr.bf16.gmra.mxu0 %v2509_v14  ;;  %v2332_v4 = vsel %vm783_vm2, %v2327_v20, %v2331_v11  ;;  %v2809_v3 = vpack.c.bf16 %v12247_v21, %v12231_v10  ;;  %v12287_v58 = vmul.f32 %v2578_v28, %v14863_v13  ;;  %v12290_v57 = vmul.f32 %v2582_v35, %v14865_v44  ;;  %v14867_v10 = vld [vmem:[#allocation42_spill] sm:$0xff] }
 0x275   : > { %v2576_v46 = vsel %vm1050_vm1, %v14862_v23, %v2575_v18  ;;  %v14675_v12 = vrot.slane %v12260_v25, 7  ;;  %v2585_v56 = vrot.slane %v12260_v25, 1  ;;  %v1977_v1 = vpop.f32.mrf.mxu0  ;;  %v2810_v14 = vpack.c.bf16 %v12260_v25, %v2188_v5 }
 0x276   : > { %v2068_v20 = vadd.f32 %v1977_v1, %v1734_v49  ;;  %14864 = vst [vmem:[#allocation59_spill] sm:$0xff] %v12287_v58  ;;  %14866 = vst [vmem:[#allocation27_spill] sm:$0xff] %v12290_v57  ;;  %v2470_v41 = vmul.f32 %v2330_v17, %v14861_v50  ;;  %v2471_v49 = vmul.f32 %v2332_v4, %v14867_v10 }
 0x277   : > { %8590 = vmatprep.mubr.msk.bf16.mxu1 %vm2930_vm4, %v2810_v14  ;;  %v1979_v62 = vpop.f32.mrf.mxu0  ;;  %v2334_v5 = vsel %vm783_vm2, %v2329_v63, %v14675_v12  ;;  %v2580_v7 = vsel %vm1050_vm1, %v2575_v18, %v2579_v43  ;;  %v12306_v63 = vmul.f32 %v2576_v46, %v14863_v13  ;;  %v2586_v53 = vsel %vm1050_vm1, %v2581_v9, %v2585_v56 }
 0x278   : > { %v2135_v28 = vadd.f32 %v11766_v47, %v2068_v20  ;;  %v2069_v35 = vadd.f32 %v1979_v62, %v1736_v38  ;;  %3082 = vmatmul.mubr.bf16.gmra.mxu1 %v2809_v3  ;;  %v2472_v23 = vmul.f32 %v2334_v5, %v14867_v10  ;;  %v12309_v50 = vmul.f32 %v2580_v7, %v14865_v44  ;;  %v14870_v62 = vld [vmem:[#allocation79_spill] sm:$0xff] }
 0x279   : > { %v1981_v14 = vpop.f32.mrf.mxu0  ;;  %14868 = vst [vmem:[#allocation60_spill] sm:$0xff] %v12306_v63  ;;  %v2584_v18 = vsel %vm1050_vm1, %v2579_v43, %v2583_v6  ;;  %v1740_v5 = vadd.f32 %v1739_v30, %v14870_v62  ;;  %v2511_v13 = vpack.c.bf16 %v2471_v49, %v2469_v55 }
 0x27a   : > { %14869 = vst [vmem:[#allocation28_spill] sm:$0xff] %v12309_v50  ;;  %v12315_v38 = vmax.f32 %v2135_v28, 0.0  ;;  %v2136_v17 = vadd.f32 %v11771_v29, %v2069_v35  ;;  %v2070_v4 = vadd.f32 %v1981_v14, %v1738_v42  ;;  %v1743_v3 = vpop.f32.mrf.mxu1  ;;  %v2512_v20 = vpack.c.bf16 %v2472_v23, %v2470_v41  ;;  %v14871_v28 = vld [vmem:[#allocation80_spill] sm:$0xff] }
 0x27b   : > { %v1983_v46 = vpop.f32.mrf.mxu0  ;;  %v1744_v41 = vadd.f32 %v1743_v3, %v14871_v28 }
 0x27c   : > { %v2335_v9 = vrot.slane %v12315_v38, 7  ;;  %v14676_v10 = vrot.slane %v12315_v38, 1  ;;  %v12323_v7 = vmax.f32 %v2136_v17, 0.0  ;;  %v2137_v43 = vadd.f32 %v11766_v47, %v2070_v4  ;;  %8623 = vmatprep.mubr.msk.bf16.mxu0 %vm2930_vm4, %v2512_v20  ;;  %v1745_v42 = vpop.f32.mrf.mxu1  ;;  %v14872_v20 = vld [vmem:[#allocation43_spill] sm:$0xff] }
 0x27d   : > { %v2071_v35 = vadd.f32 %v1983_v46, %v1740_v5  ;;  %3391 = vmatmul.mubr.bf16.gmra.mxu0 %v2511_v13  ;;  %v12337_v62 = vmul.f32 %v2586_v53, %v14872_v20  ;;  %v12345_v5 = vmul.f32 %v2584_v18, %v14872_v20  ;;  %v14875_v13 = vld [vmem:[#allocation82_spill] sm:$0xff] }
 0x27e   : > { %v2337_v55 = vrot.slane %v12323_v7, 7  ;;  %v14677_v49 = vrot.slane %v12323_v7, 1  ;;  %v12330_v30 = vmax.f32 %v2137_v43, 0.0  ;;  %v1747_v23 = vpop.f32.mrf.mxu1  ;;  %v2336_v14 = vsel %vm783_vm2, %v2331_v11, %v2335_v9  ;;  %v14876_v11 = vld [vmem:[#allocation83_spill] sm:$0xff] }
 0x27f   : > { %v2138_v17 = vadd.f32 %v11771_v29, %v2071_v35  ;;  %v1987_v4 = vpop.f32.mrf.mxu0  ;;  %14873 = vst [vmem:[#allocation29_spill] sm:$0xff] %v12337_v62  ;;  %v2588_v3 = vsel %vm1050_vm1, %v2583_v6, %v14676_v10  ;;  %14874 = vst [vmem:[#allocation62_spill] sm:$0xff] %v12345_v5  ;;  %v1746_v43 = vadd.f32 %v1745_v42, %v14875_v13  ;;  %v14878_v10 = vrot.slane %v12260_v25, 7  ;;  %v14879_v13 = vld [vmem:[#allocation41_spill] sm:$0xff]  ;;  %v14880_v25 = vld [vmem:[#allocation44_spill] sm:$0xff] }
 0x280   : > { %v2339_v46 = vrot.slane %v12330_v30, 7  ;;  %v1748_v28 = vadd.f32 %v1747_v23, %v14876_v11  ;;  %v2072_v35 = vadd.f32 %v1987_v4, %v1744_v41  ;;  %v2473_v12 = vmul.f32 %v2336_v14, %v14877_v48  ;;  %v1749_v18 = vpop.f32.mrf.mxu1 }
 0x281   : > { %v2194_v53 = vmax.f32 %v2138_v17, 0.0  ;;  %v1989_v1 = vpop.f32.mrf.mxu0  ;;  %v2590_v21 = vsel %vm1050_vm1, %v2585_v56, %v14677_v49  ;;  %v2338_v42 = vsel %vm783_vm2, %v14878_v10, %v2337_v55  ;;  %v2811_v14 = vpack.c.bf16 %v12330_v30, %v12315_v38 }
 0x282   : > { %v2139_v6 = vadd.f32 %v11766_v47, %v2072_v35  ;;  %v2073_v20 = vadd.f32 %v1989_v1, %v1746_v43  ;;  %v2340_v41 = vsel %vm783_vm2, %v2335_v9, %v2339_v46  ;;  %v12368_v44 = vmul.f32 %v2590_v21, %v14880_v25  ;;  %v14882_v9 = vld [vmem:[#allocation84_spill] sm:$0xff] }
 0x283   : > { %v2341_v23 = vrot.slane %v2194_v53, 7  ;;  %v1991_v4 = vpop.f32.mrf.mxu0  ;;  %v2812_v17 = vpack.c.bf16 %v2194_v53, %v12323_v7  ;;  %v2475_v11 = vmul.f32 %v2340_v41, %v14879_v13  ;;  %v2593_v10 = vrot.slane %v2194_v53, 1 }
 0x284   : > { %v12364_v56 = vmax.f32 %v2139_v6, 0.0  ;;  %v2140_v35 = vadd.f32 %v11771_v29, %v2073_v20  ;;  %v2074_v1 = vadd.f32 %v1991_v4, %v1748_v28  ;;  %v1753_v43 = vpop.f32.mrf.mxu1  ;;  %14881 = vst [vmem:[#allocation64_spill] sm:$0xff] %v12368_v44  ;;  %v1750_v49 = vadd.f32 %v1749_v18, %v14882_v9  ;;  %v14883_v28 = vld [vmem:[#allocation85_spill] sm:$0xff] }
 0x285   : > { %8591 = vmatprep.mubr.msk.bf16.mxu1 %vm2930_vm4, %v2812_v17  ;;  %v1993_v63 = vpop.f32.mrf.mxu0  ;;  %v2342_v50 = vsel %vm783_vm2, %v2337_v55, %v2341_v23  ;;  %v2474_v58 = vmul.f32 %v2338_v42, %v14877_v48  ;;  %v1754_v4 = vadd.f32 %v1753_v43, %v14883_v28  ;;  %v12381_v17 = vmul.f32 %v2588_v3, %v14880_v25  ;;  %v14885_v43 = vld [vmem:[#allocation86_spill] sm:$0xff] }
 0x286   : > { %v2343_v6 = vrot.slane %v12364_v56, 7  ;;  %v2196_v41 = vmax.f32 %v2140_v35, 0.0  ;;  %v2141_v20 = vadd.f32 %v11766_v47, %v2074_v1  ;;  %3092 = vmatmul.mubr.bf16.gmra.mxu1 %v2811_v14  ;;  %v1755_v21 = vpop.f32.mrf.mxu1  ;;  %v2075_v57 = vadd.f32 %v1993_v63, %v1750_v49 }
 0x287   : > { %v2476_v53 = vmul.f32 %v2342_v50, %v14879_v13  ;;  %14884 = vst [vmem:[#allocation33_spill] sm:$0xff] %v12381_v17  ;;  %v2513_v9 = vpack.c.bf16 %v2475_v11, %v2473_v12  ;;  %v2595_v1 = vrot.slane %v12364_v56, 1  ;;  %v1756_v63 = vadd.f32 %v1755_v21, %v14885_v43  ;;  %v14886_v13 = vld [vmem:[#allocation87_spill] sm:$0xff] }
 0x288   : > { %v2345_v55 = vrot.slane %v2196_v41, 7  ;;  %v2597_v48 = vrot.slane %v2196_v41, 1  ;;  %v12383_v42 = vmax.f32 %v2141_v20, 0.0  ;;  %v1757_v35 = vpop.f32.mrf.mxu1  ;;  %v2142_v14 = vadd.f32 %v11771_v29, %v2075_v57 }
 0x289   : > { %v2514_v49 = vpack.c.bf16 %v2476_v53, %v2474_v58  ;;  %v1758_v28 = vadd.f32 %v1757_v35, %v14886_v13  ;;  %v2344_v25 = vsel %vm783_vm2, %v2339_v46, %v2343_v6  ;;  %v14887_v11 = vrot.slane %v12323_v7, 1  ;;  %v14896_v58 = vld [vmem:[#allocation50_spill] sm:$0xff] }
 0x28a   : > { %v2347_v50 = vrot.slane %v12383_v42, 7  ;;  %v2346_v3 = vsel %vm783_vm2, %v2341_v23, %v2345_v55  ;;  %v2599_v20 = vrot.slane %v12383_v42, 1  ;;  %v12393_v18 = vmax.f32 %v2142_v14, 0.0 }
 0x28b   : > { %8624 = vmatprep.mubr.msk.bf16.mxu0 %vm2930_vm4, %v2514_v49  ;;  %v2813_v12 = vpack.c.bf16 %v12383_v42, %v12364_v56  ;;  %v2594_v23 = vsel %vm1050_vm1, %v14887_v11, %v2593_v10  ;;  %v2598_v46 = vsel %vm1050_vm1, %v2593_v10, %v2597_v48  ;;  %v14888_v21 = vrot.slane %v12330_v30, 1  ;;  %v14891_v49 = vld [vmem:[#allocation47_spill] sm:$0xff]  ;;  %v14893_v10 = vld [vmem:[#allocation48_spill] sm:$0xff] }
 0x28c   : > { %3401 = vmatmul.mubr.bf16.gmra.mxu0 %v2513_v9  ;;  %v2348_v57 = vsel %vm783_vm2, %v2343_v6, %v2347_v50  ;;  %v14889_v53 = vrot.slane %v12315_v38, 1  ;;  %v14683_v56 = vrot.slane %v12393_v18, 7  ;;  %v2601_v42 = vrot.slane %v12393_v18, 1  ;;  %v14890_v6 = vld [vmem:[#allocation49_spill] sm:$0xff] }
 0x28d   : > { %v1997_v14 = vpop.f32.mrf.mxu0  ;;  %v2814_v9 = vpack.c.bf16 %v12393_v18, %v2196_v41  ;;  %v2478_v43 = vmul.f32 %v2346_v3, %v14890_v6  ;;  %v12415_v13 = vmul.f32 %v2594_v23, %v14891_v49  ;;  %v12418_v11 = vmul.f32 %v2598_v46, %v14893_v10  ;;  %v1759_v46 = vpop.f32.mrf.mxu1 }
 0x28e   : > { %v2592_v35 = vsel %vm1050_vm1, %v14889_v53, %v14888_v21  ;;  %v2076_v7 = vadd.f32 %v1997_v14, %v1754_v4  ;;  %v14895_v38 = vmov %v14888_v21  ;;  %v2350_v41 = vsel %vm783_vm2, %v2345_v55, %v14683_v56 }
 0x28f   : > { %14892 = vst [vmem:[#allocation34_spill] sm:$0xff] %v12415_v13  ;;  %14894 = vst [vmem:[#allocation31_spill] sm:$0xff] %v12418_v11  ;;  %v2596_v21 = vsel %vm1050_vm1, %v14895_v38, %v2595_v1  ;;  %8592 = vmatprep.mubr.msk.bf16.mxu1 %vm2930_vm4, %v2814_v9  ;;  %v1999_v53 = vpop.f32.mrf.mxu0  ;;  %v2479_v3 = vmul.f32 %v2348_v57, %v14896_v58  ;;  %v12429_v4 = vmul.f32 %v2592_v35, %v14891_v49 }
 0x290   : > { %v12432_v23 = vmul.f32 %v2596_v21, %v14893_v10  ;;  %v2143_v30 = vadd.f32 %v11766_v47, %v2076_v7  ;;  %v2077_v14 = vadd.f32 %v1999_v53, %v1756_v63  ;;  %3102 = vmatmul.mubr.bf16.gmra.mxu1 %v2813_v12  ;;  %v2480_v9 = vmul.f32 %v2350_v41, %v14896_v58  ;;  %v14899_v21 = vld [vmem:[#allocation88_spill] sm:$0xff] }
 0x291   : > { %14897 = vst [vmem:[#allocation32_spill] sm:$0xff] %v12429_v4  ;;  %v2001_v5 = vpop.f32.mrf.mxu0  ;;  %v2477_v55 = vmul.f32 %v2344_v25, %v14890_v6  ;;  %v2602_v35 = vsel %vm1050_vm1, %v2597_v48, %v2601_v42  ;;  %v2600_v49 = vsel %vm1050_vm1, %v2595_v1, %v2599_v20  ;;  %v1760_v53 = vadd.f32 %v1759_v46, %v14899_v21 }
 0x292   : > { %14898 = vst [vmem:[#allocation65_spill] sm:$0xff] %v12432_v23  ;;  %v12443_v10 = vmax.f32 %v2143_v30, 0.0  ;;  %v2144_v63 = vadd.f32 %v11771_v29, %v2077_v14  ;;  %v2078_v12 = vadd.f32 %v2001_v5, %v1758_v28  ;;  %v1763_v7 = vpop.f32.mrf.mxu1  ;;  %v2516_v58 = vpack.c.bf16 %v2480_v9, %v2478_v43  ;;  %v14900_v30 = vld [vmem:[#allocation89_spill] sm:$0xff] }
 0x293   : > { %v2003_v41 = vpop.f32.mrf.mxu0  ;;  %v2515_v38 = vpack.c.bf16 %v2479_v3, %v2477_v55  ;;  %v1764_v14 = vadd.f32 %v1763_v7, %v14900_v30  ;;  %v14908_v13 = vrot.slane %v12393_v18, 7  ;;  %v14910_v18 = vld [vmem:[#allocation51_spill] sm:$0xff] }
 0x294   : > { %v2351_v25 = vrot.slane %v12443_v10, 7  ;;  %v14686_v6 = vrot.slane %v12443_v10, 1  ;;  %v12449_v57 = vmax.f32 %v2144_v63, 0.0  ;;  %v2145_v48 = vadd.f32 %v11766_v47, %v2078_v12  ;;  %8625 = vmatprep.mubr.msk.bf16.mxu0 %vm2930_vm4, %v2516_v58  ;;  %v1765_v1 = vpop.f32.mrf.mxu1  ;;  %v14901_v12 = vld [vmem:[#allocation46_spill] sm:$0xff] }
 0x295   : > { %v2079_v5 = vadd.f32 %v2003_v41, %v1760_v53  ;;  %3411 = vmatmul.mubr.bf16.gmra.mxu0 %v2515_v38  ;;  %v12461_v21 = vmul.f32 %v2602_v35, %v14901_v12  ;;  %v12467_v38 = vmul.f32 %v2600_v49, %v14901_v12  ;;  %v14904_v53 = vld [vmem:[#allocation90_spill] sm:$0xff]  ;;  %v14906_v35 = vld [vmem:[#allocation53_spill] sm:$0xff] }
 0x296   : > { %v2353_v28 = vrot.slane %v12449_v57, 7  ;;  %v12456_v3 = vmax.f32 %v2145_v48, 0.0  ;;  %v1767_v46 = vpop.f32.mrf.mxu1  ;;  %v2352_v9 = vsel %vm783_vm2, %v2347_v50, %v2351_v25  ;;  %v2604_v7 = vsel %vm1050_vm1, %v2599_v20, %v14686_v6  ;;  %v14905_v48 = vld [vmem:[#allocation91_spill] sm:$0xff] }
 0x297   : > { %v2146_v55 = vadd.f32 %v11771_v29, %v2079_v5  ;;  %v2007_v63 = vpop.f32.mrf.mxu0  ;;  %14902 = vst [vmem:[#allocation67_spill] sm:$0xff] %v12461_v21  ;;  %14903 = vst [vmem:[#allocation30_spill] sm:$0xff] %v12467_v38  ;;  %v1766_v41 = vadd.f32 %v1765_v1, %v14904_v53  ;;  %v1768_v30 = vadd.f32 %v1767_v46, %v14905_v48  ;;  %v14907_v23 = vrot.slane %v12449_v57, 1  ;;  %v14909_v53 = vld [vmem:[#allocation52_spill] sm:$0xff] }
 0x298   : > { %v2355_v58 = vrot.slane %v12456_v3, 7  ;;  %v2080_v50 = vadd.f32 %v2007_v63, %v1764_v14  ;;  %v2481_v4 = vmul.f32 %v2352_v9, %v14906_v35  ;;  %v1769_v12 = vpop.f32.mrf.mxu1  ;;  %v2354_v1 = vsel %vm783_vm2, %v14908_v13, %v2353_v28 }
 0x299   : > { %v2202_v56 = vmax.f32 %v2146_v55, 0.0  ;;  %v2009_v43 = vpop.f32.mrf.mxu0  ;;  %v2606_v20 = vsel %vm1050_vm1, %v2601_v42, %v14907_v23  ;;  %v2815_v9 = vpack.c.bf16 %v12456_v3, %v12443_v10  ;;  %v2482_v62 = vmul.f32 %v2354_v1, %v14906_v35 }
 0x29a   : > { %v2147_v49 = vadd.f32 %v11766_v47, %v2080_v50  ;;  %v2081_v6 = vadd.f32 %v2009_v43, %v1766_v41  ;;  %v2356_v14 = vsel %vm783_vm2, %v2351_v25, %v2355_v58  ;;  %v12490_v50 = vmul.f32 %v2606_v20, %v14910_v18  ;;  %v14912_v25 = vld [vmem:[#allocation92_spill] sm:$0xff] }
 0x29b   : > { %v2357_v46 = vrot.slane %v2202_v56, 7  ;;  %v2011_v63 = vpop.f32.mrf.mxu0  ;;  %v2816_v55 = vpack.c.bf16 %v2202_v56, %v12449_v57  ;;  %v2483_v48 = vmul.f32 %v2356_v14, %v14909_v53  ;;  %v2609_v13 = vrot.slane %v2202_v56, 1 }
 0x29c   : > { %v12486_v42 = vmax.f32 %v2147_v49, 0.0  ;;  %v2148_v23 = vadd.f32 %v11771_v29, %v2081_v6  ;;  %v2082_v43 = vadd.f32 %v2011_v63, %v1768_v30  ;;  %v1773_v41 = vpop.f32.mrf.mxu1  ;;  %14911 = vst [vmem:[#allocation68_spill] sm:$0xff] %v12490_v50  ;;  %v1770_v5 = vadd.f32 %v1769_v12, %v14912_v25  ;;  %v14913_v30 = vld [vmem:[#allocation93_spill] sm:$0xff] }
 0x29d   : > { %8593 = vmatprep.mubr.msk.bf16.mxu1 %vm2930_vm4, %v2816_v55  ;;  %v2013_v11 = vpop.f32.mrf.mxu0  ;;  %v2358_v17 = vsel %vm783_vm2, %v2353_v28, %v2357_v46  ;;  %v1774_v63 = vadd.f32 %v1773_v41, %v14913_v30  ;;  %v12503_v55 = vmul.f32 %v2604_v7, %v14910_v18  ;;  %v2517_v25 = vpack.c.bf16 %v2483_v48, %v2481_v4  ;;  %v14915_v41 = vld [vmem:[#allocation95_spill] sm:$0xff] }
 0x29e   : > { %v2359_v49 = vrot.slane %v12486_v42, 7  ;;  %v2204_v14 = vmax.f32 %v2148_v23, 0.0  ;;  %v2149_v6 = vadd.f32 %v11766_v47, %v2082_v43  ;;  %3112 = vmatmul.mubr.bf16.gmra.mxu1 %v2815_v9  ;;  %v1775_v20 = vpop.f32.mrf.mxu1  ;;  %v2083_v44 = vadd.f32 %v2013_v11, %v1770_v5 }
 0x29f   : > { %v2484_v56 = vmul.f32 %v2358_v17, %v14909_v53  ;;  %14914 = vst [vmem:[#allocation70_spill] sm:$0xff] %v12503_v55  ;;  %v2611_v43 = vrot.slane %v12486_v42, 1  ;;  %v1776_v11 = vadd.f32 %v1775_v20, %v14915_v41  ;;  %v14916_v53 = vld [vmem:[#allocation97_spill] sm:$0xff]  ;;  %v14917_v48 = vrot.slane %v12449_v57, 1 }
 0x2a0   : > { %v2361_v28 = vrot.slane %v2204_v14, 7  ;;  %v2613_v35 = vrot.slane %v2204_v14, 1  ;;  %v12505_v1 = vmax.f32 %v2149_v6, 0.0  ;;  %v1777_v23 = vpop.f32.mrf.mxu1  ;;  %v2150_v9 = vadd.f32 %v11771_v29, %v2083_v44  ;;  %v14926_v6 = vld [vmem:[#allocation57_spill] sm:$0xff] }
 0x2a1   : > { %v2518_v5 = vpack.c.bf16 %v2484_v56, %v2482_v62  ;;  %v1778_v30 = vadd.f32 %v1777_v23, %v14916_v53  ;;  %v2360_v18 = vsel %vm783_vm2, %v2355_v58, %v2359_v49  ;;  %v14918_v20 = vrot.slane %v12456_v3, 1  ;;  %v14921_v53 = vld [vmem:[#allocation54_spill] sm:$0xff] }
 0x2a2   : > { %v2363_v17 = vrot.slane %v12505_v1, 7  ;;  %v2362_v7 = vsel %vm783_vm2, %v2357_v46, %v2361_v28  ;;  %v12515_v12 = vmax.f32 %v2150_v9, 0.0  ;;  %v2817_v44 = vpack.c.bf16 %v12505_v1, %v12486_v42 }
 0x2a3   : > { %8626 = vmatprep.mubr.msk.bf16.mxu0 %vm2930_vm4, %v2518_v5  ;;  %v2610_v46 = vsel %vm1050_vm1, %v14917_v48, %v2609_v13  ;;  %v2614_v58 = vsel %vm1050_vm1, %v2609_v13, %v2613_v35  ;;  %v14919_v56 = vrot.slane %v12443_v10, 1  ;;  %v14923_v13 = vld [vmem:[#allocation55_spill] sm:$0xff]  ;;  %v14925_v10 = vmov %v14918_v20 }
 0x2a4   : > { %3421 = vmatmul.mubr.bf16.gmra.mxu0 %v2517_v25  ;;  %v2364_v4 = vsel %vm783_vm2, %v2359_v49, %v2363_v17  ;;  %v14692_v42 = vrot.slane %v12515_v12, 7  ;;  %v2818_v25 = vpack.c.bf16 %v12515_v12, %v2204_v14  ;;  %v14920_v49 = vld [vmem:[#allocation56_spill] sm:$0xff]  ;;  %v12537_v48 = vmul.f32 %v2610_v46, %v14921_v53 }
 0x2a5   : > { %v2608_v23 = vsel %vm1050_vm1, %v14919_v56, %v14918_v20  ;;  %v2017_v41 = vpop.f32.mrf.mxu0  ;;  %v2486_v5 = vmul.f32 %v2362_v7, %v14920_v49  ;;  %v12540_v62 = vmul.f32 %v2614_v58, %v14923_v13  ;;  %v2612_v20 = vsel %vm1050_vm1, %v14925_v10, %v2611_v43  ;;  %v1779_v58 = vpop.f32.mrf.mxu1 }
 0x2a6   : > { %v2084_v57 = vadd.f32 %v2017_v41, %v1774_v63  ;;  %14922 = vst [vmem:[#allocation37_spill] sm:$0xff] %v12537_v48  ;;  %8594 = vmatprep.mubr.msk.bf16.mxu1 %vm2930_vm4, %v2818_v25  ;;  %v2366_v14 = vsel %vm783_vm2, %v2361_v28, %v14692_v42  ;;  %v2487_v7 = vmul.f32 %v2364_v4, %v14926_v6 }
 0x2a7   : > { %14924 = vst [vmem:[#allocation36_spill] sm:$0xff] %v12540_v62  ;;  %v2019_v56 = vpop.f32.mrf.mxu0  ;;  %v12551_v63 = vmul.f32 %v2608_v23, %v14921_v53  ;;  %v12554_v46 = vmul.f32 %v2612_v20, %v14923_v13  ;;  %3122 = vmatmul.mubr.bf16.gmra.mxu1 %v2817_v44  ;;  %v2488_v25 = vmul.f32 %v2366_v14, %v14926_v6  ;;  %v14929_v23 = vrot.slane %v12515_v12, 1  ;;  %v14931_v14 = vld [vmem:[#allocation100_spill] sm:$0xff] }
 0x2a8   : > { %v2151_v3 = vadd.f32 %v11766_v47, %v2084_v57  ;;  %v2085_v41 = vadd.f32 %v2019_v56, %v1776_v11  ;;  %v2485_v28 = vmul.f32 %v2360_v18, %v14920_v49  ;;  %v14930_v13 = vrot.slane %v12505_v1, 1 }
 0x2a9   : > { %14927 = vst [vmem:[#allocation35_spill] sm:$0xff] %v12551_v63  ;;  %14928 = vst [vmem:[#allocation71_spill] sm:$0xff] %v12554_v46  ;;  %v2021_v9 = vpop.f32.mrf.mxu0  ;;  %v2618_v53 = vsel %vm1050_vm1, %v2613_v35, %v14929_v23  ;;  %v2520_v56 = vpack.c.bf16 %v2488_v25, %v2486_v5  ;;  %v1780_v18 = vadd.f32 %v1779_v58, %v14931_v14 }
 0x2aa   : > { %v2616_v11 = vsel %vm1050_vm1, %v2611_v43, %v14930_v13  ;;  %v12569_v44 = vmax.f32 %v2151_v3, 0.0  ;;  %v2152_v6 = vadd.f32 %v11771_v29, %v2085_v41  ;;  %v2086_v57 = vadd.f32 %v2021_v9, %v1778_v30  ;;  %v1783_v20 = vpop.f32.mrf.mxu1  ;;  %v14932_v3 = vld [vmem:[#allocation94_spill] sm:$0xff] }
 0x2ab   : > { %v2023_v49 = vpop.f32.mrf.mxu0  ;;  %v2519_v10 = vpack.c.bf16 %v2487_v7, %v2485_v28  ;;  %8627 = vmatprep.mubr.msk.bf16.mxu0 %vm2930_vm4, %v2520_v56  ;;  %v1784_v13 = vadd.f32 %v1783_v20, %v14932_v3  ;;  %v14933_v30 = vld [vmem:[#allocation58_spill] sm:$0xff]  ;;  %v14934_v56 = vld [vmem:[#allocation96_spill] sm:$0xff] }
 0x2ac   : > { %v2367_v4 = vrot.slane %v12569_v44, 7  ;;  %v14695_v42 = vrot.slane %v12569_v44, 1  ;;  %v2208_v35 = vmax.f32 %v2152_v6, 0.0  ;;  %v2153_v23 = vadd.f32 %v11766_v47, %v2086_v57  ;;  %v1785_v43 = vpop.f32.mrf.mxu1 }
 0x2ad   : > { %v2087_v41 = vadd.f32 %v2023_v49, %v1780_v18  ;;  %3431 = vmatmul.mubr.bf16.gmra.mxu0 %v2519_v10  ;;  %v12579_v9 = vmul.f32 %v2618_v53, %v14933_v30  ;;  %v12585_v28 = vmul.f32 %v2616_v11, %v14933_v30  ;;  %v1786_v14 = vadd.f32 %v1785_v43, %v14934_v56  ;;  %v14936_v49 = vld [vmem:[#allocation98_spill] sm:$0xff] }
 0x2ae   : > { %v2621_v5 = vrot.slane %v2208_v35, 1  ;;  %v12581_v58 = vmax.f32 %v2153_v23, 0.0  ;;  %v1787_v7 = vpop.f32.mrf.mxu1  ;;  %v2368_v25 = vsel %vm783_vm2, %v2363_v17, %v2367_v4  ;;  %v2369_v6 = vrot.slane %v2208_v35, 7  ;;  %v14937_v11 = vld [vmem:[#allocation66_spill] sm:$0xff] }
 0x2af   : > { %v2154_v57 = vadd.f32 %v11771_v29, %v2087_v41  ;;  %v2027_v20 = vpop.f32.mrf.mxu0  ;;  %v14935_v10 = vrot.slane %v12505_v1, 1  ;;  %v1788_v23 = vadd.f32 %v1787_v7, %v14936_v49  ;;  %v2489_v30 = vmul.f32 %v2368_v25, %v14937_v11 }
 0x2b0   : > { %v2371_v18 = vrot.slane %v12581_v58, 7  ;;  %v2088_v17 = vadd.f32 %v2027_v20, %v1784_v13  ;;  %v1789_v3 = vpop.f32.mrf.mxu1  ;;  %v2623_v63 = vrot.slane %v12581_v58, 1  ;;  %v2819_v43 = vpack.c.bf16 %v12581_v58, %v12569_v44 }
 0x2b1   : > { %v2620_v53 = vsel %vm1050_vm1, %v14935_v10, %v14695_v42  ;;  %v2210_v41 = vmax.f32 %v2154_v57, 0.0  ;;  %v2029_v46 = vpop.f32.mrf.mxu0  ;;  %v14938_v56 = vrot.slane %v12515_v12, 1  ;;  %v14939_v42 = vld [vmem:[#allocation101_spill] sm:$0xff]  ;;  %v14940_v57 = vrot.slane %v12515_v12, 7 }
 0x2b2   : > { %v2155_v10 = vadd.f32 %v11766_v47, %v2088_v17  ;;  %v1790_v48 = vadd.f32 %v1789_v3, %v14939_v42  ;;  %v2089_v7 = vadd.f32 %v2029_v46, %v1786_v14  ;;  %v2372_v13 = vsel %vm783_vm2, %v2367_v4, %v2371_v18  ;;  %v14942_v4 = vld [vmem:[#allocation63_spill] sm:$0xff] }
 0x2b3   : > { %v2622_v1 = vsel %vm1050_vm1, %v14938_v56, %v2621_v5  ;;  %v2373_v20 = vrot.slane %v2210_v41, 7  ;;  %v2625_v25 = vrot.slane %v2210_v41, 1  ;;  %v2031_v49 = vpop.f32.mrf.mxu0  ;;  %v2820_v62 = vpack.c.bf16 %v2210_v41, %v2208_v35  ;;  %v14941_v56 = vld [vmem:[#allocation61_spill] sm:$0xff] }
 0x2b4   : > { %v2370_v38 = vsel %vm783_vm2, %v14940_v57, %v2369_v6  ;;  %v2211_v58 = vmax.f32 %v2155_v10, 0.0  ;;  %v2156_v55 = vadd.f32 %v11771_v29, %v2089_v7  ;;  %v2090_v21 = vadd.f32 %v2031_v49, %v1788_v23 }
 0x2b5   : > { %v12611_v50 = vmul.f32 %v2622_v1, %v14941_v56  ;;  %8595 = vmatprep.mubr.msk.bf16.mxu1 %vm2930_vm4, %v2820_v62  ;;  %v2033_v42 = vpop.f32.mrf.mxu0  ;;  %v2374_v46 = vsel %vm783_vm2, %v2369_v6, %v2373_v20  ;;  %v2491_v14 = vmul.f32 %v2372_v13, %v14942_v4  ;;  %v12617_v35 = vmul.f32 %v2620_v53, %v14941_v56 }
 0x2b6   : > { %v2626_v12 = vsel %vm1050_vm1, %v2621_v5, %v2625_v25  ;;  %v2375_v17 = vrot.slane %v2211_v58, 7  ;;  %v2212_v3 = vmax.f32 %v2156_v55, 0.0  ;;  %v2157_v41 = vadd.f32 %v11766_v47, %v2090_v21  ;;  %3132 = vmatmul.mubr.bf16.gmra.mxu1 %v2819_v43  ;;  %v14943_v43 = vld [vmem:[#allocation69_spill] sm:$0xff] }
 0x2b7   : > { %v2490_v23 = vmul.f32 %v2370_v38, %v14937_v11  ;;  %v2091_v1 = vadd.f32 %v2033_v42, %v1790_v48  ;;  %v2492_v62 = vmul.f32 %v2374_v46, %v14942_v4  ;;  %v2772_v6 = vpack.c.bf16 %v12611_v50, %v12579_v9 }
 0x2b8   : > { %v2771_v10 = vpack.c.bf16 %v12617_v35, %v12585_v28  ;;  %v2627_v53 = vrot.slane %v2211_v58, 1  ;;  %v2377_v7 = vrot.slane %v2212_v3, 7  ;;  %v2629_v13 = vrot.slane %v2212_v3, 1 }
 0x2b9   : > { %v2213_v5 = vmax.f32 %v2157_v41, 0.0  ;;  %v2158_v55 = vadd.f32 %v11771_v29, %v2091_v1  ;;  %v2522_v49 = vpack.c.bf16 %v2492_v62, %v2490_v23  ;;  %v2521_v47 = vpack.c.bf16 %v2491_v14, %v2489_v30  ;;  %v14945_v30 = vld [vmem:[#allocation74_spill] sm:$0xff]  ;;  %v14946_v41 = vld [vmem:[#allocation72_spill] sm:$0xff] }
 0x2ba   : > { %v2376_v21 = vsel %vm783_vm2, %v2371_v18, %v2375_v17  ;;  %v2378_v11 = vsel %vm783_vm2, %v2373_v20, %v2377_v7  ;;  %v12631_v57 = vmul.f32 %v2626_v12, %v14943_v43  ;;  %v2630_v46 = vsel %vm1050_vm1, %v2625_v25, %v2629_v13 }
 0x2bb   : > { %v2379_v38 = vrot.slane %v2213_v5, 7  ;;  %v2631_v48 = vrot.slane %v2213_v5, 1  ;;  %v2214_v56 = vmax.f32 %v2158_v55, 0.0  ;;  %8628 = vmatprep.mubr.msk.bf16.mxu0 %vm2930_vm4, %v2522_v49  ;;  %v2821_v42 = vpack.c.bf16 %v2213_v5, %v2211_v58  ;;  %v14947_v55 = vld [vmem:[#allocation77_spill] sm:$0xff] }
 0x2bc   : > { %v14944_v4 = vrot.slane %v12569_v44, 1  ;;  %3441 = vmatmul.mubr.bf16.gmra.mxu0 %v2521_v47  ;;  %v2494_v18 = vmul.f32 %v2378_v11, %v14945_v30  ;;  %v12641_v20 = vmul.f32 %v2630_v46, %v14946_v41  ;;  %v2628_v12 = vsel %vm1050_vm1, %v2623_v63, %v2627_v53 }
 0x2bd   : > { %v2380_v14 = vsel %vm783_vm2, %v2375_v17, %v2379_v38  ;;  %v2691_v23 = vsel %vm1050_vm1, %v2631_v48, 0.0  ;;  %v2381_v1 = vrot.slane %v2214_v56, 7  ;;  %v2633_v58 = vrot.slane %v2214_v56, 1 }
 0x2be   : > { %v2624_v29 = vsel %vm1050_vm1, %v14944_v4, %v2623_v63  ;;  %v2822_v62 = vpack.c.bf16 %v2214_v56, %v2212_v3  ;;  %v2774_v44 = vpack.c.bf16 %v12641_v20, %v12631_v57  ;;  %v12651_v5 = vmul.f32 %v2628_v12, %v14946_v41  ;;  %v10068_v12 = vld [vmem:[#allocation13 + $0x38] sm:$0xff]  }
 0x2bf   : > { %v12648_v25 = vmul.f32 %v2624_v29, %v14943_v43  ;;  %v2632_v17 = vsel %vm1050_vm1, %v2627_v53, %v2631_v48  ;;  %v2382_v63 = vsel %vm783_vm2, %v2377_v7, %v2381_v1  ;;  %v2495_v49 = vmul.f32 %v2380_v14, %v14947_v55  ;;  %v14948_v43 = vld [vmem:[#allocation78_spill] sm:$0xff]  ;;  %v14949_v53 = vld [vmem:[#allocation81_spill] sm:$0xff]  ;;  %v14965_v1 = vld [vmem:[#allocation28_spill] sm:$0xff] }
 0x2c0   : > { %8596 = vmatprep.mubr.msk.bf16.mxu1 %vm2930_vm4, %v2822_v62  ;;  %v2634_v47 = vsel %vm1050_vm1, %v2629_v13, %v2633_v58  ;;  %v2692_v3 = vsel %vm1050_vm1, %v2633_v58, 0.0  ;;  %v2496_v38 = vmul.f32 %v2382_v63, %v14947_v55  ;;  %v14950_v7 = vpack.c.bf16 %v11880_v34, %v11887_v16  ;;  %v14968_v58 = vld [vmem:[#allocation64_spill] sm:$0xff]  ;;  %v14969_v62 = vld [vmem:[#allocation29_spill] sm:$0xff]  ;;  %v10073_v55 = vld [vmem:[#allocation11 + $0x20] sm:$0xff]  }
 0x2c1   : > { %3142 = vmatmul.mubr.bf16.gmra.mxu1 %v2821_v42  ;;  %v2773_v11 = vpack.c.bf16 %v12651_v5, %v12648_v25  ;;  %v12663_v56 = vmul.f32 %v2634_v47, %v14948_v43  ;;  %v12666_v48 = vmul.f32 %v2692_v3, %v14949_v53  ;;  %v2493_v13 = vmul.f32 %v2376_v21, %v14945_v30 }
 0x2c2   : > { %8649 = vmatprep.mubr.msk.bf16.mxu1 %vm2930_vm4, %v14950_v7  ;;  %v12674_v42 = vmul.f32 %v2632_v17, %v14948_v43  ;;  %v12677_v46 = vmul.f32 %v2691_v23, %v14949_v53  ;;  %v2524_v4 = vpack.c.bf16 %v2496_v38, %v2494_v18  ;;  %v14951_v34 = vpack.c.bf16 %v11830_v52, %v11821_v45  ;;  %v10067_v18 = vld [vmem:[#allocation11 + $0x38] sm:$0xff]   ;;  %v14971_v38 = vld [vmem:[#allocation33_spill] sm:$0xff]  ;;  %v14974_v7 = vld [vmem:[#allocation31_spill] sm:$0xff] }
 0x2c3   : > { %v2776_v29 = vpack.c.bf16 %v12666_v48, %v12663_v56  ;;  %v2523_v14 = vpack.c.bf16 %v2495_v49, %v2493_v13  ;;  %v14952_v16 = vpack.c.bf16 %v11958_v54, %v11949_v24  ;;  %v14953_v21 = vpack.c.bf16 %v11983_v15, %v11991_v2  ;;  %4113 = vmatpush1.bf16.msra.mxu0 %v10067_v18  ;;  %v10069_v15 = vld [vmem:[#allocation11 + $0x30] sm:$0xff]   ;;  %v10070_v2 = vld [vmem:[#allocation13 + $0x30] sm:$0xff]   ;;  %v10074_v49 = vld [vmem:[#allocation13 + $0x20] sm:$0xff]  }
 0x2c4   : > { %v2775_v41 = vpack.c.bf16 %v12677_v46, %v12674_v42  ;;  %8629 = vmatprep.mubr.msk.bf16.mxu0 %vm2930_vm4, %v2524_v4  ;;  %v14954_v30 = vpack.c.bf16 %v12022_v61, %v12019_v0  ;;  %v14955_v45 = vpack.c.bf16 %v12042_v27, %v12039_v26  ;;  %v14956_v52 = vpack.c.bf16 %v12095_v31, %v12092_v60  ;;  %v10071_v31 = vld [vmem:[#allocation11 + $0x28] sm:$0xff]   ;;  %v14972_v43 = vld [vmem:[#allocation62_spill] sm:$0xff]  ;;  %v14977_v18 = vld [vmem:[#allocation65_spill] sm:$0xff] }
 0x2c5   : > { %3451 = vmatmul.mubr.bf16.gmra.mxu0 %v2523_v14  ;;  %4114 = vmatprep.subr.bf16.mxu0 %v14785_v32  ;;  %v14957_v24 = vpack.c.bf16 %v12139_v19, %v12136_v51  ;;  %v14958_v54 = vpack.c.bf16 %v12151_v22, %v12148_v8  ;;  %v14959_v0 = vpack.c.bf16 %v12180_v39, %v12177_v33  ;;  %v10072_v51 = vld [vmem:[#allocation13 + $0x28] sm:$0xff]   ;;  %v14962_v22 = vld [vmem:[#allocation27_spill] sm:$0xff]  ;;  %v14975_v13 = vld [vmem:[#allocation34_spill] sm:$0xff] }
 0x2c6   : > { %v14960_v61 = vpack.c.bf16 %v12235_v59, %v12205_v40  ;;  %v14961_v8 = vpack.c.bf16 %v12265_v36, %v12253_v37  ;;  %v14963_v33 = vld [vmem:[#allocation59_spill] sm:$0xff]  ;;  %v14966_v37 = vld [vmem:[#allocation60_spill] sm:$0xff]  ;;  %v14970_v17 = vpack.c.bf16 %v14968_v58, %v14969_v62  ;;  %v14973_v53 = vpack.c.bf16 %v14971_v38, %v14972_v43 }
 0x2c7   : > { %4115 = vmatpush1.bf16.msra.mxu0 %v10069_v15  ;;  %v14964_v59 = vpack.c.bf16 %v14962_v22, %v14963_v33  ;;  %v14967_v36 = vpack.c.bf16 %v14965_v1, %v14966_v37  ;;  %v14976_v4 = vpack.c.bf16 %v14974_v7, %v14975_v13  ;;  %v14986_v22 = vld [vmem:[#allocation36_spill] sm:$0xff]  ;;  %v14987_v33 = vld [vmem:[#allocation37_spill] sm:$0xff]  ;;  %v10081_v58 = vld [vmem:[#allocation11] sm:$0xff]  }
 0x2c8   : > { %4116 = vmatprep.subr.bf16.mxu0 %v14785_v32  ;;  %v10079_v1 = vld [vmem:[#allocation11 + $0x8] sm:$0xff]   ;;  %v10080_v37 = vld [vmem:[#allocation13 + $0x8] sm:$0xff]   ;;  %v14990_v38 = vld [vmem:[#allocation35_spill] sm:$0xff] }
 0x2c9   : > { %3649 = vmatmul.mubr.bf16.vlgmr.msra.gmra.mxu1 %v14951_v34  ;;  %v10083_v7 = vld [vmem:[#allocation11 + $0x40] sm:$0x3f]   ;;  %v10084_v13 = vld [vmem:[#allocation13 + $0x40] sm:$0x3f]  }
 0x2ca   : > { %8650 = vmatprep.mubr.msk.bf16.mxu1 %vm2930_vm4, %v14952_v16  ;;  %4332 = vmatpush1.bf16.msra.mxu1 %v10068_v12  ;;  %v10075_v16 = vld [vmem:[#allocation11 + $0x18] sm:$0xff]   ;;  %v14978_v12 = vld [vmem:[#allocation32_spill] sm:$0xff] }
 0x2cb   : > { %4333 = vmatprep.subr.bf16.mxu1 %v14785_v32  ;;  %4117 = vmatpush1.bf16.msra.mxu0 %v10071_v31  ;;  %v14983_v31 = vld [vmem:[#allocation70_spill] sm:$0xff] }
 0x2cc   : > { %4118 = vmatprep.subr.bf16.mxu0 %v14785_v32 }
 0x2ce   : > { %4334 = vmatpush1.bf16.msra.mxu1 %v10070_v2  ;;  %v10077_v2 = vld [vmem:[#allocation11 + $0x10] sm:$0xff]  }
 0x2cf   : > { %4335 = vmatprep.subr.bf16.mxu1 %v14785_v32  ;;  %4119 = vmatpush1.bf16.msra.mxu0 %v10073_v55 }
 0x2d0   : > { %4120 = vmatprep.subr.bf16.mxu0 %v14785_v32 }
 0x2d1   : > { %3659 = vmatmul.mubr.bf16.gmra.mxu1 %v14953_v21  ;;  %v10076_v21 = vld [vmem:[#allocation13 + $0x18] sm:$0xff]  }
 0x2d2   : > { %8651 = vmatprep.mubr.msk.bf16.mxu1 %vm2930_vm4, %v14954_v30  ;;  %4336 = vmatpush1.bf16.msra.mxu1 %v10072_v51  ;;  %v14984_v51 = vld [vmem:[#allocation30_spill] sm:$0xff] }
 0x2d3   : > { %4337 = vmatprep.subr.bf16.mxu1 %v14785_v32  ;;  %4121 = vmatpush1.bf16.msra.mxu0 %v10075_v16  ;;  %v4329_v16 = vsel %vm1373_vm0, %v10084_v13, 0 }
 0x2d4   : > { %4122 = vmatprep.subr.bf16.mxu0 %v14785_v32 }
 0x2d6   : > { %4338 = vmatpush1.bf16.msra.mxu1 %v10074_v49  ;;  %v14989_v49 = vld [vmem:[#allocation71_spill] sm:$0xff] }
 0x2d7   : > { %4339 = vmatprep.subr.bf16.mxu1 %v14785_v32  ;;  %4123 = vmatpush1.bf16.msra.mxu0 %v10077_v2  ;;  %v14991_v43 = vpack.c.bf16 %v14989_v49, %v14990_v38 }
 0x2d8   : > { %4124 = vmatprep.subr.bf16.mxu0 %v14785_v32 }
 0x2d9   : > { %3669 = vmatmul.mubr.bf16.gmra.mxu1 %v14955_v45  ;;  %v14979_v45 = vpack.c.bf16 %v14977_v18, %v14978_v12 }
 0x2da   : > { %8652 = vmatprep.mubr.msk.bf16.mxu1 %vm2930_vm4, %v14956_v52  ;;  %v14980_v52 = vld [vmem:[#allocation68_spill] sm:$0xff]  ;;  %4340 = vmatpush1.bf16.msra.mxu1 %v10076_v21 }
 0x2db   : > { %4341 = vmatprep.subr.bf16.mxu1 %v14785_v32  ;;  %4125 = vmatpush1.bf16.msra.mxu0 %v10079_v1 }
 0x2dc   : > { %4126 = vmatprep.subr.bf16.mxu0 %v14785_v32 }
 0x2df   : > { %4127 = vmatpush1.bf16.msra.mxu0 %v10081_v58 }
 0x2e0   : > { %4142 = vmatprep.subr.bf16.mxu0 %v14785_v32 }
 0x2e1   : > { %3679 = vmatmul.mubr.bf16.gmra.mxu1 %v14957_v24  ;;  %v14981_v24 = vld [vmem:[#allocation67_spill] sm:$0xff] }
 0x2e2   : > { %8653 = vmatprep.mubr.msk.bf16.mxu1 %vm2930_vm4, %v14958_v54  ;;  %v14982_v54 = vpack.c.bf16 %v14980_v52, %v14981_v24 }
 0x2e9   : > { %3689 = vmatmul.mubr.bf16.gmra.mxu1 %v14959_v0  ;;  %v12723_v26 = vpop.f32.mrf.mxu1  ;;  %v10078_v0 = vld [vmem:[#allocation13 + $0x10] sm:$0xff]  }
 0x2ea   : > { %8654 = vmatprep.mubr.msk.bf16.mxu1 %vm2930_vm4, %v14960_v61  ;;  %4342 = vmatpush1.bf16.msra.mxu1 %v10078_v0 }
 0x2eb   : > { %v12725_v27 = vpop.f32.mrf.mxu1  ;;  %4343 = vmatprep.subr.bf16.mxu1 %v14785_v32 }
 0x2ed   : > { %v12727_v60 = vpop.f32.mrf.mxu1 }
 0x2ee   : > { %4344 = vmatpush1.bf16.msra.mxu1 %v10080_v37 }
 0x2ef   : > { %v12729_v19 = vpop.f32.mrf.mxu1  ;;  %4345 = vmatprep.subr.bf16.mxu1 %v14785_v32 }
 0x2f1   : > { %3699 = vmatmul.mubr.bf16.gmra.mxu1 %v14961_v8  ;;  %v12738_v39 = vpop.f32.mrf.mxu1  ;;  %v14985_v8 = vpack.c.bf16 %v14983_v31, %v14984_v51 }
 0x2f2   : > { %8655 = vmatprep.mubr.msk.bf16.mxu1 %vm2930_vm4, %v14964_v59  ;;  %v14988_v59 = vpack.c.bf16 %v14986_v22, %v14987_v33 }
 0x2f3   : > { %v12742_v40 = vpop.f32.mrf.mxu1 }
 0x2f5   : > { %v12744_v23 = vpop.f32.mrf.mxu1 }
 0x2f7   : > { %v12753_v63 = vpop.f32.mrf.mxu1 }
 0x2f9   : > { %3709 = vmatmul.mubr.bf16.gmra.mxu1 %v14967_v36 }
 0x2fa   : > { %8656 = vmatprep.mubr.msk.bf16.mxu1 %vm2930_vm4, %v14970_v17  ;;  %v10082_v17 = vld [vmem:[#allocation13] sm:$0xff]  }
 0x2fb   : > { %4346 = vmatpush1.bf16.msra.mxu1 %v10082_v17 }
 0x2fc   : > { %4361 = vmatprep.subr.bf16.mxu1 %v14785_v32 }
 0x2fe   : > { %v12755_v47 = vpop.f32.mrf.mxu1 }
 0x2ff   : > { %4362 = vmatpush2.bf16.msra.mxu1 %v4329_v16 }
 0x300   : > { %v12757_v3 = vpop.f32.mrf.mxu1 }
 0x301   : > { %3719 = vmatmul.mubr.bf16.gmra.mxu1 %v14973_v53 }
 0x302   : > { %8657 = vmatprep.mubr.msk.bf16.mxu1 %vm2930_vm4, %v14976_v4  ;;  %v12768_v14 = vpop.f32.mrf.mxu1  ;;  %v4110_v4 = vsel %vm1373_vm0, %v10083_v7, 0  ;;  %vm8053_vm0 = vcmask 130048  }
 0x303   : > { %4143 = vmatpush2.bf16.msra.mxu0 %v4110_v4 }
 0x304   : > { %v12770_v34 = vpop.f32.mrf.mxu1  ;;  %4757 = vmatprep.subr.bf16.mxu0 %v14785_v32 }
 0x308   : > { %v12772_v30 = vpop.f32.mrf.mxu1 }
 0x309   : > { %3729 = vmatmul.mubr.bf16.gmra.mxu1 %v14979_v45 }
 0x30a   : > { %8658 = vmatprep.mubr.msk.bf16.mxu1 %vm2930_vm4, %v14982_v54  ;;  %v12783_v15 = vpop.f32.mrf.mxu1 }
 0x30c   : > { %v12785_v61 = vpop.f32.mrf.mxu1 }
 0x30e   : > { %v12796_v36 = vpop.f32.mrf.mxu1 }
 0x311   : > { %3739 = vmatmul.mubr.bf16.gmra.mxu1 %v14985_v8 }
 0x312   : > { %8659 = vmatprep.mubr.msk.bf16.mxu1 %vm2930_vm4, %v14988_v59 }
 0x316   : > { %v12798_v62 = vpop.f32.mrf.mxu1 }
 0x318   : > { %v12802_v55 = vpop.f32.mrf.mxu1 }
 0x319   : > { %3749 = vmatmul.mubr.bf16.gmra.mxu1 %v14991_v43 }
 0x31a   : > { %8660 = vmatprep.mubr.msk.bf16.mxu1 %vm2930_vm4, %v2772_v6  ;;  %v12811_v53 = vpop.f32.mrf.mxu1 }
 0x31c   : > { %v12817_v21 = vpop.f32.mrf.mxu1 }
 0x320   : > { %v12820_v50 = vpop.f32.mrf.mxu1 }
 0x321   : > { %3759 = vmatmul.mubr.bf16.gmra.mxu1 %v2771_v10  ;;  %v3322_v10 = vpop.f32.mrf.mxu0 }
 0x322   : > { %8661 = vmatprep.mubr.msk.bf16.mxu1 %vm2930_vm4, %v2774_v44  ;;  %v12829_v9 = vpop.f32.mrf.mxu1 }
 0x323   : > { %v3324_v44 = vpop.f32.mrf.mxu0 }
 0x324   : > { %v12831_v6 = vpop.f32.mrf.mxu1 }
 0x325   : > { %v3326_v5 = vpop.f32.mrf.mxu0 }
 0x326   : > { %v12840_v28 = vpop.f32.mrf.mxu1 }
 0x327   : > { %v3328_v56 = vpop.f32.mrf.mxu0 }
 0x329   : > { %3769 = vmatmul.mubr.bf16.gmra.mxu1 %v2773_v11 }
 0x32a   : > { %8662 = vmatprep.mubr.msk.bf16.mxu1 %vm2930_vm4, %v2776_v29  ;;  %v12857_v29 = vpop.f32.mrf.mxu0 }
 0x32c   : > { %v12861_v12 = vpop.f32.mrf.mxu0 }
 0x32e   : > { %v12842_v35 = vpop.f32.mrf.mxu1  ;;  %v12865_v42 = vpop.f32.mrf.mxu0 }
 0x330   : > { %v12844_v57 = vpop.f32.mrf.mxu1  ;;  %v12871_v52 = vpop.f32.mrf.mxu0 }
 0x331   : > { %14992 = vst [vmem:[#allocation73_spill] sm:$0xff] %v12844_v57  ;;  %3779 = vmatmul.mubr.bf16.gmra.mxu1 %v2775_v41 }
 0x332   : > { %v12849_v20 = vpop.f32.mrf.mxu1  ;;  %v12875_v54 = vpop.f32.mrf.mxu0 }
 0x333   : > { %14993 = vst [vmem:[#allocation75_spill] sm:$0xff] %v12849_v20  ;;  %v3327_v20 = vadd.f32 %v3326_v5, %v12727_v60  ;;  %v3335_v5 = vadd.f32 %v12861_v12, %v12742_v40  ;;  %v3339_v40 = vadd.f32 %v12871_v52, %v12753_v63 }
 0x334   : > { %v12851_v25 = vpop.f32.mrf.mxu1  ;;  %v12879_v0 = vpop.f32.mrf.mxu0 }
 0x335   : > { %14994 = vst [vmem:[#allocation76_spill] sm:$0xff] %v12851_v25  ;;  %v3345_v63 = vadd.f32 %v12879_v0, %v12757_v3 }
 0x336   : > { %v12883_v51 = vpop.f32.mrf.mxu0 }
 0x338   : > { %v12853_v11 = vpop.f32.mrf.mxu1  ;;  %v12887_v22 = vpop.f32.mrf.mxu0 }
 0x339   : > { %14995 = vst [vmem:[#allocation38_spill] sm:$0xff] %v12853_v11  ;;  %v3349_v3 = vadd.f32 %v12887_v22, %v12770_v34 }
 0x33a   : > { %v12855_v48 = vpop.f32.mrf.mxu1  ;;  %v12891_v59 = vpop.f32.mrf.mxu0 }
 0x33b   : > { %14996 = vst [vmem:[#allocation39_spill] sm:$0xff] %v12855_v48 }
 0x33c   : > { %v12859_v18 = vpop.f32.mrf.mxu1  ;;  %v12895_v37 = vpop.f32.mrf.mxu0 }
 0x33d   : > { %14997 = vst [vmem:[#allocation40_spill] sm:$0xff] %v12859_v18  ;;  %v3355_v34 = vadd.f32 %v12895_v37, %v12783_v15 }
 0x33e   : > { %v12863_v45 = vpop.f32.mrf.mxu1  ;;  %v12901_v49 = vpop.f32.mrf.mxu0 }
 0x33f   : > { %14998 = vst [vmem:[#allocation42_spill] sm:$0xff] %v12863_v45  ;;  %v3323_v45 = vadd.f32 %v3322_v10, %v12723_v26  ;;  %v3329_v10 = vadd.f32 %v3328_v56, %v12729_v19 }
 0x340   : > { %v12905_v43 = vpop.f32.mrf.mxu0 }
 0x341   : > { %v3359_v37 = vadd.f32 %v12905_v43, %v12796_v36 }
 0x342   : > { %v12909_v13 = vpop.f32.mrf.mxu0 }
 0x344   : > { %v12913_v16 = vpop.f32.mrf.mxu0 }
 0x345   : > { %v3365_v36 = vadd.f32 %v12913_v16, %v12802_v55 }
 0x346   : > { %v12867_v46 = vpop.f32.mrf.mxu1 }
 0x347   : > { %14999 = vst [vmem:[#allocation79_spill] sm:$0xff] %v12867_v46 }
 0x348   : > { %v12869_v41 = vpop.f32.mrf.mxu1 }
 0x349   : > { %15000 = vst [vmem:[#allocation80_spill] sm:$0xff] %v12869_v41 }
 0x34a   : > { %v12873_v24 = vpop.f32.mrf.mxu1 }
 0x34b   : > { %15001 = vst [vmem:[#allocation43_spill] sm:$0xff] %v12873_v24 }
 0x34c   : > { %v12877_v2 = vpop.f32.mrf.mxu1 }
 0x34d   : > { %15002 = vst [vmem:[#allocation82_spill] sm:$0xff] %v12877_v2 }
 0x350   : > { %v12881_v31 = vpop.f32.mrf.mxu1 }
 0x351   : > { %15003 = vst [vmem:[#allocation83_spill] sm:$0xff] %v12881_v31 }
 0x352   : > { %v12885_v8 = vpop.f32.mrf.mxu1 }
 0x353   : > { %15004 = vst [vmem:[#allocation45_spill] sm:$0xff] %v12885_v8 }
 0x354   : > { %v12889_v33 = vpop.f32.mrf.mxu1 }
 0x355   : > { %15005 = vst [vmem:[#allocation41_spill] sm:$0xff] %v12889_v33 }
 0x356   : > { %v12893_v1 = vpop.f32.mrf.mxu1 }
 0x357   : > { %15006 = vst [vmem:[#allocation44_spill] sm:$0xff] %v12893_v1  ;;  %v12917_v1 = vpop.f32.mrf.mxu0 }
 0x35e   : > { %v12897_v58 = vpop.f32.mrf.mxu1 }
 0x35f   : > { %15007 = vst [vmem:[#allocation84_spill] sm:$0xff] %v12897_v58 }
 0x360   : > { %v12899_v17 = vpop.f32.mrf.mxu1 }
 0x361   : > { %15008 = vst [vmem:[#allocation85_spill] sm:$0xff] %v12899_v17  ;;  %v12921_v17 = vpop.f32.mrf.mxu0 }
 0x362   : > { %v12903_v38 = vpop.f32.mrf.mxu1  ;;  %v3369_v16 = vadd.f32 %v12921_v17, %v12817_v21 }
 0x363   : > { %15009 = vst [vmem:[#allocation86_spill] sm:$0xff] %v12903_v38  ;;  %v12925_v38 = vpop.f32.mrf.mxu0 }
 0x364   : > { %v12907_v7 = vpop.f32.mrf.mxu1 }
 0x365   : > { %15010 = vst [vmem:[#allocation87_spill] sm:$0xff] %v12907_v7  ;;  %v12931_v31 = vpop.f32.mrf.mxu0 }
 0x366   : > { %v3375_v21 = vadd.f32 %v12931_v31, %v12829_v9 }
 0x367   : > { %v12911_v4 = vpop.f32.mrf.mxu1  ;;  %v12935_v2 = vpop.f32.mrf.mxu0 }
 0x368   : > { %15011 = vst [vmem:[#allocation49_spill] sm:$0xff] %v12911_v4 }
 0x369   : > { %v12915_v32 = vpop.f32.mrf.mxu1 }
 0x36a   : > { %15012 = vst [vmem:[#allocation47_spill] sm:$0xff] %v12915_v32 }
 0x36b   : > { %v12919_v58 = vpop.f32.mrf.mxu1 }
 0x36c   : > { %15013 = vst [vmem:[#allocation48_spill] sm:$0xff] %v12919_v58  ;;  %v12941_v58 = vpop.f32.mrf.mxu0 }
 0x36d   : > { %v12923_v33 = vpop.f32.mrf.mxu1  ;;  %v3379_v9 = vadd.f32 %v12941_v58, %v12840_v28  ;;  %v15028_v28 = vld [vmem:[#allocation73_spill] sm:$0xff] }
 0x36e   : > { %15014 = vst [vmem:[#allocation50_spill] sm:$0xff] %v12923_v33  ;;  %v12945_v33 = vpop.f32.mrf.mxu0 }
 0x36f   : > { %15021 = vst [vmem:[#allocation52_spill] sm:$0xff] %v12945_v33 }
 0x376   : > { %v12927_v8 = vpop.f32.mrf.mxu1 }
 0x377   : > { %15015 = vst [vmem:[#allocation88_spill] sm:$0xff] %v12927_v8 }
 0x378   : > { %v12929_v7 = vpop.f32.mrf.mxu1 }
 0x379   : > { %15016 = vst [vmem:[#allocation89_spill] sm:$0xff] %v12929_v7  ;;  %v2216_v7 = vld [vmem:[#allocation10 + $0x1] ss:$8 sm:$0x3] }
 0x37a   : > { %v12933_v4 = vpop.f32.mrf.mxu1 }
 0x37b   : > { %15017 = vst [vmem:[#allocation46_spill] sm:$0xff] %v12933_v4  ;;  %v12952_v4 = vpop.f32.mrf.mxu0 }
 0x37c   : > { %v12937_v32 = vpop.f32.mrf.mxu1  ;;  %v3385_v58 = vadd.f32 %v12952_v4, %v15028_v28 }
 0x37d   : > { %15018 = vst [vmem:[#allocation90_spill] sm:$0xff] %v12937_v32  ;;  %v3325_v32 = vadd.f32 %v3324_v44, %v12725_v27  ;;  %v12964_v33 = vpop.f32.mrf.mxu0 }
 0x381   : > { %v12939_v24 = vpop.f32.mrf.mxu1 }
 0x382   : > { %15019 = vst [vmem:[#allocation91_spill] sm:$0xff] %v12939_v24  ;;  %v15024_v24 = vld [vmem:[#allocation99_spill] sm:$0xff] }
 0x383   : > { %v12943_v41 = vpop.f32.mrf.mxu1  ;;  %v15025_v11 = vsub.s32 0, %v15024_v24 }
 0x384   : > { %15020 = vst [vmem:[#allocation53_spill] sm:$0xff] %v12943_v41 }
 0x385   : > { %v12947_v46 = vpop.f32.mrf.mxu1  ;;  %v12957_v25 = vrot.slane %v2216_v7, %v15025_v11  ;;  %v3333_v11 = vadd.f32 %v12857_v29, %v12738_v39 }
 0x386   : > { %15022 = vst [vmem:[#allocation51_spill] sm:$0xff] %v12947_v46  ;;  %v15026_v46 = vsub.s32 1, %v15024_v24 }
 0x387   : > { %v12949_v8 = vpop.f32.mrf.mxu1 }
 0x388   : > { %15023 = vst [vmem:[#allocation92_spill] sm:$0xff] %v12949_v8  ;;  %v12962_v8 = vrot.slane %v2216_v7, %v15026_v46  ;;  %v12974_v46 = vpop.f32.mrf.mxu0 }
 0x389   : > { %v3650_v18 = vpop.f32.mrf.mxu1 }
 0x38a   : > { %v3789_v48 = vadd.f32 %v3650_v18, %v3323_v45  ;;  %v12979_v39 = vpop.f32.mrf.mxu0 }
 0x38b   : > { %v3652_v41 = vpop.f32.mrf.mxu1 }
 0x38c   : > { %v3790_v57 = vadd.f32 %v3652_v41, %v3325_v32  ;;  %v3856_v27 = vadd.f32 %v12957_v25, %v3789_v48  ;;  %v3337_v48 = vadd.f32 %v12865_v42, %v12744_v23 }
 0x38d   : > { %v3654_v26 = vpop.f32.mrf.mxu1 }
 0x38e   : > { %v3791_v44 = vadd.f32 %v3654_v26, %v3327_v20  ;;  %v3857_v45 = vadd.f32 %v12962_v8, %v3790_v57  ;;  %v3912_v24 = vmax.f32 %v3856_v27, 0.0 }
 0x38f   : > { %v3656_v18 = vpop.f32.mrf.mxu1 }
 0x390   : > { %v3858_v32 = vadd.f32 %v12957_v25, %v3791_v44  ;;  %v3792_v60 = vadd.f32 %v3656_v18, %v3329_v10  ;;  %v3913_v29 = vmax.f32 %v3857_v45, 0.0 }
 0x391   : > { %v3660_v41 = vpop.f32.mrf.mxu1 }
 0x392   : > { %v3914_v19 = vmax.f32 %v3858_v32, 0.0  ;;  %v3859_v56 = vadd.f32 %v12962_v8, %v3792_v60  ;;  %v3793_v20 = vadd.f32 %v3660_v41, %v3333_v11  ;;  %v3343_v11 = vadd.f32 %v12875_v54, %v12755_v47  ;;  %v12986_v32 = vpop.f32.mrf.mxu0 }
 0x393   : > { %v3662_v57 = vpop.f32.mrf.mxu1 }
 0x394   : > { %v3968_v7 = vpack.c.bf16 %v3914_v19, %v3912_v24  ;;  %v3915_v26 = vmax.f32 %v3859_v56, 0.0  ;;  %v3794_v10 = vadd.f32 %v3662_v57, %v3335_v5  ;;  %v3860_v27 = vadd.f32 %v12957_v25, %v3793_v20  ;;  %v12997_v19 = vpop.f32.mrf.mxu0 }
 0x395   : > { %v3664_v44 = vpop.f32.mrf.mxu1  ;;  %v3347_v24 = vadd.f32 %v12883_v51, %v12768_v14 }
 0x396   : > { %v3969_v12 = vpack.c.bf16 %v3915_v26, %v3913_v29  ;;  %v3795_v18 = vadd.f32 %v3664_v44, %v3337_v48  ;;  %v3861_v42 = vadd.f32 %v12962_v8, %v3794_v10  ;;  %v3916_v5 = vmax.f32 %v3860_v27, 0.0 }
 0x397   : > { %v3666_v23 = vpop.f32.mrf.mxu1  ;;  %v3353_v44 = vadd.f32 %v12891_v59, %v12772_v30 }
 0x398   : > { %v3862_v45 = vadd.f32 %v12957_v25, %v3795_v18  ;;  %v3796_v60 = vadd.f32 %v3666_v23, %v3339_v40  ;;  %8672 = vmatprep.mubr.msk.bf16.mxu0 %vm2930_vm4, %v3969_v12  ;;  %8695 = vmatprep.mubr.msk.bf16.mxu1 %vm2930_vm4, %v3969_v12  ;;  %v3917_v20 = vmax.f32 %v3861_v42, 0.0  ;;  %v13004_v40 = vpop.f32.mrf.mxu0  ;;  %v3357_v42 = vadd.f32 %v12901_v49, %v12785_v61 }
 0x399   : > { %v3670_v52 = vpop.f32.mrf.mxu1  ;;  %4145 = vmatmul.mubr.bf16.vlgmr.msra.gmra.mxu0 %v3968_v7  ;;  %4364 = vmatmul.mubr.bf16.vlgmr.msra.gmra.mxu1 %v3968_v7 }
 0x39a   : > { %v3918_v47 = vmax.f32 %v3862_v45, 0.0  ;;  %v3863_v54 = vadd.f32 %v12962_v8, %v3796_v60  ;;  %v3797_v41 = vadd.f32 %v3670_v52, %v3343_v11  ;;  %v13012_v22 = vpop.f32.mrf.mxu0 }
 0x39b   : > { %v3672_v56 = vpop.f32.mrf.mxu1 }
 0x39c   : > { %v3970_v48 = vpack.c.bf16 %v3918_v47, %v3916_v5  ;;  %v3919_v57 = vmax.f32 %v3863_v54, 0.0  ;;  %v3798_v29 = vadd.f32 %v3672_v56, %v3345_v63  ;;  %v3864_v7 = vadd.f32 %v12957_v25, %v3797_v41  ;;  %v13017_v47 = vpop.f32.mrf.mxu0 }
 0x39d   : > { %v3674_v26 = vpop.f32.mrf.mxu1  ;;  %v3363_v56 = vadd.f32 %v12909_v13, %v12798_v62 }
 0x39e   : > { %v3971_v0 = vpack.c.bf16 %v3919_v57, %v3917_v20  ;;  %v3799_v10 = vadd.f32 %v3674_v26, %v3347_v24  ;;  %v3865_v51 = vadd.f32 %v12962_v8, %v3798_v29  ;;  %v3920_v30 = vmax.f32 %v3864_v7, 0.0  ;;  %v13030_v43 = vpop.f32.mrf.mxu0 }
 0x39f   : > { %v3676_v14 = vpop.f32.mrf.mxu1 }
 0x3a0   : > { %v3866_v12 = vadd.f32 %v12957_v25, %v3799_v10  ;;  %v3800_v27 = vadd.f32 %v3676_v14, %v3349_v3  ;;  %8673 = vmatprep.mubr.msk.bf16.mxu0 %vm2930_vm4, %v3971_v0  ;;  %8696 = vmatprep.mubr.msk.bf16.mxu1 %vm2930_vm4, %v3971_v0  ;;  %v3921_v60 = vmax.f32 %v3865_v51, 0.0  ;;  %v3367_v3 = vadd.f32 %v12917_v1, %v12811_v53  ;;  %v13035_v51 = vpop.f32.mrf.mxu0 }
 0x3a1   : > { %v3680_v18 = vpop.f32.mrf.mxu1  ;;  %4153 = vmatmul.mubr.bf16.gmra.mxu0 %v3970_v48  ;;  %4372 = vmatmul.mubr.bf16.gmra.mxu1 %v3970_v48 }
 0x3a2   : > { %v3922_v59 = vmax.f32 %v3866_v12, 0.0  ;;  %v3867_v11 = vadd.f32 %v12962_v8, %v3800_v27  ;;  %v3801_v23 = vadd.f32 %v3680_v18, %v3353_v44  ;;  %v3373_v18 = vadd.f32 %v12925_v38, %v12820_v50 }
 0x3a3   : > { %v3682_v45 = vpop.f32.mrf.mxu1 }
 0x3a4   : > { %v3972_v63 = vpack.c.bf16 %v3922_v59, %v3920_v30  ;;  %v3923_v52 = vmax.f32 %v3867_v11, 0.0  ;;  %v3802_v5 = vadd.f32 %v3682_v45, %v3355_v34  ;;  %v3868_v41 = vadd.f32 %v12957_v25, %v3801_v23  ;;  %v13042_v30 = vpop.f32.mrf.mxu0 }
 0x3a5   : > { %v3684_v15 = vpop.f32.mrf.mxu1  ;;  %v3377_v45 = vadd.f32 %v12935_v2, %v12831_v6 }
 0x3a6   : > { %v3973_v54 = vpack.c.bf16 %v3923_v52, %v3921_v60  ;;  %v3803_v24 = vadd.f32 %v3684_v15, %v3357_v42  ;;  %v3869_v61 = vadd.f32 %v12962_v8, %v3802_v5  ;;  %v3924_v29 = vmax.f32 %v3868_v41, 0.0  ;;  %v13053_v60 = vpop.f32.mrf.mxu0 }
 0x3a7   : > { %v3686_v20 = vpop.f32.mrf.mxu1 }
 0x3a8   : > { %v3870_v49 = vadd.f32 %v12957_v25, %v3803_v24  ;;  %v3804_v48 = vadd.f32 %v3686_v20, %v3359_v37  ;;  %8674 = vmatprep.mubr.msk.bf16.mxu0 %vm2930_vm4, %v3973_v54  ;;  %8697 = vmatprep.mubr.msk.bf16.mxu1 %vm2930_vm4, %v3973_v54  ;;  %v3925_v7 = vmax.f32 %v3869_v61, 0.0  ;;  %v13060_v61 = vpop.f32.mrf.mxu0 }
 0x3a9   : > { %v3690_v57 = vpop.f32.mrf.mxu1  ;;  %4161 = vmatmul.mubr.bf16.gmra.mxu0 %v3972_v63  ;;  %4380 = vmatmul.mubr.bf16.gmra.mxu1 %v3972_v63 }
 0x3aa   : > { %v3926_v62 = vmax.f32 %v3870_v49, 0.0  ;;  %v3871_v13 = vadd.f32 %v12962_v8, %v3804_v48  ;;  %v3805_v26 = vadd.f32 %v3690_v57, %v3363_v56  ;;  %v15027_v56 = vld [vmem:[#allocation52_spill] sm:$0xff] }
 0x3ab   : > { %v3692_v0 = vpop.f32.mrf.mxu1  ;;  %v3383_v20 = vadd.f32 %v15027_v56, %v12842_v35 }
 0x3ac   : > { %v3974_v10 = vpack.c.bf16 %v3926_v62, %v3924_v29  ;;  %v3927_v44 = vmax.f32 %v3871_v13, 0.0  ;;  %v3806_v14 = vadd.f32 %v3692_v0, %v3365_v36  ;;  %v3872_v27 = vadd.f32 %v12957_v25, %v3805_v26  ;;  %v15029_v13 = vld [vmem:[#allocation75_spill] sm:$0xff] }
 0x3ad   : > { %v3694_v55 = vpop.f32.mrf.mxu1  ;;  %v3387_v26 = vadd.f32 %v12964_v33, %v15029_v13 }
 0x3ae   : > { %v3975_v12 = vpack.c.bf16 %v3927_v44, %v3925_v7  ;;  %v3807_v34 = vadd.f32 %v3694_v55, %v3367_v3  ;;  %v3873_v1 = vadd.f32 %v12962_v8, %v3806_v14  ;;  %v3928_v23 = vmax.f32 %v3872_v27, 0.0  ;;  %v13071_v3 = vpop.f32.mrf.mxu0 }
 0x3af   : > { %v3696_v53 = vpop.f32.mrf.mxu1 }
 0x3b0   : > { %v3874_v59 = vadd.f32 %v12957_v25, %v3807_v34  ;;  %v3808_v11 = vadd.f32 %v3696_v53, %v3369_v16  ;;  %8675 = vmatprep.mubr.msk.bf16.mxu0 %vm2930_vm4, %v3975_v12  ;;  %8698 = vmatprep.mubr.msk.bf16.mxu1 %vm2930_vm4, %v3975_v12  ;;  %v3929_v52 = vmax.f32 %v3873_v1, 0.0  ;;  %v13073_v55 = vpop.f32.mrf.mxu0  ;;  %v15030_v16 = vld [vmem:[#allocation76_spill] sm:$0xff]  ;;  %v15031_v53 = vld [vmem:[#allocation38_spill] sm:$0xff] }
 0x3b1   : > { %v3700_v17 = vpop.f32.mrf.mxu1  ;;  %4169 = vmatmul.mubr.bf16.gmra.mxu0 %v3974_v10  ;;  %4388 = vmatmul.mubr.bf16.gmra.mxu1 %v3974_v10  ;;  %v3389_v12 = vadd.f32 %v12974_v46, %v15030_v16  ;;  %v3393_v33 = vadd.f32 %v12979_v39, %v15031_v53 }
 0x3b2   : > { %v3930_v50 = vmax.f32 %v3874_v59, 0.0  ;;  %v3875_v38 = vadd.f32 %v12962_v8, %v3808_v11  ;;  %v3809_v42 = vadd.f32 %v3700_v17, %v3373_v18  ;;  %v15032_v17 = vld [vmem:[#allocation39_spill] sm:$0xff] }
 0x3b3   : > { %v3702_v63 = vpop.f32.mrf.mxu1  ;;  %v3395_v46 = vadd.f32 %v12986_v32, %v15032_v17 }
 0x3b4   : > { %v3976_v5 = vpack.c.bf16 %v3930_v50, %v3928_v23  ;;  %v3931_v15 = vmax.f32 %v3875_v38, 0.0  ;;  %v3810_v37 = vadd.f32 %v3702_v63, %v3375_v21  ;;  %v3876_v41 = vadd.f32 %v12957_v25, %v3809_v42  ;;  %v13086_v23 = vpop.f32.mrf.mxu0  ;;  %v15033_v63 = vld [vmem:[#allocation40_spill] sm:$0xff] }
 0x3b5   : > { %v3704_v54 = vpop.f32.mrf.mxu1 }
 0x3b6   : > { %v3977_v31 = vpack.c.bf16 %v3931_v15, %v3929_v52  ;;  %v3811_v24 = vadd.f32 %v3704_v54, %v3377_v45  ;;  %v3877_v2 = vadd.f32 %v12962_v8, %v3810_v37  ;;  %v3932_v57 = vmax.f32 %v3876_v41, 0.0  ;;  %v15034_v41 = vld [vmem:[#allocation42_spill] sm:$0xff] }
 0x3b7   : > { %v3706_v6 = vpop.f32.mrf.mxu1  ;;  %v3397_v52 = vadd.f32 %v12997_v19, %v15033_v63 }
 0x3b8   : > { %v3878_v49 = vadd.f32 %v12957_v25, %v3811_v24  ;;  %v3812_v48 = vadd.f32 %v3706_v6, %v3379_v9  ;;  %8676 = vmatprep.mubr.msk.bf16.mxu0 %vm2930_vm4, %v3977_v31  ;;  %8699 = vmatprep.mubr.msk.bf16.mxu1 %vm2930_vm4, %v3977_v31  ;;  %v3933_v7 = vmax.f32 %v3877_v2, 0.0  ;;  %v13091_v31 = vpop.f32.mrf.mxu0  ;;  %v3399_v24 = vadd.f32 %v13004_v40, %v15034_v41  ;;  %v15035_v2 = vld [vmem:[#allocation79_spill] sm:$0xff]  ;;  %v15042_v41 = vld [vmem:[#allocation44_spill] sm:$0xff] }
 0x3b9   : > { %v3710_v36 = vpop.f32.mrf.mxu1  ;;  %4177 = vmatmul.mubr.bf16.gmra.mxu0 %v3976_v5  ;;  %4396 = vmatmul.mubr.bf16.gmra.mxu1 %v3976_v5 }
 0x3ba   : > { %v3934_v35 = vmax.f32 %v3878_v49, 0.0  ;;  %v3879_v29 = vadd.f32 %v12962_v8, %v3812_v48  ;;  %v3813_v62 = vadd.f32 %v3710_v36, %v3383_v20  ;;  %v3403_v49 = vadd.f32 %v13012_v22, %v15035_v2  ;;  %v15036_v36 = vld [vmem:[#allocation80_spill] sm:$0xff] }
 0x3bb   : > { %v3712_v0 = vpop.f32.mrf.mxu1  ;;  %v3405_v40 = vadd.f32 %v13017_v47, %v15036_v36 }
 0x3bc   : > { %v3978_v10 = vpack.c.bf16 %v3934_v35, %v3932_v57  ;;  %v3935_v44 = vmax.f32 %v3879_v29, 0.0  ;;  %v3814_v14 = vadd.f32 %v3712_v0, %v3385_v58  ;;  %v3880_v34 = vadd.f32 %v12957_v25, %v3813_v62  ;;  %v13104_v57 = vpop.f32.mrf.mxu0 }
 0x3bd   : > { %v3714_v4 = vpop.f32.mrf.mxu1 }
 0x3be   : > { %v3979_v27 = vpack.c.bf16 %v3935_v44, %v3933_v7  ;;  %v3815_v18 = vadd.f32 %v3714_v4, %v3387_v26  ;;  %v3881_v59 = vadd.f32 %v12962_v8, %v3814_v14  ;;  %v3936_v38 = vmax.f32 %v3880_v34, 0.0  ;;  %v15037_v26 = vld [vmem:[#allocation43_spill] sm:$0xff]  ;;  %v13109_v7 = vpop.f32.mrf.mxu0 }
 0x3bf   : > { %v3716_v1 = vpop.f32.mrf.mxu1  ;;  %v3407_v0 = vadd.f32 %v13030_v43, %v15037_v26 }
 0x3c0   : > { %v3882_v11 = vadd.f32 %v12957_v25, %v3815_v18  ;;  %v3816_v21 = vadd.f32 %v3716_v1, %v3389_v12  ;;  %8677 = vmatprep.mubr.msk.bf16.mxu0 %vm2930_vm4, %v3979_v27  ;;  %8700 = vmatprep.mubr.msk.bf16.mxu1 %vm2930_vm4, %v3979_v27  ;;  %v3937_v15 = vmax.f32 %v3881_v59, 0.0  ;;  %v15038_v12 = vld [vmem:[#allocation82_spill] sm:$0xff]  ;;  %v13116_v59 = vpop.f32.mrf.mxu0 }
 0x3c1   : > { %v3720_v50 = vpop.f32.mrf.mxu1  ;;  %4185 = vmatmul.mubr.bf16.gmra.mxu0 %v3978_v10  ;;  %4404 = vmatmul.mubr.bf16.gmra.mxu1 %v3978_v10  ;;  %v3409_v27 = vadd.f32 %v13035_v51, %v15038_v12  ;;  %v15040_v51 = vld [vmem:[#allocation45_spill] sm:$0xff] }
 0x3c2   : > { %v3938_v39 = vmax.f32 %v3882_v11, 0.0  ;;  %v3883_v42 = vadd.f32 %v12962_v8, %v3816_v21  ;;  %v3817_v45 = vadd.f32 %v3720_v50, %v3393_v33  ;;  %v15039_v33 = vld [vmem:[#allocation83_spill] sm:$0xff] }
 0x3c3   : > { %v3722_v5 = vpop.f32.mrf.mxu1  ;;  %v3413_v1 = vadd.f32 %v13042_v30, %v15039_v33 }
 0x3c4   : > { %v3980_v37 = vpack.c.bf16 %v3938_v39, %v3936_v38  ;;  %v3939_v54 = vmax.f32 %v3883_v42, 0.0  ;;  %v3818_v9 = vadd.f32 %v3722_v5, %v3395_v46  ;;  %v3884_v20 = vadd.f32 %v12957_v25, %v3817_v45  ;;  %v15041_v45 = vld [vmem:[#allocation41_spill] sm:$0xff] }
 0x3c5   : > { %v3724_v32 = vpop.f32.mrf.mxu1  ;;  %v3415_v46 = vadd.f32 %v13053_v60, %v15040_v51  ;;  %v3417_v63 = vadd.f32 %v13060_v61, %v15041_v45  ;;  %v3419_v60 = vadd.f32 %v13071_v3, %v15042_v41 }
 0x3c6   : > { %v3981_v56 = vpack.c.bf16 %v3939_v54, %v3937_v15  ;;  %v3819_v6 = vadd.f32 %v3724_v32, %v3397_v52  ;;  %v3885_v19 = vadd.f32 %v12962_v8, %v3818_v9  ;;  %v3940_v29 = vmax.f32 %v3884_v20, 0.0  ;;  %v3436_v52 = vpop.f32.mrf.mxu0 }
 0x3c7   : > { %v3726_v48 = vpop.f32.mrf.mxu1 }
 0x3c8   : > { %v3886_v28 = vadd.f32 %v12957_v25, %v3819_v6  ;;  %v3820_v58 = vadd.f32 %v3726_v48, %v3399_v24  ;;  %8678 = vmatprep.mubr.msk.bf16.mxu0 %vm2930_vm4, %v3981_v56  ;;  %8701 = vmatprep.mubr.msk.bf16.mxu1 %vm2930_vm4, %v3981_v56  ;;  %v3941_v44 = vmax.f32 %v3885_v19, 0.0  ;;  %v15043_v6 = vld [vmem:[#allocation84_spill] sm:$0xff] }
 0x3c9   : > { %v3730_v35 = vpop.f32.mrf.mxu1  ;;  %4193 = vmatmul.mubr.bf16.gmra.mxu0 %v3980_v37  ;;  %4412 = vmatmul.mubr.bf16.gmra.mxu1 %v3980_v37  ;;  %v3423_v2 = vadd.f32 %v13073_v55, %v15043_v6 }
 0x3ca   : > { %v3942_v22 = vmax.f32 %v3886_v28, 0.0  ;;  %v3887_v62 = vadd.f32 %v12962_v8, %v3820_v58  ;;  %v3821_v13 = vadd.f32 %v3730_v35, %v3403_v49  ;;  %v3438_v49 = vpop.f32.mrf.mxu0  ;;  %v15044_v58 = vld [vmem:[#allocation85_spill] sm:$0xff] }
 0x3cb   : > { %v3732_v10 = vpop.f32.mrf.mxu1  ;;  %v3425_v3 = vadd.f32 %v13086_v23, %v15044_v58  ;;  %v15046_v23 = vld [vmem:[#allocation87_spill] sm:$0xff] }
 0x3cc   : > { %v3982_v14 = vpack.c.bf16 %v3942_v22, %v3940_v29  ;;  %v3943_v4 = vmax.f32 %v3887_v62, 0.0  ;;  %v3822_v47 = vadd.f32 %v3732_v10, %v3405_v40  ;;  %v3888_v18 = vadd.f32 %v12957_v25, %v3821_v13  ;;  %v3442_v36 = vpop.f32.mrf.mxu0  ;;  %v15045_v62 = vld [vmem:[#allocation86_spill] sm:$0xff] }
 0x3cd   : > { %v3734_v16 = vpop.f32.mrf.mxu1  ;;  %v3427_v13 = vadd.f32 %v13091_v31, %v15045_v62 }
 0x3ce   : > { %v3983_v34 = vpack.c.bf16 %v3943_v4, %v3941_v44  ;;  %v3823_v53 = vadd.f32 %v3734_v16, %v3407_v0  ;;  %v3889_v11 = vadd.f32 %v12962_v8, %v3822_v47  ;;  %v3944_v38 = vmax.f32 %v3888_v18, 0.0  ;;  %v3444_v4 = vpop.f32.mrf.mxu0  ;;  %v15047_v18 = vld [vmem:[#allocation49_spill] sm:$0xff] }
 0x3cf   : > { %v3736_v43 = vpop.f32.mrf.mxu1  ;;  %v3429_v16 = vadd.f32 %v13104_v57, %v15046_v23 }
 0x3d0   : > { %v3890_v21 = vadd.f32 %v12957_v25, %v3823_v53  ;;  %v3824_v17 = vadd.f32 %v3736_v43, %v3409_v27  ;;  %8679 = vmatprep.mubr.msk.bf16.mxu0 %vm2930_vm4, %v3983_v34  ;;  %8702 = vmatprep.mubr.msk.bf16.mxu1 %vm2930_vm4, %v3983_v34  ;;  %v3945_v15 = vmax.f32 %v3889_v11, 0.0  ;;  %v3433_v53 = vadd.f32 %v13109_v7, %v15047_v18  ;;  %v15048_v11 = vld [vmem:[#allocation47_spill] sm:$0xff] }
 0x3d1   : > { %v3740_v50 = vpop.f32.mrf.mxu1  ;;  %4201 = vmatmul.mubr.bf16.gmra.mxu0 %v3982_v14  ;;  %4420 = vmatmul.mubr.bf16.gmra.mxu1 %v3982_v14  ;;  %v3435_v57 = vadd.f32 %v13116_v59, %v15048_v11 }
 0x3d2   : > { %v3946_v30 = vmax.f32 %v3890_v21, 0.0  ;;  %v3891_v39 = vadd.f32 %v12962_v8, %v3824_v17  ;;  %v3825_v42 = vadd.f32 %v3740_v50, %v3413_v1  ;;  %v3446_v21 = vpop.f32.mrf.mxu0 }
 0x3d3   : > { %v3742_v5 = vpop.f32.mrf.mxu1 }
 0x3d4   : > { %v3984_v37 = vpack.c.bf16 %v3946_v30, %v3944_v38  ;;  %v3947_v54 = vmax.f32 %v3891_v39, 0.0  ;;  %v3826_v9 = vadd.f32 %v3742_v5, %v3415_v46  ;;  %v3892_v56 = vadd.f32 %v12957_v25, %v3825_v42  ;;  %v15049_v38 = vld [vmem:[#allocation48_spill] sm:$0xff] }
 0x3d5   : > { %v3744_v32 = vpop.f32.mrf.mxu1  ;;  %v3437_v30 = vadd.f32 %v3436_v52, %v15049_v38 }
 0x3d6   : > { %v3985_v24 = vpack.c.bf16 %v3947_v54, %v3945_v15  ;;  %v3827_v20 = vadd.f32 %v3744_v32, %v3417_v63  ;;  %v3893_v61 = vadd.f32 %v12962_v8, %v3826_v9  ;;  %v3948_v35 = vmax.f32 %v3892_v56, 0.0  ;;  %v3448_v15 = vpop.f32.mrf.mxu0  ;;  %v15050_v54 = vld [vmem:[#allocation50_spill] sm:$0xff] }
 0x3d7   : > { %v3746_v48 = vpop.f32.mrf.mxu1  ;;  %v3439_v59 = vadd.f32 %v3438_v49, %v15050_v54 }
 0x3d8   : > { %v3894_v19 = vadd.f32 %v12957_v25, %v3827_v20  ;;  %v3828_v28 = vadd.f32 %v3746_v48, %v3419_v60  ;;  %8680 = vmatprep.mubr.msk.bf16.mxu0 %vm2930_vm4, %v3985_v24  ;;  %8703 = vmatprep.mubr.msk.bf16.mxu1 %vm2930_vm4, %v3985_v24  ;;  %v3949_v0 = vmax.f32 %v3893_v61, 0.0  ;;  %v15051_v60 = vld [vmem:[#allocation88_spill] sm:$0xff]  ;;  %v3452_v56 = vpop.f32.mrf.mxu0  ;;  %v15052_v48 = vld [vmem:[#allocation89_spill] sm:$0xff] }
 0x3d9   : > { %v3750_v40 = vpop.f32.mrf.mxu1  ;;  %4209 = vmatmul.mubr.bf16.gmra.mxu0 %v3984_v37  ;;  %4428 = vmatmul.mubr.bf16.gmra.mxu1 %v3984_v37  ;;  %v3443_v24 = vadd.f32 %v3442_v36, %v15051_v60  ;;  %v3445_v61 = vadd.f32 %v3444_v4, %v15052_v48  ;;  %v15053_v36 = vld [vmem:[#allocation46_spill] sm:$0xff] }
 0x3da   : > { %v3950_v55 = vmax.f32 %v3894_v19, 0.0  ;;  %v3895_v29 = vadd.f32 %v12962_v8, %v3828_v28  ;;  %v3829_v22 = vadd.f32 %v3750_v40, %v3423_v2  ;;  %v3447_v40 = vadd.f32 %v3446_v21, %v15053_v36  ;;  %v15057_v21 = vld [vmem:[#allocation51_spill] sm:$0xff] }
 0x3db   : > { %v3752_v26 = vpop.f32.mrf.mxu1 }
 0x3dc   : > { %v3986_v10 = vpack.c.bf16 %v3950_v55, %v3948_v35  ;;  %v3951_v44 = vmax.f32 %v3895_v29, 0.0  ;;  %v3830_v14 = vadd.f32 %v3752_v26, %v3425_v3  ;;  %v3896_v27 = vadd.f32 %v12957_v25, %v3829_v22  ;;  %v3454_v35 = vpop.f32.mrf.mxu0 }
 0x3dd   : > { %v3754_v47 = vpop.f32.mrf.mxu1 }
 0x3de   : > { %v3987_v12 = vpack.c.bf16 %v3951_v44, %v3949_v0  ;;  %v3831_v34 = vadd.f32 %v3754_v47, %v3427_v13  ;;  %v3897_v31 = vadd.f32 %v12962_v8, %v3830_v14  ;;  %v3952_v51 = vmax.f32 %v3896_v27, 0.0  ;;  %v15054_v0 = vld [vmem:[#allocation90_spill] sm:$0xff]  ;;  %v15055_v47 = vld [vmem:[#allocation91_spill] sm:$0xff] }
 0x3df   : > { %v3756_v33 = vpop.f32.mrf.mxu1  ;;  %v3453_v23 = vadd.f32 %v3452_v56, %v15055_v47 }
 0x3e0   : > { %v3898_v1 = vadd.f32 %v12957_v25, %v3831_v34  ;;  %v3832_v43 = vadd.f32 %v3756_v33, %v3429_v16  ;;  %8681 = vmatprep.mubr.msk.bf16.mxu0 %vm2930_vm4, %v3987_v12  ;;  %8704 = vmatprep.mubr.msk.bf16.mxu1 %vm2930_vm4, %v3987_v12  ;;  %v3953_v42 = vmax.f32 %v3897_v31, 0.0  ;;  %v3456_v16 = vpop.f32.mrf.mxu0 }
 0x3e1   : > { %v3760_v17 = vpop.f32.mrf.mxu1  ;;  %4217 = vmatmul.mubr.bf16.gmra.mxu0 %v3986_v10  ;;  %4436 = vmatmul.mubr.bf16.gmra.mxu1 %v3986_v10  ;;  %v3449_v10 = vadd.f32 %v3448_v15, %v15054_v0 }
 0x3e2   : > { %v3954_v46 = vmax.f32 %v3898_v1, 0.0  ;;  %v3899_v7 = vadd.f32 %v12962_v8, %v3832_v43  ;;  %v3833_v50 = vadd.f32 %v3760_v17, %v3433_v53  ;;  %v15056_v53 = vld [vmem:[#allocation53_spill] sm:$0xff]  ;;  %v3457_v17 = vadd.f32 %v3456_v16, %v15057_v21 }
 0x3e3   : > { %v3762_v39 = vpop.f32.mrf.mxu1  ;;  %v3455_v33 = vadd.f32 %v3454_v35, %v15056_v53 }
 0x3e4   : > { %v3988_v45 = vpack.c.bf16 %v3954_v46, %v3952_v51  ;;  %v3955_v63 = vmax.f32 %v3899_v7, 0.0  ;;  %v3834_v5 = vadd.f32 %v3762_v39, %v3435_v57  ;;  %v3900_v32 = vadd.f32 %v12957_v25, %v3833_v50  ;;  %v3458_v51 = vpop.f32.mrf.mxu0 }
 0x3e5   : > { %v3764_v37 = vpop.f32.mrf.mxu1 }
 0x3e6   : > { %v3989_v9 = vpack.c.bf16 %v3955_v63, %v3953_v42  ;;  %v3835_v41 = vadd.f32 %v3764_v37, %v3437_v30  ;;  %v3901_v6 = vadd.f32 %v12962_v8, %v3834_v5  ;;  %v3956_v19 = vmax.f32 %v3900_v32, 0.0  ;;  %v15058_v42 = vld [vmem:[#allocation92_spill] sm:$0xff] }
 0x3e7   : > { %v3766_v20 = vpop.f32.mrf.mxu1 }
 0x3e8   : > { %v3902_v52 = vadd.f32 %v12957_v25, %v3835_v41  ;;  %v3836_v2 = vadd.f32 %v3766_v20, %v3439_v59  ;;  %8682 = vmatprep.mubr.msk.bf16.mxu0 %vm2930_vm4, %v3989_v9  ;;  %8705 = vmatprep.mubr.msk.bf16.mxu1 %vm2930_vm4, %v3989_v9  ;;  %v3957_v29 = vmax.f32 %v3901_v6, 0.0 }
 0x3e9   : > { %v3770_v49 = vpop.f32.mrf.mxu1  ;;  %4225 = vmatmul.mubr.bf16.gmra.mxu0 %v3988_v45  ;;  %4444 = vmatmul.mubr.bf16.gmra.mxu1 %v3988_v45  ;;  %v3459_v45 = vadd.f32 %v3458_v51, %v15058_v42 }
 0x3ea   : > { %v3958_v28 = vmax.f32 %v3902_v52, 0.0  ;;  %v3903_v58 = vadd.f32 %v12962_v8, %v3836_v2  ;;  %v3837_v3 = vadd.f32 %v3770_v49, %v3443_v24 }
 0x3eb   : > { %v3772_v55 = vpop.f32.mrf.mxu1 }
 0x3ec   : > { %v3990_v22 = vpack.c.bf16 %v3958_v28, %v3956_v19  ;;  %v3959_v62 = vmax.f32 %v3903_v58, 0.0  ;;  %v3838_v13 = vadd.f32 %v3772_v55, %v3445_v61  ;;  %v3904_v14 = vadd.f32 %v12957_v25, %v3837_v3 }
 0x3ed   : > { %v3774_v26 = vpop.f32.mrf.mxu1 }
 0x3ee   : > { %v3991_v44 = vpack.c.bf16 %v3959_v62, %v3957_v29  ;;  %v3839_v4 = vadd.f32 %v3774_v26, %v3447_v40  ;;  %v3905_v27 = vadd.f32 %v12962_v8, %v3838_v13  ;;  %v3960_v1 = vmax.f32 %v3904_v14, 0.0  ;;  %v10087_v26 = vld [vmem:[%s14561_s12 + $0x4] ss:$8 sps:$4 sm:$0xff]  }
 0x3ef   : > { %v3776_v12 = vpop.f32.mrf.mxu1 }
 0x3f0   : > { %v3906_v34 = vadd.f32 %v12957_v25, %v3839_v4  ;;  %v3840_v18 = vadd.f32 %v3776_v12, %v3449_v10  ;;  %8683 = vmatprep.mubr.msk.bf16.mxu0 %vm2930_vm4, %v3991_v44  ;;  %8706 = vmatprep.mubr.msk.bf16.mxu1 %vm2930_vm4, %v3991_v44  ;;  %v3961_v7 = vmax.f32 %v3905_v27, 0.0 }
 0x3f1   : > { %v3780_v31 = vpop.f32.mrf.mxu1  ;;  %4233 = vmatmul.mubr.bf16.gmra.mxu0 %v3990_v22  ;;  %4452 = vmatmul.mubr.bf16.gmra.mxu1 %v3990_v22 }
 0x3f2   : > { %v3962_v43 = vmax.f32 %v3906_v34, 0.0  ;;  %v3907_v11 = vadd.f32 %v12962_v8, %v3840_v18  ;;  %v3841_v57 = vadd.f32 %v3780_v31, %v3453_v23 }
 0x3f3   : > { %v3782_v46 = vpop.f32.mrf.mxu1 }
 0x3f4   : > { %v3992_v50 = vpack.c.bf16 %v3962_v43, %v3960_v1  ;;  %v3963_v38 = vmax.f32 %v3907_v11, 0.0  ;;  %v3842_v30 = vadd.f32 %v3782_v46, %v3455_v33  ;;  %v3908_v5 = vadd.f32 %v12957_v25, %v3841_v57 }
 0x3f5   : > { %v3784_v39 = vpop.f32.mrf.mxu1 }
 0x3f6   : > { %v3993_v63 = vpack.c.bf16 %v3963_v38, %v3961_v7  ;;  %v3843_v15 = vadd.f32 %v3784_v39, %v3457_v17  ;;  %v3909_v54 = vadd.f32 %v12962_v8, %v3842_v30  ;;  %v3964_v32 = vmax.f32 %v3908_v5, 0.0 }
 0x3f7   : > { %v3786_v37 = vpop.f32.mrf.mxu1 }
 0x3f8   : > { %v3910_v59 = vadd.f32 %v12957_v25, %v3843_v15  ;;  %v3844_v9 = vadd.f32 %v3786_v37, %v3459_v45  ;;  %8684 = vmatprep.mubr.msk.bf16.mxu0 %vm2930_vm4, %v3993_v63  ;;  %8707 = vmatprep.mubr.msk.bf16.mxu1 %vm2930_vm4, %v3993_v63  ;;  %v3965_v24 = vmax.f32 %v3909_v54, 0.0 }
 0x3f9   : > { %4241 = vmatmul.mubr.bf16.gmra.mxu0 %v3992_v50  ;;  %4460 = vmatmul.mubr.bf16.gmra.mxu1 %v3992_v50 }
 0x3fa   : > { %v3966_v41 = vmax.f32 %v3910_v59, 0.0  ;;  %v3911_v60 = vadd.f32 %v12962_v8, %v3844_v9 }
 0x3fc   : > { %v3994_v56 = vpack.c.bf16 %v3966_v41, %v3964_v32  ;;  %v3967_v20 = vmax.f32 %v3911_v60, 0.0 }
 0x3fe   : > { %v3995_v6 = vpack.c.bf16 %v3967_v20, %v3965_v24 }
 0x400   : > { %8685 = vmatprep.mubr.msk.bf16.mxu0 %vm2930_vm4, %v3995_v6  ;;  %8708 = vmatprep.mubr.msk.bf16.mxu1 %vm2930_vm4, %v3995_v6 }
 0x401   : > { %4249 = vmatmul.mubr.bf16.gmra.mxu0 %v3994_v56  ;;  %4468 = vmatmul.mubr.bf16.gmra.mxu1 %v3994_v56 }
 0x402   : > { %8723 = vmatprep.mubr.msk.bf16.mxu0 %vm4735_vm5, %v10087_v26 }
 0x459   : > { %v4146_v25 = vpop.f32.mrf.mxu0  ;;  %v4365_v52 = vpop.f32.mrf.mxu1 }
 0x45a   : > { %v4476_v2 = vmax.f32 %v4146_v25, %v4365_v52 }
 0x45b   : > { %v4148_v48 = vpop.f32.mrf.mxu0  ;;  %v4367_v61 = vpop.f32.mrf.mxu1 }
 0x45c   : > { %v4532_v3 = vrot.slane %v4476_v2, 1 }
 0x45d   : > { %v4149_v49 = vpop.f32.mrf.mxu0  ;;  %v4368_v19 = vpop.f32.mrf.mxu1 }
 0x45e   : > { %v4477_v28 = vmax.f32 %v4149_v49, %v4368_v19 }
 0x45f   : > { %v4151_v58 = vpop.f32.mrf.mxu0  ;;  %v4370_v8 = vpop.f32.mrf.mxu1 }
 0x460   : > { %v4533_v36 = vrot.slane %v4477_v28, 1 }
 0x461   : > { %v4154_v40 = vpop.f32.mrf.mxu0  ;;  %v4373_v35 = vpop.f32.mrf.mxu1 }
 0x462   : > { %v4534_v55 = vsel %vm1050_vm1, %v4532_v3, %v4533_v36  ;;  %v4478_v29 = vmax.f32 %v4154_v40, %v4373_v35 }
 0x463   : > { %v4616_v22 = vmax.f32 %v4476_v2, %v4534_v55  ;;  %v4156_v62 = vpop.f32.mrf.mxu0  ;;  %v4375_v13 = vpop.f32.mrf.mxu1 }
 0x464   : > { %v4535_v0 = vrot.slane %v4478_v29, 1 }
 0x465   : > { %v4157_v10 = vpop.f32.mrf.mxu0  ;;  %v4376_v44 = vpop.f32.mrf.mxu1 }
 0x466   : > { %v4536_v14 = vsel %vm1050_vm1, %v4533_v36, %v4535_v0  ;;  %v4479_v4 = vmax.f32 %v4157_v10, %v4376_v44  ;;  %v10616_v44 = vmov 2  }
 0x467   : > { %v4617_v47 = vmax.f32 %v4477_v28, %v4536_v14  ;;  %v4159_v23 = vpop.f32.mrf.mxu0  ;;  %v4378_v16 = vpop.f32.mrf.mxu1  ;;  %9944 = vset.pattern.permute.xlu1 %v10616_v44  ;;  %v10231_v14 = vld [vmem:[%s14556_s7] sm:$0xff] }
 0x468   : > { %v4537_v12 = vrot.slane %v4479_v4, 1  ;;  %4904 = vperm.xlu1 %9944, %v10231_v14  }
 0x469   : > { %v4162_v27 = vpop.f32.mrf.mxu0  ;;  %v4381_v34 = vpop.f32.mrf.mxu1  ;;  %v13189_v18 = vpack.c.bf16 %v4617_v47, %v4616_v22 }
 0x46a   : > { %v4538_v53 = vsel %vm1050_vm1, %v4535_v0, %v4537_v12  ;;  %v4480_v33 = vmax.f32 %v4162_v27, %v4381_v34 }
 0x46b   : > { %v4618_v31 = vmax.f32 %v4478_v29, %v4538_v53  ;;  %v4164_v1 = vpop.f32.mrf.mxu0  ;;  %v4383_v43 = vpop.f32.mrf.mxu1 }
 0x46c   : > { %v4539_v11 = vrot.slane %v4480_v33, 1  ;;  %v10617_v43 = vmov 3  }
 0x46d   : > { %v4165_v57 = vpop.f32.mrf.mxu0  ;;  %v4384_v21 = vpop.f32.mrf.mxu1  ;;  %9945 = vset.pattern.permute.xlu1 %v10617_v43  ;;  %9947 = vset.pattern.permute.xlu0 %v10617_v43 }
 0x46e   : > { %v4540_v17 = vsel %vm1050_vm1, %v4537_v12, %v4539_v11  ;;  %v4481_v51 = vmax.f32 %v4165_v57, %v4384_v21  ;;  %5023 = vperm.xlu1 %9945, %v10231_v14   ;;  %v10232_v21 = vld [vmem:[%s14556_s7 + $0x10] sm:$0xff] }
 0x46f   : > { %v4619_v46 = vmax.f32 %v4479_v4, %v4540_v17  ;;  %v4167_v7 = vpop.f32.mrf.mxu0  ;;  %v4386_v50 = vpop.f32.mrf.mxu1  ;;  %5031 = vperm.xlu0 %9947, %v10232_v21  }
 0x470   : > { %v4541_v38 = vrot.slane %v4481_v51, 1  ;;  %v14703_v7 = vmov 0.0  }
 0x471   : > { %v4170_v30 = vpop.f32.mrf.mxu0  ;;  %v4389_v39 = vpop.f32.mrf.mxu1  ;;  %v13193_v42 = vpack.c.bf16 %v4619_v46, %v4618_v31  ;;  %9239 = vmatprep.subr.bf16.mxu1 %v14703_v7  ;;  %9249 = vmatprep.mubr.msk.bf16.mxu1 %vm10619_vm7, %v14703_v7 }
 0x472   : > { %v4542_v45 = vsel %vm1050_vm1, %v4539_v11, %v4541_v38  ;;  %v13196_v63 = vmax.f32 %v4170_v30, %v4389_v39  ;;  %v10107_v39 = vld [vmem:[%s14552_s3 + $0x3c] sm:$0xff]  }
 0x473   : > { %v4620_v5 = vmax.f32 %v4480_v33, %v4542_v45  ;;  %v4172_v15 = vpop.f32.mrf.mxu0  ;;  %v4391_v37 = vpop.f32.mrf.mxu1  ;;  %v10106_v33 = vld [vmem:[%s14552_s3 + $0x44] ss:$0 sps:$4 sm:$0x77]   ;;  %9948 = vset.pattern.permute.xlu0 %v10616_v44 }
 0x474   : > { %v4543_v54 = vrot.slane %v13196_v63, 1  ;;  %v5176_v17 = vsel %vm5174_vm6, %v10106_v33, 0 }
 0x475   : > { %v13199_v59 = vpop.f32.mrf.mxu0  ;;  %v13201_v9 = vpop.f32.mrf.mxu1  ;;  %9240 = vmatpush3.bf16.msra.mxu1 %v5176_v17 }
 0x476   : > { %v4544_v32 = vsel %vm1050_vm1, %v4541_v38, %v4543_v54  ;;  %9241 = vmatprep.subr.bf16.mxu1 %v14703_v7 }
 0x477   : > { %v4621_v41 = vmax.f32 %v4481_v51, %v4544_v32  ;;  %v4175_v60 = vpop.f32.mrf.mxu0  ;;  %v4394_v24 = vpop.f32.mrf.mxu1 }
 0x478   : > { %v10233_v60 = vld [vmem:[%s14556_s7 + $0x8] sm:$0xff] }
 0x479   : > { %v13206_v56 = vpop.f32.mrf.mxu0  ;;  %v13208_v20 = vpop.f32.mrf.mxu1  ;;  %v13210_v6 = vpack.c.bf16 %v4621_v41, %v4620_v5  ;;  %5027 = vperm.xlu1 %9945, %v10233_v60   ;;  %4908 = vperm.xlu0 %9948, %v10233_v60   ;;  %v10237_v60 = vld [vmem:[%s14556_s7 + $0x20] sm:$0xff] }
 0x47a   : > { %9242 = vmatpush3.bf16.msra.mxu1 %v10107_v39 }
 0x47b   : > { %v4180_v25 = vpop.f32.mrf.mxu0  ;;  %v4399_v52 = vpop.f32.mrf.mxu1  ;;  %9243 = vmatprep.subr.bf16.mxu1 %v14703_v7 }
 0x47d   : > { %v13212_v2 = vpop.f32.mrf.mxu0  ;;  %v13214_v48 = vpop.f32.mrf.mxu1  ;;  %9946 = vset.pattern.permute.xlu1 %v10616_v44  ;;  %4912 = vperm.xlu0 %9948, %v10232_v21  }
 0x47f   : > { %v4183_v61 = vpop.f32.mrf.mxu0  ;;  %v4402_v49 = vpop.f32.mrf.mxu1 }
 0x481   : > { %v4186_v19 = vpop.f32.mrf.mxu0  ;;  %v4405_v28 = vpop.f32.mrf.mxu1 }
 0x482   : > { %v13247_v24 = vmax.f32 %v4186_v19, %v4405_v28  ;;  %v13259_v28 = vmax.f32 %v13212_v2, %v13214_v48  ;;  %v10234_v2 = vld [vmem:[%s14556_s7 + $0x18] sm:$0xff]  ;;  %v4484_v48 = vmax.f32 %v13206_v56, %v13208_v20  ;;  %v4483_v56 = vmax.f32 %v13199_v59, %v13201_v9 }
 0x483   : > { %v4188_v58 = vpop.f32.mrf.mxu0  ;;  %v4407_v8 = vpop.f32.mrf.mxu1  ;;  %4916 = vperm.xlu1 %9946, %v10234_v2  }
 0x484   : > { %v4549_v20 = vrot.slane %v13259_v28, 1  ;;  %v4547_v59 = vrot.slane %v4484_v48, 1 }
 0x485   : > { %v4189_v3 = vpop.f32.mrf.mxu0  ;;  %v4408_v36 = vpop.f32.mrf.mxu1 }
 0x486   : > { %v13238_v15 = vmax.f32 %v4189_v3, %v4408_v36  ;;  %v10108_v3 = vld [vmem:[%s14552_s3 + $0x34] sm:$0xff]  }
 0x487   : > { %v4191_v40 = vpop.f32.mrf.mxu0  ;;  %v4410_v35 = vpop.f32.mrf.mxu1  ;;  %9244 = vmatpush3.bf16.msra.mxu1 %v10108_v3  ;;  %9949 = vset.pattern.permute.xlu1 %v10617_v43 }
 0x488   : > { %9245 = vmatprep.subr.bf16.mxu1 %v14703_v7  ;;  %5035 = vperm.xlu1 %9949, %v10234_v2  }
 0x489   : > { %v4194_v55 = vpop.f32.mrf.mxu0  ;;  %v4413_v29 = vpop.f32.mrf.mxu1 }
 0x48a   : > { %v4488_v50 = vmax.f32 %v4194_v55, %v4413_v29  ;;  %v4553_v55 = vrot.slane %v13238_v15, 1 }
 0x48b   : > { %v4196_v22 = vpop.f32.mrf.mxu0  ;;  %v4415_v62 = vpop.f32.mrf.mxu1 }
 0x48c   : > { %v4555_v61 = vrot.slane %v4488_v50, 1  ;;  %9950 = vset.pattern.permute.xlu1 %v10616_v44 }
 0x48d   : > { %v4197_v13 = vpop.f32.mrf.mxu0  ;;  %v4416_v26 = vpop.f32.mrf.mxu1  ;;  %4920 = vperm.xlu1 %9950, %v10237_v60  }
 0x48e   : > { %v13225_v11 = vmax.f32 %v4197_v13, %v4416_v26  ;;  %v4556_v14 = vsel %vm1050_vm1, %v4553_v55, %v4555_v61 }
 0x48f   : > { %v4199_v0 = vpop.f32.mrf.mxu0  ;;  %v4418_v10 = vpop.f32.mrf.mxu1 }
 0x490   : > { %v4557_v37 = vrot.slane %v13225_v11, 1  ;;  %v4551_v10 = vrot.slane %v13247_v24, 1 }
 0x491   : > { %v4202_v4 = vpop.f32.mrf.mxu0  ;;  %v4421_v47 = vpop.f32.mrf.mxu1  ;;  %9951 = vset.pattern.permute.xlu1 %v10617_v43 }
 0x492   : > { %v4490_v34 = vmax.f32 %v4202_v4, %v4421_v47  ;;  %v4558_v29 = vsel %vm1050_vm1, %v4555_v61, %v4557_v37  ;;  %v4552_v9 = vsel %vm1050_vm1, %v4549_v20, %v4551_v10  ;;  %5039 = vperm.xlu1 %9951, %v10237_v60  }
 0x493   : > { %v4204_v23 = vpop.f32.mrf.mxu0  ;;  %v4423_v16 = vpop.f32.mrf.mxu1  ;;  %v4628_v47 = vmax.f32 %v4488_v50, %v4558_v29  ;;  %v4625_v50 = vmax.f32 %v13259_v28, %v4552_v9  ;;  %v10238_v29 = vld [vmem:[%s14556_s7 + $0x48] sm:$0xff] }
 0x494   : > { %v4559_v38 = vrot.slane %v4490_v34, 1 }
 0x495   : > { %v4205_v12 = vpop.f32.mrf.mxu0  ;;  %v4424_v27 = vpop.f32.mrf.mxu1 }
 0x496   : > { %v4491_v53 = vmax.f32 %v4205_v12, %v4424_v27  ;;  %v4560_v49 = vsel %vm1050_vm1, %v4557_v37, %v4559_v38  ;;  %v4554_v27 = vsel %vm1050_vm1, %v4551_v10, %v4553_v55  ;;  %v10239_v10 = vld [vmem:[%s14556_s7 + $0x38] sm:$0xff] }
 0x497   : > { %v4207_v31 = vpop.f32.mrf.mxu0  ;;  %v4426_v1 = vpop.f32.mrf.mxu1  ;;  %v4629_v62 = vmax.f32 %v13225_v11, %v4560_v49  ;;  %v10235_v11 = vld [vmem:[%s14556_s7 + $0x28] sm:$0xff] }
 0x498   : > { %v4561_v57 = vrot.slane %v4491_v53, 1  ;;  %4924 = vperm.xlu0 %9948, %v10235_v11   ;;  %5043 = vperm.xlu1 %9951, %v10235_v11  }
 0x499   : > { %v4210_v51 = vpop.f32.mrf.mxu0  ;;  %v4429_v46 = vpop.f32.mrf.mxu1  ;;  %v4664_v1 = vpack.c.bf16 %v4629_v62, %v4628_v47 }
 0x49a   : > { %v13232_v30 = vmax.f32 %v4210_v51, %v4429_v46  ;;  %v4562_v32 = vsel %vm1050_vm1, %v4559_v38, %v4561_v57  ;;  %v4545_v51 = vrot.slane %v4483_v56, 1  ;;  %v4550_v46 = vsel %vm1050_vm1, %v4547_v59, %v4549_v20 }
 0x49b   : > { %v4212_v45 = vpop.f32.mrf.mxu0  ;;  %v4431_v5 = vpop.f32.mrf.mxu1  ;;  %v4630_v36 = vmax.f32 %v4490_v34, %v4562_v32  ;;  %v15059_v34 = vmov 0   ;;  %v4624_v37 = vmax.f32 %v4484_v48, %v4550_v46 }
 0x49c   : > { %v4563_v41 = vrot.slane %v13232_v30, 1  ;;  %9953 = vset.pattern.permute.xlu0 %v10617_v43  ;;  %v4548_v5 = vsel %vm1050_vm1, %v4545_v51, %v4547_v59  ;;  %9952 = vset.pattern.permute.xlu1 %v10616_v44  ;;  %v10241_v59 = vld [vmem:[%s14556_s7 + $0x40] sm:$0xff] }
 0x49d   : > { %v4213_v25 = vpop.f32.mrf.mxu0  ;;  %v4432_v52 = vpop.f32.mrf.mxu1  ;;  %v4662_v49 = vpack.c.bf16 %v4625_v50, %v4624_v37  ;;  %4932 = vperm.xlu1 %9952, %v10239_v10  }
 0x49e   : > { %v4564_v58 = vsel %vm1050_vm1, %v4561_v57, %v4563_v41  ;;  %v13251_v8 = vmax.f32 %v4213_v25, %v4432_v52  ;;  %v4626_v57 = vmax.f32 %v13247_v24, %v4554_v27  ;;  %v4546_v24 = vsel %vm1050_vm1, %v4543_v54, %v4545_v51 }
 0x49f   : > { %v4631_v40 = vmax.f32 %v4491_v53, %v4564_v58  ;;  %v4215_v35 = vpop.f32.mrf.mxu0  ;;  %v4434_v19 = vpop.f32.mrf.mxu1  ;;  %v4627_v53 = vmax.f32 %v13238_v15, %v4556_v14  ;;  %v10236_v15 = vld [vmem:[%s14556_s7 + $0x30] sm:$0xff]  ;;  %v4623_v25 = vmax.f32 %v4483_v56, %v4548_v5  ;;  %v4622_v58 = vmax.f32 %v13196_v63, %v4546_v24 }
 0x4a0   : > { %v4565_v22 = vrot.slane %v13251_v8, 1  ;;  %5047 = vperm.xlu0 %9953, %v10236_v15   ;;  %v10240_v14 = vld [vmem:[%s14556_s7 + $0x50] sm:$0xff] }
 0x4a1   : > { %v13266_v13 = vpop.f32.mrf.mxu0  ;;  %v13268_v26 = vpop.f32.mrf.mxu1  ;;  %v4665_v0 = vpack.c.bf16 %v4631_v40, %v4630_v36  ;;  %v4663_v45 = vpack.c.bf16 %v4627_v53, %v4626_v57  ;;  %v4661_v35 = vpack.c.bf16 %v4623_v25, %v4622_v58  ;;  %9955 = vset.pattern.permute.xlu1 %v10617_v43 }
 0x4a2   : > { %v13280_v4 = vsel %vm1050_vm1, %v4563_v41, %v4565_v22  ;;  %5051 = vperm.xlu1 %9955, %v10239_v10  }
 0x4a3   : > { %v4632_v23 = vmax.f32 %v13232_v30, %v13280_v4  ;;  %v4220_v16 = vpop.f32.mrf.mxu0  ;;  %v4439_v12 = vpop.f32.mrf.mxu1  ;;  %4758 = vmatpush1.bf16.msra.mxu0 %v4665_v0  ;;  %v10110_v30 = vld [vmem:[%s14552_s3 + $0x18] sm:$0xff]  }
 0x4a4   : > { %4759 = vmatprep.subr.bf16.mxu0 %v15059_v34  ;;  %9954 = vset.pattern.permute.xlu0 %v10616_v44  ;;  %v10090_v4 = vld [vmem:[%s14561_s12 + $0x10] ss:$8 sps:$4 sm:$0xff]  }
 0x4a5   : > { %v13291_v33 = vpop.f32.mrf.mxu0  ;;  %v13293_v31 = vpop.f32.mrf.mxu1  ;;  %4928 = vperm.xlu0 %9954, %v10236_v15  }
 0x4a6   : > { %9956 = vset.pattern.permute.xlu1 %v10616_v44 }
 0x4a7   : > { %v4223_v21 = vpop.f32.mrf.mxu0  ;;  %v4442_v17 = vpop.f32.mrf.mxu1  ;;  %4760 = vmatpush1.bf16.msra.mxu0 %v4664_v1  ;;  %4936 = vperm.xlu1 %9956, %v10241_v59  }
 0x4a8   : > { %4761 = vmatprep.subr.bf16.mxu0 %v15059_v34 }
 0x4a9   : > { %v13304_v38 = vpop.f32.mrf.mxu0  ;;  %v13306_v39 = vpop.f32.mrf.mxu1  ;;  %4940 = vperm.xlu0 %9954, %v10238_v29  }
 0x4ab   : > { %v4228_v32 = vpop.f32.mrf.mxu0  ;;  %v4447_v41 = vpop.f32.mrf.mxu1  ;;  %4762 = vmatpush1.bf16.msra.mxu0 %v4663_v45  ;;  %9957 = vset.pattern.permute.xlu1 %v10617_v43 }
 0x4ac   : > { %4763 = vmatprep.subr.bf16.mxu0 %v15059_v34  ;;  %5055 = vperm.xlu1 %9957, %v10241_v59   ;;  %v10094_v59 = vld [vmem:[%s14561_s12 + $0x34] ss:$8 sps:$4 sm:$0xff]  }
 0x4ad   : > { %v13321_v52 = vpop.f32.mrf.mxu0  ;;  %v13323_v61 = vpop.f32.mrf.mxu1  ;;  %4944 = vperm.xlu0 %9954, %v10240_v14  }
 0x4af   : > { %v4231_v3 = vpop.f32.mrf.mxu0  ;;  %v4450_v36 = vpop.f32.mrf.mxu1  ;;  %4764 = vmatpush1.bf16.msra.mxu0 %v4662_v49 }
 0x4b0   : > { %4765 = vmatprep.subr.bf16.mxu0 %v15059_v34  ;;  %v4497_v3 = vmax.f32 %v13321_v52, %v13323_v61  ;;  %5059 = vperm.xlu1 %9957, %v10238_v29  }
 0x4b1   : > { %v4234_v54 = vpop.f32.mrf.mxu0  ;;  %v4453_v40 = vpop.f32.mrf.mxu1  ;;  %9959 = vset.pattern.permute.xlu0 %v10617_v43 }
 0x4b2   : > { %5063 = vperm.xlu0 %9959, %v10240_v14   ;;  %v4498_v32 = vmax.f32 %v4234_v54, %v4453_v40  ;;  %v4496_v54 = vmax.f32 %v13304_v38, %v13306_v39  ;;  %v10243_v38 = vld [vmem:[%s14556_s7 + $0x58] sm:$0xff]  ;;  %v4494_v39 = vmax.f32 %v13266_v13, %v13268_v26 }
 0x4b3   : > { %v4236_v19 = vpop.f32.mrf.mxu0  ;;  %v4455_v28 = vpop.f32.mrf.mxu1  ;;  %4766 = vmatpush1.bf16.msra.mxu0 %v4661_v35 }
 0x4b4   : > { %4767 = vmatprep.subr.bf16.mxu0 %v15059_v34  ;;  %v4575_v40 = vrot.slane %v4498_v32, 1  ;;  %9958 = vset.pattern.permute.xlu1 %v10616_v44 }
 0x4b5   : > { %v4237_v55 = vpop.f32.mrf.mxu0  ;;  %v4456_v63 = vpop.f32.mrf.mxu1  ;;  %4948 = vperm.xlu1 %9958, %v10243_v38  }
 0x4b6   : > { %9962 = vset.pattern.permute.xlu0 %v10616_v44  ;;  %v4499_v5 = vmax.f32 %v4237_v55, %v4456_v63 }
 0x4b7   : > { %v4239_v62 = vpop.f32.mrf.mxu0  ;;  %v4458_v0 = vpop.f32.mrf.mxu1  ;;  %4768 = vmatpush1.bf16.msra.mxu0 %v13210_v6 }
 0x4b8   : > { %4769 = vmatprep.subr.bf16.mxu0 %v15059_v34  ;;  %v4577_v36 = vrot.slane %v4499_v5, 1  ;;  %v4495_v62 = vmax.f32 %v13291_v33, %v13293_v31  ;;  %v4573_v0 = vrot.slane %v4497_v3, 1 }
 0x4b9   : > { %v4242_v2 = vpop.f32.mrf.mxu0  ;;  %v4461_v48 = vpop.f32.mrf.mxu1  ;;  %9960 = vset.pattern.permute.xlu1 %v10617_v43 }
 0x4ba   : > { %v4500_v17 = vmax.f32 %v4242_v2, %v4461_v48  ;;  %v4578_v52 = vsel %vm1050_vm1, %v4575_v40, %v4577_v36  ;;  %v4571_v2 = vrot.slane %v4496_v54, 1  ;;  %v4576_v33 = vsel %vm1050_vm1, %v4573_v0, %v4575_v40  ;;  %5067 = vperm.xlu1 %9960, %v10243_v38  }
 0x4bb   : > { %v4244_v47 = vpop.f32.mrf.mxu0  ;;  %v4463_v16 = vpop.f32.mrf.mxu1  ;;  %4770 = vmatpush1.bf16.msra.mxu0 %v13193_v42  ;;  %v4638_v31 = vmax.f32 %v4498_v32, %v4578_v52  ;;  %v4569_v48 = vrot.slane %v4495_v62, 1  ;;  %v4637_v14 = vmax.f32 %v4497_v3, %v4576_v33  ;;  %v10117_v33 = vld [vmem:[%s14552_s3 + $0x60] sm:$0xff]  }
 0x4bc   : > { %4771 = vmatprep.subr.bf16.mxu0 %v15059_v34  ;;  %v4579_v41 = vrot.slane %v4500_v17, 1  ;;  %v4574_v10 = vsel %vm1050_vm1, %v4571_v2, %v4573_v0  ;;  %v4567_v16 = vrot.slane %v4494_v39, 1 }
 0x4bd   : > { %v4245_v6 = vpop.f32.mrf.mxu0  ;;  %v4464_v12 = vpop.f32.mrf.mxu1 }
 0x4be   : > { %v4501_v9 = vmax.f32 %v4245_v6, %v4464_v12  ;;  %v4580_v55 = vsel %vm1050_vm1, %v4577_v36, %v4579_v41  ;;  %v4572_v6 = vsel %vm1050_vm1, %v4569_v48, %v4571_v2  ;;  %v4636_v12 = vmax.f32 %v4496_v54, %v4574_v10  ;;  %9961 = vset.pattern.permute.xlu1 %v10616_v44  ;;  %v10109_v44 = vld [vmem:[%s14552_s3 + $0x20] ss:$0 sps:$4 sm:$0x77]  }
 0x4bf   : > { %v4247_v56 = vpop.f32.mrf.mxu0  ;;  %v4466_v20 = vpop.f32.mrf.mxu1  ;;  %4772 = vmatpush1.bf16.msra.mxu0 %v13189_v18  ;;  %v13356_v18 = vld [vmem:[%s14556_s7 + $0x68] sm:$0xff]  ;;  %v4639_v61 = vmax.f32 %v4499_v5, %v4580_v55  ;;  %v4570_v13 = vsel %vm1050_vm1, %v4567_v16, %v4569_v48  ;;  %v4635_v26 = vmax.f32 %v4495_v62, %v4572_v6 }
 0x4c0   : > { %4777 = vmatprep.subr.bf16.mxu0 %v15059_v34  ;;  %4956 = vperm.xlu0 %9962, %v13356_v18   ;;  %v4581_v15 = vrot.slane %v4501_v9, 1  ;;  %v4668_v56 = vpack.c.bf16 %v4637_v14, %v4636_v12  ;;  %v4568_v20 = vsel %vm1050_vm1, %v4565_v22, %v4567_v16  ;;  %v10113_v5 = vld [vmem:[%s14552_s3 + $0x24] sm:$0xff]  }
 0x4c1   : > { %v4250_v27 = vpop.f32.mrf.mxu0  ;;  %v4469_v53 = vpop.f32.mrf.mxu1  ;;  %v4669_v47 = vpack.c.bf16 %v4639_v61, %v4638_v31 }
 0x4c2   : > { %v4502_v1 = vmax.f32 %v4250_v27, %v4469_v53  ;;  %v4582_v35 = vsel %vm1050_vm1, %v4579_v41, %v4581_v15  ;;  %v4634_v27 = vmax.f32 %v4494_v39, %v4570_v13  ;;  %v10244_v53 = vld [vmem:[%s14556_s7 + $0x60] sm:$0xff] }
 0x4c3   : > { %v4252_v42 = vpop.f32.mrf.mxu0  ;;  %v4471_v11 = vpop.f32.mrf.mxu1  ;;  %v4640_v63 = vmax.f32 %v4500_v17, %v4582_v35  ;;  %4952 = vperm.xlu1 %9961, %v10244_v53   ;;  %v10102_v17 = vld [vmem:[%s14561_s12 + $0x50] ss:$8 sps:$4 sm:$0xff]  }
 0x4c4   : > { %v4583_v51 = vrot.slane %v4502_v1, 1  ;;  %v4667_v42 = vpack.c.bf16 %v4635_v26, %v4634_v27  ;;  %v10085_v11 = vld [vmem:[%s14561_s12] ss:$8 sps:$4 sm:$0xff]  }
 0x4c5   : > { %v4253_v57 = vpop.f32.mrf.mxu0  ;;  %v4472_v21 = vpop.f32.mrf.mxu1 }
 0x4c6   : > { %v4503_v46 = vmax.f32 %v4253_v57, %v4472_v21  ;;  %v4584_v60 = vsel %vm1050_vm1, %v4581_v15, %v4583_v51  ;;  %v10099_v57 = vld [vmem:[%s14561_s12 + $0x40] ss:$8 sps:$4 sm:$0xff]   ;;  %v10100_v21 = vld [vmem:[%s14561_s12 + $0x54] ss:$8 sps:$4 sm:$0xff]  }
 0x4c7   : > { %v4255_v50 = vpop.f32.mrf.mxu0  ;;  %v4474_v45 = vpop.f32.mrf.mxu1  ;;  %v4641_v19 = vmax.f32 %v4501_v9, %v4584_v60  ;;  %9963 = vset.pattern.permute.xlu1 %v10617_v43  ;;  %v10088_v43 = vld [vmem:[%s14561_s12 + $0x14] ss:$8 sps:$4 sm:$0xff]   ;;  %v10097_v9 = vld [vmem:[%s14561_s12 + $0x44] ss:$8 sps:$4 sm:$0xff]  }
 0x4c8   : > { %v4585_v37 = vrot.slane %v4503_v46, 1  ;;  %5071 = vperm.xlu1 %9963, %v10244_v53   ;;  %v10111_v50 = vld [vmem:[%s14552_s3 + $0x2c] sm:$0xff]  }
 0x4c9   : > { %v4670_v29 = vpack.c.bf16 %v4641_v19, %v4640_v63  ;;  %v10112_v45 = vld [vmem:[%s14552_s3 + $0x10] sm:$0xff]   ;;  %9246 = vmatpush3.bf16.msra.mxu1 %v10111_v50  ;;  %v10114_v15 = vld [vmem:[%s14552_s3 + $0x8] sm:$0xff]  }
 0x4ca   : > { %v4586_v24 = vsel %vm1050_vm1, %v4583_v51, %v4585_v37  ;;  %v4615_v25 = vsel %vm1050_vm1, %v4585_v37, 0.0  ;;  %v10103_v51 = vld [vmem:[%s14561_s12 + $0x64] ss:$8 sps:$4 sm:$0xff]   ;;  %9247 = vmatprep.subr.bf16.mxu1 %v14703_v7  ;;  %v10116_v19 = vld [vmem:[%s14552_s3 + $0x68] ss:$0 sps:$4 sm:$0x77]  }
 0x4cb   : > { %v4642_v49 = vmax.f32 %v4502_v1, %v4586_v24  ;;  %v4643_v58 = vmax.f32 %v4503_v46, %v4615_v25  ;;  %v4633_v1 = vmax.f32 %v13251_v8, %v4568_v20  ;;  %v5316_v8 = vsel %vm5174_vm6, %v10109_v44, 0  ;;  %v10105_v46 = vld [vmem:[%s14561_s12 + $0x60] ss:$8 sps:$4 sm:$0xff]  }
 0x4cc   : > { %5075 = vperm.xlu1 %9963, %v13356_v18   ;;  %v10096_v18 = vld [vmem:[%s14561_s12 + $0x30] ss:$8 sps:$4 sm:$0xff]   ;;  %v10115_v37 = vld [vmem:[%s14552_s3] sm:$0xff]   ;;  %v5466_v0 = vsel %vm5174_vm6, %v10116_v19, 0 }
 0x4cd   : > { %v4671_v28 = vpack.c.bf16 %v4643_v58, %v4642_v49  ;;  %v4666_v22 = vpack.c.bf16 %v4633_v1, %v4632_v23  ;;  %v10091_v23 = vld [vmem:[%s14561_s12 + $0x24] ss:$8 sps:$4 sm:$0xff]   ;;  %9248 = vmatpush3.bf16.msra.mxu1 %v10113_v5 }
 0x4ce   : > { %9315 = vmatprep.subr.bf16.mxu1 %v14703_v7 }
 0x4cf   : > { %4778 = vmatpush2.bf16.msra.mxu0 %v4671_v28 }
 0x4d0   : > { %4779 = vmatprep.subr.bf16.mxu0 %v15059_v34 }
 0x4d3   : > { %4780 = vmatpush2.bf16.msra.mxu0 %v4670_v29 }
 0x4d4   : > { %4781 = vmatprep.subr.bf16.mxu0 %v15059_v34 }
 0x4d7   : > { %4782 = vmatpush2.bf16.msra.mxu0 %v4669_v47  ;;  %v10118_v47 = vld [vmem:[%s14552_s3 + $0x58] sm:$0xff]  }
 0x4d8   : > { %4783 = vmatprep.subr.bf16.mxu0 %v15059_v34 }
 0x4db   : > { %4784 = vmatpush2.bf16.msra.mxu0 %v4668_v56 }
 0x4dc   : > { %4785 = vmatprep.subr.bf16.mxu0 %v15059_v34 }
 0x4df   : > { %4786 = vmatpush2.bf16.msra.mxu0 %v4667_v42  ;;  %v10119_v42 = vld [vmem:[%s14552_s3 + $0x50] sm:$0xff]  }
 0x4e0   : > { %4787 = vmatprep.subr.bf16.mxu0 %v15059_v34  ;;  %v10093_v34 = vld [vmem:[%s14561_s12 + $0x20] ss:$8 sps:$4 sm:$0xff]  }
 0x4e3   : > { %4788 = vmatpush2.bf16.msra.mxu0 %v4666_v22  ;;  %v13480_v32 = vpop.permute.xlu1 %4904 }
 0x4e4   : > { %9277 = vmatprep.subr.bf16.mxu0 %v14703_v7 }
 0x4e6   : > { %4790 = vmatmul.mubr.bf16.vlgmr.msra.gmra.mxu0 %v10085_v11 }
 0x4e7   : > { %8724 = vmatprep.mubr.msk.bf16.mxu0 %vm4735_vm5, %v10088_v43  ;;  %9278 = vmatpush3.bf16.msra.mxu0 %v5316_v8 }
 0x4e8   : > { %9279 = vmatprep.subr.bf16.mxu0 %v14703_v7 }
 0x4e9   : > { %v13482_v41 = vpop.permute.xlu1 %5023 }
 0x4ea   : > { %v13492_v58 = vpop.permute.xlu0 %5031 }
 0x4eb   : > { %9280 = vmatpush3.bf16.msra.mxu0 %v10110_v30 }
 0x4ec   : > { %9281 = vmatprep.subr.bf16.mxu0 %v14703_v7 }
 0x4ee   : > { %4798 = vmatmul.mubr.bf16.gmra.mxu0 %v10090_v4  ;;  %v10120_v4 = vld [vmem:[%s14552_s3 + $0x48] sm:$0xff]  }
 0x4ef   : > { %8725 = vmatprep.mubr.msk.bf16.mxu0 %vm4735_vm5, %v10091_v23  ;;  %9282 = vmatpush3.bf16.msra.mxu0 %v10112_v45 }
 0x4f0   : > { %9283 = vmatprep.subr.bf16.mxu0 %v14703_v7 }
 0x4f3   : > { %9284 = vmatpush3.bf16.msra.mxu0 %v10114_v15 }
 0x4f4   : > { %9285 = vmatprep.subr.bf16.mxu0 %v14703_v7  ;;  %v13484_v60 = vpop.permute.xlu1 %5027  ;;  %v13508_v62 = vpop.permute.xlu0 %4908 }
 0x4f6   : > { %4806 = vmatmul.mubr.bf16.gmra.mxu0 %v10093_v34 }
 0x4f7   : > { %8726 = vmatprep.mubr.msk.bf16.mxu0 %vm4735_vm5, %v10094_v59  ;;  %9286 = vmatpush3.bf16.msra.mxu0 %v10115_v37 }
 0x4f8   : > { %9353 = vmatprep.subr.bf16.mxu0 %v14703_v7  ;;  %v13533_v6 = vpop.permute.xlu0 %4912 }
 0x4fe   : > { %4814 = vmatmul.mubr.bf16.gmra.mxu0 %v10096_v18  ;;  %v13486_v24 = vpop.permute.xlu1 %4916 }
 0x4ff   : > { %8727 = vmatprep.mubr.msk.bf16.mxu0 %vm4735_vm5, %v10097_v9 }
 0x503   : > { %v13488_v25 = vpop.permute.xlu1 %5035 }
 0x506   : > { %4822 = vmatmul.mubr.bf16.gmra.mxu0 %v10099_v57 }
 0x507   : > { %8728 = vmatprep.mubr.msk.bf16.mxu0 %vm4735_vm5, %v10100_v21 }
 0x508   : > { %v13490_v49 = vpop.permute.xlu1 %4920 }
 0x50d   : > { %v13497_v35 = vpop.permute.xlu1 %5039 }
 0x50e   : > { %4830 = vmatmul.mubr.bf16.gmra.mxu0 %v10102_v17 }
 0x50f   : > { %8729 = vmatprep.mubr.msk.bf16.mxu0 %vm4735_vm5, %v10103_v51 }
 0x513   : > { %v13513_v29 = vpop.permute.xlu1 %5043  ;;  %v13555_v22 = vpop.permute.xlu0 %4924 }
 0x516   : > { %4838 = vmatmul.mubr.bf16.gmra.mxu0 %v10105_v46 }
 0x517   : > { %9287 = vmatprep.mubr.msk.bf16.mxu0 %vm10619_vm7, %v14703_v7 }
 0x518   : > { %v13540_v26 = vpop.permute.xlu1 %4932 }
 0x51b   : > { %v13575_v57 = vpop.permute.xlu0 %5047 }
 0x51c   : > { %15060 = vst [vmem:[#allocation93_spill] sm:$0xff] %v13575_v57 }
 0x51d   : > { %v13558_v8 = vpop.permute.xlu1 %5051 }
 0x522   : > { %v13584_v50 = vpop.permute.xlu1 %4936 }
 0x5a6   : > { %v13494_v3 = vpop.f32.mrf.mxu0 }
 0x5a7   : > { %v4861_v36 = vrot.slane %v13494_v3, 7 }
 0x5a8   : > { %v4793_v28 = vpop.f32.mrf.mxu0 }
 0x5a9   : > { %v4902_v40 = vsel %vm783_vm2, 0.0, %v4861_v36 }
 0x5aa   : > { %v13502_v54 = vpop.f32.mrf.mxu0  ;;  %v4959_v38 = vmul.f32 %v13480_v32, %v4902_v40 }
 0x5ab   : > { %v4862_v55 = vrot.slane %v13502_v54, 7  ;;  %v5108_v63 = vpack.c.bf16 %v13502_v54, %v13494_v3 }
 0x5ac   : > { %v4796_v52 = vpop.f32.mrf.mxu0 }
 0x5ad   : > { %9250 = vmatmul.mubr.msk.bf16.vlgmr.msra.gmra.mxu1 %vm5152_vm8, %v5108_v63  ;;  %v4863_v61 = vsel %vm783_vm2, %v4861_v36, %v4862_v55  ;;  %v13591_v36 = vpop.permute.xlu0 %4928  ;;  %v13600_v63 = vpop.permute.xlu1 %5055 }
 0x5ae   : > { %v4960_v39 = vmul.f32 %v13508_v62, %v4863_v61  ;;  %v13517_v2 = vpop.f32.mrf.mxu0  ;;  %9253 = vmatprep.mubr.msk.bf16.mxu1 %vm10619_vm7, %v14703_v7  ;;  %9316 = vmatpush3.bf16.msra.mxu1 %v5466_v0  ;;  %15061 = vst [vmem:[#allocation95_spill] sm:$0xff] %v13600_v63 }
 0x5af   : > { %v4864_v31 = vrot.slane %v13517_v2, 7  ;;  %9317 = vmatprep.subr.bf16.mxu1 %v14703_v7 }
 0x5b0   : > { %v4973_v48 = vpack.c.bf16 %v4960_v39, %v4959_v38  ;;  %v4801_v10 = vpop.f32.mrf.mxu0 }
 0x5b1   : > { %v4865_v16 = vsel %vm783_vm2, %v4862_v55, %v4864_v31 }
 0x5b2   : > { %v13526_v14 = vpop.f32.mrf.mxu0  ;;  %9288 = vmatmul.mubr.msk.bf16.vlgmr.msra.gmra.mxu0 %vm5152_vm8, %v4973_v48  ;;  %9318 = vmatpush3.bf16.msra.mxu1 %v10117_v33  ;;  %v4961_v27 = vmul.f32 %v13533_v6, %v4865_v16 }
 0x5b3   : > { %v4866_v12 = vrot.slane %v13526_v14, 7  ;;  %v5109_v13 = vpack.c.bf16 %v13526_v14, %v13517_v2  ;;  %9291 = vmatprep.mubr.msk.bf16.mxu0 %vm10619_vm7, %v14703_v7  ;;  %9319 = vmatprep.subr.bf16.mxu1 %v14703_v7 }
 0x5b4   : > { %v4804_v56 = vpop.f32.mrf.mxu0 }
 0x5b5   : > { %v4867_v20 = vsel %vm783_vm2, %v4864_v31, %v4866_v12  ;;  %9254 = vmatmul.mubr.msk.bf16.gmra.mxu1 %vm5152_vm8, %v5109_v13 }
 0x5b6   : > { %v4962_v53 = vmul.f32 %v13486_v24, %v4867_v20  ;;  %v13547_v1 = vpop.f32.mrf.mxu0  ;;  %9257 = vmatprep.mubr.msk.bf16.mxu1 %vm10619_vm7, %v14703_v7  ;;  %9320 = vmatpush3.bf16.msra.mxu1 %v10118_v47  ;;  %v13615_v47 = vpop.permute.xlu1 %5059 }
 0x5b7   : > { %v4868_v44 = vrot.slane %v13547_v1, 7  ;;  %9321 = vmatprep.subr.bf16.mxu1 %v14703_v7  ;;  %15062 = vst [vmem:[#allocation97_spill] sm:$0xff] %v13615_v47 }
 0x5b8   : > { %v4974_v11 = vpack.c.bf16 %v4962_v53, %v4961_v27  ;;  %v4809_v43 = vpop.f32.mrf.mxu0 }
 0x5b9   : > { %v4869_v23 = vsel %vm783_vm2, %v4866_v12, %v4868_v44  ;;  %v13618_v12 = vpop.permute.xlu0 %4940 }
 0x5ba   : > { %v13560_v30 = vpop.f32.mrf.mxu0  ;;  %9292 = vmatmul.mubr.msk.bf16.gmra.mxu0 %vm5152_vm8, %v4974_v11  ;;  %9322 = vmatpush3.bf16.msra.mxu1 %v10119_v42  ;;  %v4963_v21 = vmul.f32 %v13490_v49, %v4869_v23  ;;  %v13631_v43 = vpop.permute.xlu1 %4948 }
 0x5bb   : > { %v4870_v34 = vrot.slane %v13560_v30, 7  ;;  %v5110_v59 = vpack.c.bf16 %v13560_v30, %v13547_v1  ;;  %9295 = vmatprep.mubr.msk.bf16.mxu0 %vm10619_vm7, %v14703_v7  ;;  %9323 = vmatprep.subr.bf16.mxu1 %v14703_v7 }
 0x5bc   : > { %v4812_v18 = vpop.f32.mrf.mxu0 }
 0x5bd   : > { %v4871_v9 = vsel %vm783_vm2, %v4868_v44, %v4870_v34  ;;  %9258 = vmatmul.mubr.msk.bf16.gmra.mxu1 %vm5152_vm8, %v5110_v59 }
 0x5be   : > { %v4964_v17 = vmul.f32 %v13555_v22, %v4871_v9  ;;  %v13579_v51 = vpop.f32.mrf.mxu0  ;;  %9261 = vmatprep.mubr.msk.bf16.mxu1 %vm10619_vm7, %v14703_v7  ;;  %9324 = vmatpush3.bf16.msra.mxu1 %v10120_v4  ;;  %v13633_v4 = vpop.permute.xlu0 %4944 }
 0x5bf   : > { %v4872_v46 = vrot.slane %v13579_v51, 7  ;;  %9395 = vmatprep.subr.bf16.mxu1 %v14703_v7 }
 0x5c0   : > { %v4975_v45 = vpack.c.bf16 %v4964_v17, %v4963_v21  ;;  %v4817_v5 = vpop.f32.mrf.mxu0 }
 0x5c1   : > { %v4873_v37 = vsel %vm783_vm2, %v4870_v34, %v4872_v46  ;;  %v13652_v5 = vpop.permute.xlu1 %5067 }
 0x5c2   : > { %v13587_v15 = vpop.f32.mrf.mxu0  ;;  %9296 = vmatmul.mubr.msk.bf16.gmra.mxu0 %vm5152_vm8, %v4975_v45  ;;  %v4965_v0 = vmul.f32 %v13591_v36, %v4873_v37  ;;  %15063 = vst [vmem:[#allocation56_spill] sm:$0xff] %v13652_v5 }
 0x5c3   : > { %v4874_v19 = vrot.slane %v13587_v15, 7  ;;  %v5111_v28 = vpack.c.bf16 %v13587_v15, %v13579_v51  ;;  %9299 = vmatprep.mubr.msk.bf16.mxu0 %vm10619_vm7, %v14703_v7 }
 0x5c4   : > { %v4820_v40 = vpop.f32.mrf.mxu0 }
 0x5c5   : > { %v4875_v55 = vsel %vm783_vm2, %v4872_v46, %v4874_v19  ;;  %9262 = vmatmul.mubr.msk.bf16.gmra.mxu1 %vm5152_vm8, %v5111_v28  ;;  %v4983_v28 = vrot.slane %v13517_v2, 1  ;;  %v4980_v2 = vrot.slane %v13494_v3, 1 }
 0x5c6   : > { %v4966_v52 = vmul.f32 %v13540_v26, %v4875_v55  ;;  %v13604_v61 = vpop.f32.mrf.mxu0  ;;  %9265 = vmatprep.mubr.msk.bf16.mxu1 %vm10619_vm7, %v14703_v7 }
 0x5c7   : > { %v4876_v38 = vrot.slane %v13604_v61, 7 }
 0x5c8   : > { %v4976_v39 = vpack.c.bf16 %v4966_v52, %v4965_v0  ;;  %v4825_v33 = vpop.f32.mrf.mxu0  ;;  %v4981_v0 = vrot.slane %v13502_v54, 1 }
 0x5c9   : > { %v4877_v16 = vsel %vm783_vm2, %v4874_v19, %v4876_v38  ;;  %v13655_v19 = vpop.permute.xlu0 %5063 }
 0x5ca   : > { %v13609_v31 = vpop.f32.mrf.mxu0  ;;  %9300 = vmatmul.mubr.msk.bf16.gmra.mxu0 %vm5152_vm8, %v4976_v39  ;;  %v4967_v20 = vmul.f32 %v13584_v50, %v4877_v16  ;;  %15064 = vst [vmem:[#allocation54_spill] sm:$0xff] %v13655_v19  ;;  %v4984_v54 = vsel %vm1050_vm1, %v4981_v0, %v4983_v28  ;;  %v13672_v16 = vpop.permute.xlu1 %4952 }
 0x5cb   : > { %v4878_v48 = vrot.slane %v13609_v31, 7  ;;  %v5112_v10 = vpack.c.bf16 %v13609_v31, %v13604_v61  ;;  %9303 = vmatprep.mubr.msk.bf16.mxu0 %vm10619_vm7, %v14703_v7  ;;  %v5079_v3 = vmul.f32 %v13484_v60, %v4984_v54  ;;  %v4997_v54 = vrot.slane %v13609_v31, 1 }
 0x5cc   : > { %v4828_v13 = vpop.f32.mrf.mxu0 }
 0x5cd   : > { %9266 = vmatmul.mubr.msk.bf16.gmra.mxu1 %vm5152_vm8, %v5112_v10  ;;  %v4879_v56 = vsel %vm783_vm2, %v4876_v38, %v4878_v48 }
 0x5ce   : > { %v4968_v27 = vmul.f32 %v13618_v12, %v4879_v56  ;;  %v13626_v53 = vpop.f32.mrf.mxu0  ;;  %9269 = vmatprep.mubr.msk.bf16.mxu1 %vm10619_vm7, %v14703_v7  ;;  %v4982_v56 = vsel %vm1050_vm1, %v4980_v2, %v4981_v0  ;;  %v4993_v0 = vrot.slane %v13587_v15, 1 }
 0x5cf   : > { %v4880_v42 = vrot.slane %v13626_v53, 7  ;;  %v4999_v2 = vrot.slane %v13626_v53, 1 }
 0x5d0   : > { %v4977_v44 = vpack.c.bf16 %v4968_v27, %v4967_v20  ;;  %v4833_v11 = vpop.f32.mrf.mxu0 }
 0x5d1   : > { %v4881_v34 = vsel %vm783_vm2, %v4878_v48, %v4880_v42  ;;  %v13666_v48 = vpop.permute.xlu0 %4956  ;;  %v5078_v11 = vmul.f32 %v13482_v41, %v4982_v56  ;;  %v5000_v15 = vsel %vm1050_vm1, %v4997_v54, %v4999_v2 }
 0x5d2   : > { %v13635_v23 = vpop.f32.mrf.mxu0  ;;  %9304 = vmatmul.mubr.msk.bf16.gmra.mxu0 %vm5152_vm8, %v4977_v44  ;;  %v4969_v17 = vmul.f32 %v13633_v4, %v4881_v34  ;;  %v4985_v34 = vrot.slane %v13526_v14, 1  ;;  %v5087_v56 = vmul.f32 %v13615_v47, %v5000_v15 }
 0x5d3   : > { %v4882_v59 = vrot.slane %v13635_v23, 7  ;;  %v5113_v18 = vpack.c.bf16 %v13635_v23, %v13626_v53  ;;  %9307 = vmatprep.mubr.msk.bf16.mxu0 %vm10619_vm7, %v14703_v7 }
 0x5d4   : > { %v4836_v9 = vpop.f32.mrf.mxu0 }
 0x5d5   : > { %v4883_v21 = vsel %vm783_vm2, %v4880_v42, %v4882_v59  ;;  %9270 = vmatmul.mubr.msk.bf16.gmra.mxu1 %vm5152_vm8, %v5113_v18  ;;  %v4987_v42 = vrot.slane %v13547_v1, 1  ;;  %v4986_v9 = vsel %vm1050_vm1, %v4983_v28, %v4985_v34 }
 0x5d6   : > { %v4970_v46 = vmul.f32 %v13631_v43, %v4883_v21  ;;  %v13648_v45 = vpop.f32.mrf.mxu0  ;;  %9273 = vmatprep.mubr.msk.bf16.mxu1 %vm10619_vm7, %v14703_v7  ;;  %v4991_v21 = vrot.slane %v13579_v51, 1  ;;  %v5080_v14 = vmul.f32 %v13492_v58, %v4986_v9 }
 0x5d7   : > { %v4884_v37 = vrot.slane %v13648_v45, 7  ;;  %v4988_v18 = vsel %vm1050_vm1, %v4985_v34, %v4987_v42 }
 0x5d8   : > { %v4978_v40 = vpack.c.bf16 %v4970_v46, %v4969_v17  ;;  %v4841_v55 = vpop.f32.mrf.mxu0  ;;  %v5081_v1 = vmul.f32 %v13488_v25, %v4988_v18  ;;  %v4989_v17 = vrot.slane %v13560_v30, 1 }
 0x5d9   : > { %v4885_v38 = vsel %vm783_vm2, %v4882_v59, %v4884_v37  ;;  %v5092_v59 = vpack.c.bf16 %v5079_v3, %v5078_v11  ;;  %v4995_v55 = vrot.slane %v13604_v61, 1 }
 0x5da   : > { %v13659_v52 = vpop.f32.mrf.mxu0  ;;  %9308 = vmatmul.mubr.msk.bf16.gmra.mxu0 %vm5152_vm8, %v4978_v40  ;;  %v4971_v20 = vmul.f32 %v13672_v16, %v4885_v38  ;;  %v5093_v46 = vpack.c.bf16 %v5081_v1, %v5080_v14  ;;  %v4990_v40 = vsel %vm1050_vm1, %v4987_v42, %v4989_v17 }
 0x5db   : > { %v4886_v39 = vrot.slane %v13659_v52, 7  ;;  %v5114_v33 = vpack.c.bf16 %v13659_v52, %v13648_v45  ;;  %9311 = vmatprep.mubr.msk.bf16.mxu0 %vm10619_vm7, %v14703_v7  ;;  %v5082_v51 = vmul.f32 %v13497_v35, %v4990_v40  ;;  %v4996_v30 = vsel %vm1050_vm1, %v4993_v0, %v4995_v55  ;;  %v10125_v40 = vld [vmem:[%s14553_s4 + $0x28] sm:$0xff]  }
 0x5dc   : > { %v4844_v10 = vpop.f32.mrf.mxu0 }
 0x5dd   : > { %9274 = vmatmul.mubr.msk.bf16.gmra.mxu1 %vm5152_vm8, %v5114_v33  ;;  %v4887_v13 = vsel %vm783_vm2, %v4884_v37, %v4886_v39  ;;  %v4992_v37 = vsel %vm1050_vm1, %v4989_v17, %v4991_v21  ;;  %v4994_v39 = vsel %vm1050_vm1, %v4991_v21, %v4993_v0  ;;  %v5085_v33 = vmul.f32 %v13558_v8, %v4996_v30  ;;  %v10122_v17 = vld [vmem:[%s14553_s4 + $0x60] sm:$0xff]   ;;  %v10129_v0 = vld [vmem:[%s14553_s4 + $0x18] sm:$0xff]   ;;  %v10131_v30 = vld [vmem:[%s14553_s4 + $0x10] sm:$0xff]  }
 0x5de   : > { %v4972_v27 = vmul.f32 %v13666_v48, %v4887_v13  ;;  %9325 = vmatprep.mubr.msk.bf16.mxu1 %vm10619_vm7, %v14703_v7  ;;  %v5083_v28 = vmul.f32 %v13513_v29, %v4992_v37  ;;  %v5084_v61 = vmul.f32 %v13575_v57, %v4994_v39  ;;  %v4998_v13 = vsel %vm1050_vm1, %v4995_v55, %v4997_v54  ;;  %v10124_v37 = vld [vmem:[%s14553_s4 + $0x58] sm:$0xff]   ;;  %v10127_v55 = vld [vmem:[%s14553_s4 + $0x20] sm:$0xff]  }
 0x5df   : > { %v5086_v53 = vmul.f32 %v13600_v63, %v4998_v13  ;;  %v10132_v39 = vld [vmem:[%s14553_s4 + $0x38] sm:$0xff]  }
 0x5e0   : > { %v4979_v44 = vpack.c.bf16 %v4972_v27, %v4971_v20  ;;  %v5094_v38 = vpack.c.bf16 %v5083_v28, %v5082_v51  ;;  %v5095_v10 = vpack.c.bf16 %v5085_v33, %v5084_v61  ;;  %v5003_v20 = vrot.slane %v13648_v45, 1  ;;  %v10126_v28 = vld [vmem:[%s14553_s4 + $0x50] sm:$0xff]   ;;  %v10128_v51 = vld [vmem:[%s14553_s4 + $0x48] sm:$0xff]  }
 0x5e1   : > { %v5001_v27 = vrot.slane %v13635_v23, 1  ;;  %v5096_v3 = vpack.c.bf16 %v5087_v56, %v5086_v53  ;;  %v5005_v45 = vrot.slane %v13659_v52, 1  ;;  %v10121_v52 = vld [vmem:[%s14553_s4 + $0x68] sm:$0xff]  }
 0x5e2   : > { %9312 = vmatmul.mubr.msk.bf16.gmra.mxu0 %vm5152_vm8, %v4979_v44  ;;  %v13727_v44 = vpop.permute.xlu1 %5071  ;;  %v10133_v33 = vld [vmem:[%s14553_s4 + $0x8] sm:$0xff]  }
 0x5e3   : > { %9367 = vmatprep.mubr.msk.bf16.mxu0 %vm10619_vm7, %v14703_v7  ;;  %v5004_v31 = vsel %vm1050_vm1, %v5001_v27, %v5003_v20  ;;  %v5002_v42 = vsel %vm1050_vm1, %v4999_v2, %v5001_v27  ;;  %15065 = vst [vmem:[#allocation55_spill] sm:$0xff] %v13727_v44  ;;  %v5006_v23 = vsel %vm1050_vm1, %v5003_v20, %v5005_v45  ;;  %v5021_v9 = vsel %vm1050_vm1, %v5005_v45, 0.0  ;;  %v10134_v2 = vld [vmem:[%s14553_s4] sm:$0xff]  }
 0x5e4   : > { %v5089_v11 = vmul.f32 %v13652_v5, %v5004_v31  ;;  %v5088_v34 = vmul.f32 %v13655_v19, %v5002_v42  ;;  %v5090_v1 = vmul.f32 %v13727_v44, %v5006_v23  ;;  %9354 = vmatpush3.bf16.msra.mxu0 %v10121_v52 }
 0x5e5   : > { %9326 = vmatmul.mubr.msk.bf16.vlgmr.msra.gmra.mxu1 %vm5152_vm8, %v5092_v59  ;;  %9355 = vmatprep.subr.bf16.mxu0 %v14703_v7 }
 0x5e6   : > { %9329 = vmatprep.mubr.msk.bf16.mxu1 %vm10619_vm7, %v14703_v7  ;;  %v5097_v59 = vpack.c.bf16 %v5089_v11, %v5088_v34  ;;  %v13735_v18 = vpop.permute.xlu1 %5075 }
 0x5e7   : > { %15066 = vst [vmem:[#allocation57_spill] sm:$0xff] %v13735_v18  ;;  %v5091_v21 = vmul.f32 %v13735_v18, %v5021_v9 }
 0x5e8   : > { %9356 = vmatpush3.bf16.msra.mxu0 %v10122_v17 }
 0x5e9   : > { %v5098_v14 = vpack.c.bf16 %v5091_v21, %v5090_v1  ;;  %9357 = vmatprep.subr.bf16.mxu0 %v14703_v7 }
 0x5ec   : > { %9358 = vmatpush3.bf16.msra.mxu0 %v10124_v37 }
 0x5ed   : > { %9330 = vmatmul.mubr.msk.bf16.gmra.mxu1 %vm5152_vm8, %v5093_v46  ;;  %v10123_v46 = vld [vmem:[%s14553_s4 + $0x30] sm:$0xff]   ;;  %9359 = vmatprep.subr.bf16.mxu0 %v14703_v7 }
 0x5ee   : > { %9333 = vmatprep.mubr.msk.bf16.mxu1 %vm10619_vm7, %v14703_v7  ;;  %9396 = vmatpush3.bf16.msra.mxu1 %v10123_v46 }
 0x5ef   : > { %9397 = vmatprep.subr.bf16.mxu1 %v14703_v7 }
 0x5f0   : > { %9360 = vmatpush3.bf16.msra.mxu0 %v10126_v28 }
 0x5f1   : > { %9361 = vmatprep.subr.bf16.mxu0 %v14703_v7 }
 0x5f2   : > { %9398 = vmatpush3.bf16.msra.mxu1 %v10125_v40 }
 0x5f3   : > { %9399 = vmatprep.subr.bf16.mxu1 %v14703_v7 }
 0x5f4   : > { %9362 = vmatpush3.bf16.msra.mxu0 %v10128_v51 }
 0x5f5   : > { %9334 = vmatmul.mubr.msk.bf16.gmra.mxu1 %vm5152_vm8, %v5094_v38  ;;  %9363 = vmatprep.subr.bf16.mxu0 %v14703_v7  ;;  %v10130_v38 = vld [vmem:[%s14553_s4 + $0x40] sm:$0xff]  }
 0x5f6   : > { %9337 = vmatprep.mubr.msk.bf16.mxu1 %vm10619_vm7, %v14703_v7  ;;  %9400 = vmatpush3.bf16.msra.mxu1 %v10127_v55 }
 0x5f7   : > { %9401 = vmatprep.subr.bf16.mxu1 %v14703_v7 }
 0x5f8   : > { %9364 = vmatpush3.bf16.msra.mxu0 %v10130_v38 }
 0x5f9   : > { %9365 = vmatprep.subr.bf16.mxu0 %v14703_v7 }
 0x5fa   : > { %9402 = vmatpush3.bf16.msra.mxu1 %v10129_v0 }
 0x5fb   : > { %9403 = vmatprep.subr.bf16.mxu1 %v14703_v7 }
 0x5fc   : > { %9366 = vmatpush3.bf16.msra.mxu0 %v10132_v39 }
 0x5fd   : > { %9338 = vmatmul.mubr.msk.bf16.gmra.mxu1 %vm5152_vm8, %v5095_v10  ;;  %9437 = vmatprep.subr.bf16.mxu0 %v14703_v7 }
 0x5fe   : > { %9341 = vmatprep.mubr.msk.bf16.mxu1 %vm10619_vm7, %v14703_v7  ;;  %9404 = vmatpush3.bf16.msra.mxu1 %v10131_v30 }
 0x5ff   : > { %9405 = vmatprep.subr.bf16.mxu1 %v14703_v7 }
 0x602   : > { %9406 = vmatpush3.bf16.msra.mxu1 %v10133_v33 }
 0x603   : > { %9407 = vmatprep.subr.bf16.mxu1 %v14703_v7 }
 0x605   : > { %9342 = vmatmul.mubr.msk.bf16.gmra.mxu1 %vm5152_vm8, %v5096_v3 }
 0x606   : > { %9345 = vmatprep.mubr.msk.bf16.mxu1 %vm10619_vm7, %v14703_v7  ;;  %9408 = vmatpush3.bf16.msra.mxu1 %v10134_v2 }
 0x607   : > { %9479 = vmatprep.subr.bf16.mxu1 %v14703_v7 }
 0x60d   : > { %9346 = vmatmul.mubr.msk.bf16.gmra.mxu1 %vm5152_vm8, %v5097_v59 }
 0x60e   : > { %9349 = vmatprep.mubr.msk.bf16.mxu1 %vm10619_vm7, %v14703_v7 }
 0x615   : > { %9350 = vmatmul.mubr.msk.bf16.gmra.mxu1 %vm5152_vm8, %v5098_v14 }
 0x616   : > { %9409 = vmatprep.mubr.msk.bf16.mxu1 %vm10619_vm7, %v14703_v7 }
 0x66d   : > { %v5212_v61 = vpop.f32.mrf.mxu1 }
 0x66f   : > { %v9251_v54 = vpop.f32.mrf.mxu1 }
 0x671   : > { %v5215_v10 = vpop.f32.mrf.mxu1 }
 0x672   : > { %v5352_v15 = vpop.f32.mrf.mxu0 }
 0x673   : > { %v9252_v13 = vpop.f32.mrf.mxu1 }
 0x674   : > { %v9289_v56 = vpop.f32.mrf.mxu0 }
 0x675   : > { %v5220_v20 = vpop.f32.mrf.mxu1 }
 0x676   : > { %v5355_v53 = vpop.f32.mrf.mxu0 }
 0x677   : > { %v9255_v27 = vpop.f32.mrf.mxu1 }
 0x678   : > { %v9290_v3 = vpop.f32.mrf.mxu0 }
 0x679   : > { %v13802_v31 = vpop.f32.mrf.mxu1 }
 0x67a   : > { %v5360_v42 = vpop.f32.mrf.mxu0 }
 0x67b   : > { %v9256_v11 = vpop.f32.mrf.mxu1  ;;  %v5361_v57 = vadd.f32 %v5360_v42, %v5220_v20 }
 0x67c   : > { %v9293_v45 = vpop.f32.mrf.mxu0 }
 0x67d   : > { %v13804_v34 = vpop.f32.mrf.mxu1 }
 0x67e   : > { %v5363_v59 = vpop.f32.mrf.mxu0 }
 0x67f   : > { %v9259_v23 = vpop.f32.mrf.mxu1 }
 0x680   : > { %v9294_v9 = vpop.f32.mrf.mxu0 }
 0x681   : > { %v13806_v1 = vpop.f32.mrf.mxu1 }
 0x682   : > { %v13808_v21 = vpop.f32.mrf.mxu0 }
 0x683   : > { %v9260_v14 = vpop.f32.mrf.mxu1 }
 0x684   : > { %v9297_v52 = vpop.f32.mrf.mxu0 }
 0x685   : > { %v13810_v17 = vpop.f32.mrf.mxu1 }
 0x686   : > { %v13812_v46 = vpop.f32.mrf.mxu0 }
 0x687   : > { %v9263_v37 = vpop.f32.mrf.mxu1 }
 0x688   : > { %v9298_v40 = vpop.f32.mrf.mxu0 }
 0x689   : > { %v13814_v28 = vpop.f32.mrf.mxu1 }
 0x68a   : > { %v13816_v55 = vpop.f32.mrf.mxu0 }
 0x68b   : > { %v9264_v51 = vpop.f32.mrf.mxu1 }
 0x68c   : > { %v9301_v0 = vpop.f32.mrf.mxu0 }
 0x68d   : > { %v13818_v38 = vpop.f32.mrf.mxu1 }
 0x68e   : > { %v13820_v30 = vpop.f32.mrf.mxu0 }
 0x68f   : > { %v9267_v39 = vpop.f32.mrf.mxu1 }
 0x690   : > { %v9302_v33 = vpop.f32.mrf.mxu0 }
 0x691   : > { %v13822_v2 = vpop.f32.mrf.mxu1 }
 0x692   : > { %v13824_v54 = vpop.f32.mrf.mxu0 }
 0x693   : > { %v9268_v13 = vpop.f32.mrf.mxu1 }
 0x694   : > { %v9305_v56 = vpop.f32.mrf.mxu0 }
 0x695   : > { %v13826_v27 = vpop.f32.mrf.mxu1  ;;  %v5353_v56 = vadd.f32 %v5352_v15, %v5212_v61 }
 0x696   : > { %v13828_v3 = vpop.f32.mrf.mxu0 }
 0x697   : > { %v9271_v11 = vpop.f32.mrf.mxu1 }
 0x698   : > { %v9306_v45 = vpop.f32.mrf.mxu0 }
 0x699   : > { %v13830_v23 = vpop.f32.mrf.mxu1  ;;  %v13842_v45 = vld [vmem:[#allocation10 + $0x2] ss:$0 sm:$0xff] }
 0x69a   : > { %v13832_v9 = vpop.f32.mrf.mxu0 }
 0x69b   : > { %v9272_v14 = vpop.f32.mrf.mxu1 }
 0x69c   : > { %v9309_v52 = vpop.f32.mrf.mxu0 }
 0x69d   : > { %v13834_v37 = vpop.f32.mrf.mxu1  ;;  %v5356_v52 = vadd.f32 %v5355_v53, %v5215_v10 }
 0x69e   : > { %v13836_v40 = vpop.f32.mrf.mxu0 }
 0x69f   : > { %v9275_v51 = vpop.f32.mrf.mxu1 }
 0x6a0   : > { %v9310_v0 = vpop.f32.mrf.mxu0 }
 0x6a1   : > { %v13838_v39 = vpop.f32.mrf.mxu1 }
 0x6a2   : > { %v13840_v33 = vpop.f32.mrf.mxu0 }
 0x6a3   : > { %v9276_v13 = vpop.f32.mrf.mxu1 }
 0x6a4   : > { %v9313_v11 = vpop.f32.mrf.mxu0 }
 0x6a5   : > { %v5502_v7 = vpop.f32.mrf.mxu1 }
 0x6a6   : > { %v5557_v18 = vadd.f32 %v5502_v7, %v5353_v56  ;;  %v13844_v44 = vpop.f32.mrf.mxu0  ;;  %v5364_v56 = vadd.f32 %v5363_v59, %v13802_v31 }
 0x6a7   : > { %v9327_v14 = vpop.f32.mrf.mxu1 }
 0x6a8   : > { %v5571_v19 = vadd.f32 %v5557_v18, %v13842_v45  ;;  %v9314_v5 = vpop.f32.mrf.mxu0 }
 0x6a9   : > { %v5505_v51 = vpop.f32.mrf.mxu1  ;;  %v10135_v5 = vld [vmem:[%s14553_s4 + $0xa0] sm:$0xff]  }
 0x6aa   : > { %v13847_v0 = vmax.f32 %v5571_v19, 0.0  ;;  %v5558_v63 = vadd.f32 %v5505_v51, %v5356_v52  ;;  %v15067_v52 = vmov 0.0   ;;  %v10136_v51 = vld [vmem:[%s14553_s4 + $0x98] sm:$0xff]  }
 0x6ab   : > { %v9328_v47 = vpop.f32.mrf.mxu1 }
 0x6ac   : > { %v5614_v61 = vrot.slane %v13847_v0, 7  ;;  %v5572_v15 = vadd.f32 %v5558_v63, %v13842_v45 }
 0x6ad   : > { %v5510_v13 = vpop.f32.mrf.mxu1 }
 0x6ae   : > { %v13851_v11 = vmax.f32 %v5572_v15, 0.0  ;;  %v5559_v7 = vadd.f32 %v5510_v13, %v5361_v57  ;;  %v5655_v19 = vsel %vm783_vm2, 0.0, %v5614_v61 }
 0x6af   : > { %v9331_v10 = vpop.f32.mrf.mxu1  ;;  %v5656_v42 = vmul.f32 %v5655_v19, %v13480_v32 }
 0x6b0   : > { %v5615_v47 = vrot.slane %v13851_v11, 7  ;;  %v5754_v18 = vpack.c.bf16 %v13851_v11, %v13847_v0  ;;  %v5573_v63 = vadd.f32 %v5559_v7, %v13842_v45  ;;  %v5372_v10 = vadd.f32 %v13812_v46, %v13806_v1 }
 0x6b1   : > { %v5513_v20 = vpop.f32.mrf.mxu1 }
 0x6b2   : > { %v5616_v57 = vsel %vm783_vm2, %v5614_v61, %v5615_v47  ;;  %v13863_v53 = vmax.f32 %v5573_v63, 0.0  ;;  %v5560_v31 = vadd.f32 %v5513_v20, %v5364_v56  ;;  %9368 = vmatmul.mubr.msk.bf16.vlgmr.msra.gmra.mxu0 %vm5818_vm9, %v5754_v18  ;;  %v5369_v61 = vadd.f32 %v13808_v21, %v13804_v34  ;;  %v10137_v34 = vld [vmem:[%s14553_s4 + $0x90] sm:$0xff]  }
 0x6b3   : > { %v5657_v59 = vmul.f32 %v5616_v57, %v13508_v62  ;;  %v9332_v14 = vpop.f32.mrf.mxu1  ;;  %9371 = vmatprep.mubr.msk.bf16.mxu0 %vm10619_vm7, %v15067_v52  ;;  %9438 = vmatpush3.bf16.msra.mxu0 %v10135_v5 }
 0x6b4   : > { %v5617_v15 = vrot.slane %v13863_v53, 7  ;;  %v5574_v13 = vadd.f32 %v5560_v31, %v13842_v45  ;;  %9439 = vmatprep.subr.bf16.mxu0 %v15067_v52  ;;  %v5377_v14 = vadd.f32 %v13816_v55, %v13810_v17  ;;  %v10139_v17 = vld [vmem:[%s14553_s4 + $0x80] sm:$0xff]  }
 0x6b5   : > { %v5670_v32 = vpack.c.bf16 %v5657_v59, %v5656_v42  ;;  %v5518_v62 = vpop.f32.mrf.mxu1  ;;  %v10138_v59 = vld [vmem:[%s14553_s4 + $0x88] sm:$0xff]  }
 0x6b6   : > { %v13878_v7 = vmax.f32 %v5574_v13, 0.0  ;;  %v5561_v56 = vadd.f32 %v5518_v62, %v5369_v61  ;;  %v5618_v21 = vsel %vm783_vm2, %v5615_v47, %v5617_v15 }
 0x6b7   : > { %v9335_v5 = vpop.f32.mrf.mxu1  ;;  %9410 = vmatmul.mubr.msk.bf16.vlgmr.msra.gmra.mxu1 %vm5818_vm9, %v5670_v32  ;;  %9440 = vmatpush3.bf16.msra.mxu0 %v10136_v51  ;;  %v5658_v47 = vmul.f32 %v5618_v21, %v13533_v6  ;;  %v5380_v32 = vadd.f32 %v13820_v30, %v13814_v28 }
 0x6b8   : > { %v5619_v19 = vrot.slane %v13878_v7, 7  ;;  %v5755_v18 = vpack.c.bf16 %v13878_v7, %v13863_v53  ;;  %v5575_v63 = vadd.f32 %v5561_v56, %v13842_v45  ;;  %9413 = vmatprep.mubr.msk.bf16.mxu1 %vm10619_vm7, %v15067_v52  ;;  %9441 = vmatprep.subr.bf16.mxu0 %v15067_v52 }
 0x6b9   : > { %v5521_v1 = vpop.f32.mrf.mxu1 }
 0x6ba   : > { %v5620_v46 = vsel %vm783_vm2, %v5617_v15, %v5619_v19  ;;  %v13895_v20 = vmax.f32 %v5575_v63, 0.0  ;;  %v5562_v57 = vadd.f32 %v5521_v1, %v5372_v10  ;;  %9372 = vmatmul.mubr.msk.bf16.gmra.mxu0 %vm5818_vm9, %v5755_v18  ;;  %v10140_v1 = vld [vmem:[%s14553_s4 + $0x78] sm:$0xff]  }
 0x6bb   : > { %v5659_v31 = vmul.f32 %v5620_v46, %v13486_v24  ;;  %v9336_v42 = vpop.f32.mrf.mxu1  ;;  %9375 = vmatprep.mubr.msk.bf16.mxu0 %vm10619_vm7, %v15067_v52  ;;  %9442 = vmatpush3.bf16.msra.mxu0 %v10137_v34  ;;  %v5385_v46 = vadd.f32 %v13824_v54, %v13818_v38  ;;  %v10141_v38 = vld [vmem:[%s14553_s4 + $0x70] sm:$0xff]  }
 0x6bc   : > { %v5621_v51 = vrot.slane %v13895_v20, 7  ;;  %v5576_v61 = vadd.f32 %v5562_v57, %v13842_v45  ;;  %9443 = vmatprep.subr.bf16.mxu0 %v15067_v52 }
 0x6bd   : > { %v5526_v6 = vpop.f32.mrf.mxu1  ;;  %v5671_v24 = vpack.c.bf16 %v5659_v31, %v5658_v47 }
 0x6be   : > { %v13910_v15 = vmax.f32 %v5576_v61, 0.0  ;;  %v5563_v13 = vadd.f32 %v5526_v6, %v5377_v14  ;;  %v5622_v55 = vsel %vm783_vm2, %v5619_v19, %v5621_v51 }
 0x6bf   : > { %v9339_v62 = vpop.f32.mrf.mxu1  ;;  %9414 = vmatmul.mubr.msk.bf16.gmra.mxu1 %vm5818_vm9, %v5671_v24  ;;  %9444 = vmatpush3.bf16.msra.mxu0 %v10138_v59  ;;  %v5660_v19 = vmul.f32 %v5622_v55, %v13490_v49  ;;  %v5388_v59 = vadd.f32 %v13828_v3, %v13822_v2  ;;  %v5393_v55 = vadd.f32 %v13832_v9, %v13826_v27 }
 0x6c0   : > { %v5623_v56 = vrot.slane %v13910_v15, 7  ;;  %v5756_v10 = vpack.c.bf16 %v13910_v15, %v13895_v20  ;;  %v5577_v5 = vadd.f32 %v5563_v13, %v13842_v45  ;;  %9417 = vmatprep.mubr.msk.bf16.mxu1 %vm10619_vm7, %v15067_v52  ;;  %9445 = vmatprep.subr.bf16.mxu0 %v15067_v52 }
 0x6c1   : > { %v5529_v28 = vpop.f32.mrf.mxu1 }
 0x6c2   : > { %v5624_v30 = vsel %vm783_vm2, %v5621_v51, %v5623_v56  ;;  %v13927_v34 = vmax.f32 %v5577_v5, 0.0  ;;  %v5564_v21 = vadd.f32 %v5529_v28, %v5380_v32  ;;  %9376 = vmatmul.mubr.msk.bf16.gmra.mxu0 %vm5818_vm9, %v5756_v10 }
 0x6c3   : > { %v5661_v18 = vmul.f32 %v5624_v30, %v13555_v22  ;;  %v9340_v63 = vpop.f32.mrf.mxu1  ;;  %9379 = vmatprep.mubr.msk.bf16.mxu0 %vm10619_vm7, %v15067_v52  ;;  %9446 = vmatpush3.bf16.msra.mxu0 %v10139_v17 }
 0x6c4   : > { %v5625_v57 = vrot.slane %v13927_v34, 7  ;;  %v5578_v47 = vadd.f32 %v5564_v21, %v13842_v45  ;;  %9447 = vmatprep.subr.bf16.mxu0 %v15067_v52 }
 0x6c5   : > { %v5534_v49 = vpop.f32.mrf.mxu1  ;;  %v5672_v22 = vpack.c.bf16 %v5661_v18, %v5660_v19 }
 0x6c6   : > { %v13942_v31 = vmax.f32 %v5578_v47, 0.0  ;;  %v5565_v42 = vadd.f32 %v5534_v49, %v5385_v46  ;;  %v5626_v54 = vsel %vm783_vm2, %v5623_v56, %v5625_v57  ;;  %v5401_v49 = vadd.f32 %v13840_v33, %v13834_v37 }
 0x6c7   : > { %v9343_v14 = vpop.f32.mrf.mxu1  ;;  %9418 = vmatmul.mubr.msk.bf16.gmra.mxu1 %vm5818_vm9, %v5672_v22  ;;  %9448 = vmatpush3.bf16.msra.mxu0 %v10140_v1  ;;  %v5662_v32 = vmul.f32 %v5626_v54, %v13591_v36 }
 0x6c8   : > { %v5627_v51 = vrot.slane %v13942_v31, 7  ;;  %v5757_v61 = vpack.c.bf16 %v13942_v31, %v13927_v34  ;;  %v5579_v6 = vadd.f32 %v5565_v42, %v13842_v45  ;;  %9421 = vmatprep.mubr.msk.bf16.mxu1 %vm10619_vm7, %v15067_v52  ;;  %9449 = vmatprep.subr.bf16.mxu0 %v15067_v52 }
 0x6c9   : > { %v5537_v2 = vpop.f32.mrf.mxu1 }
 0x6ca   : > { %v5628_v3 = vsel %vm783_vm2, %v5625_v57, %v5627_v51  ;;  %v13959_v24 = vmax.f32 %v5579_v6, 0.0  ;;  %v5566_v13 = vadd.f32 %v5537_v2, %v5388_v59  ;;  %9380 = vmatmul.mubr.msk.bf16.gmra.mxu0 %vm5818_vm9, %v5757_v61 }
 0x6cb   : > { %v5663_v62 = vmul.f32 %v5628_v3, %v13540_v26  ;;  %v9344_v17 = vpop.f32.mrf.mxu1  ;;  %9383 = vmatprep.mubr.msk.bf16.mxu0 %vm10619_vm7, %v15067_v52  ;;  %9450 = vmatpush3.bf16.msra.mxu0 %v10141_v38  ;;  %v5396_v26 = vadd.f32 %v13836_v40, %v13830_v23 }
 0x6cc   : > { %v5629_v56 = vrot.slane %v13959_v24, 7  ;;  %v5580_v10 = vadd.f32 %v5566_v13, %v13842_v45  ;;  %9521 = vmatprep.subr.bf16.mxu0 %v15067_v52 }
 0x6cd   : > { %v5542_v5 = vpop.f32.mrf.mxu1  ;;  %v5673_v28 = vpack.c.bf16 %v5663_v62, %v5662_v32 }
 0x6ce   : > { %v13971_v30 = vmax.f32 %v5580_v10, 0.0  ;;  %v5567_v36 = vadd.f32 %v5542_v5, %v5393_v55  ;;  %v5630_v19 = vsel %vm783_vm2, %v5627_v51, %v5629_v56  ;;  %v5680_v55 = vrot.slane %v13863_v53, 1 }
 0x6cf   : > { %v9347_v21 = vpop.f32.mrf.mxu1  ;;  %9422 = vmatmul.mubr.msk.bf16.gmra.mxu1 %vm5818_vm9, %v5673_v28  ;;  %v5664_v40 = vmul.f32 %v5630_v19, %v13584_v50  ;;  %v5404_v50 = vadd.f32 %v13844_v44, %v13838_v39  ;;  %v5678_v5 = vrot.slane %v13851_v11, 1 }
 0x6d0   : > { %v5631_v27 = vrot.slane %v13971_v30, 7  ;;  %v5758_v9 = vpack.c.bf16 %v13971_v30, %v13959_v24  ;;  %v5581_v18 = vadd.f32 %v5567_v36, %v13842_v45  ;;  %9425 = vmatprep.mubr.msk.bf16.mxu1 %vm10619_vm7, %v15067_v52 }
 0x6d1   : > { %v5545_v63 = vpop.f32.mrf.mxu1  ;;  %v5681_v53 = vsel %vm1050_vm1, %v5678_v5, %v5680_v55 }
 0x6d2   : > { %v5632_v1 = vsel %vm783_vm2, %v5629_v56, %v5631_v27  ;;  %v13984_v46 = vmax.f32 %v5581_v18, 0.0  ;;  %v5568_v23 = vadd.f32 %v5545_v63, %v5396_v26  ;;  %9384 = vmatmul.mubr.msk.bf16.gmra.mxu0 %vm5818_vm9, %v5758_v9  ;;  %v5720_v19 = vmul.f32 %v5681_v53, %v13484_v60  ;;  %v10148_v53 = vld [vmem:[%s15075_s14 + $0x18] sm:$0xff]  }
 0x6d3   : > { %v5665_v57 = vmul.f32 %v5632_v1, %v13618_v12  ;;  %v9348_v47 = vpop.f32.mrf.mxu1  ;;  %9387 = vmatprep.mubr.msk.bf16.mxu0 %vm10619_vm7, %v15067_v52  ;;  %v5682_v18 = vrot.slane %v13878_v7, 1 }
 0x6d4   : > { %v5633_v22 = vrot.slane %v13984_v46, 7  ;;  %v5582_v42 = vadd.f32 %v5568_v23, %v13842_v45 }
 0x6d5   : > { %v5550_v59 = vpop.f32.mrf.mxu1  ;;  %v5674_v14 = vpack.c.bf16 %v5665_v57, %v5664_v40 }
 0x6d6   : > { %v13995_v38 = vmax.f32 %v5582_v42, 0.0  ;;  %v5569_v54 = vadd.f32 %v5550_v59, %v5401_v49  ;;  %v5634_v51 = vsel %vm783_vm2, %v5631_v27, %v5633_v22  ;;  %v5684_v27 = vrot.slane %v13895_v20, 1  ;;  %v15068_v42 = vld [vmem:[#allocation93_spill] sm:$0xff] }
 0x6d7   : > { %v9351_v12 = vpop.f32.mrf.mxu1  ;;  %9426 = vmatmul.mubr.msk.bf16.gmra.mxu1 %vm5818_vm9, %v5674_v14  ;;  %v5666_v39 = vmul.f32 %v5634_v51, %v13633_v4  ;;  %v5686_v20 = vrot.slane %v13910_v15, 1 }
 0x6d8   : > { %v5635_v61 = vrot.slane %v13995_v38, 7  ;;  %v5759_v37 = vpack.c.bf16 %v13995_v38, %v13984_v46  ;;  %v5583_v33 = vadd.f32 %v5569_v54, %v13842_v45  ;;  %9429 = vmatprep.mubr.msk.bf16.mxu1 %vm10619_vm7, %v15067_v52  ;;  %v15069_v54 = vld [vmem:[#allocation97_spill] sm:$0xff]  ;;  %v15070_v12 = vld [vmem:[#allocation95_spill] sm:$0xff]  ;;  %v5698_v51 = vrot.slane %v13995_v38, 1 }
 0x6d9   : > { %v5553_v6 = vpop.f32.mrf.mxu1  ;;  %v5687_v40 = vsel %vm1050_vm1, %v5684_v27, %v5686_v20 }
 0x6da   : > { %v5636_v2 = vsel %vm783_vm2, %v5633_v22, %v5635_v61  ;;  %v14008_v3 = vmax.f32 %v5583_v33, 0.0  ;;  %v5570_v44 = vadd.f32 %v5553_v6, %v5404_v50  ;;  %9388 = vmatmul.mubr.msk.bf16.gmra.mxu0 %vm5818_vm9, %v5759_v37  ;;  %v15071_v33 = vld [vmem:[#allocation56_spill] sm:$0xff] }
 0x6db   : > { %v5667_v13 = vmul.f32 %v5636_v2, %v13631_v43  ;;  %v9352_v32 = vpop.f32.mrf.mxu1  ;;  %9391 = vmatprep.mubr.msk.bf16.mxu0 %vm10619_vm7, %v15067_v52 }
 0x6dc   : > { %v5637_v62 = vrot.slane %v14008_v3, 7  ;;  %v5584_v17 = vadd.f32 %v5570_v44, %v13842_v45  ;;  %v5677_v45 = vrot.slane %v13847_v0, 1  ;;  %v15072_v44 = vld [vmem:[#allocation54_spill] sm:$0xff]  ;;  %v15073_v32 = vld [vmem:[#allocation55_spill] sm:$0xff] }
 0x6dd   : > { %v5675_v56 = vpack.c.bf16 %v5667_v13, %v5666_v39 }
 0x6de   : > { %v14018_v10 = vmax.f32 %v5584_v17, 0.0  ;;  %v5638_v4 = vsel %vm783_vm2, %v5635_v61, %v5637_v62  ;;  %v5679_v11 = vsel %vm1050_vm1, %v5677_v45, %v5678_v5  ;;  %v15074_v17 = vld [vmem:[#allocation57_spill] sm:$0xff]  ;;  %v10143_v5 = vld [vmem:[%s15076_s6 + $0x30] sm:$0xff]  }
 0x6df   : > { %9430 = vmatmul.mubr.msk.bf16.gmra.mxu1 %vm5818_vm9, %v5675_v56  ;;  %v5668_v26 = vmul.f32 %v5638_v4, %v13672_v16  ;;  %v5719_v9 = vmul.f32 %v5679_v11, %v13482_v41  ;;  %v5683_v16 = vsel %vm1050_vm1, %v5680_v55, %v5682_v18  ;;  %v5688_v41 = vrot.slane %v13927_v34, 1  ;;  %v10144_v4 = vld [vmem:[%s15075_s14 + $0x28] sm:$0xff]   ;;  %v10147_v45 = vld [vmem:[%s15076_s6 + $0x20] sm:$0xff]   ;;  %v10150_v11 = vld [vmem:[%s15075_s14 + $0x10] sm:$0xff]  }
 0x6e0   : > { %v5639_v43 = vrot.slane %v14018_v10, 7  ;;  %v5760_v28 = vpack.c.bf16 %v14018_v10, %v14008_v3  ;;  %9433 = vmatprep.mubr.msk.bf16.mxu1 %vm10619_vm7, %v15067_v52  ;;  %v5721_v7 = vmul.f32 %v5683_v16, %v13492_v58  ;;  %v5723_v34 = vmul.f32 %v5687_v40, %v13497_v35 }
 0x6e1   : > { %v5733_v63 = vpack.c.bf16 %v5720_v19, %v5719_v9  ;;  %v5689_v23 = vsel %vm1050_vm1, %v5686_v20, %v5688_v41  ;;  %v5690_v58 = vrot.slane %v13942_v31, 1  ;;  %v5694_v35 = vrot.slane %v13971_v30, 1  ;;  %v10153_v19 = vld [vmem:[%s15076_s6 + $0x8] sm:$0xff]  }
 0x6e2   : > { %v5640_v36 = vsel %vm783_vm2, %v5637_v62, %v5639_v43  ;;  %9392 = vmatmul.mubr.msk.bf16.gmra.mxu0 %vm5818_vm9, %v5760_v28  ;;  %v5724_v57 = vmul.f32 %v5689_v23, %v13513_v29  ;;  %v5696_v29 = vrot.slane %v13984_v46, 1  ;;  %v5702_v2 = vrot.slane %v14018_v10, 1  ;;  %v10142_v10 = vld [vmem:[%s15075_s14 + $0x30] sm:$0xff]   ;;  %v10145_v43 = vld [vmem:[%s15076_s6 + $0x28] sm:$0xff]   ;;  %v10146_v28 = vld [vmem:[%s15075_s14 + $0x20] sm:$0xff]  }
 0x6e3   : > { %v5669_v21 = vmul.f32 %v5640_v36, %v13666_v48  ;;  %9451 = vmatprep.mubr.msk.bf16.mxu0 %vm10619_vm7, %v15067_v52  ;;  %v5685_v48 = vsel %vm1050_vm1, %v5682_v18, %v5684_v27  ;;  %v5691_v49 = vsel %vm1050_vm1, %v5688_v41, %v5690_v58  ;;  %9480 = vmatpush3.bf16.msra.mxu1 %v10142_v10  ;;  %v10149_v36 = vld [vmem:[%s15076_s6 + $0x18] sm:$0xff]   ;;  %v10154_v27 = vld [vmem:[%s15075_s14] sm:$0xff]  }
 0x6e4   : > { %v5722_v60 = vmul.f32 %v5685_v48, %v13488_v25  ;;  %v5692_v25 = vrot.slane %v13959_v24, 1  ;;  %v5735_v47 = vpack.c.bf16 %v5724_v57, %v5723_v34  ;;  %v5725_v24 = vmul.f32 %v5691_v49, %v15068_v42  ;;  %9481 = vmatprep.subr.bf16.mxu1 %v15067_v52 }
 0x6e5   : > { %v5676_v0 = vpack.c.bf16 %v5669_v21, %v5668_v26  ;;  %v5697_v31 = vsel %vm1050_vm1, %v5694_v35, %v5696_v29  ;;  %v5699_v37 = vsel %vm1050_vm1, %v5696_v29, %v5698_v51  ;;  %v5718_v38 = vsel %vm1050_vm1, %v5702_v2, 0.0  ;;  %v10151_v26 = vld [vmem:[%s15076_s6 + $0x10] sm:$0xff]   ;;  %v10152_v21 = vld [vmem:[%s15075_s14 + $0x8] sm:$0xff]  }
 0x6e6   : > { %v5734_v1 = vpack.c.bf16 %v5722_v60, %v5721_v7  ;;  %v5693_v15 = vsel %vm1050_vm1, %v5690_v58, %v5692_v25  ;;  %v5695_v14 = vsel %vm1050_vm1, %v5692_v25, %v5694_v35  ;;  %v5728_v50 = vmul.f32 %v5697_v31, %v15069_v54 }
 0x6e7   : > { %9434 = vmatmul.mubr.msk.bf16.gmra.mxu1 %vm5818_vm9, %v5676_v0  ;;  %v5726_v22 = vmul.f32 %v5693_v15, %v13558_v8  ;;  %v5700_v8 = vrot.slane %v14008_v3, 1  ;;  %v5727_v46 = vmul.f32 %v5695_v14, %v15070_v12  ;;  %v5729_v3 = vmul.f32 %v5699_v37, %v15072_v44  ;;  %v10155_v0 = vld [vmem:[%s15076_s6] sm:$0xff]  }
 0x6e8   : > { %9493 = vmatprep.mubr.msk.bf16.mxu1 %vm10619_vm7, %v15067_v52  ;;  %v5732_v55 = vmul.f32 %v5718_v38, %v15074_v17  ;;  %9482 = vmatpush3.bf16.msra.mxu1 %v10144_v4 }
 0x6e9   : > { %v5736_v59 = vpack.c.bf16 %v5726_v22, %v5725_v24  ;;  %v5737_v61 = vpack.c.bf16 %v5728_v50, %v5727_v46  ;;  %v5701_v30 = vsel %vm1050_vm1, %v5698_v51, %v5700_v8  ;;  %v5703_v13 = vsel %vm1050_vm1, %v5700_v8, %v5702_v2  ;;  %9483 = vmatprep.subr.bf16.mxu1 %v15067_v52 }
 0x6ea   : > { %9452 = vmatmul.mubr.msk.bf16.vlgmr.msra.gmra.mxu0 %vm5818_vm9, %v5733_v63  ;;  %v5730_v6 = vmul.f32 %v5701_v30, %v15071_v33  ;;  %v5731_v62 = vmul.f32 %v5703_v13, %v15073_v32 }
 0x6eb   : > { %9455 = vmatprep.mubr.msk.bf16.mxu0 %vm10619_vm7, %v15067_v52  ;;  %9522 = vmatpush3.bf16.msra.mxu0 %v10143_v5 }
 0x6ec   : > { %v5738_v39 = vpack.c.bf16 %v5730_v6, %v5729_v3  ;;  %v5739_v56 = vpack.c.bf16 %v5732_v55, %v5731_v62  ;;  %9523 = vmatprep.subr.bf16.mxu0 %v15067_v52  ;;  %9484 = vmatpush3.bf16.msra.mxu1 %v10146_v28 }
 0x6ed   : > { %9485 = vmatprep.subr.bf16.mxu1 %v15067_v52 }
 0x6ef   : > { %9524 = vmatpush3.bf16.msra.mxu0 %v10145_v43 }
 0x6f0   : > { %9525 = vmatprep.subr.bf16.mxu0 %v15067_v52  ;;  %9486 = vmatpush3.bf16.msra.mxu1 %v10148_v53 }
 0x6f1   : > { %9487 = vmatprep.subr.bf16.mxu1 %v15067_v52 }
 0x6f2   : > { %9456 = vmatmul.mubr.msk.bf16.gmra.mxu0 %vm5818_vm9, %v5734_v1 }
 0x6f3   : > { %9459 = vmatprep.mubr.msk.bf16.mxu0 %vm10619_vm7, %v15067_v52  ;;  %9526 = vmatpush3.bf16.msra.mxu0 %v10147_v45 }
 0x6f4   : > { %9527 = vmatprep.subr.bf16.mxu0 %v15067_v52  ;;  %9488 = vmatpush3.bf16.msra.mxu1 %v10150_v11 }
 0x6f5   : > { %9489 = vmatprep.subr.bf16.mxu1 %v15067_v52 }
 0x6f7   : > { %9528 = vmatpush3.bf16.msra.mxu0 %v10149_v36 }
 0x6f8   : > { %9529 = vmatprep.subr.bf16.mxu0 %v15067_v52  ;;  %9490 = vmatpush3.bf16.msra.mxu1 %v10152_v21 }
 0x6f9   : > { %9491 = vmatprep.subr.bf16.mxu1 %v15067_v52 }
 0x6fa   : > { %9460 = vmatmul.mubr.msk.bf16.gmra.mxu0 %vm5818_vm9, %v5735_v47 }
 0x6fb   : > { %9463 = vmatprep.mubr.msk.bf16.mxu0 %vm10619_vm7, %v15067_v52  ;;  %9530 = vmatpush3.bf16.msra.mxu0 %v10151_v26  ;;  %v14195_v26 = vld [vmem:[#allocation10 + $0x3] ss:$0 sm:$0xff] }
 0x6fc   : > { %9531 = vmatprep.subr.bf16.mxu0 %v15067_v52  ;;  %9492 = vmatpush3.bf16.msra.mxu1 %v10154_v27 }
 0x6ff   : > { %9532 = vmatpush3.bf16.msra.mxu0 %v10153_v19 }
 0x700   : > { %9533 = vmatprep.subr.bf16.mxu0 %v15067_v52 }
 0x702   : > { %9464 = vmatmul.mubr.msk.bf16.gmra.mxu0 %vm5818_vm9, %v5736_v59 }
 0x703   : > { %9467 = vmatprep.mubr.msk.bf16.mxu0 %vm10619_vm7, %v15067_v52  ;;  %9534 = vmatpush3.bf16.msra.mxu0 %v10155_v0 }
 0x704   : > { %9633 = vmatprep.subr.bf16.mxu0 %v15067_v52 }
 0x70a   : > { %9468 = vmatmul.mubr.msk.bf16.gmra.mxu0 %vm5818_vm9, %v5737_v61 }
 0x70b   : > { %9471 = vmatprep.mubr.msk.bf16.mxu0 %vm10619_vm7, %v15067_v52 }
 0x712   : > { %9472 = vmatmul.mubr.msk.bf16.gmra.mxu0 %vm5818_vm9, %v5738_v39 }
 0x713   : > { %9475 = vmatprep.mubr.msk.bf16.mxu0 %vm10619_vm7, %v15067_v52 }
 0x71a   : > { %9476 = vmatmul.mubr.msk.bf16.gmra.mxu0 %vm5818_vm9, %v5739_v56 }
 0x71b   : > { %9535 = vmatprep.mubr.msk.bf16.mxu0 %vm10619_vm7, %v15067_v52 }
 0x772   : > { %v5874_v9 = vpop.f32.mrf.mxu0 }
 0x774   : > { %v9369_v18 = vpop.f32.mrf.mxu0 }
 0x776   : > { %v5877_v63 = vpop.f32.mrf.mxu0 }
 0x777   : > { %v6026_v48 = vpop.f32.mrf.mxu1 }
 0x778   : > { %v9370_v16 = vpop.f32.mrf.mxu0  ;;  %v6027_v28 = vadd.f32 %v6026_v48, %v5874_v9 }
 0x779   : > { %v9411_v60 = vpop.f32.mrf.mxu1 }
 0x77a   : > { %v5882_v41 = vpop.f32.mrf.mxu0 }
 0x77b   : > { %v6029_v7 = vpop.f32.mrf.mxu1 }
 0x77c   : > { %v9373_v20 = vpop.f32.mrf.mxu0  ;;  %v6030_v19 = vadd.f32 %v6029_v7, %v5877_v63 }
 0x77d   : > { %v9412_v1 = vpop.f32.mrf.mxu1 }
 0x77e   : > { %v14153_v23 = vpop.f32.mrf.mxu0 }
 0x77f   : > { %v6034_v40 = vpop.f32.mrf.mxu1 }
 0x780   : > { %v9374_v57 = vpop.f32.mrf.mxu0  ;;  %v6035_v20 = vadd.f32 %v6034_v40, %v5882_v41 }
 0x781   : > { %v9415_v25 = vpop.f32.mrf.mxu1 }
 0x782   : > { %v14155_v34 = vpop.f32.mrf.mxu0 }
 0x783   : > { %v6037_v58 = vpop.f32.mrf.mxu1 }
 0x784   : > { %v9377_v47 = vpop.f32.mrf.mxu0 }
 0x785   : > { %v9416_v15 = vpop.f32.mrf.mxu1 }
 0x786   : > { %v14157_v49 = vpop.f32.mrf.mxu0  ;;  %v6038_v15 = vadd.f32 %v6037_v58, %v14153_v23 }
 0x787   : > { %v14159_v22 = vpop.f32.mrf.mxu1 }
 0x788   : > { %v9378_v29 = vpop.f32.mrf.mxu0  ;;  %v6043_v41 = vadd.f32 %v14159_v22, %v14155_v34 }
 0x789   : > { %v9419_v42 = vpop.f32.mrf.mxu1 }
 0x78a   : > { %v14161_v24 = vpop.f32.mrf.mxu0 }
 0x78b   : > { %v14163_v35 = vpop.f32.mrf.mxu1 }
 0x78c   : > { %v9381_v59 = vpop.f32.mrf.mxu0 }
 0x78d   : > { %v9420_v31 = vpop.f32.mrf.mxu1 }
 0x78e   : > { %v14165_v14 = vpop.f32.mrf.mxu0 }
 0x78f   : > { %v14167_v54 = vpop.f32.mrf.mxu1 }
 0x790   : > { %v9382_v50 = vpop.f32.mrf.mxu0  ;;  %v6051_v22 = vadd.f32 %v14167_v54, %v14161_v24 }
 0x791   : > { %v9423_v8 = vpop.f32.mrf.mxu1 }
 0x792   : > { %v14169_v12 = vpop.f32.mrf.mxu0 }
 0x793   : > { %v14171_v46 = vpop.f32.mrf.mxu1 }
 0x794   : > { %v9385_v51 = vpop.f32.mrf.mxu0 }
 0x795   : > { %v9424_v61 = vpop.f32.mrf.mxu1  ;;  %v6046_v51 = vadd.f32 %v14163_v35, %v14157_v49 }
 0x796   : > { %v14173_v30 = vpop.f32.mrf.mxu0 }
 0x797   : > { %v14175_v37 = vpop.f32.mrf.mxu1 }
 0x798   : > { %v9386_v33 = vpop.f32.mrf.mxu0  ;;  %v6059_v54 = vadd.f32 %v14175_v37, %v14169_v12 }
 0x799   : > { %v9427_v6 = vpop.f32.mrf.mxu1 }
 0x79a   : > { %v14177_v2 = vpop.f32.mrf.mxu0 }
 0x79b   : > { %v14179_v44 = vpop.f32.mrf.mxu1 }
 0x79c   : > { %v9389_v3 = vpop.f32.mrf.mxu0 }
 0x79d   : > { %v9428_v39 = vpop.f32.mrf.mxu1 }
 0x79e   : > { %v14181_v13 = vpop.f32.mrf.mxu0 }
 0x79f   : > { %v14183_v38 = vpop.f32.mrf.mxu1 }
 0x7a0   : > { %v9390_v32 = vpop.f32.mrf.mxu0  ;;  %v6067_v37 = vadd.f32 %v14183_v38, %v14177_v2 }
 0x7a1   : > { %v9431_v62 = vpop.f32.mrf.mxu1 }
 0x7a2   : > { %v14185_v17 = vpop.f32.mrf.mxu0 }
 0x7a3   : > { %v14187_v55 = vpop.f32.mrf.mxu1 }
 0x7a4   : > { %v9393_v56 = vpop.f32.mrf.mxu0 }
 0x7a5   : > { %v9432_v10 = vpop.f32.mrf.mxu1 }
 0x7a6   : > { %v14189_v5 = vpop.f32.mrf.mxu0  ;;  %v6054_v10 = vadd.f32 %v14171_v46, %v14165_v14 }
 0x7a7   : > { %v14191_v4 = vpop.f32.mrf.mxu1 }
 0x7a8   : > { %v9394_v43 = vpop.f32.mrf.mxu0  ;;  %v6075_v38 = vadd.f32 %v14191_v4, %v14185_v17 }
 0x7a9   : > { %v9435_v45 = vpop.f32.mrf.mxu1 }
 0x7aa   : > { %v6193_v53 = vpop.f32.mrf.mxu0 }
 0x7ab   : > { %v6248_v36 = vadd.f32 %v6193_v53, %v6027_v28  ;;  %v14193_v11 = vpop.f32.mrf.mxu1 }
 0x7ac   : > { %v9453_v21 = vpop.f32.mrf.mxu0 }
 0x7ad   : > { %v9436_v27 = vpop.f32.mrf.mxu1  ;;  %v6262_v18 = vadd.f32 %v6248_v36, %v14195_v26 }
 0x7ae   : > { %v6196_v0 = vpop.f32.mrf.mxu0 }
 0x7af   : > { %v6249_v16 = vadd.f32 %v6196_v0, %v6030_v19  ;;  %v6276_v9 = vmax.f32 %v6262_v18, 0.0  ;;  %v6062_v0 = vadd.f32 %v14179_v44, %v14173_v30 }
 0x7b0   : > { %v9454_v60 = vpop.f32.mrf.mxu0 }
 0x7b1   : > { %v6263_v1 = vadd.f32 %v6249_v16, %v14195_v26 }
 0x7b2   : > { %v6201_v57 = vpop.f32.mrf.mxu0 }
 0x7b3   : > { %v6277_v48 = vmax.f32 %v6263_v1, 0.0  ;;  %v6250_v25 = vadd.f32 %v6201_v57, %v6035_v20 }
 0x7b4   : > { %v9457_v47 = vpop.f32.mrf.mxu0 }
 0x7b5   : > { %v6290_v29 = vpack.c.bf16 %v6277_v48, %v6276_v9  ;;  %v6264_v63 = vadd.f32 %v6250_v25, %v14195_v26  ;;  %v6070_v25 = vadd.f32 %v14187_v55, %v14181_v13 }
 0x7b6   : > { %v6204_v42 = vpop.f32.mrf.mxu0 }
 0x7b7   : > { %v6251_v7 = vadd.f32 %v6204_v42, %v6038_v15  ;;  %9494 = vmatmul.mubr.msk.bf16.vlgmr.msra.gmra.mxu1 %vm5818_vm9, %v6290_v29  ;;  %9536 = vmatmul.mubr.msk.bf16.vlgmr.msra.gmra.mxu0 %vm5818_vm9, %v6290_v29  ;;  %v6278_v58 = vmax.f32 %v6264_v63, 0.0 }
 0x7b8   : > { %v9458_v59 = vpop.f32.mrf.mxu0  ;;  %9497 = vmatprep.mubr.msk.bf16.mxu1 %vm10619_vm7, %v15067_v52  ;;  %9539 = vmatprep.mubr.msk.bf16.mxu0 %vm10619_vm7, %v15067_v52 }
 0x7b9   : > { %v6265_v23 = vadd.f32 %v6251_v7, %v14195_v26 }
 0x7ba   : > { %v6209_v40 = vpop.f32.mrf.mxu0 }
 0x7bb   : > { %v6279_v31 = vmax.f32 %v6265_v23, 0.0  ;;  %v6252_v50 = vadd.f32 %v6209_v40, %v6043_v41  ;;  %v6078_v23 = vadd.f32 %v14193_v11, %v14189_v5 }
 0x7bc   : > { %v9461_v8 = vpop.f32.mrf.mxu0 }
 0x7bd   : > { %v6291_v61 = vpack.c.bf16 %v6279_v31, %v6278_v58  ;;  %v6266_v6 = vadd.f32 %v6252_v50, %v14195_v26 }
 0x7be   : > { %v6212_v33 = vpop.f32.mrf.mxu0 }
 0x7bf   : > { %v6253_v3 = vadd.f32 %v6212_v33, %v6046_v51  ;;  %9498 = vmatmul.mubr.msk.bf16.gmra.mxu1 %vm5818_vm9, %v6291_v61  ;;  %9540 = vmatmul.mubr.msk.bf16.gmra.mxu0 %vm5818_vm9, %v6291_v61  ;;  %v6280_v39 = vmax.f32 %v6266_v6, 0.0  ;;  %v10156_v51 = vld [vmem:[#allocation14] sm:$0xff]   ;;  %v10620_v61 = vmov 4   ;;  %v10247_v6 = vld [vmem:[%s14556_s7 + $0x10] sm:$0xff] }
 0x7c0   : > { %v9462_v34 = vpop.f32.mrf.mxu0  ;;  %9501 = vmatprep.mubr.msk.bf16.mxu1 %vm10619_vm7, %v15067_v52  ;;  %9543 = vmatprep.mubr.msk.bf16.mxu0 %vm10619_vm7, %v15067_v52  ;;  %v10246_v33 = vld [vmem:[%s14556_s7] sm:$0xff] }
 0x7c1   : > { %v6267_v49 = vadd.f32 %v6253_v3, %v14195_v26  ;;  %9965 = vset.pattern.permute.xlu1 %v10620_v61  ;;  %9964 = vset.pattern.permute.xlu0 %v10620_v61  ;;  %v10248_v3 = vld [vmem:[%s14556_s7 + $0x18] sm:$0xff]  ;;  %v10249_v34 = vld [vmem:[%s14556_s7 + $0x20] sm:$0xff] }
 0x7c2   : > { %v6217_v35 = vpop.f32.mrf.mxu0  ;;  %6830 = vperm.xlu0 %9964, %v10246_v33  }
 0x7c3   : > { %v6281_v32 = vmax.f32 %v6267_v49, 0.0  ;;  %v6254_v62 = vadd.f32 %v6217_v35, %v6051_v22  ;;  %v10250_v22 = vld [vmem:[%s14556_s7 + $0x28] sm:$0xff]  ;;  %v10251_v49 = vld [vmem:[%s14556_s7 + $0x30] sm:$0xff]  ;;  %v10621_v35 = vmov 5  }
 0x7c4   : > { %v9465_v56 = vpop.f32.mrf.mxu0 }
 0x7c5   : > { %v6292_v43 = vpack.c.bf16 %v6281_v32, %v6280_v39  ;;  %v6268_v45 = vadd.f32 %v6254_v62, %v14195_v26 }
 0x7c6   : > { %v6220_v28 = vpop.f32.mrf.mxu0  ;;  %6842 = vperm.xlu0 %9964, %v10248_v3  }
 0x7c7   : > { %v6255_v53 = vadd.f32 %v6220_v28, %v6054_v10  ;;  %9502 = vmatmul.mubr.msk.bf16.gmra.mxu1 %vm5818_vm9, %v6292_v43  ;;  %9544 = vmatmul.mubr.msk.bf16.gmra.mxu0 %vm5818_vm9, %v6292_v43  ;;  %v6282_v36 = vmax.f32 %v6268_v45, 0.0 }
 0x7c8   : > { %v9466_v24 = vpop.f32.mrf.mxu0  ;;  %9505 = vmatprep.mubr.msk.bf16.mxu1 %vm10619_vm7, %v15067_v52  ;;  %9547 = vmatprep.mubr.msk.bf16.mxu0 %vm10619_vm7, %v15067_v52 }
 0x7c9   : > { %v6269_v14 = vadd.f32 %v6255_v53, %v14195_v26 }
 0x7ca   : > { %v6225_v46 = vpop.f32.mrf.mxu0  ;;  %6850 = vperm.xlu0 %9964, %v10250_v22  }
 0x7cb   : > { %v6283_v21 = vmax.f32 %v6269_v14, 0.0  ;;  %v6256_v19 = vadd.f32 %v6225_v46, %v6059_v54 }
 0x7cc   : > { %v9469_v27 = vpop.f32.mrf.mxu0 }
 0x7cd   : > { %v6293_v18 = vpack.c.bf16 %v6283_v21, %v6282_v36  ;;  %v6270_v60 = vadd.f32 %v6256_v19, %v14195_v26 }
 0x7ce   : > { %v6228_v16 = vpop.f32.mrf.mxu0  ;;  %9966 = vset.pattern.permute.xlu0 %v10621_v35 }
 0x7cf   : > { %v6257_v20 = vadd.f32 %v6228_v16, %v6062_v0  ;;  %9506 = vmatmul.mubr.msk.bf16.gmra.mxu1 %vm5818_vm9, %v6293_v18  ;;  %9548 = vmatmul.mubr.msk.bf16.gmra.mxu0 %vm5818_vm9, %v6293_v18  ;;  %v6284_v1 = vmax.f32 %v6270_v60, 0.0 }
 0x7d0   : > { %v9470_v12 = vpop.f32.mrf.mxu0  ;;  %9509 = vmatprep.mubr.msk.bf16.mxu1 %vm10619_vm7, %v15067_v52  ;;  %9551 = vmatprep.mubr.msk.bf16.mxu0 %vm10619_vm7, %v15067_v52 }
 0x7d1   : > { %v6271_v30 = vadd.f32 %v6257_v20, %v14195_v26  ;;  %6890 = vperm.xlu0 %9966, %v10246_v33  }
 0x7d2   : > { %v6233_v44 = vpop.f32.mrf.mxu0 }
 0x7d3   : > { %v6285_v57 = vmax.f32 %v6271_v30, 0.0  ;;  %v6258_v9 = vadd.f32 %v6233_v44, %v6067_v37 }
 0x7d4   : > { %v9473_v48 = vpop.f32.mrf.mxu0 }
 0x7d5   : > { %v6294_v47 = vpack.c.bf16 %v6285_v57, %v6284_v1  ;;  %v6272_v29 = vadd.f32 %v6258_v9, %v14195_v26  ;;  %6902 = vperm.xlu0 %9966, %v10248_v3  }
 0x7d6   : > { %v6236_v15 = vpop.f32.mrf.mxu0 }
 0x7d7   : > { %v6259_v42 = vadd.f32 %v6236_v15, %v6070_v25  ;;  %9510 = vmatmul.mubr.msk.bf16.gmra.mxu1 %vm5818_vm9, %v6294_v47  ;;  %9552 = vmatmul.mubr.msk.bf16.gmra.mxu0 %vm5818_vm9, %v6294_v47  ;;  %v6286_v63 = vmax.f32 %v6272_v29, 0.0 }
 0x7d8   : > { %v9474_v2 = vpop.f32.mrf.mxu0  ;;  %9513 = vmatprep.mubr.msk.bf16.mxu1 %vm10619_vm7, %v15067_v52  ;;  %9555 = vmatprep.mubr.msk.bf16.mxu0 %vm10619_vm7, %v15067_v52 }
 0x7d9   : > { %v6273_v13 = vadd.f32 %v6259_v42, %v14195_v26  ;;  %6910 = vperm.xlu0 %9966, %v10250_v22  }
 0x7da   : > { %v6241_v55 = vpop.f32.mrf.mxu0 }
 0x7db   : > { %v6287_v7 = vmax.f32 %v6273_v13, 0.0  ;;  %v6260_v59 = vadd.f32 %v6241_v55, %v6075_v38 }
 0x7dc   : > { %v9477_v41 = vpop.f32.mrf.mxu0 }
 0x7dd   : > { %v6295_v40 = vpack.c.bf16 %v6287_v7, %v6286_v63  ;;  %v6274_v31 = vadd.f32 %v6260_v59, %v14195_v26 }
 0x7de   : > { %v6244_v58 = vpop.f32.mrf.mxu0 }
 0x7df   : > { %v6261_v50 = vadd.f32 %v6244_v58, %v6078_v23  ;;  %9514 = vmatmul.mubr.msk.bf16.gmra.mxu1 %vm5818_vm9, %v6295_v40  ;;  %9556 = vmatmul.mubr.msk.bf16.gmra.mxu0 %vm5818_vm9, %v6295_v40  ;;  %v6288_v8 = vmax.f32 %v6274_v31, 0.0 }
 0x7e0   : > { %v9478_v17 = vpop.f32.mrf.mxu0  ;;  %9517 = vmatprep.mubr.msk.bf16.mxu1 %vm10619_vm7, %v15067_v52  ;;  %9559 = vmatprep.mubr.msk.bf16.mxu0 %vm10619_vm7, %v15067_v52 }
 0x7e1   : > { %v6275_v4 = vadd.f32 %v6261_v50, %v14195_v26  ;;  %v10245_v26 = vld [vmem:[%s14556_s7 + $0x8] sm:$0xff] }
 0x7e2   : > { %6834 = vperm.xlu1 %9965, %v10245_v26  }
 0x7e3   : > { %v6289_v5 = vmax.f32 %v6275_v4, 0.0 }
 0x7e5   : > { %v6296_v11 = vpack.c.bf16 %v6289_v5, %v6288_v8 }
 0x7e6   : > { %6838 = vperm.xlu1 %9965, %v10247_v6  }
 0x7e7   : > { %9518 = vmatmul.mubr.msk.bf16.gmra.mxu1 %vm5818_vm9, %v6296_v11  ;;  %9560 = vmatmul.mubr.msk.bf16.gmra.mxu0 %vm5818_vm9, %v6296_v11 }
 0x7e8   : > { %9641 = vmatprep.mubr.msk.bf16.mxu0 %vm10619_vm7, %v15067_v52  ;;  %9577 = vmatprep.mubr.msk.bf16.mxu1 %vm5818_vm9, %v10156_v51 }
 0x7ea   : > { %6846 = vperm.xlu1 %9965, %v10249_v34  }
 0x7ee   : > { %6854 = vperm.xlu1 %9965, %v10251_v49  }
 0x7f2   : > { %9967 = vset.pattern.permute.xlu1 %v10621_v35 }
 0x7f3   : > { %6894 = vperm.xlu1 %9967, %v10245_v26  }
 0x7f7   : > { %6898 = vperm.xlu1 %9967, %v10247_v6  }
 0x7fb   : > { %6906 = vperm.xlu1 %9967, %v10249_v34  }
 0x7ff   : > { %6914 = vperm.xlu1 %9967, %v10251_v49  }
 0x877   : > { %v6408_v39 = vpop.f32.mrf.mxu1  ;;  %v6553_v32 = vpop.f32.mrf.mxu0 }
 0x878   : > { %v6608_v62 = vmax.f32 %v6408_v39, %v6553_v32 }
 0x879   : > { %v9495_v56 = vpop.f32.mrf.mxu1  ;;  %v9537_v10 = vpop.f32.mrf.mxu0 }
 0x87a   : > { %v6636_v54 = vrot.slane %v6608_v62, 1 }
 0x87b   : > { %v6411_v43 = vpop.f32.mrf.mxu1  ;;  %v6556_v28 = vpop.f32.mrf.mxu0 }
 0x87c   : > { %v6609_v45 = vmax.f32 %v6411_v43, %v6556_v28 }
 0x87d   : > { %v9496_v53 = vpop.f32.mrf.mxu1  ;;  %v9538_v24 = vpop.f32.mrf.mxu0 }
 0x87e   : > { %v6637_v14 = vrot.slane %v6609_v45, 1 }
 0x87f   : > { %v6416_v46 = vpop.f32.mrf.mxu1  ;;  %v6561_v36 = vpop.f32.mrf.mxu0 }
 0x880   : > { %v14294_v21 = vmax.f32 %v6416_v46, %v6561_v36  ;;  %v6638_v19 = vsel %vm1050_vm1, %v6636_v54, %v6637_v14 }
 0x881   : > { %v9499_v27 = vpop.f32.mrf.mxu1  ;;  %v9541_v0 = vpop.f32.mrf.mxu0  ;;  %v6678_v18 = vmax.f32 %v6608_v62, %v6638_v19 }
 0x882   : > { %v6639_v16 = vrot.slane %v14294_v21, 1 }
 0x883   : > { %v14298_v60 = vpop.f32.mrf.mxu1  ;;  %v14300_v20 = vpop.f32.mrf.mxu0 }
 0x884   : > { %v6640_v12 = vsel %vm1050_vm1, %v6637_v14, %v6639_v16 }
 0x885   : > { %v9500_v37 = vpop.f32.mrf.mxu1  ;;  %v9542_v30 = vpop.f32.mrf.mxu0  ;;  %v6679_v44 = vmax.f32 %v6609_v45, %v6640_v12 }
 0x887   : > { %v14305_v1 = vpop.f32.mrf.mxu1  ;;  %v14307_v57 = vpop.f32.mrf.mxu0  ;;  %v14309_v9 = vpack.c.bf16 %v6679_v44, %v6678_v18 }
 0x889   : > { %v9503_v48 = vpop.f32.mrf.mxu1  ;;  %v9545_v25 = vpop.f32.mrf.mxu0 }
 0x88b   : > { %v6427_v47 = vpop.f32.mrf.mxu1  ;;  %v6572_v15 = vpop.f32.mrf.mxu0 }
 0x88d   : > { %v9504_v29 = vpop.f32.mrf.mxu1  ;;  %v9546_v42 = vpop.f32.mrf.mxu0 }
 0x88f   : > { %v6432_v2 = vpop.f32.mrf.mxu1  ;;  %v6577_v38 = vpop.f32.mrf.mxu0 }
 0x890   : > { %v6614_v25 = vmax.f32 %v6432_v2, %v6577_v38  ;;  %v6611_v38 = vmax.f32 %v14298_v60, %v14300_v20 }
 0x891   : > { %v9507_v13 = vpop.f32.mrf.mxu1  ;;  %v9549_v55 = vpop.f32.mrf.mxu0 }
 0x893   : > { %v6435_v63 = vpop.f32.mrf.mxu1  ;;  %v6580_v7 = vpop.f32.mrf.mxu0 }
 0x894   : > { %v6615_v27 = vmax.f32 %v6435_v63, %v6580_v7 }
 0x895   : > { %v9508_v59 = vpop.f32.mrf.mxu1  ;;  %v9550_v41 = vpop.f32.mrf.mxu0 }
 0x896   : > { %v6613_v59 = vmax.f32 %v6427_v47, %v6572_v15  ;;  %v6649_v41 = vrot.slane %v6615_v27, 1 }
 0x897   : > { %v6440_v23 = vpop.f32.mrf.mxu1  ;;  %v6585_v40 = vpop.f32.mrf.mxu0 }
 0x898   : > { %v6616_v14 = vmax.f32 %v6440_v23, %v6585_v40  ;;  %v6612_v40 = vmax.f32 %v14305_v1, %v14307_v57  ;;  %v6641_v57 = vrot.slane %v6611_v38, 1 }
 0x899   : > { %v9511_v58 = vpop.f32.mrf.mxu1  ;;  %v9553_v31 = vpop.f32.mrf.mxu0 }
 0x89a   : > { %v6651_v29 = vrot.slane %v6616_v14, 1  ;;  %v6647_v58 = vrot.slane %v6614_v25, 1  ;;  %v6642_v20 = vsel %vm1050_vm1, %v6639_v16, %v6641_v57 }
 0x89b   : > { %v6443_v50 = vpop.f32.mrf.mxu1  ;;  %v6588_v17 = vpop.f32.mrf.mxu0 }
 0x89c   : > { %v6617_v28 = vmax.f32 %v6443_v50, %v6588_v17  ;;  %v6652_v31 = vsel %vm1050_vm1, %v6649_v41, %v6651_v29  ;;  %v6645_v50 = vrot.slane %v6613_v59, 1  ;;  %v6650_v47 = vsel %vm1050_vm1, %v6647_v58, %v6649_v41 }
 0x89d   : > { %v9512_v4 = vpop.f32.mrf.mxu1  ;;  %v9554_v8 = vpop.f32.mrf.mxu0  ;;  %v6685_v17 = vmax.f32 %v6615_v27, %v6652_v31  ;;  %v6684_v1 = vmax.f32 %v6614_v25, %v6650_v47  ;;  %v10165_v27 = vld [vmem:[#allocation8 + $0x10] sm:$0xff]  }
 0x89e   : > { %v6653_v0 = vrot.slane %v6617_v28, 1  ;;  %v6643_v4 = vrot.slane %v6612_v40, 1  ;;  %v6648_v8 = vsel %vm1050_vm1, %v6645_v50, %v6647_v58 }
 0x89f   : > { %v6448_v5 = vpop.f32.mrf.mxu1  ;;  %v6593_v11 = vpop.f32.mrf.mxu0 }
 0x8a0   : > { %v6618_v62 = vmax.f32 %v6448_v5, %v6593_v11  ;;  %v6654_v63 = vsel %vm1050_vm1, %v6651_v29, %v6653_v0  ;;  %v6646_v5 = vsel %vm1050_vm1, %v6643_v4, %v6645_v50  ;;  %v6702_v11 = vpack.c.bf16 %v6685_v17, %v6684_v1  ;;  %v10168_v17 = vld [vmem:[#allocation8 + $0x50] ss:$0 sps:$4 sm:$0xff]  }
 0x8a1   : > { %v9515_v51 = vpop.f32.mrf.mxu1  ;;  %v9557_v61 = vpop.f32.mrf.mxu0  ;;  %v6686_v2 = vmax.f32 %v6616_v14, %v6654_v63  ;;  %v6682_v60 = vmax.f32 %v6612_v40, %v6646_v5  ;;  %v10167_v40 = vld [vmem:[#allocation8] sm:$0xff]  }
 0x8a2   : > { %v6655_v46 = vrot.slane %v6618_v62, 1  ;;  %v6683_v51 = vmax.f32 %v6613_v59, %v6648_v8  ;;  %v6644_v61 = vsel %vm1050_vm1, %v6641_v57, %v6643_v4 }
 0x8a3   : > { %v6451_v26 = vpop.f32.mrf.mxu1  ;;  %v6596_v33 = vpop.f32.mrf.mxu0 }
 0x8a4   : > { %v6619_v49 = vmax.f32 %v6451_v26, %v6596_v33  ;;  %v6656_v42 = vsel %vm1050_vm1, %v6653_v0, %v6655_v46  ;;  %v6701_v26 = vpack.c.bf16 %v6683_v51, %v6682_v60  ;;  %v6681_v33 = vmax.f32 %v6611_v38, %v6644_v61 }
 0x8a5   : > { %v9516_v6 = vpop.f32.mrf.mxu1  ;;  %v9558_v3 = vpop.f32.mrf.mxu0  ;;  %v6687_v23 = vmax.f32 %v6617_v28, %v6656_v42 }
 0x8a6   : > { %v6657_v45 = vrot.slane %v6619_v49, 1  ;;  %v6680_v6 = vmax.f32 %v14294_v21, %v6642_v20  ;;  %v10159_v21 = vld [vmem:[#allocation14 + $0x18] ss:$0 sps:$4 sm:$0xff]  }
 0x8a7   : > { %v6456_v34 = vpop.f32.mrf.mxu1  ;;  %v6601_v22 = vpop.f32.mrf.mxu0  ;;  %v6703_v15 = vpack.c.bf16 %v6687_v23, %v6686_v2 }
 0x8a8   : > { %v6620_v35 = vmax.f32 %v6456_v34, %v6601_v22  ;;  %v6658_v37 = vsel %vm1050_vm1, %v6655_v46, %v6657_v45  ;;  %v6700_v3 = vpack.c.bf16 %v6681_v33, %v6680_v6  ;;  %v10160_v34 = vld [vmem:[#allocation8 + $0x34] ss:$0 sps:$4 sm:$0xff]   ;;  %v10157_v22 = vld [vmem:[#allocation14 + $0x8] sm:$0xff]   ;;  %v10169_v33 = vld [vmem:[#allocation8 + $0x48] sm:$0xff]  }
 0x8a9   : > { %v9519_v39 = vpop.f32.mrf.mxu1  ;;  %v9561_v32 = vpop.f32.mrf.mxu0  ;;  %v6688_v55 = vmax.f32 %v6618_v62, %v6658_v37  ;;  %v6983_v16 = vsel %vm6981_vm10, %v10160_v34, 0 }
 0x8aa   : > { %v6659_v56 = vrot.slane %v6620_v35, 1  ;;  %v10162_v39 = vld [vmem:[#allocation8 + $0x24] sm:$0xff]   ;;  %v10164_v32 = vld [vmem:[#allocation8 + $0x18] ss:$0 sps:$4 sm:$0xff]   ;;  %v6835_v62 = vpop.permute.xlu1 %6834 }
 0x8ab   : > { %v6459_v10 = vpop.f32.mrf.mxu1  ;;  %v6604_v43 = vpop.f32.mrf.mxu0 }
 0x8ac   : > { %v6621_v53 = vmax.f32 %v6459_v10, %v6604_v43  ;;  %v6660_v19 = vsel %vm1050_vm1, %v6657_v45, %v6659_v56  ;;  %v6831_v43 = vpop.permute.xlu0 %6830 }
 0x8ad   : > { %v9520_v24 = vpop.f32.mrf.mxu1  ;;  %v9562_v54 = vpop.f32.mrf.mxu0  ;;  %v6689_v48 = vmax.f32 %v6619_v49, %v6660_v19  ;;  %v10158_v49 = vld [vmem:[#allocation14 + $0x10] sm:$0xff]   ;;  %v7083_v19 = vsel %vm6981_vm10, %v10164_v32, 0 }
 0x8ae   : > { %v6661_v36 = vrot.slane %v6621_v53, 1  ;;  %v6839_v45 = vpop.permute.xlu1 %6838 }
 0x8af   : > { %v6704_v7 = vpack.c.bf16 %v6689_v48, %v6688_v55  ;;  %v10166_v48 = vld [vmem:[#allocation8 + $0x8] sm:$0xff]  }
 0x8b0   : > { %v6677_v18 = vsel %vm1050_vm1, %v6661_v36, 0.0  ;;  %v6662_v12 = vsel %vm1050_vm1, %v6659_v56, %v6661_v36  ;;  %v6843_v0 = vpop.permute.xlu0 %6842 }
 0x8b1   : > { %v6691_v30 = vmax.f32 %v6621_v53, %v6677_v18  ;;  %v6690_v44 = vmax.f32 %v6620_v35, %v6662_v12  ;;  %v10161_v35 = vld [vmem:[#allocation8 + $0x2c] sm:$0xff]  }
 0x8b2   : > { %v6847_v37 = vpop.permute.xlu1 %6846 }
 0x8b3   : > { %v6705_v13 = vpack.c.bf16 %v6691_v30, %v6690_v44 }
 0x8b4   : > { %v6851_v63 = vpop.permute.xlu0 %6850 }
 0x8b5   : > { %9563 = vmatprep.subr.bf16.mxu1 %v6705_v13 }
 0x8b6   : > { %9564 = vmatpush3.bf16.msra.mxu1 %v6705_v13  ;;  %v6855_v58 = vpop.permute.xlu1 %6854 }
 0x8b7   : > { %9565 = vmatprep.subr.bf16.mxu1 %v6704_v7 }
 0x8b8   : > { %v6891_v57 = vpop.permute.xlu0 %6890 }
 0x8ba   : > { %9566 = vmatpush3.bf16.msra.mxu1 %v6704_v7  ;;  %v6895_v5 = vpop.permute.xlu1 %6894 }
 0x8bb   : > { %9567 = vmatprep.subr.bf16.mxu1 %v6703_v15 }
 0x8be   : > { %9568 = vmatpush3.bf16.msra.mxu1 %v6703_v15 }
 0x8bf   : > { %9569 = vmatprep.subr.bf16.mxu1 %v6702_v11 }
 0x8c2   : > { %9570 = vmatpush3.bf16.msra.mxu1 %v6702_v11 }
 0x8c3   : > { %9571 = vmatprep.subr.bf16.mxu1 %v6701_v26 }
 0x8c6   : > { %9572 = vmatpush3.bf16.msra.mxu1 %v6701_v26  ;;  %v7191_v26 = vsel %vm6981_vm10, %v10168_v17, 0 }
 0x8c7   : > { %9573 = vmatprep.subr.bf16.mxu1 %v6700_v3 }
 0x8ca   : > { %9574 = vmatpush3.bf16.msra.mxu1 %v6700_v3 }
 0x8cb   : > { %9575 = vmatprep.subr.bf16.mxu1 %v14309_v9 }
 0x8ce   : > { %9576 = vmatpush3.bf16.msra.mxu1 %v14309_v9  ;;  %v10163_v9 = vld [vmem:[#allocation8 + $0x1c] sm:$0xff]  }
 0x8cf   : > { %9747 = vmatprep.subr.msk.bf16.mxu1 %vm6981_vm10, %v10160_v34 }
 0x8d1   : > { %9578 = vmatmul.mubr.msk.bf16.vlgmr.msra.gmra.mxu1 %vm5818_vm9, %v10157_v22 }
 0x8d2   : > { %9581 = vmatprep.mubr.msk.bf16.mxu1 %vm5818_vm9, %v10158_v49  ;;  %9586 = vmatpush3.bf16.msra.mxu1 %v6983_v16  ;;  %v6903_v49 = vpop.permute.xlu0 %6902 }
 0x8d3   : > { %9587 = vmatprep.subr.bf16.mxu1 %v10161_v35 }
 0x8d6   : > { %9588 = vmatpush3.bf16.msra.mxu1 %v10161_v35  ;;  %v10170_v35 = vld [vmem:[#allocation8 + $0x40] sm:$0xff]  }
 0x8d7   : > { %9589 = vmatprep.subr.bf16.mxu1 %v10162_v39 }
 0x8d9   : > { %9582 = vmatmul.mubr.msk.bf16.gmra.mxu1 %vm5818_vm9, %v10159_v21  ;;  %v6899_v21 = vpop.permute.xlu1 %6898 }
 0x8da   : > { %9590 = vmatpush3.bf16.msra.mxu1 %v10162_v39 }
 0x8db   : > { %9591 = vmatprep.subr.bf16.mxu1 %v10163_v9 }
 0x8de   : > { %9592 = vmatpush3.bf16.msra.mxu1 %v10163_v9 }
 0x8df   : > { %9748 = vmatprep.subr.msk.bf16.mxu1 %vm6981_vm10, %v10164_v32 }
 0x991   : > { %v14338_v56 = vpop.f32.mrf.mxu1 }
 0x992   : > { %v6811_v29 = vrot.slane %v14338_v56, 7  ;;  %v6871_v61 = vrot.slane %v14338_v56, 1 }
 0x993   : > { %v14340_v10 = vpop.f32.mrf.mxu1 }
 0x994   : > { %v6808_v14 = vrot.slane %v14340_v10, 7  ;;  %v6868_v60 = vrot.slane %v14340_v10, 1 }
 0x995   : > { %v14342_v28 = vpop.f32.mrf.mxu1 }
 0x996   : > { %v6936_v46 = vpack.c.bf16 %v14342_v28, %v14338_v56  ;;  %v6828_v30 = vsel %vm783_vm2, 0.0, %v6808_v14  ;;  %v6813_v55 = vrot.slane %v14342_v28, 7  ;;  %v6873_v56 = vrot.slane %v14342_v28, 1 }
 0x997   : > { %v14344_v53 = vpop.f32.mrf.mxu1  ;;  %v6857_v13 = vmul.f32 %v6831_v43, %v6828_v30 }
 0x998   : > { %v6809_v24 = vrot.slane %v14344_v53, 7  ;;  %v6935_v54 = vpack.c.bf16 %v14344_v53, %v14340_v10  ;;  %v6814_v50 = vsel %vm783_vm2, %v6811_v29, %v6813_v55  ;;  %v6869_v1 = vrot.slane %v14344_v53, 1 }
 0x999   : > { %v14352_v36 = vpop.f32.mrf.mxu1  ;;  %v6860_v8 = vmul.f32 %v6843_v0, %v6814_v50 }
 0x99a   : > { %9593 = vmatprep.mubr.msk.bf16.mxu1 %vm6968_vm11, %v6935_v54  ;;  %v6810_v18 = vsel %vm783_vm2, %v6808_v14, %v6809_v24  ;;  %v6938_v7 = vpack.c.bf16 %v14352_v36, %v14352_v36  ;;  %v6812_v31 = vsel %vm783_vm2, %v6809_v24, %v6811_v29  ;;  %v6819_v11 = vrot.slane %v14352_v36, 7 }
 0x99b   : > { %v14357_v12 = vpop.f32.mrf.mxu1  ;;  %9594 = vmatmul.mubr.msk.bf16.vlgmr.msra.gmra.mxu1 %vm6968_vm11, %v6936_v46  ;;  %v6858_v25 = vmul.f32 %v6835_v62, %v6810_v18  ;;  %v6859_v47 = vmul.f32 %v6839_v45, %v6812_v31  ;;  %v6870_v34 = vsel %vm1050_vm1, %v6868_v60, %v6869_v1  ;;  %v6872_v22 = vsel %vm1050_vm1, %v6869_v1, %v6871_v61  ;;  %v10171_v45 = vld [vmem:[#allocation8 + $0x38] sm:$0xff]   ;;  %v6911_v46 = vpop.permute.xlu0 %6910 }
 0x99c   : > { %9602 = vmatpush3.bf16.msra.mxu1 %v7083_v19  ;;  %v6815_v23 = vrot.slane %v14357_v12, 7  ;;  %v6918_v39 = vmul.f32 %v6895_v5, %v6872_v22  ;;  %v6917_v9 = vmul.f32 %v6891_v57, %v6870_v34  ;;  %v6875_v32 = vrot.slane %v14357_v12, 1 }
 0x99d   : > { %v9584_v44 = vpop.f32.mrf.mxu1  ;;  %9603 = vmatprep.subr.bf16.mxu1 %v10165_v27  ;;  %v6864_v2 = vpack.c.bf16 %v6858_v25, %v6857_v13  ;;  %v6865_v20 = vpack.c.bf16 %v6860_v8, %v6859_v47  ;;  %v6879_v43 = vrot.slane %v14352_v36, 1  ;;  %v6874_v19 = vsel %vm1050_vm1, %v6871_v61, %v6873_v56 }
 0x99e   : > { %v6816_v15 = vsel %vm783_vm2, %v6813_v55, %v6815_v23  ;;  %v6924_v53 = vpack.c.bf16 %v6918_v39, %v6917_v9  ;;  %v6876_v24 = vsel %vm1050_vm1, %v6873_v56, %v6875_v32  ;;  %v6919_v18 = vmul.f32 %v6899_v21, %v6874_v19 }
 0x99f   : > { %v14362_v42 = vpop.f32.mrf.mxu1  ;;  %v6861_v51 = vmul.f32 %v6847_v37, %v6816_v15  ;;  %v6920_v28 = vmul.f32 %v6903_v49, %v6876_v24  ;;  %v6888_v30 = vsel %vm1050_vm1, %v6879_v43, 0.0 }
 0x9a0   : > { %v6817_v59 = vrot.slane %v14362_v42, 7  ;;  %v6937_v41 = vpack.c.bf16 %v14362_v42, %v14357_v12  ;;  %9604 = vmatpush3.bf16.msra.mxu1 %v10165_v27  ;;  %v6877_v62 = vrot.slane %v14362_v42, 1  ;;  %v6907_v27 = vpop.permute.xlu1 %6906 }
 0x9a1   : > { %9605 = vmatprep.subr.bf16.mxu1 %v10166_v48  ;;  %v6925_v12 = vpack.c.bf16 %v6920_v28, %v6919_v18 }
 0x9a2   : > { %9597 = vmatprep.mubr.msk.bf16.mxu1 %vm6968_vm11, %v6937_v41  ;;  %v6818_v38 = vsel %vm783_vm2, %v6815_v23, %v6817_v59  ;;  %v6820_v6 = vsel %vm783_vm2, %v6817_v59, %v6819_v11  ;;  %v6878_v54 = vsel %vm1050_vm1, %v6875_v32, %v6877_v62  ;;  %v6880_v14 = vsel %vm1050_vm1, %v6877_v62, %v6879_v43 }
 0x9a3   : > { %9598 = vmatmul.mubr.msk.bf16.gmra.mxu1 %vm6968_vm11, %v6938_v7  ;;  %v6862_v4 = vmul.f32 %v6851_v63, %v6818_v38  ;;  %v6863_v16 = vmul.f32 %v6855_v58, %v6820_v6  ;;  %v6921_v36 = vmul.f32 %v6907_v27, %v6878_v54  ;;  %v6922_v0 = vmul.f32 %v6911_v46, %v6880_v14 }
 0x9a4   : > { %9606 = vmatpush3.bf16.msra.mxu1 %v10166_v48  ;;  %9609 = vmatprep.mubr.msk.bf16.mxu1 %vm6968_vm11, %v6864_v2  ;;  %v6915_v37 = vpop.permute.xlu1 %6914 }
 0x9a5   : > { %9607 = vmatprep.subr.bf16.mxu1 %v10167_v40  ;;  %v6866_v3 = vpack.c.bf16 %v6862_v4, %v6861_v51  ;;  %v6867_v10 = vpack.c.bf16 %v6863_v16, %v6863_v16  ;;  %v6926_v44 = vpack.c.bf16 %v6922_v0, %v6921_v36  ;;  %v6923_v48 = vmul.f32 %v6915_v37, %v6888_v30  ;;  %v6800_v51 = vld [vmem:[#allocation10 + $0x4] ss:$0 sm:$0xff]  ;;  %v7330_v37 = vld [vmem:[#allocation16 + $0x4] sm:$0xf]  ;;  %v7282_v30 = vld [vmem:[#allocation16] sm:$0xf] }
 0x9a7   : > { %v6927_v25 = vpack.c.bf16 %v6923_v48, %v6923_v48  ;;  %v7420_v48 = vld [vmem:[#allocation16 + $0xc] sm:$0xf] }
 0x9a8   : > { %9608 = vmatpush3.bf16.msra.mxu1 %v10167_v40 }
 0x9a9   : > { %9749 = vmatprep.subr.msk.bf16.mxu1 %vm6981_vm10, %v10168_v17 }
 0x9ab   : > { %9610 = vmatmul.mubr.msk.bf16.vlgmr.msra.gmra.mxu1 %vm6968_vm11, %v6865_v20 }
 0x9ac   : > { %9613 = vmatprep.mubr.msk.bf16.mxu1 %vm6968_vm11, %v6866_v3  ;;  %9618 = vmatpush3.bf16.msra.mxu1 %v7191_v26 }
 0x9ad   : > { %9619 = vmatprep.subr.bf16.mxu1 %v10169_v33 }
 0x9b0   : > { %9620 = vmatpush3.bf16.msra.mxu1 %v10169_v33 }
 0x9b1   : > { %9621 = vmatprep.subr.bf16.mxu1 %v10170_v35 }
 0x9b3   : > { %9614 = vmatmul.mubr.msk.bf16.gmra.mxu1 %vm6968_vm11, %v6867_v10 }
 0x9b4   : > { %9622 = vmatpush3.bf16.msra.mxu1 %v10170_v35  ;;  %9625 = vmatprep.mubr.msk.bf16.mxu1 %vm6968_vm11, %v6924_v53 }
 0x9b5   : > { %9623 = vmatprep.subr.bf16.mxu1 %v10171_v45 }
 0x9b8   : > { %9624 = vmatpush3.bf16.msra.mxu1 %v10171_v45 }
 0x9b9   : > { %9645 = vmatprep.subr.bf16.mxu1 %v15067_v52 }
 0x9bb   : > { %9626 = vmatmul.mubr.msk.bf16.vlgmr.msra.gmra.mxu1 %vm6968_vm11, %v6925_v12 }
 0x9bc   : > { %9629 = vmatprep.mubr.msk.bf16.mxu1 %vm6968_vm11, %v6926_v44  ;;  %v7375_v44 = vld [vmem:[#allocation16 + $0x8] sm:$0xf] }
 0x9c3   : > { %9630 = vmatmul.mubr.msk.bf16.gmra.mxu1 %vm6968_vm11, %v6927_v25  ;;  %v7465_v25 = vld [vmem:[#allocation16 + $0x10] sm:$0xf] }
 0x9c4   : > { %9653 = vmatprep.mubr.msk.bf16.mxu1 %vm10619_vm7, %v15067_v52 }
 0xa5b   : > { %v9595_v29 = vpop.f32.mrf.mxu1 }
 0xa5d   : > { %v7019_v42 = vpop.f32.mrf.mxu1 }
 0xa5f   : > { %v9596_v13 = vpop.f32.mrf.mxu1 }
 0xa61   : > { %v7022_v55 = vpop.f32.mrf.mxu1 }
 0xa63   : > { %v9599_v59 = vpop.f32.mrf.mxu1 }
 0xa65   : > { %v7035_v41 = vpop.f32.mrf.mxu1 }
 0xa67   : > { %v9600_v63 = vpop.f32.mrf.mxu1 }
 0xa68   : > { %v10176_v63 = vld [vmem:[#allocation17 + $0x68] sm:$0xff]  }
 0xa69   : > { %v7038_v7 = vpop.f32.mrf.mxu1 }
 0xa6b   : > { %v9611_v23 = vpop.f32.mrf.mxu1 }
 0xa6c   : > { %v7128_v6 = vadd.f32 %v9611_v23, %v9595_v29  ;;  %v7510_v29 = vld [vmem:[#allocation16 + $0x14] sm:$0xf]  ;;  %v10178_v23 = vld [vmem:[#allocation17 + $0x60] sm:$0xff]  }
 0xa6d   : > { %v7119_v40 = vpop.f32.mrf.mxu1 }
 0xa6e   : > { %v7120_v32 = vadd.f32 %v7119_v40, %v7019_v42  ;;  %v7555_v42 = vld [vmem:[#allocation16 + $0x18] sm:$0xf]  ;;  %v10179_v40 = vld [vmem:[#allocation17 + $0x20] sm:$0xff]  }
 0xa6f   : > { %v9612_v58 = vpop.f32.mrf.mxu1 }
 0xa70   : > { %v7131_v60 = vadd.f32 %v9612_v58, %v9596_v13  ;;  %v10172_v13 = vld [vmem:[#allocation17 + $0x78] sm:$0xff]  }
 0xa71   : > { %v7122_v31 = vpop.f32.mrf.mxu1  ;;  %v10180_v58 = vld [vmem:[#allocation17 + $0x58] sm:$0xff]  }
 0xa72   : > { %v7123_v49 = vadd.f32 %v7122_v31, %v7022_v55  ;;  %v10173_v55 = vld [vmem:[#allocation17 + $0x38] sm:$0xff]  }
 0xa73   : > { %v9615_v2 = vpop.f32.mrf.mxu1  ;;  %v10181_v31 = vld [vmem:[#allocation17 + $0xf8] sm:$0xff]  }
 0xa74   : > { %v7144_v1 = vadd.f32 %v9615_v2, %v9599_v59  ;;  %v10174_v59 = vld [vmem:[#allocation17 + $0x70] sm:$0xff]   ;;  %v10183_v2 = vld [vmem:[#allocation17 + $0xb8] sm:$0xff]  }
 0xa75   : > { %v7135_v38 = vpop.f32.mrf.mxu1 }
 0xa76   : > { %v7136_v5 = vadd.f32 %v7135_v38, %v7035_v41  ;;  %v10175_v41 = vld [vmem:[#allocation17 + $0x30] sm:$0xff]  }
 0xa77   : > { %v9616_v50 = vpop.f32.mrf.mxu1  ;;  %v10185_v38 = vld [vmem:[#allocation17 + $0xf0] sm:$0xff]  }
 0xa78   : > { %v10182_v50 = vld [vmem:[#allocation17 + $0x18] sm:$0xff]  }
 0xa79   : > { %v7138_v47 = vpop.f32.mrf.mxu1 }
 0xa7a   : > { %v7139_v3 = vadd.f32 %v7138_v47, %v7038_v7  ;;  %v10177_v7 = vld [vmem:[#allocation17 + $0x28] sm:$0xff]   ;;  %v10184_v47 = vld [vmem:[#allocation17 + $0x50] sm:$0xff]  }
 0xa7b   : > { %v9627_v15 = vpop.f32.mrf.mxu1 }
 0xa7c   : > { %v7259_v35 = vadd.f32 %v9627_v15, %v7128_v6  ;;  %v10187_v15 = vld [vmem:[#allocation17 + $0xb0] sm:$0xff]   ;;  %v10194_v6 = vld [vmem:[#allocation17] sm:$0xff]  }
 0xa7d   : > { %v7227_v17 = vpop.f32.mrf.mxu1 }
 0xa7e   : > { %v7266_v45 = vadd.f32 %v7259_v35, %v6800_v51  ;;  %v7257_v53 = vadd.f32 %v7227_v17, %v7120_v32  ;;  %v10189_v17 = vld [vmem:[#allocation17 + $0xe8] sm:$0xff]   ;;  %v10198_v35 = vld [vmem:[#allocation17 + $0x98] sm:$0xff]  }
 0xa7f   : > { %v9628_v4 = vpop.f32.mrf.mxu1 }
 0xa80   : > { %v7260_v34 = vadd.f32 %v9628_v4, %v7131_v60  ;;  %v7273_v27 = vmax.f32 %v7266_v45, 0.0  ;;  %v7264_v28 = vadd.f32 %v7257_v53, %v6800_v51  ;;  %v10186_v4 = vld [vmem:[#allocation17 + $0x10] sm:$0xff]  }
 0xa81   : > { %v7230_v8 = vpop.f32.mrf.mxu1 }
 0xa82   : > { %v7267_v62 = vadd.f32 %v7260_v34, %v6800_v51  ;;  %v7258_v56 = vadd.f32 %v7230_v8, %v7123_v49  ;;  %v7271_v18 = vmax.f32 %v7264_v28, 0.0  ;;  %v10188_v8 = vld [vmem:[#allocation17 + $0x48] sm:$0xff]   ;;  %v10196_v49 = vld [vmem:[#allocation17 + $0xd8] sm:$0xff]  }
 0xa83   : > { %v9631_v57 = vpop.f32.mrf.mxu1 }
 0xa84   : > { %v7263_v11 = vadd.f32 %v9631_v57, %v7144_v1  ;;  %v7274_v14 = vmax.f32 %v7267_v62, 0.0  ;;  %v7265_v46 = vadd.f32 %v7258_v56, %v6800_v51  ;;  %v10191_v1 = vld [vmem:[#allocation17 + $0xa8] sm:$0xff]  }
 0xa85   : > { %v7243_v61 = vpop.f32.mrf.mxu1  ;;  %v10206_v56 = vld [vmem:[#allocation17 + $0x88] sm:$0xff]  }
 0xa86   : > { %v7270_v20 = vadd.f32 %v7263_v11, %v6800_v51  ;;  %v7261_v26 = vadd.f32 %v7243_v61, %v7136_v5  ;;  %v14419_v36 = vpack.c.bf16 %v7274_v14, %v7273_v27  ;;  %v7272_v0 = vmax.f32 %v7265_v46, 0.0  ;;  %v10190_v11 = vld [vmem:[#allocation17 + $0x8] sm:$0xff]  }
 0xa87   : > { %v9632_v33 = vpop.f32.mrf.mxu1 }
 0xa88   : > { %v7277_v22 = vmax.f32 %v7270_v20, 0.0  ;;  %v7268_v39 = vadd.f32 %v7261_v26, %v6800_v51  ;;  %v7278_v12 = vpack.c.bf16 %v7272_v0, %v7271_v18  ;;  %v10192_v26 = vld [vmem:[#allocation17 + $0x40] sm:$0xff]  }
 0xa89   : > { %v7246_v16 = vpop.f32.mrf.mxu1  ;;  %v10193_v33 = vld [vmem:[#allocation17 + $0xe0] sm:$0xff]  }
 0xa8a   : > { %v7281_v21 = vpack.c.bf16 %v7277_v22, %v7277_v22  ;;  %v7262_v9 = vadd.f32 %v7246_v16, %v7139_v3  ;;  %v7275_v24 = vmax.f32 %v7268_v39, 0.0  ;;  %v10195_v22 = vld [vmem:[#allocation17 + $0xa0] sm:$0xff]   ;;  %v10197_v16 = vld [vmem:[#allocation17 + $0x178] sm:$0xff]   ;;  %v10202_v39 = vld [vmem:[#allocation17 + $0x90] sm:$0xff]  }
 0xa8c   : > { %v14407_v10 = vsel %vm6981_vm10, %v7281_v21, 0  ;;  %v7269_v43 = vadd.f32 %v7262_v9, %v6800_v51  ;;  %v10200_v21 = vld [vmem:[#allocation17 + $0xd0] sm:$0xff]   ;;  %v10204_v9 = vld [vmem:[#allocation17 + $0xc8] sm:$0xff]  }
 0xa8d   : > { %9634 = vmatpush3.bf16.msra.mxu0 %v14407_v10  ;;  %9646 = vmatpush3.bf16.msra.mxu1 %v14407_v10 }
 0xa8e   : > { %v7276_v54 = vmax.f32 %v7269_v43, 0.0  ;;  %9635 = vmatprep.subr.bf16.mxu0 %v15067_v52  ;;  %9647 = vmatprep.subr.bf16.mxu1 %v15067_v52 }
 0xa90   : > { %v14413_v19 = vpack.c.bf16 %v7276_v54, %v7275_v24  ;;  %v10208_v24 = vld [vmem:[#allocation17 + $0xc0] sm:$0xff]  }
 0xa91   : > { %v10210_v54 = vld [vmem:[#allocation17 + $0x80] sm:$0xff]  }
 0xa92   : > { %9636 = vmatpush3.bf16.msra.mxu0 %v14413_v19  ;;  %9648 = vmatpush3.bf16.msra.mxu1 %v14413_v19 }
 0xa93   : > { %9637 = vmatprep.subr.bf16.mxu0 %v15067_v52  ;;  %9649 = vmatprep.subr.bf16.mxu1 %v15067_v52 }
 0xa96   : > { %9638 = vmatpush3.bf16.msra.mxu0 %v14419_v36  ;;  %9650 = vmatpush3.bf16.msra.mxu1 %v14419_v36 }
 0xa97   : > { %9639 = vmatprep.subr.bf16.mxu0 %v15067_v52  ;;  %9651 = vmatprep.subr.bf16.mxu1 %v15067_v52 }
 0xa9a   : > { %9640 = vmatpush3.bf16.msra.mxu0 %v7278_v12  ;;  %9652 = vmatpush3.bf16.msra.mxu1 %v7278_v12 }
 0xa9b   : > { %9657 = vmatprep.subr.bf16.mxu0 %v15067_v52  ;;  %9669 = vmatprep.subr.bf16.mxu1 %v15067_v52 }
 0xa9d   : > { %9654 = vmatmul.mubr.msk.bf16.vlgmr.msra.gmra.mxu1 %vm6968_vm11, %v7330_v37  ;;  %9642 = vmatmul.mubr.msk.bf16.vlgmr.msra.gmra.mxu0 %vm6968_vm11, %v7282_v30 }
 0xa9e   : > { %9658 = vmatpush3.bf16.msra.mxu0 %v14407_v10  ;;  %9670 = vmatpush3.bf16.msra.mxu1 %v14407_v10 }
 0xa9f   : > { %9659 = vmatprep.subr.bf16.mxu0 %v15067_v52  ;;  %9671 = vmatprep.subr.bf16.mxu1 %v15067_v52 }
 0xaa0   : > { %9665 = vmatprep.mubr.msk.bf16.mxu0 %vm10619_vm7, %v15067_v52  ;;  %9677 = vmatprep.mubr.msk.bf16.mxu1 %vm10619_vm7, %v15067_v52 }
 0xaa2   : > { %9660 = vmatpush3.bf16.msra.mxu0 %v14413_v19  ;;  %9672 = vmatpush3.bf16.msra.mxu1 %v14413_v19 }
 0xaa3   : > { %9661 = vmatprep.subr.bf16.mxu0 %v15067_v52  ;;  %9673 = vmatprep.subr.bf16.mxu1 %v15067_v52 }
 0xaa6   : > { %9662 = vmatpush3.bf16.msra.mxu0 %v14419_v36  ;;  %9674 = vmatpush3.bf16.msra.mxu1 %v14419_v36 }
 0xaa7   : > { %9663 = vmatprep.subr.bf16.mxu0 %v15067_v52  ;;  %9675 = vmatprep.subr.bf16.mxu1 %v15067_v52 }
 0xaaa   : > { %9664 = vmatpush3.bf16.msra.mxu0 %v7278_v12  ;;  %9676 = vmatpush3.bf16.msra.mxu1 %v7278_v12 }
 0xaab   : > { %9681 = vmatprep.subr.bf16.mxu0 %v15067_v52  ;;  %9693 = vmatprep.subr.bf16.mxu1 %v15067_v52 }
 0xaad   : > { %9666 = vmatmul.mubr.msk.bf16.vlgmr.msra.gmra.mxu0 %vm6968_vm11, %v7375_v44  ;;  %9678 = vmatmul.mubr.msk.bf16.vlgmr.msra.gmra.mxu1 %vm6968_vm11, %v7420_v48 }
 0xaae   : > { %9682 = vmatpush3.bf16.msra.mxu0 %v14407_v10  ;;  %9694 = vmatpush3.bf16.msra.mxu1 %v14407_v10 }
 0xaaf   : > { %9683 = vmatprep.subr.bf16.mxu0 %v15067_v52  ;;  %9695 = vmatprep.subr.bf16.mxu1 %v15067_v52 }
 0xab0   : > { %9689 = vmatprep.mubr.msk.bf16.mxu0 %vm10619_vm7, %v15067_v52  ;;  %9701 = vmatprep.mubr.msk.bf16.mxu1 %vm10619_vm7, %v15067_v52 }
 0xab2   : > { %9684 = vmatpush3.bf16.msra.mxu0 %v14413_v19  ;;  %9696 = vmatpush3.bf16.msra.mxu1 %v14413_v19 }
 0xab3   : > { %9685 = vmatprep.subr.bf16.mxu0 %v15067_v52  ;;  %9697 = vmatprep.subr.bf16.mxu1 %v15067_v52 }
 0xab6   : > { %9686 = vmatpush3.bf16.msra.mxu0 %v14419_v36  ;;  %9698 = vmatpush3.bf16.msra.mxu1 %v14419_v36 }
 0xab7   : > { %9687 = vmatprep.subr.bf16.mxu0 %v15067_v52  ;;  %9699 = vmatprep.subr.bf16.mxu1 %v15067_v52 }
 0xaba   : > { %9688 = vmatpush3.bf16.msra.mxu0 %v7278_v12  ;;  %9700 = vmatpush3.bf16.msra.mxu1 %v7278_v12 }
 0xabb   : > { %9705 = vmatprep.subr.bf16.mxu0 %v15067_v52  ;;  %9162 = vmatprep.subr.bf16.mxu1 %v10172_v13 }
 0xabd   : > { %9690 = vmatmul.mubr.msk.bf16.vlgmr.msra.gmra.mxu0 %vm6968_vm11, %v7465_v25  ;;  %9702 = vmatmul.mubr.msk.bf16.vlgmr.msra.gmra.mxu1 %vm6968_vm11, %v7510_v29 }
 0xabe   : > { %9706 = vmatpush3.bf16.msra.mxu0 %v14407_v10  ;;  %9713 = vmatprep.mubr.msk.bf16.mxu0 %vm10619_vm7, %v15067_v52 }
 0xabf   : > { %9707 = vmatprep.subr.bf16.mxu0 %v15067_v52  ;;  %9163 = vmatpush3.bf16.msra.mxu1 %v10173_v55 }
 0xac0   : > { %9164 = vmatprep.subr.bf16.mxu1 %v10174_v59 }
 0xac2   : > { %9708 = vmatpush3.bf16.msra.mxu0 %v14413_v19 }
 0xac3   : > { %9709 = vmatprep.subr.bf16.mxu0 %v15067_v52  ;;  %9165 = vmatpush3.bf16.msra.mxu1 %v10175_v41  ;;  %v10199_v41 = vld [vmem:[#allocation17 + $0x138] sm:$0xff]  }
 0xac4   : > { %9166 = vmatprep.subr.bf16.mxu1 %v10176_v63 }
 0xac6   : > { %9710 = vmatpush3.bf16.msra.mxu0 %v14419_v36 }
 0xac7   : > { %9711 = vmatprep.subr.bf16.mxu0 %v15067_v52  ;;  %9167 = vmatpush3.bf16.msra.mxu1 %v10177_v7  ;;  %v10201_v7 = vld [vmem:[#allocation17 + $0x170] sm:$0xff]  }
 0xac8   : > { %9168 = vmatprep.subr.bf16.mxu1 %v10178_v23  ;;  %v10203_v23 = vld [vmem:[#allocation17 + $0x130] sm:$0xff]  }
 0xaca   : > { %9712 = vmatpush3.bf16.msra.mxu0 %v7278_v12 }
 0xacb   : > { %9169 = vmatpush3.bf16.msra.mxu1 %v10179_v40  ;;  %9184 = vmatprep.subr.bf16.mxu0 %v10181_v31  ;;  %v10205_v40 = vld [vmem:[#allocation17 + $0x168] sm:$0xff]   ;;  %v10209_v31 = vld [vmem:[#allocation17 + $0x160] sm:$0xff]  }
 0xacc   : > { %9170 = vmatprep.subr.bf16.mxu1 %v10180_v58  ;;  %v10207_v58 = vld [vmem:[#allocation17 + $0x128] sm:$0xff]  }
 0xacd   : > { %9714 = vmatmul.mubr.msk.bf16.vlgmr.msra.gmra.mxu0 %vm6968_vm11, %v7555_v42 }
 0xace   : > { %9185 = vmatpush3.bf16.msra.mxu0 %v10183_v2 }
 0xacf   : > { %9186 = vmatprep.subr.bf16.mxu0 %v10185_v38  ;;  %9171 = vmatpush3.bf16.msra.mxu1 %v10182_v50  ;;  %v10211_v38 = vld [vmem:[#allocation17 + $0x120] sm:$0xff]   ;;  %v10212_v50 = vld [vmem:[#allocation17 + $0x158] sm:$0xff]  }
 0xad0   : > { %9172 = vmatprep.subr.bf16.mxu1 %v10184_v47 }
 0xad2   : > { %9187 = vmatpush3.bf16.msra.mxu0 %v10187_v15 }
 0xad3   : > { %9188 = vmatprep.subr.bf16.mxu0 %v10189_v17  ;;  %9173 = vmatpush3.bf16.msra.mxu1 %v10186_v4 }
 0xad4   : > { %9174 = vmatprep.subr.bf16.mxu1 %v10188_v8  ;;  %v10213_v8 = vld [vmem:[#allocation17 + $0x118] sm:$0xff]  }
 0xad6   : > { %9189 = vmatpush3.bf16.msra.mxu0 %v10191_v1  ;;  %v10220_v1 = vld [vmem:[#allocation17 + $0x180] sm:$0xff]  }
 0xad7   : > { %9175 = vmatpush3.bf16.msra.mxu1 %v10190_v11  ;;  %9190 = vmatprep.subr.bf16.mxu0 %v10193_v33  ;;  %v10215_v11 = vld [vmem:[#allocation17 + $0x110] sm:$0xff]  }
 0xad8   : > { %9176 = vmatprep.subr.bf16.mxu1 %v10192_v26  ;;  %v10219_v26 = vld [vmem:[#allocation17 + $0x100] sm:$0xff]  }
 0xada   : > { %9191 = vmatpush3.bf16.msra.mxu0 %v10195_v22 }
 0xadb   : > { %9177 = vmatpush3.bf16.msra.mxu1 %v10194_v6  ;;  %9192 = vmatprep.subr.bf16.mxu0 %v10196_v49 }
 0xadc   : > { %9206 = vmatprep.subr.bf16.mxu1 %v10197_v16  ;;  %v10221_v16 = vld [vmem:[#allocation17 + $0x1c0] sm:$0xff]  }
 0xade   : > { %9193 = vmatpush3.bf16.msra.mxu0 %v10198_v35  ;;  %v10222_v35 = vld [vmem:[#allocation17 + $0x1b8] sm:$0xff]  }
 0xadf   : > { %9194 = vmatprep.subr.bf16.mxu0 %v10200_v21  ;;  %v10223_v21 = vld [vmem:[#allocation17 + $0x1b0] sm:$0xff]  }
 0xae2   : > { %9195 = vmatpush3.bf16.msra.mxu0 %v10202_v39  ;;  %v10224_v39 = vld [vmem:[#allocation17 + $0x1a8] sm:$0xff]  }
 0xae3   : > { %9196 = vmatprep.subr.bf16.mxu0 %v10204_v9  ;;  %v10225_v9 = vld [vmem:[#allocation17 + $0x1a0] sm:$0xff]  }
 0xae6   : > { %9197 = vmatpush3.bf16.msra.mxu0 %v10206_v56  ;;  %v10228_v56 = vld [vmem:[#allocation17 + $0x188] sm:$0xff]  }
 0xae7   : > { %9198 = vmatprep.subr.bf16.mxu0 %v10208_v24 }
 0xaea   : > { %9199 = vmatpush3.bf16.msra.mxu0 %v10210_v54 }
 0xaeb   : > { %9717 = vmatprep.subr.bf16.mxu0 %v15067_v52 }
 0xb5d   : > { %v7368_v57 = vpop.f32.mrf.mxu1  ;;  %v14477_v5 = vpop.f32.mrf.mxu0 }
 0xb5e   : > { %7600 = vrot.lane.b32.xlu0 %v7368_v57, %s10622_s29  ;;  %s8327_s29 = sshll.u32 %s695_s28, 4  ;;  %s14508_s29 = int_to_ptr.vmem [resolvable:$true] %s8327_s29 }
 0xb5f   : > { %v9643_v51 = vpop.f32.mrf.mxu0  ;;  %v9655_v61 = vpop.f32.mrf.mxu1  ;;  %s10514_s30 = scalar_lea.vmem %s14508_s29, 128  ;;  %p10521_p6 = scmp.lt.s32.totalorder %s14508_s29, %s10519_s18 }
 0xb60   : > { %v10216_v51 = vld [vmem:[#allocation17 + $0x148] sm:$0xff]   ;;  %p10515_p1 = scmp.ne.s32.totalorder %s14508_s29, %s10514_s30  ;;  %p10522_p8 = scmp.lt.s32.totalorder %s10520_s23, %s10514_s30 }
 0xb61   : > { %v7326_v60 = vpop.f32.mrf.mxu0  ;;  %v7371_v20 = vpop.f32.mrf.mxu1  ;;  %v10217_v61 = vld [vmem:[#allocation17 + $0x108] sm:$0xff]  }
 0xb62   : > { %v10218_v60 = vld [vmem:[#allocation17 + $0x140] sm:$0xff]   ;;  %p10516_p7 = pnand %p10515_p1, %p15079_p3  ;;  %p10523_p9 = por %p10522_p8, %p10521_p6 }
 0xb63   : > { %v9644_v3 = vpop.f32.mrf.mxu0  ;;  %v9656_v34 = vpop.f32.mrf.mxu1 }
 0xb64   : > { %p10517_p13 = pneg %p10516_p7 }
 0xb66   : > { %p10524_p4 = pnand %p10523_p9, %p10517_p13 }
 0xb6d   : > { %v7413_v32 = vpop.f32.mrf.mxu0  ;;  %v7458_v62 = vpop.f32.mrf.mxu1 }
 0xb6e   : > { %7604 = vrot.lane.b32.xlu1 %v7413_v32, %s10623_s1  ;;  %7608 = vrot.lane.b32.xlu0 %v7458_v62, %s10624_s15  ;;  %v10226_v32 = vld [vmem:[#allocation17 + $0x198] sm:$0xff]   ;;  %v10227_v62 = vld [vmem:[#allocation17 + $0x190] sm:$0xff]  }
 0xb6f   : > { %v9667_v10 = vpop.f32.mrf.mxu0  ;;  %v9679_v43 = vpop.f32.mrf.mxu1 }
 0xb71   : > { %v7416_v45 = vpop.f32.mrf.mxu0  ;;  %v7461_v53 = vpop.f32.mrf.mxu1 }
 0xb73   : > { %v9668_v14 = vpop.f32.mrf.mxu0  ;;  %v9680_v46 = vpop.f32.mrf.mxu1 }
 0xb7d   : > { %v7503_v19 = vpop.f32.mrf.mxu0  ;;  %v7548_v27 = vpop.f32.mrf.mxu1 }
 0xb7e   : > { %7612 = vrot.lane.b32.xlu1 %v7503_v19, %s10625_s5  ;;  %7616 = vrot.lane.b32.xlu0 %v7548_v27, %s10626_s8  ;;  %v8921_v27 = vld [vmem:[%s15077_s20] ss:$0 sm:$0xff]  ;;  %s15078_s5 = sld [smem:[#allocation115_spill]] }
 0xb7f   : > { %v9691_v28 = vpop.f32.mrf.mxu0  ;;  %v9703_v36 = vpop.f32.mrf.mxu1 }
 0xb81   : > { %v7506_v0 = vpop.f32.mrf.mxu0  ;;  %v7551_v18 = vpop.f32.mrf.mxu1 }
 0xb83   : > { %v9692_v12 = vpop.f32.mrf.mxu0  ;;  %v9704_v37 = vpop.f32.mrf.mxu1 }
 0xb84   : > { %s14506_s8 = scalar_lea.hbm %s15078_s5, %s8982_s10 }
 0xb8d   : > { %v7593_v30 = vpop.f32.mrf.mxu0 }
 0xb8e   : > { %7620 = vrot.lane.b32.xlu1 %v7593_v30, %s10627_s9  ;;  %s8314_s9 = scalar_lea.sflag [#allocation4], %s10932_s13 }
 0xb8f   : > { %v9715_v44 = vpop.f32.mrf.mxu0 }
 0xb91   : > { %v7596_v48 = vpop.f32.mrf.mxu0 }
 0xb93   : > { %v9716_v25 = vpop.f32.mrf.mxu0 }
 0xbd0   : > { %v7601_v29 = vpop.permute.xlu0 %7600 }
 0xbd1   : > { %v7623_v42 = vsel %vm5818_vm9, %v14477_v5, %v7601_v29  ;;  %v10214_v5 = vld [vmem:[#allocation17 + $0x150] sm:$0xff]  }
 0xbd2   : > { %v7747_v63 = vpack.c.bf16 %v7623_v42, %v7623_v42 }
 0xbe0   : > { %v7605_v13 = vpop.permute.xlu1 %7604  ;;  %v7609_v2 = vpop.permute.xlu0 %7608 }
 0xbe1   : > { %v7624_v55 = vsel %vm4735_vm5, %v7601_v29, %v7605_v13  ;;  %v7626_v47 = vsel %vm7625_vm12, %v7605_v13, %v7609_v2 }
 0xbe2   : > { %v7748_v59 = vpack.c.bf16 %v7624_v55, %v7624_v55  ;;  %v7749_v57 = vpack.c.bf16 %v7626_v47, %v7626_v47 }
 0xbe4   : > { %8089 = vmatprep.mubr.bf16.mxu1 %v7748_v59 }
 0xbe5   : > { %8090 = vmatmul.mubr.bf16.vlgmr.msra.gmra.mxu1 %v7747_v63 }
 0xbe6   : > { %9207 = vmatpush3.bf16.msra.mxu1 %v10199_v41  ;;  %v8972_v41 = vld [vmem:[%s15077_s20 + $0x1] ss:$0 sm:$0xff] }
 0xbe7   : > { %9208 = vmatprep.subr.bf16.mxu1 %v10201_v7 }
 0xbea   : > { %9209 = vmatpush3.bf16.msra.mxu1 %v10203_v23 }
 0xbeb   : > { %9210 = vmatprep.subr.bf16.mxu1 %v10205_v40 }
 0xbee   : > { %9211 = vmatpush3.bf16.msra.mxu1 %v10207_v58 }
 0xbef   : > { %9212 = vmatprep.subr.bf16.mxu1 %v10209_v31 }
 0xbf0   : > { %v7613_v15 = vpop.permute.xlu1 %7612  ;;  %v7617_v20 = vpop.permute.xlu0 %7616 }
 0xbf1   : > { %v7628_v17 = vsel %vm7627_vm13, %v7609_v2, %v7613_v15  ;;  %v7630_v33 = vsel %vm7629_vm14, %v7613_v15, %v7617_v20 }
 0xbf2   : > { %v7750_v4 = vpack.c.bf16 %v7628_v17, %v7628_v17  ;;  %9213 = vmatpush3.bf16.msra.mxu1 %v10211_v38  ;;  %v7751_v49 = vpack.c.bf16 %v7630_v33, %v7630_v33 }
 0xbf3   : > { %9214 = vmatprep.subr.bf16.mxu1 %v10212_v50 }
 0xbf4   : > { %8129 = vmatprep.mubr.bf16.mxu0 %v7750_v4 }
 0xbf5   : > { %8130 = vmatmul.mubr.bf16.vlgmr.msra.gmra.mxu0 %v7749_v57 }
 0xbf6   : > { %9215 = vmatpush3.bf16.msra.mxu1 %v10213_v8  ;;  %9718 = vmatpush3.bf16.msra.mxu0 %v10220_v1 }
 0xbf7   : > { %9216 = vmatprep.subr.bf16.mxu1 %v10214_v5  ;;  %9719 = vmatprep.mubr.msk.bf16.mxu0 %vm10619_vm7, %v15067_v52 }
 0xbf8   : > { %9723 = vmatprep.subr.bf16.mxu0 %v15067_v52 }
 0xbfa   : > { %9217 = vmatpush3.bf16.msra.mxu1 %v10215_v11 }
 0xbfb   : > { %9218 = vmatprep.subr.bf16.mxu1 %v10216_v51 }
 0xbfe   : > { %9219 = vmatpush3.bf16.msra.mxu1 %v10217_v61 }
 0xbff   : > { %9220 = vmatprep.subr.bf16.mxu1 %v10218_v60 }
 0xc00   : > { %v7621_v6 = vpop.permute.xlu1 %7620 }
 0xc01   : > { %v7632_v3 = vsel %vm7631_vm15, %v7617_v20, %v7621_v6  ;;  %v7753_v34 = vpack.c.bf16 %v7621_v6, %v7621_v6 }
 0xc02   : > { %v7752_v22 = vpack.c.bf16 %v7632_v3, %v7632_v3  ;;  %9221 = vmatpush3.bf16.msra.mxu1 %v10219_v26 }
 0xc03   : > { %9720 = vmatmul.mubr.msk.bf16.vlgmr.msra.gmra.mxu0 %vm8053_vm0, %v7753_v34 }
 0xc04   : > { %8169 = vmatprep.mubr.bf16.mxu1 %v7752_v22  ;;  %9739 = vmatprep.mubr.msk.bf16.mxu0 %vm10619_vm7, %v15067_v52 }
 0xc05   : > { %8170 = vmatmul.mubr.bf16.vlgmr.msra.gmra.mxu1 %v7751_v49  ;;  %9724 = vmatpush3.bf16.msra.mxu0 %v10221_v16 }
 0xc06   : > { %9725 = vmatprep.subr.bf16.mxu0 %v15067_v52 }
 0xc09   : > { %9726 = vmatpush3.bf16.msra.mxu0 %v10222_v35 }
 0xc0a   : > { %9727 = vmatprep.subr.bf16.mxu0 %v15067_v52 }
 0xc0d   : > { %9728 = vmatpush3.bf16.msra.mxu0 %v10223_v21 }
 0xc0e   : > { %9729 = vmatprep.subr.bf16.mxu0 %v15067_v52 }
 0xc11   : > { %9730 = vmatpush3.bf16.msra.mxu0 %v10224_v39 }
 0xc12   : > { %9731 = vmatprep.subr.bf16.mxu0 %v15067_v52 }
 0xc15   : > { %9732 = vmatpush3.bf16.msra.mxu0 %v10225_v9 }
 0xc16   : > { %9733 = vmatprep.subr.bf16.mxu0 %v15067_v52 }
 0xc19   : > { %9734 = vmatpush3.bf16.msra.mxu0 %v10226_v32 }
 0xc1a   : > { %9735 = vmatprep.subr.bf16.mxu0 %v15067_v52 }
 0xc1d   : > { %9736 = vmatpush3.bf16.msra.mxu0 %v10227_v62 }
 0xc1e   : > { %9737 = vmatprep.subr.bf16.mxu0 %v15067_v52 }
 0xc21   : > { %9738 = vmatpush3.bf16.msra.mxu0 %v10228_v56 }
 0xca5   : > { %v9178_v10 = vpop.f32.mrf.mxu1 }
 0xca7   : > { %v9179_v43 = vpop.f32.mrf.mxu1 }
 0xca8   : > { %v9180_v19 = vadd.f32 %v9179_v43, %v9178_v10 }
 0xca9   : > { %v9181_v45 = vpop.f32.mrf.mxu1 }
 0xcaa   : > { %v8092_v52 = vadd.f32 %v9180_v19, %v8921_v27 }
 0xcab   : > { %v9182_v53 = vpop.f32.mrf.mxu1 }
 0xcb5   : > { %v9200_v24 = vpop.f32.mrf.mxu0 }
 0xcb7   : > { %v9201_v54 = vpop.f32.mrf.mxu0 }
 0xcb8   : > { %v9202_v36 = vadd.f32 %v9201_v54, %v9200_v24 }
 0xcb9   : > { %v9203_v14 = vpop.f32.mrf.mxu0 }
 0xcba   : > { %v8132_v30 = vadd.f32 %v9202_v36, %v8092_v52 }
 0xcbb   : > { %v9204_v46 = vpop.f32.mrf.mxu0 }
 0xcc3   : > { %v8211_v28 = vpop.f32.mrf.mxu0 }
 0xcc5   : > { %v9222_v0 = vpop.f32.mrf.mxu1  ;;  %v9721_v18 = vpop.f32.mrf.mxu0 }
 0xcc7   : > { %v9223_v12 = vpop.f32.mrf.mxu1  ;;  %v8214_v37 = vpop.f32.mrf.mxu0 }
 0xcc8   : > { %v9224_v44 = vadd.f32 %v9223_v12, %v9222_v0 }
 0xcc9   : > { %v9225_v48 = vpop.f32.mrf.mxu1  ;;  %v9722_v25 = vpop.f32.mrf.mxu0 }
 0xcca   : > { %v8172_v29 = vadd.f32 %v9224_v44, %v8132_v30 }
 0xccb   : > { %v9226_v42 = vpop.f32.mrf.mxu1 }
 0xccc   : > { %v8212_v13 = vadd.f32 %v8211_v28, %v8172_v29 }
 0xcce   : > { %v8217_v55 = vmax.f32 %v8212_v13, 0.0 }
 0xcd0   : > { %v8218_v59 = vpack.c.bf16 %v8217_v55, %v8217_v55 }
 0xcd2   : > { %9740 = vmatmul.mubr.bf16.vlgmr.msra.gmra.mxu0 %v8218_v59 }
 0xd92   : > { %v8306_v63 = vpop.f32.mrf.mxu0 }
 0xd93   : > { %v8307_v7 = vadd.f32 %v8972_v41, %v8306_v63 }
 0xd94   : > { %v9741_v23 = vpop.f32.mrf.mxu0 }
 0xd95   : > { %8312 = vst [vmem:[%s695_s28] sm:$0xff] %v8307_v7 }
 0xd96   : > { %v8309_v40 = vpop.f32.mrf.mxu0 }
 0xd97   : > { %10527 = shalt.err (!%p10524_p4)
}
 0xd98   : > { %s10528_s16 = scalar_lea.hbm %s14506_s8, 128  ;;  %s10532_s10 = scalar_lea.hbm %s15078_s5, 256 }
 0xd99   : > { %p10529_p10 = scmp.ne.s32.totalorder %s14506_s8, %s10528_s16  ;;  %p10533_p0 = scmp.lt.s32.totalorder %s14506_s8, %s15078_s5 }
 0xd9a   : > { %p10534_p2 = scmp.lt.s32.totalorder %s10532_s10, %s10528_s16 }
 0xd9b   : > { %p10530_p11 = pnand %p10529_p10, %p15079_p3 }
 0xd9c   : > { %p10535_p5 = por %p10534_p2, %p10533_p0 }
 0xd9d   : > { %p10531_p12 = pneg %p10530_p11 }
 0xd9f   : > { %p10536_p1 = pnand %p10535_p5, %p10531_p12 }
 0xda1   : > { %10539 = shalt.err (!%p10536_p1)
}
 0xda2   : > { %9790 = dma.vmem_to_hbm [thread:$0]  (%p15079_p3), %s14508_s29, 128, %s14506_s8, %s8314_s9   ;;  %v9742_v58 = vpop.f32.mrf.mxu0 }
 0xda3 PF: > { %s8339_s15 = sand.u32 1, %s10586_s24   ;;  %p15080_p7 = scmp.ne.s32.totalorder %s14745_s17, 0 }
 0xda4   : > { %p15081_p13 = scmp.ge.s32.totalorder %s10598_s27, 2  ;;  %s8340_s30 = scalar_lea.sflag [#allocation4], %s8339_s15 }
 0xda6   : > { %p9825_p6 = pnand %p15081_p13, %p15080_p7 }
 0xda8   : > { %p9826_p8 = pneg %p9825_p6 }
 0xdaa   : > { %10581 = dma.done.wait (%p9826_p8), %s8340_s30, 128  }
 0xdab   : > { %10583 = vsyncadd (%p9826_p8), %s8340_s30, 4294967168  ;;  %p35_p9 = scmp.ge.s32.totalorder %s10863_s22, 4   ;;  %s15082_s24 = smov %s10590_s25 }
 0xdac   : > { %s15083_s25 = smov %s10594_s26  ;;  %s15084_s26 = smov %s10875_s19 }
 0xdad   : > { %s15085_s27 = smov %s10863_s22  ;;  %37 = sbr.rel (!%p35_p9) target bundleno = 25 (0x19), region = 186 }
 0xdb2   :  { %8345 = vsyncpa [#allocation3], 1 }
 0xdb3   :  { %8347 = vsyncpa [#allocation3 + $0x1], 1 }
 0xdb4   :  { %8348 = vsyncpa [#allocation6], 1 }
 0xdb5   :  { %8349 = vsyncpa [#allocation9], 1 }
 0xdb6   :  { %8350 = vsyncpa [#allocation12], 1 }
 0xdb7   :  { %8351 = vsyncpa [#allocation15], 1 }
 0xdb8   :  { %8352 = vsyncpa [#allocation18], 1 }
 0xdb9   :  { %8353 = vsyncpa [#allocation4], 1 }
 0xdba   :  { %8355 = vsyncpa [#allocation4 + $0x1], 1 }

</bundles_post_ra>
